<compile_context>
chip_gen: v5e
topology: v5e:2x2
jax: 0.10.0
libtpu: 0.0.40
codegen_flags: <defaults>
</compile_context>

<pallas_src>
import jax
import jax.numpy as jnp
import numpy as np
from jax.experimental import pallas as pl
from jax.experimental.pallas import tpu as pltpu

EPS = 1e-5  # PyTorch BatchNorm1d default eps


def _leaky(x, slope=0.2):
    return jnp.where(x > 0, x, slope * x)


def _bn_train(x, gamma, beta):
    # BatchNorm1d training mode. Single fused cross-sublane reduction over the
    # lane-concatenated [x | x*x], then one precomputed scale/shift per feature.
    n = x.shape[-1]
    stacked = jnp.concatenate([x, x * x], axis=-1)            # (B, 2N)
    s = jnp.mean(stacked, axis=0, keepdims=True)              # (1, 2N), one XLU pass
    mean, mean_sq = s[:, :n], s[:, n:]
    var = jnp.maximum(mean_sq - mean * mean, 0.0)              # clamp vs f32 cancellation
    scale = gamma * jax.lax.rsqrt(var + EPS)
    shift = beta - mean * scale
    return x * scale + shift


def discriminator_kernel(x_ref, lbl_ref, w11_ref, w12_ref, small_ref,
                         w2a_hbm, w2b_hbm, w3_hbm,
                         out_ref,
                         w2a_vmem, w2b_vmem, w3_vmem, sem):
    bf16 = jnp.bfloat16
    f32 = jnp.float32
    B = x_ref.shape[0]

    # Kick off the fc2/fc3 weight streams (HBM -> VMEM) so they overlap the
    # fc1 matmuls below.
    cp_w2a = pltpu.make_async_copy(w2a_hbm, w2a_vmem, sem.at[0])
    cp_w2b = pltpu.make_async_copy(w2b_hbm, w2b_vmem, sem.at[1])
    cp_w3 = pltpu.make_async_copy(w3_hbm, w3_vmem, sem.at[2])
    cp_w2a.start()
    cp_w2b.start()
    cp_w3.start()

    # Packed small params: one (8, 1024) f32 array, sliced by row.
    b11 = small_ref[0:1, :]              # (1, 1024)
    b12 = small_ref[1:2, :]              # (1, 1024)
    b2 = small_ref[2:3, 0:512]
    g2 = small_ref[2:3, 512:1024]
    be2 = small_ref[3:4, 0:512]
    b3 = small_ref[4:5, 0:256]
    g3 = small_ref[4:5, 256:512]
    be3 = small_ref[4:5, 512:768]
    w4 = small_ref[5:6, 0:256]
    b4 = small_ref[5:6, 256:257]

    # fc1_1 + leaky (bf16 operands, f32 MXU accumulation; activation kept bf16)
    x1 = _leaky(jnp.dot(x_ref[...], w11_ref[...],
                        preferred_element_type=f32) + b11).astype(bf16)

    # fc1_2 + leaky: one-hot built in-kernel from int32 labels (no padded
    # (B,128) f32 label DMA).
    iota = jax.lax.broadcasted_iota(jnp.int32, (B, 10), 1)
    onehot = jnp.where(iota == lbl_ref[...], 1.0, 0.0).astype(bf16)
    y1 = _leaky(jnp.dot(onehot, w12_ref[...],
                        preferred_element_type=f32) + b12).astype(bf16)

    # fc2 + BN + leaky: concat folded into two matmuls against the streamed weights.
    cp_w2a.wait()
    cp_w2b.wait()
    h = (jnp.dot(x1, w2a_vmem[...], preferred_element_type=f32)
         + jnp.dot(y1, w2b_vmem[...], preferred_element_type=f32) + b2)
    h = _leaky(_bn_train(h, g2, be2)).astype(bf16)

    # fc3 + BN + leaky
    cp_w3.wait()
    h = jnp.dot(h, w3_vmem[...], preferred_element_type=f32) + b3
    h = _leaky(_bn_train(h, g3, be3))

    # fc4 (out_features=1): VPU multiply + lane reduction, then sigmoid.
    logits = jnp.sum(h * w4, axis=-1, keepdims=True) + b4
    out_ref[...] = jax.nn.sigmoid(logits)


def discriminator_forward(x_bf16, labels_i32, params):
    B = x_bf16.shape[0]
    vmem = pl.BlockSpec(memory_space=pltpu.MemorySpace.VMEM)
    hbm = pl.BlockSpec(memory_space=pl.ANY)
    args = (x_bf16, labels_i32,
            params["w11"], params["w12"], params["small"],
            params["w2a"], params["w2b"], params["w3"])
    return pl.pallas_call(
        discriminator_kernel,
        out_shape=jax.ShapeDtypeStruct((B, 1), jnp.float32),
        in_specs=[vmem, vmem, vmem, vmem, vmem, hbm, hbm, hbm],
        out_specs=vmem,
        scratch_shapes=[
            pltpu.VMEM((1024, 512), jnp.bfloat16),   # w2a stream target
            pltpu.VMEM((1024, 512), jnp.bfloat16),   # w2b stream target
            pltpu.VMEM((512, 256), jnp.bfloat16),    # w3 stream target
            pltpu.SemaphoreType.DMA((3,)),
        ],
        compiler_params=pltpu.CompilerParams(vmem_limit_bytes=48 << 20),
    )(*args)


def init_params(key, std=0.02):
    # normal_init(m, 0.0, 0.02): Linear weights ~ N(0, std), biases = 0.
    # BN params keep PyTorch defaults (gamma=1, beta=0).
    # Large weights pre-transposed to (in, out) and stored bf16; small (1,N)
    # params packed into one (8,1024) f32 array.
    ks = jax.random.split(key, 5)

    def lin(k, fi, fo):
        return (jax.random.normal(k, (fi, fo), jnp.float32) * std)

    w2 = lin(ks[2], 2048, 512).astype(jnp.bfloat16)
    w4_row = lin(ks[4], 256, 1).reshape(256)          # fc4 weight row, kept f32

    small = jnp.zeros((8, 1024), jnp.float32)
    # row 0: b11 ; row 1: b12 ; row 2: [b2|g2] ; row 3: [be2|0]
    # row 4: [b3|g3|be3|0] ; row 5: [w4|b4|0]   (biases / betas stay zero-init)
    small = small.at[2, 512:1024].set(1.0)             # gamma2 = 1
    small = small.at[4, 256:512].set(1.0)              # gamma3 = 1
    small = small.at[5, 0:256].set(w4_row)

    return dict(
        w11=lin(ks[0], 784, 1024).astype(jnp.bfloat16),
        w12=lin(ks[1], 10, 1024).astype(jnp.bfloat16),
        w2a=w2[:1024], w2b=w2[1024:],
        w3=lin(ks[3], 512, 256).astype(jnp.bfloat16),
        small=small,
    )


def reference_forward(x_bf16, labels_i32, p):
    # Pure-JAX reference using the exact same math/dtypes as the kernel.
    bf16 = jnp.bfloat16
    f32 = jnp.float32
    s = p["small"]
    b11, b12 = s[0:1, :], s[1:2, :]
    b2, g2, be2 = s[2:3, 0:512], s[2:3, 512:1024], s[3:4, 0:512]
    b3, g3, be3 = s[4:5, 0:256], s[4:5, 256:512], s[4:5, 512:768]
    w4, b4 = s[5:6, 0:256], s[5:6, 256:257]

    onehot = jax.nn.one_hot(labels_i32[:, 0], 10, dtype=bf16)
    a = _leaky(jnp.dot(x_bf16, p["w11"], preferred_element_type=f32) + b11).astype(bf16)
    b = _leaky(jnp.dot(onehot, p["w12"], preferred_element_type=f32) + b12).astype(bf16)
    h = (jnp.dot(a, p["w2a"], preferred_element_type=f32)
         + jnp.dot(b, p["w2b"], preferred_element_type=f32) + b2)
    h = _leaky(_bn_train(h, g2, be2)).astype(bf16)
    h = jnp.dot(h, p["w3"], preferred_element_type=f32) + b3
    h = _leaky(_bn_train(h, g3, be3))
    logits = jnp.sum(h * w4, axis=-1, keepdims=True) + b4
    return jax.nn.sigmoid(logits)


if __name__ == "__main__":
    key = jax.random.PRNGKey(0)
    k_in, k_lbl, k_par = jax.random.split(key, 3)

    # Small demo batch; keep B a multiple of 16 (bf16 sublane pack).
    # Use 128-256+ in real training to fill MXU rows.
    B = 16
    x = jax.random.normal(k_in, (B, 784), jnp.float32).astype(jnp.bfloat16)
    labels = jax.random.randint(k_lbl, (B, 1), 0, 10, dtype=jnp.int32)

    params = init_params(k_par)

    out = discriminator_forward(x, labels, params)
    out = jax.block_until_ready(out)

    ref = reference_forward(x, labels, params)
    np.testing.assert_allclose(np.asarray(out), np.asarray(ref),
                               rtol=2e-3, atol=2e-3)
    assert out.shape == (B, 1)
    print("KERNEL_OK")
</pallas_src>

<mosaic_0001>
module attributes {stable_mosaic.version = 11 : i64} {
  func.func @discriminator_kernel(%arg0: memref<16x784xbf16, #tpu.memory_space<vmem>>, %arg1: memref<16x1xi32, #tpu.memory_space<vmem>>, %arg2: memref<784x1024xbf16, #tpu.memory_space<vmem>>, %arg3: memref<10x1024xbf16, #tpu.memory_space<vmem>>, %arg4: memref<8x1024xf32, #tpu.memory_space<vmem>>, %arg5: memref<1024x512xbf16, #tpu.memory_space<any>>, %arg6: memref<1024x512xbf16, #tpu.memory_space<any>>, %arg7: memref<512x256xbf16, #tpu.memory_space<any>>, %arg8: memref<16x1xf32, #tpu.memory_space<vmem>>, %arg9: memref<1024x512xbf16, #tpu.memory_space<vmem>>, %arg10: memref<1024x512xbf16, #tpu.memory_space<vmem>>, %arg11: memref<512x256xbf16, #tpu.memory_space<vmem>>, %arg12: memref<3x!tpu.dma_semaphore, #tpu.memory_space<semaphore_mem>>) attributes {dimension_semantics = [], scalar_prefetch = 0 : i64, scratch_operands = 4 : i64, tpu.core_type = #tpu.core_type<tc>} {
    %c0_i32 = arith.constant 0 : i32
    %0 = tpu.memref_slice %arg12[%c0_i32] : memref<3x!tpu.dma_semaphore, #tpu.memory_space<semaphore_mem>> -> memref<1x!tpu.dma_semaphore, #tpu.memory_space<semaphore_mem>>
    %1 = tpu.memref_squeeze %0 : memref<1x!tpu.dma_semaphore, #tpu.memory_space<semaphore_mem>> -> memref<!tpu.dma_semaphore, #tpu.memory_space<semaphore_mem>>
    tpu.enqueue_dma source(%arg5 : memref<1024x512xbf16, #tpu.memory_space<any>>) target(%arg9 : memref<1024x512xbf16, #tpu.memory_space<vmem>>) target_semaphore(%1 : memref<!tpu.dma_semaphore, #tpu.memory_space<semaphore_mem>>)
    %c1_i32 = arith.constant 1 : i32
    %2 = tpu.memref_slice %arg12[%c1_i32] : memref<3x!tpu.dma_semaphore, #tpu.memory_space<semaphore_mem>> -> memref<1x!tpu.dma_semaphore, #tpu.memory_space<semaphore_mem>>
    %3 = tpu.memref_squeeze %2 : memref<1x!tpu.dma_semaphore, #tpu.memory_space<semaphore_mem>> -> memref<!tpu.dma_semaphore, #tpu.memory_space<semaphore_mem>>
    tpu.enqueue_dma source(%arg6 : memref<1024x512xbf16, #tpu.memory_space<any>>) target(%arg10 : memref<1024x512xbf16, #tpu.memory_space<vmem>>) target_semaphore(%3 : memref<!tpu.dma_semaphore, #tpu.memory_space<semaphore_mem>>)
    %c2_i32 = arith.constant 2 : i32
    %4 = tpu.memref_slice %arg12[%c2_i32] : memref<3x!tpu.dma_semaphore, #tpu.memory_space<semaphore_mem>> -> memref<1x!tpu.dma_semaphore, #tpu.memory_space<semaphore_mem>>
    %5 = tpu.memref_squeeze %4 : memref<1x!tpu.dma_semaphore, #tpu.memory_space<semaphore_mem>> -> memref<!tpu.dma_semaphore, #tpu.memory_space<semaphore_mem>>
    tpu.enqueue_dma source(%arg7 : memref<512x256xbf16, #tpu.memory_space<any>>) target(%arg11 : memref<512x256xbf16, #tpu.memory_space<vmem>>) target_semaphore(%5 : memref<!tpu.dma_semaphore, #tpu.memory_space<semaphore_mem>>)
    %c0 = arith.constant 0 : index
    %c0_0 = arith.constant 0 : index
    %6 = vector.load %arg4[%c0, %c0_0] : memref<8x1024xf32, #tpu.memory_space<vmem>>, vector<1x1024xf32>
    %c1 = arith.constant 1 : index
    %c0_1 = arith.constant 0 : index
    %7 = vector.load %arg4[%c1, %c0_1] : memref<8x1024xf32, #tpu.memory_space<vmem>>, vector<1x1024xf32>
    %c2 = arith.constant 2 : index
    %c0_2 = arith.constant 0 : index
    %8 = vector.load %arg4[%c2, %c0_2] : memref<8x1024xf32, #tpu.memory_space<vmem>>, vector<1x512xf32>
    %c2_3 = arith.constant 2 : index
    %c512 = arith.constant 512 : index
    %9 = vector.load %arg4[%c2_3, %c512] : memref<8x1024xf32, #tpu.memory_space<vmem>>, vector<1x512xf32>
    %c3 = arith.constant 3 : index
    %c0_4 = arith.constant 0 : index
    %10 = vector.load %arg4[%c3, %c0_4] : memref<8x1024xf32, #tpu.memory_space<vmem>>, vector<1x512xf32>
    %c4 = arith.constant 4 : index
    %c0_5 = arith.constant 0 : index
    %11 = vector.load %arg4[%c4, %c0_5] : memref<8x1024xf32, #tpu.memory_space<vmem>>, vector<1x256xf32>
    %c4_6 = arith.constant 4 : index
    %c256 = arith.constant 256 : index
    %12 = vector.load %arg4[%c4_6, %c256] : memref<8x1024xf32, #tpu.memory_space<vmem>>, vector<1x256xf32>
    %c4_7 = arith.constant 4 : index
    %c512_8 = arith.constant 512 : index
    %13 = vector.load %arg4[%c4_7, %c512_8] : memref<8x1024xf32, #tpu.memory_space<vmem>>, vector<1x256xf32>
    %c5 = arith.constant 5 : index
    %c0_9 = arith.constant 0 : index
    %14 = vector.load %arg4[%c5, %c0_9] : memref<8x1024xf32, #tpu.memory_space<vmem>>, vector<1x256xf32>
    %c5_10 = arith.constant 5 : index
    %c256_11 = arith.constant 256 : index
    %15 = vector.load %arg4[%c5_10, %c256_11] : memref<8x1024xf32, #tpu.memory_space<vmem>>, vector<1x1xf32>
    %c0_12 = arith.constant 0 : index
    %c0_13 = arith.constant 0 : index
    %16 = vector.load %arg0[%c0_12, %c0_13] : memref<16x784xbf16, #tpu.memory_space<vmem>>, vector<16x784xbf16>
    %c0_14 = arith.constant 0 : index
    %c0_15 = arith.constant 0 : index
    %17 = vector.load %arg2[%c0_14, %c0_15] : memref<784x1024xbf16, #tpu.memory_space<vmem>>, vector<784x1024xbf16>
    %cst = arith.constant dense<0.000000e+00> : vector<16x1024xf32>
    %18 = tpu.matmul %16, %17, %cst {dimension_numbers = #tpu.dot_dimension_numbers<[1], [0], [0], [1], [0, 0, 1, 1], [], []>} : vector<16x784xbf16>, vector<784x1024xbf16>, vector<16x1024xf32> -> vector<16x1024xf32>
    %19 = vector.broadcast %6 : vector<1x1024xf32> to vector<16x1024xf32>
    %20 = arith.addf %18, %19 : vector<16x1024xf32>
    %cst_16 = arith.constant 0.000000e+00 : f32
    %21 = vector.broadcast %cst_16 : f32 to vector<16x1024xf32>
    %22 = arith.cmpf ogt, %20, %21 : vector<16x1024xf32>
    %cst_17 = arith.constant 2.000000e-01 : f32
    %23 = vector.broadcast %cst_17 : f32 to vector<16x1024xf32>
    %24 = arith.mulf %23, %20 : vector<16x1024xf32>
    %25 = arith.select %22, %20, %24 : vector<16x1024xi1>, vector<16x1024xf32>
    %26 = arith.truncf %25 : vector<16x1024xf32> to vector<16x1024xbf16>
    %27 = tpu.iota {dimensions = array<i32: 1>} : vector<16x10xi32>
    %c0_18 = arith.constant 0 : index
    %c0_19 = arith.constant 0 : index
    %28 = vector.load %arg1[%c0_18, %c0_19] : memref<16x1xi32, #tpu.memory_space<vmem>>, vector<16x1xi32>
    %29 = vector.broadcast %28 : vector<16x1xi32> to vector<16x10xi32>
    %30 = arith.cmpi eq, %27, %29 : vector<16x10xi32>
    %cst_20 = arith.constant 1.000000e+00 : f32
    %cst_21 = arith.constant 0.000000e+00 : f32
    %31 = vector.broadcast %cst_20 : f32 to vector<16x10xf32>
    %32 = vector.broadcast %cst_21 : f32 to vector<16x10xf32>
    %33 = arith.select %30, %31, %32 : vector<16x10xi1>, vector<16x10xf32>
    %34 = arith.truncf %33 : vector<16x10xf32> to vector<16x10xbf16>
    %c0_22 = arith.constant 0 : index
    %c0_23 = arith.constant 0 : index
    %35 = vector.load %arg3[%c0_22, %c0_23] : memref<10x1024xbf16, #tpu.memory_space<vmem>>, vector<10x1024xbf16>
    %cst_24 = arith.constant dense<0.000000e+00> : vector<16x1024xf32>
    %36 = tpu.matmul %34, %35, %cst_24 {dimension_numbers = #tpu.dot_dimension_numbers<[1], [0], [0], [1], [0, 0, 1, 1], [], []>} : vector<16x10xbf16>, vector<10x1024xbf16>, vector<16x1024xf32> -> vector<16x1024xf32>
    %37 = vector.broadcast %7 : vector<1x1024xf32> to vector<16x1024xf32>
    %38 = arith.addf %36, %37 : vector<16x1024xf32>
    %cst_25 = arith.constant 0.000000e+00 : f32
    %39 = vector.broadcast %cst_25 : f32 to vector<16x1024xf32>
    %40 = arith.cmpf ogt, %38, %39 : vector<16x1024xf32>
    %cst_26 = arith.constant 2.000000e-01 : f32
    %41 = vector.broadcast %cst_26 : f32 to vector<16x1024xf32>
    %42 = arith.mulf %41, %38 : vector<16x1024xf32>
    %43 = arith.select %40, %38, %42 : vector<16x1024xi1>, vector<16x1024xf32>
    %44 = arith.truncf %43 : vector<16x1024xf32> to vector<16x1024xbf16>
    %c0_i32_27 = arith.constant 0 : i32
    %45 = tpu.memref_slice %arg12[%c0_i32_27] : memref<3x!tpu.dma_semaphore, #tpu.memory_space<semaphore_mem>> -> memref<1x!tpu.dma_semaphore, #tpu.memory_space<semaphore_mem>>
    %46 = tpu.memref_squeeze %45 : memref<1x!tpu.dma_semaphore, #tpu.memory_space<semaphore_mem>> -> memref<!tpu.dma_semaphore, #tpu.memory_space<semaphore_mem>>
    tpu.wait_dma2 semaphore(%46 : memref<!tpu.dma_semaphore, #tpu.memory_space<semaphore_mem>>) src(%arg5 : memref<1024x512xbf16, #tpu.memory_space<any>>) dst(%arg9 : memref<1024x512xbf16, #tpu.memory_space<vmem>>)
    %c1_i32_28 = arith.constant 1 : i32
    %47 = tpu.memref_slice %arg12[%c1_i32_28] : memref<3x!tpu.dma_semaphore, #tpu.memory_space<semaphore_mem>> -> memref<1x!tpu.dma_semaphore, #tpu.memory_space<semaphore_mem>>
    %48 = tpu.memref_squeeze %47 : memref<1x!tpu.dma_semaphore, #tpu.memory_space<semaphore_mem>> -> memref<!tpu.dma_semaphore, #tpu.memory_space<semaphore_mem>>
    tpu.wait_dma2 semaphore(%48 : memref<!tpu.dma_semaphore, #tpu.memory_space<semaphore_mem>>) src(%arg6 : memref<1024x512xbf16, #tpu.memory_space<any>>) dst(%arg10 : memref<1024x512xbf16, #tpu.memory_space<vmem>>)
    %c0_29 = arith.constant 0 : index
    %c0_30 = arith.constant 0 : index
    %49 = vector.load %arg9[%c0_29, %c0_30] : memref<1024x512xbf16, #tpu.memory_space<vmem>>, vector<1024x512xbf16>
    %cst_31 = arith.constant dense<0.000000e+00> : vector<16x512xf32>
    %50 = tpu.matmul %26, %49, %cst_31 {dimension_numbers = #tpu.dot_dimension_numbers<[1], [0], [0], [1], [0, 0, 1, 1], [], []>} : vector<16x1024xbf16>, vector<1024x512xbf16>, vector<16x512xf32> -> vector<16x512xf32>
    %c0_32 = arith.constant 0 : index
    %c0_33 = arith.constant 0 : index
    %51 = vector.load %arg10[%c0_32, %c0_33] : memref<1024x512xbf16, #tpu.memory_space<vmem>>, vector<1024x512xbf16>
    %cst_34 = arith.constant dense<0.000000e+00> : vector<16x512xf32>
    %52 = tpu.matmul %44, %51, %cst_34 {dimension_numbers = #tpu.dot_dimension_numbers<[1], [0], [0], [1], [0, 0, 1, 1], [], []>} : vector<16x1024xbf16>, vector<1024x512xbf16>, vector<16x512xf32> -> vector<16x512xf32>
    %53 = arith.addf %50, %52 : vector<16x512xf32>
    %54 = vector.broadcast %8 : vector<1x512xf32> to vector<16x512xf32>
    %55 = arith.addf %53, %54 : vector<16x512xf32>
    %56 = arith.mulf %55, %55 : vector<16x512xf32>
    %57 = tpu.concatenate %55, %56 in 1 : vector<16x512xf32>, vector<16x512xf32> -> vector<16x1024xf32>
    %cst_35 = arith.constant dense<0.000000e+00> : vector<1024xf32>
    %58 = vector.multi_reduction <add>, %57, %cst_35 [0] : vector<16x1024xf32> to vector<1024xf32>
    %59 = vector.shape_cast %58 : vector<1024xf32> to vector<1x1024xf32>
    %cst_36 = arith.constant 1.600000e+01 : f32
    %60 = vector.broadcast %cst_36 : f32 to vector<1x1024xf32>
    %61 = arith.divf %59, %60 : vector<1x1024xf32>
    %62 = vector.extract_strided_slice %61 {offsets = [0, 0], sizes = [1, 512], strides = [1, 1]} : vector<1x1024xf32> to vector<1x512xf32>
    %63 = vector.extract_strided_slice %61 {offsets = [0, 512], sizes = [1, 512], strides = [1, 1]} : vector<1x1024xf32> to vector<1x512xf32>
    %64 = arith.mulf %62, %62 : vector<1x512xf32>
    %65 = arith.subf %63, %64 : vector<1x512xf32>
    %cst_37 = arith.constant 0.000000e+00 : f32
    %66 = vector.broadcast %cst_37 : f32 to vector<1x512xf32>
    %67 = arith.maximumf %65, %66 : vector<1x512xf32>
    %cst_38 = arith.constant 9.99999974E-6 : f32
    %68 = vector.broadcast %cst_38 : f32 to vector<1x512xf32>
    %69 = arith.addf %67, %68 : vector<1x512xf32>
    %70 = math.rsqrt %69 : vector<1x512xf32>
    %71 = arith.mulf %9, %70 : vector<1x512xf32>
    %72 = arith.mulf %62, %71 : vector<1x512xf32>
    %73 = arith.subf %10, %72 : vector<1x512xf32>
    %74 = vector.broadcast %71 : vector<1x512xf32> to vector<16x512xf32>
    %75 = arith.mulf %55, %74 : vector<16x512xf32>
    %76 = vector.broadcast %73 : vector<1x512xf32> to vector<16x512xf32>
    %77 = arith.addf %75, %76 : vector<16x512xf32>
    %cst_39 = arith.constant 0.000000e+00 : f32
    %78 = vector.broadcast %cst_39 : f32 to vector<16x512xf32>
    %79 = arith.cmpf ogt, %77, %78 : vector<16x512xf32>
    %cst_40 = arith.constant 2.000000e-01 : f32
    %80 = vector.broadcast %cst_40 : f32 to vector<16x512xf32>
    %81 = arith.mulf %80, %77 : vector<16x512xf32>
    %82 = arith.select %79, %77, %81 : vector<16x512xi1>, vector<16x512xf32>
    %83 = arith.truncf %82 : vector<16x512xf32> to vector<16x512xbf16>
    %c2_i32_41 = arith.constant 2 : i32
    %84 = tpu.memref_slice %arg12[%c2_i32_41] : memref<3x!tpu.dma_semaphore, #tpu.memory_space<semaphore_mem>> -> memref<1x!tpu.dma_semaphore, #tpu.memory_space<semaphore_mem>>
    %85 = tpu.memref_squeeze %84 : memref<1x!tpu.dma_semaphore, #tpu.memory_space<semaphore_mem>> -> memref<!tpu.dma_semaphore, #tpu.memory_space<semaphore_mem>>
    tpu.wait_dma2 semaphore(%85 : memref<!tpu.dma_semaphore, #tpu.memory_space<semaphore_mem>>) src(%arg7 : memref<512x256xbf16, #tpu.memory_space<any>>) dst(%arg11 : memref<512x256xbf16, #tpu.memory_space<vmem>>)
    %c0_42 = arith.constant 0 : index
    %c0_43 = arith.constant 0 : index
    %86 = vector.load %arg11[%c0_42, %c0_43] : memref<512x256xbf16, #tpu.memory_space<vmem>>, vector<512x256xbf16>
    %cst_44 = arith.constant dense<0.000000e+00> : vector<16x256xf32>
    %87 = tpu.matmul %83, %86, %cst_44 {dimension_numbers = #tpu.dot_dimension_numbers<[1], [0], [0], [1], [0, 0, 1, 1], [], []>} : vector<16x512xbf16>, vector<512x256xbf16>, vector<16x256xf32> -> vector<16x256xf32>
    %88 = vector.broadcast %11 : vector<1x256xf32> to vector<16x256xf32>
    %89 = arith.addf %87, %88 : vector<16x256xf32>
    %90 = arith.mulf %89, %89 : vector<16x256xf32>
    %91 = tpu.concatenate %89, %90 in 1 : vector<16x256xf32>, vector<16x256xf32> -> vector<16x512xf32>
    %cst_45 = arith.constant dense<0.000000e+00> : vector<512xf32>
    %92 = vector.multi_reduction <add>, %91, %cst_45 [0] : vector<16x512xf32> to vector<512xf32>
    %93 = vector.shape_cast %92 : vector<512xf32> to vector<1x512xf32>
    %cst_46 = arith.constant 1.600000e+01 : f32
    %94 = vector.broadcast %cst_46 : f32 to vector<1x512xf32>
    %95 = arith.divf %93, %94 : vector<1x512xf32>
    %96 = vector.extract_strided_slice %95 {offsets = [0, 0], sizes = [1, 256], strides = [1, 1]} : vector<1x512xf32> to vector<1x256xf32>
    %97 = vector.extract_strided_slice %95 {offsets = [0, 256], sizes = [1, 256], strides = [1, 1]} : vector<1x512xf32> to vector<1x256xf32>
    %98 = arith.mulf %96, %96 : vector<1x256xf32>
    %99 = arith.subf %97, %98 : vector<1x256xf32>
    %cst_47 = arith.constant 0.000000e+00 : f32
    %100 = vector.broadcast %cst_47 : f32 to vector<1x256xf32>
    %101 = arith.maximumf %99, %100 : vector<1x256xf32>
    %cst_48 = arith.constant 9.99999974E-6 : f32
    %102 = vector.broadcast %cst_48 : f32 to vector<1x256xf32>
    %103 = arith.addf %101, %102 : vector<1x256xf32>
    %104 = math.rsqrt %103 : vector<1x256xf32>
    %105 = arith.mulf %12, %104 : vector<1x256xf32>
    %106 = arith.mulf %96, %105 : vector<1x256xf32>
    %107 = arith.subf %13, %106 : vector<1x256xf32>
    %108 = vector.broadcast %105 : vector<1x256xf32> to vector<16x256xf32>
    %109 = arith.mulf %89, %108 : vector<16x256xf32>
    %110 = vector.broadcast %107 : vector<1x256xf32> to vector<16x256xf32>
    %111 = arith.addf %109, %110 : vector<16x256xf32>
    %cst_49 = arith.constant 0.000000e+00 : f32
    %112 = vector.broadcast %cst_49 : f32 to vector<16x256xf32>
    %113 = arith.cmpf ogt, %111, %112 : vector<16x256xf32>
    %cst_50 = arith.constant 2.000000e-01 : f32
    %114 = vector.broadcast %cst_50 : f32 to vector<16x256xf32>
    %115 = arith.mulf %114, %111 : vector<16x256xf32>
    %116 = arith.select %113, %111, %115 : vector<16x256xi1>, vector<16x256xf32>
    %117 = vector.broadcast %14 : vector<1x256xf32> to vector<16x256xf32>
    %118 = arith.mulf %116, %117 : vector<16x256xf32>
    %cst_51 = arith.constant dense<0.000000e+00> : vector<16xf32>
    %119 = vector.multi_reduction <add>, %118, %cst_51 [1] : vector<16x256xf32> to vector<16xf32>
    %120 = vector.shape_cast %119 : vector<16xf32> to vector<16x1xf32>
    %121 = vector.broadcast %15 : vector<1x1xf32> to vector<16x1xf32>
    %122 = arith.addf %120, %121 : vector<16x1xf32>
    %123 = arith.negf %122 : vector<16x1xf32>
    %124 = math.exp %123 : vector<16x1xf32>
    %cst_52 = arith.constant 1.000000e+00 : f32
    %125 = vector.broadcast %cst_52 : f32 to vector<16x1xf32>
    %126 = arith.addf %125, %124 : vector<16x1xf32>
    %127 = arith.divf %125, %126 : vector<16x1xf32>
    %c0_53 = arith.constant 0 : index
    %c0_54 = arith.constant 0 : index
    %128 = vector.load %arg8[%c0_53, %c0_54] : memref<16x1xf32, #tpu.memory_space<vmem>>, vector<16x1xf32>
    tpu.vector_store %arg8[%c0_53, %c0_54], %127 {strides = array<i32>} : memref<16x1xf32, #tpu.memory_space<vmem>>, vector<16x1xf32>,
    return
  }
}

</mosaic_0001>

<bundles_post_ra>
// kernel: tpu_custom_call.1
= control target key start
LH: loop header
LB: loop body
LE: loop exit
PB: predicated region body
PF: predicated region fallthrough
CT: control target
= control target key end

     0   :  { %13 = vsyncpa [#allocation7], 0  ;;  %s14388_s0 = inlined_call_operand.hbm [shape: bf16[16,784], index: 0, kind: input, shape index: {}]   ;;  %s14389_s1 = inlined_call_operand.vmem [shape: s32[16,1], index: 1, kind: input, shape index: {}]   ;;  %s14390_s2 = inlined_call_operand.hbm [shape: bf16[784,1024], index: 2, kind: input, shape index: {}]   ;;  %s14391_s3 = inlined_call_operand.hbm [shape: bf16[10,1024], index: 3, kind: input, shape index: {}]   ;;  %s14392_s4 = inlined_call_operand.hbm [shape: f32[8,1024], index: 4, kind: input, shape index: {}]   ;;  %s14393_s5 = inlined_call_operand.hbm [shape: bf16[1024,512], index: 5, kind: input, shape index: {}]   ;;  %s14394_s6 = inlined_call_operand.hbm [shape: bf16[1024,512], index: 6, kind: input, shape index: {}]   ;;  %s14395_s7 = inlined_call_operand.hbm [shape: bf16[512,256], index: 7, kind: input, shape index: {}]   ;;  %s14396_s8 = inlined_call_operand.vmem [shape: f32[16,1], index: 8, kind: output, shape index: {}]  }
   0x1   :  { %14 = vsyncpa [#allocation9], 0  ;;  %s35_s29 = sshll.u32 %s14390_s2, 4  ;;  %s36_s29 = int_to_ptr.hbm [resolvable:$true] %s35_s29 }
   0x2   :  { %15 = vsyncpa [#allocation12], 0  ;;  %s13743_s30 = smov [#allocation8]   ;;  %s20_s12 = sshll.u32 %s14388_s0, 4  ;;  %s21_s12 = int_to_ptr.hbm [resolvable:$true] %s20_s12 }
   0x3   :  { %s37_s9 = sshll.u32 %s13743_s30, 4  ;;  %s13744_s13 = smov 512   ;;  %s38_s9 = int_to_ptr.vmem [resolvable:$true] %s37_s9 }
   0x4   :  { %s13745_s14 = smov 32   ;;  %s13746_s15 = smov [#allocation6]  }
   0x5   :  { %43 = dma.hbm_to_vmem [thread:$0]  %s36_s29, 50176, %s38_s9, [#allocation9], %s13744_s13, %s13744_s13, %s13745_s14  }
   0x6   :  { %s22_s16 = sshll.u32 %s13746_s15, 4  ;;  %s13747_s17 = smov 448   ;;  %s23_s16 = int_to_ptr.vmem [resolvable:$true] %s22_s16 }
   0x7   :  { %s13748_s18 = smov 28   ;;  %s48_s20 = sshll.u32 %s14391_s3, 4  ;;  %s49_s20 = int_to_ptr.hbm [resolvable:$true] %s48_s20 }
   0x8   :  { %28 = dma.hbm_to_vmem [thread:$0]  %s21_s12, 896, %s23_s16, [#allocation7], %s13747_s17, %s13747_s17, %s13748_s18  }
   0x9   :  { %s13749_s21 = smov [#allocation10]   ;;  %s62_s24 = sshll.u32 %s14392_s4, 4  ;;  %s63_s24 = int_to_ptr.hbm [resolvable:$true] %s62_s24 }
   0xa   :  { %s50_s22 = sshll.u32 %s13749_s21, 4  ;;  %s13750_s25 = smov [#allocation11]   ;;  %s51_s22 = int_to_ptr.vmem [resolvable:$true] %s50_s22 }
   0xb   :  { %56 = dma.hbm_to_vmem [thread:$0]  %s49_s20, 1024, %s51_s22, [#allocation9], %s13744_s13, %s13744_s13, %s13745_s14  }
   0xc   :  { %s64_s26 = sshll.u32 %s13750_s25, 4  ;;  %s65_s26 = int_to_ptr.vmem [resolvable:$true] %s64_s26 }
   0xd   :  { %67 = dma.hbm_to_vmem [thread:$0]  %s63_s24, 1024, %s65_s26, [#allocation12]  }
   0xe   :  { %13731 = dma.done.wait [#allocation7], 896  }
   0xf   :  { %13732 = vsyncadd [#allocation7], 4294966400 }
  0x10   :  { %13733 = dma.done.wait [#allocation9], 51200  }
  0x11   :  { %13734 = vsyncadd [#allocation9], 4294916096 }
  0x12   :  { %13735 = dma.done.wait [#allocation12], 1024  }
  0x13   :  { %13736 = vsyncadd [#allocation12], 4294966272  ;;  %v13814_v0 = vld [vmem:[#allocation11 + $0x2] ss:$8 sm:$0xf]  ;;  %vm2560_vm0 = vcmask 130048  }
  0x14   :  { %v13816_v1 = vld [vmem:[#allocation11 + $0x22] ss:$8 sm:$0xf]  ;;  %v13818_v2 = vld [vmem:[#allocation11 + $0x3] ss:$8 sm:$0xf] }
  0x15   :  { %14400 = vst [vmem:[#allocation27_spill] sm:$0xff] %v13818_v2  ;;  %v13820_v3 = vld [vmem:[#allocation11 + $0x4] ss:$8 sm:$0x3]  ;;  %v13828_v7 = vld [vmem:[#allocation11 + $0x15] ss:$0 sm:$0xff] }
  0x16   :  { %14401 = vst [vmem:[#allocation28_spill] sm:$0xff] %v13820_v3  ;;  %v13822_v4 = vld [vmem:[#allocation11 + $0x14] ss:$8 sm:$0x3]  ;;  %v8844_v8 = vld [vmem:[#allocation8 + $0x1c0] sm:$0xf] }
  0x17   :  { %14402 = vst [vmem:[#allocation29_spill] sm:$0xff] %v13822_v4  ;;  %v13824_v5 = vld [vmem:[#allocation11 + $0x24] ss:$8 sm:$0x3]  ;;  %v12610_v9 = vld [vmem:[#allocation8 + $0x1dc] sm:$0xf0] }
  0x18   :  { %14403 = vst [vmem:[#allocation30_spill] sm:$0xff] %v13824_v5  ;;  %v13826_v6 = vld [vmem:[#allocation11 + $0x5] ss:$8 sm:$0x3]  ;;  %v9100_v10 = vld [vmem:[#allocation8 + $0x3c0] sm:$0xf]  ;;  %v8845_v11 = vor.u32 %v12610_v9, %v8844_v8 }
  0x19   :  { %14404 = vst [vmem:[#allocation31_spill] sm:$0xff] %v13826_v6  ;;  %v12674_v12 = vld [vmem:[#allocation8 + $0x3dc] sm:$0xf0]  ;;  %vm3480_vm9 = vcmask 1044480   ;;  %vm3476_vm12 = vcmask 80896   ;;  %s92_s30 = sshll.u32 %s14393_s5, 4  ;;  %s93_s30 = int_to_ptr.hbm [resolvable:$true] %s92_s30 }
  0x1a   :  { %14405 = vst [vmem:[#allocation32_spill] sm:$0xff] %v13828_v7  ;;  %v9356_v13 = vld [vmem:[#allocation8 + $0x5c0] sm:$0xf]  ;;  %v9101_v15 = vor.u32 %v12674_v12, %v9100_v10  ;;  %2564 = vmatpush.bf16.msra.mxu0 %v8845_v11  ;;  %s13753_s9 = smov [#allocation2]   ;;  %s106_s13 = sshll.u32 %s14394_s6, 4  ;;  %s107_s13 = int_to_ptr.hbm [resolvable:$true] %s106_s13 }
  0x1b   :  { %v12738_v14 = vld [vmem:[#allocation8 + $0x5dc] sm:$0xf0]  ;;  %s94_s10 = sshll.u32 %s13753_s9, 4  ;;  %s13754_s14 = smov [#allocation3]   ;;  %s95_s10 = int_to_ptr.vmem [resolvable:$true] %s94_s10 }
  0x1c   :  { %v9357_v16 = vor.u32 %v12738_v14, %v9356_v13  ;;  %v9612_v17 = vld [vmem:[#allocation8 + $0x7c0] sm:$0xf]  ;;  %2578 = vmatpush.bf16.msra.mxu1 %v9101_v15  ;;  %97 = dma.hbm_to_vmem [thread:$0]  %s93_s30, 32768, %s95_s10, [#allocation5] }
  0x1d   :  { %v12802_v18 = vld [vmem:[#allocation8 + $0x7dc] sm:$0xf0]  ;;  %s108_s15 = sshll.u32 %s13754_s14, 4  ;;  %s120_s5 = sshll.u32 %s14395_s7, 4  ;;  %s109_s15 = int_to_ptr.vmem [resolvable:$true] %s108_s15  ;;  %s121_s5 = int_to_ptr.hbm [resolvable:$true] %s120_s5 }
  0x1e   :  { %v8812_v19 = vld [vmem:[#allocation8 + $0x180] sm:$0xf]  ;;  %v9613_v20 = vor.u32 %v12802_v18, %v9612_v17  ;;  %2592 = vmatpush.bf16.msra.mxu2 %v9357_v16  ;;  %111 = dma.hbm_to_vmem [thread:$0]  %s107_s13, 32768, %s109_s15, [#allocation5 + $0x1] }
  0x1f   :  { %v12602_v21 = vld [vmem:[#allocation8 + $0x19c] sm:$0xf0]  ;;  %s13755_s6 = smov [#allocation4]  }
  0x20   :  { %v9068_v22 = vld [vmem:[#allocation8 + $0x380] sm:$0xf]  ;;  %v8813_v24 = vor.u32 %v12602_v21, %v8812_v19  ;;  %2606 = vmatpush.bf16.msra.mxu3 %v9613_v20  ;;  %s122_s18 = sshll.u32 %s13755_s6, 4  ;;  %s123_s18 = int_to_ptr.vmem [resolvable:$true] %s122_s18 }
  0x21   :  { %v12666_v23 = vld [vmem:[#allocation8 + $0x39c] sm:$0xf0]  ;;  %125 = dma.hbm_to_vmem [thread:$0]  %s121_s5, 8192, %s123_s18, [#allocation5 + $0x2] }
  0x22   :  { %v9069_v25 = vor.u32 %v12666_v23, %v9068_v22  ;;  %v9324_v26 = vld [vmem:[#allocation8 + $0x580] sm:$0xf]  ;;  %2565 = vmatpush.bf16.msra.mxu0 %v8813_v24 }
  0x23   :  { %v12730_v27 = vld [vmem:[#allocation8 + $0x59c] sm:$0xf0] }
  0x24   :  { %v9580_v28 = vld [vmem:[#allocation8 + $0x780] sm:$0xf]  ;;  %v9325_v29 = vor.u32 %v12730_v27, %v9324_v26  ;;  %2579 = vmatpush.bf16.msra.mxu1 %v9069_v25 }
  0x25   :  { %v12794_v30 = vld [vmem:[#allocation8 + $0x79c] sm:$0xf0] }
  0x26   :  { %v8780_v31 = vld [vmem:[#allocation8 + $0x140] sm:$0xf]  ;;  %v9581_v33 = vor.u32 %v12794_v30, %v9580_v28  ;;  %2593 = vmatpush.bf16.msra.mxu2 %v9325_v29 }
  0x27   :  { %v12594_v32 = vld [vmem:[#allocation8 + $0x15c] sm:$0xf0] }
  0x28   :  { %v9036_v34 = vld [vmem:[#allocation8 + $0x340] sm:$0xf]  ;;  %v8781_v37 = vor.u32 %v12594_v32, %v8780_v31  ;;  %2607 = vmatpush.bf16.msra.mxu3 %v9581_v33 }
  0x29   :  { %v12658_v35 = vld [vmem:[#allocation8 + $0x35c] sm:$0xf0] }
  0x2a   :  { %v9292_v36 = vld [vmem:[#allocation8 + $0x540] sm:$0xf]  ;;  %v9037_v41 = vor.u32 %v12658_v35, %v9036_v34  ;;  %2566 = vmatpush.bf16.msra.mxu0 %v8781_v37 }
  0x2b   :  { %v12722_v38 = vld [vmem:[#allocation8 + $0x55c] sm:$0xf0] }
  0x2c   :  { %v9548_v39 = vld [vmem:[#allocation8 + $0x740] sm:$0xf]  ;;  %v9293_v42 = vor.u32 %v12722_v38, %v9292_v36  ;;  %2580 = vmatpush.bf16.msra.mxu1 %v9037_v41 }
  0x2d   :  { %v12786_v40 = vld [vmem:[#allocation8 + $0x75c] sm:$0xf0] }
  0x2e   :  { %v8748_v43 = vld [vmem:[#allocation8 + $0x100] sm:$0xf]  ;;  %v9549_v46 = vor.u32 %v12786_v40, %v9548_v39  ;;  %2594 = vmatpush.bf16.msra.mxu2 %v9293_v42 }
  0x2f   :  { %v12586_v44 = vld [vmem:[#allocation8 + $0x11c] sm:$0xf0] }
  0x30   :  { %v9004_v45 = vld [vmem:[#allocation8 + $0x300] sm:$0xf]  ;;  %v8749_v52 = vor.u32 %v12586_v44, %v8748_v43  ;;  %2608 = vmatpush.bf16.msra.mxu3 %v9549_v46 }
  0x31   :  { %v12650_v47 = vld [vmem:[#allocation8 + $0x31c] sm:$0xf0] }
  0x32   :  { %v9260_v48 = vld [vmem:[#allocation8 + $0x500] sm:$0xf]  ;;  %v9005_v53 = vor.u32 %v12650_v47, %v9004_v45  ;;  %2567 = vmatpush.bf16.msra.mxu0 %v8749_v52 }
  0x33   :  { %v12714_v49 = vld [vmem:[#allocation8 + $0x51c] sm:$0xf0] }
  0x34   :  { %v9516_v50 = vld [vmem:[#allocation8 + $0x700] sm:$0xf]  ;;  %v9261_v54 = vor.u32 %v12714_v49, %v9260_v48  ;;  %2581 = vmatpush.bf16.msra.mxu1 %v9005_v53  ;;  %v12606_v48 = vld [vmem:[#allocation8 + $0x1c4] sm:$0xf]  ;;  %v8600_v53 = vld [vmem:[#allocation6 + $0x8] sm:$0xf] }
  0x35   :  { %v12778_v51 = vld [vmem:[#allocation8 + $0x71c] sm:$0xf0]  ;;  %v8846_v49 = vld [vmem:[#allocation8 + $0x1e0] sm:$0xf0] }
  0x36   :  { %v8716_v55 = vld [vmem:[#allocation8 + $0xc0] sm:$0xf]  ;;  %v9517_v58 = vor.u32 %v12778_v51, %v9516_v50  ;;  %2595 = vmatpush.bf16.msra.mxu2 %v9261_v54  ;;  %v12547_v54 = vld [vmem:[#allocation6 + $0x20] sm:$0xf0] }
  0x37   :  { %v12578_v56 = vld [vmem:[#allocation8 + $0xdc] sm:$0xf0] }
  0x38   :  { %v8972_v57 = vld [vmem:[#allocation8 + $0x2c0] sm:$0xf]  ;;  %v8717_v8 = vor.u32 %v12578_v56, %v8716_v55  ;;  %2609 = vmatpush.bf16.msra.mxu3 %v9517_v58  ;;  %v9102_v58 = vld [vmem:[#allocation8 + $0x3e0] sm:$0xf0] }
  0x39   :  { %v12642_v59 = vld [vmem:[#allocation8 + $0x2dc] sm:$0xf0] }
  0x3a   :  { %v9228_v60 = vld [vmem:[#allocation8 + $0x4c0] sm:$0xf]  ;;  %v8973_v9 = vor.u32 %v12642_v59, %v8972_v57  ;;  %2568 = vmatpush.bf16.msra.mxu0 %v8717_v8  ;;  %v12670_v57 = vld [vmem:[#allocation8 + $0x3c4] sm:$0xf] }
  0x3b   :  { %v12706_v61 = vld [vmem:[#allocation8 + $0x4dc] sm:$0xf0] }
  0x3c   :  { %v9484_v62 = vld [vmem:[#allocation8 + $0x6c0] sm:$0xf]  ;;  %v9229_v10 = vor.u32 %v12706_v61, %v9228_v60  ;;  %2582 = vmatpush.bf16.msra.mxu1 %v8973_v9 }
  0x3d   :  { %v12770_v63 = vld [vmem:[#allocation8 + $0x6dc] sm:$0xf0] }
  0x3e   :  { %v8684_v11 = vld [vmem:[#allocation8 + $0x80] sm:$0xf]  ;;  %v9485_v14 = vor.u32 %v12770_v63, %v9484_v62  ;;  %2596 = vmatpush.bf16.msra.mxu2 %v9229_v10  ;;  %v8849_v10 = vor.u32 %v12606_v48, %v8846_v49 }
  0x3f   :  { %v12570_v12 = vld [vmem:[#allocation8 + $0x9c] sm:$0xf0] }
  0x40   :  { %v8940_v13 = vld [vmem:[#allocation8 + $0x280] sm:$0xf]  ;;  %v8685_v20 = vor.u32 %v12570_v12, %v8684_v11  ;;  %2610 = vmatpush.bf16.msra.mxu3 %v9485_v14  ;;  %v8592_v11 = vld [vmem:[#allocation6] sm:$0xf]  ;;  %v12546_v12 = vld [vmem:[#allocation6 + $0x18] sm:$0xf0] }
  0x41   :  { %v12634_v15 = vld [vmem:[#allocation8 + $0x29c] sm:$0xf0] }
  0x42   :  { %v9196_v16 = vld [vmem:[#allocation8 + $0x480] sm:$0xf]  ;;  %v8941_v22 = vor.u32 %v12634_v15, %v8940_v13  ;;  %2569 = vmatpush.bf16.msra.mxu0 %v8685_v20  ;;  %v12544_v13 = vld [vmem:[#allocation6 + $0xc] sm:$0xf]  ;;  %v12598_v15 = vld [vmem:[#allocation8 + $0x184] sm:$0xf] }
  0x43   :  { %v12698_v17 = vld [vmem:[#allocation8 + $0x49c] sm:$0xf0] }
  0x44   :  { %v9452_v18 = vld [vmem:[#allocation8 + $0x680] sm:$0xf]  ;;  %v9197_v23 = vor.u32 %v12698_v17, %v9196_v16  ;;  %2583 = vmatpush.bf16.msra.mxu1 %v8941_v22  ;;  %v8814_v16 = vld [vmem:[#allocation8 + $0x1a0] sm:$0xf0]  ;;  %v13830_v17 = vor.u32 %v12546_v12, %v8592_v11  ;;  %v8594_v22 = vld [vmem:[#allocation6 + $0x1c] sm:$0xf0] }
  0x45   :  { %v12762_v19 = vld [vmem:[#allocation8 + $0x69c] sm:$0xf0] }
  0x46   :  { %v8652_v21 = vld [vmem:[#allocation8 + $0x40] sm:$0xf]  ;;  %v9453_v27 = vor.u32 %v12762_v19, %v9452_v18  ;;  %2597 = vmatpush.bf16.msra.mxu2 %v9197_v23  ;;  %v8602_v18 = vld [vmem:[#allocation6 + $0x24] sm:$0xf0]  ;;  %v13832_v19 = vor.u32 %v12547_v54, %v8600_v53  ;;  %v9105_v23 = vor.u32 %v12670_v57, %v9102_v58  ;;  %v12574_v58 = vld [vmem:[#allocation8 + $0xc4] sm:$0xf] }
  0x47   :  { %v12562_v24 = vld [vmem:[#allocation8 + $0x5c] sm:$0xf0]  ;;  %v13834_v20 = vor.u32 %v12544_v13, %v8602_v18  ;;  %v8686_v18 = vld [vmem:[#allocation8 + $0xa0] sm:$0xf0] }
  0x48   :  { %v8908_v25 = vld [vmem:[#allocation8 + $0x240] sm:$0xf]  ;;  %v8653_v34 = vor.u32 %v12562_v24, %v8652_v21  ;;  %2611 = vmatpush.bf16.msra.mxu3 %v9453_v27  ;;  %v12543_v21 = vld [vmem:[#allocation6 + $0x4] sm:$0xf] }
  0x49   :  { %v12626_v26 = vld [vmem:[#allocation8 + $0x25c] sm:$0xf0] }
  0x4a   :  { %v9164_v28 = vld [vmem:[#allocation8 + $0x440] sm:$0xf]  ;;  %v8909_v39 = vor.u32 %v12626_v26, %v8908_v25  ;;  %2570 = vmatpush.bf16.msra.mxu0 %v8653_v34  ;;  %v12662_v25 = vld [vmem:[#allocation8 + $0x384] sm:$0xf] }
  0x4b   :  { %v12690_v29 = vld [vmem:[#allocation8 + $0x45c] sm:$0xf0]  ;;  %v9070_v26 = vld [vmem:[#allocation8 + $0x3a0] sm:$0xf0] }
  0x4c   :  { %v9420_v30 = vld [vmem:[#allocation8 + $0x640] sm:$0xf]  ;;  %v9165_v40 = vor.u32 %v12690_v29, %v9164_v28  ;;  %2584 = vmatpush.bf16.msra.mxu1 %v8909_v39  ;;  %v8817_v28 = vor.u32 %v12598_v15, %v8814_v16  ;;  %v8782_v34 = vld [vmem:[#allocation8 + $0x160] sm:$0xf0] }
  0x4d   :  { %v12754_v31 = vld [vmem:[#allocation8 + $0x65c] sm:$0xf0]  ;;  %v9038_v39 = vld [vmem:[#allocation8 + $0x360] sm:$0xf0] }
  0x4e   :  { %v8620_v32 = vld [vmem:[#allocation8] sm:$0xf]  ;;  %v9421_v44 = vor.u32 %v12754_v31, %v9420_v30  ;;  %2598 = vmatpush.bf16.msra.mxu2 %v9165_v40  ;;  %v12566_v16 = vld [vmem:[#allocation8 + $0x84] sm:$0xf] }
  0x4f   :  { %v12554_v33 = vld [vmem:[#allocation8 + $0x1c] sm:$0xf0] }
  0x50   :  { %v8876_v35 = vld [vmem:[#allocation8 + $0x200] sm:$0xf]  ;;  %v8621_v51 = vor.u32 %v12554_v33, %v8620_v32  ;;  %2612 = vmatpush.bf16.msra.mxu3 %v9421_v44  ;;  %v12590_v33 = vld [vmem:[#allocation8 + $0x144] sm:$0xf] }
  0x51   :  { %v12618_v36 = vld [vmem:[#allocation8 + $0x21c] sm:$0xf0] }
  0x52   :  { %v9132_v37 = vld [vmem:[#allocation8 + $0x400] sm:$0xf]  ;;  %v8877_v55 = vor.u32 %v12618_v36, %v8876_v35  ;;  %2571 = vmatpush.bf16.msra.mxu0 %v8621_v51  ;;  %v13837_v35 = vor.u32 %v12543_v21, %v8594_v22  ;;  %v9073_v36 = vor.u32 %v12662_v25, %v9070_v26  ;;  %v9006_v51 = vld [vmem:[#allocation8 + $0x320] sm:$0xf0] }
  0x53   :  { %v12682_v38 = vld [vmem:[#allocation8 + $0x41c] sm:$0xf0]  ;;  %v8942_v25 = vld [vmem:[#allocation8 + $0x2a0] sm:$0xf0] }
  0x54   :  { %v9388_v41 = vld [vmem:[#allocation8 + $0x600] sm:$0xf]  ;;  %v9133_v56 = vor.u32 %v12682_v38, %v9132_v37  ;;  %2585 = vmatpush.bf16.msra.mxu1 %v8877_v55  ;;  %v12654_v38 = vld [vmem:[#allocation8 + $0x344] sm:$0xf] }
  0x55   :  { %v12746_v42 = vld [vmem:[#allocation8 + $0x61c] sm:$0xf0]  ;;  %2572 = vmatmul.bf16.vlgmr.msra.gmra.mxu0 %v13830_v17  ;;  %v9041_v48 = vor.u32 %v12654_v38, %v9038_v39 }
  0x56   :  { %v9868_v43 = vld [vmem:[#allocation8 + $0x9c0] sm:$0xf]  ;;  %v9389_v60 = vor.u32 %v12746_v42, %v9388_v41  ;;  %2599 = vmatpush.bf16.msra.mxu2 %v9133_v56  ;;  %v8785_v41 = vor.u32 %v12590_v33, %v8782_v34  ;;  %v8654_v33 = vld [vmem:[#allocation8 + $0x60] sm:$0xf0] }
  0x57   :  { %v12866_v45 = vld [vmem:[#allocation8 + $0x9dc] sm:$0xf0]  ;;  %2586 = vmatmul.bf16.vlgmr.msra.gmra.mxu1 %v13837_v35  ;;  %v12622_v34 = vld [vmem:[#allocation8 + $0x244] sm:$0xf] }
  0x58   :  { %v10124_v46 = vld [vmem:[#allocation8 + $0xbc0] sm:$0xf]  ;;  %v9869_v61 = vor.u32 %v12866_v45, %v9868_v43  ;;  %2613 = vmatpush.bf16.msra.mxu3 %v9389_v60  ;;  %v12638_v60 = vld [vmem:[#allocation8 + $0x2c4] sm:$0xf] }
  0x59   :  { %v12930_v47 = vld [vmem:[#allocation8 + $0xbdc] sm:$0xf0]  ;;  %2600 = vmatmul.bf16.vlgmr.msra.gmra.mxu2 %v13832_v19 }
  0x5a   :  { %v10156_v50 = vld [vmem:[#allocation8 + $0xc00] sm:$0xf]  ;;  %v10125_v9 = vor.u32 %v12930_v47, %v10124_v46  ;;  %2620 = vmatpush.bf16.msrb.mxu0 %v9869_v61  ;;  %v12582_v46 = vld [vmem:[#allocation8 + $0x104] sm:$0xf] }
  0x5b   :  { %v12938_v52 = vld [vmem:[#allocation8 + $0xc1c] sm:$0xf0]  ;;  %2614 = vmatmul.bf16.vlgmr.msra.gmra.mxu3 %v13834_v20  ;;  %v8750_v47 = vld [vmem:[#allocation8 + $0x120] sm:$0xf0] }
  0x5c   :  { %v9836_v59 = vld [vmem:[#allocation8 + $0x980] sm:$0xf]  ;;  %v10157_v14 = vor.u32 %v12938_v52, %v10156_v50  ;;  %2634 = vmatpush.bf16.msrb.mxu1 %v10125_v9  ;;  %2662 = vmatpush.bf16.msrb.mxu3 %v8849_v10  ;;  %v12646_v50 = vld [vmem:[#allocation8 + $0x304] sm:$0xf]  ;;  %v8753_v53 = vor.u32 %v12582_v46, %v8750_v47  ;;  %v12549_v9 = vld [vmem:[#allocation6 + $0x30] sm:$0xf0] }
  0x5d   :  { %v12858_v62 = vld [vmem:[#allocation8 + $0x99c] sm:$0xf0]  ;;  %v9009_v61 = vor.u32 %v12646_v50, %v9006_v51  ;;  %v8622_v46 = vld [vmem:[#allocation8 + $0x20] sm:$0xf0] }
  0x5e   :  { %v10092_v63 = vld [vmem:[#allocation8 + $0xb80] sm:$0xf]  ;;  %v9837_v24 = vor.u32 %v12858_v62, %v9836_v59  ;;  %2655 = vmatpush.bf16.msrb.mxu2 %v10157_v14  ;;  %v8718_v59 = vld [vmem:[#allocation8 + $0xe0] sm:$0xf0] }
  0x5f   :  { %v12922_v8 = vld [vmem:[#allocation8 + $0xb9c] sm:$0xf0]  ;;  %v8721_v11 = vor.u32 %v12574_v58, %v8718_v59  ;;  %v12734_v47 = vld [vmem:[#allocation8 + $0x5c4] sm:$0xf] }
  0x60   :  { %v10093_v27 = vor.u32 %v12922_v8, %v10092_v63  ;;  %v9804_v29 = vld [vmem:[#allocation8 + $0x940] sm:$0xf]  ;;  %2621 = vmatpush.bf16.msrb.mxu0 %v9837_v24  ;;  %2663 = vmatpush.bf16.msrb.mxu3 %v8817_v28  ;;  %v8974_v63 = vld [vmem:[#allocation8 + $0x2e0] sm:$0xf0] }
  0x61   :  { %v12850_v30 = vld [vmem:[#allocation8 + $0x95c] sm:$0xf0]  ;;  %v8977_v22 = vor.u32 %v12638_v60, %v8974_v63  ;;  %v12630_v24 = vld [vmem:[#allocation8 + $0x284] sm:$0xf] }
  0x62   :  { %v10060_v31 = vld [vmem:[#allocation8 + $0xb40] sm:$0xf]  ;;  %2676 = vmatpush.bf16.msra.mxu2 %v9105_v23  ;;  %v9805_v37 = vor.u32 %v12850_v30, %v9804_v29  ;;  %2635 = vmatpush.bf16.msrb.mxu1 %v10093_v27  ;;  %v8689_v27 = vor.u32 %v12566_v16, %v8686_v18  ;;  %v9614_v50 = vld [vmem:[#allocation8 + $0x7e0] sm:$0xf0] }
  0x63   :  { %v12914_v32 = vld [vmem:[#allocation8 + $0xb5c] sm:$0xf0]  ;;  %v12862_v51 = vld [vmem:[#allocation8 + $0x9c4] sm:$0xf] }
  0x64   :  { %v10061_v40 = vor.u32 %v12914_v32, %v10060_v31  ;;  %v9772_v42 = vld [vmem:[#allocation8 + $0x900] sm:$0xf]  ;;  %2622 = vmatpush.bf16.msrb.mxu0 %v9805_v37  ;;  %2664 = vmatpush.bf16.msrb.mxu3 %v8785_v41  ;;  %v12558_v32 = vld [vmem:[#allocation8 + $0x44] sm:$0xf]  ;;  %v8945_v37 = vor.u32 %v12630_v24, %v8942_v25 }
  0x65   :  { %v12842_v43 = vld [vmem:[#allocation8 + $0x91c] sm:$0xf0]  ;;  %v8878_v60 = vld [vmem:[#allocation8 + $0x220] sm:$0xf0] }
  0x66   :  { %v10028_v44 = vld [vmem:[#allocation8 + $0xb00] sm:$0xf]  ;;  %2677 = vmatpush.bf16.msra.mxu2 %v9073_v36  ;;  %v9773_v49 = vor.u32 %v12842_v43, %v9772_v42  ;;  %2636 = vmatpush.bf16.msrb.mxu1 %v10061_v40  ;;  %v8910_v36 = vld [vmem:[#allocation8 + $0x260] sm:$0xf0]  ;;  %v8657_v43 = vor.u32 %v12558_v32, %v8654_v33 }
  0x67   :  { %v12906_v45 = vld [vmem:[#allocation8 + $0xb1c] sm:$0xf0]  ;;  %v9582_v16 = vld [vmem:[#allocation8 + $0x7a0] sm:$0xf0] }
  0x68   :  { %v10029_v52 = vor.u32 %v12906_v45, %v10028_v44  ;;  %v9740_v54 = vld [vmem:[#allocation8 + $0x8c0] sm:$0xf]  ;;  %2623 = vmatpush.bf16.msrb.mxu0 %v9773_v49  ;;  %2665 = vmatpush.bf16.msrb.mxu3 %v8753_v53  ;;  %v12550_v45 = vld [vmem:[#allocation8 + $0x4] sm:$0xf]  ;;  %v8913_v53 = vor.u32 %v12622_v34, %v8910_v36 }
  0x69   :  { %v12834_v55 = vld [vmem:[#allocation8 + $0x8dc] sm:$0xf0]  ;;  %v12798_v49 = vld [vmem:[#allocation8 + $0x7c4] sm:$0xf]  ;;  %v8625_v59 = vor.u32 %v12550_v45, %v8622_v46 }
  0x6a   :  { %v9996_v56 = vld [vmem:[#allocation8 + $0xac0] sm:$0xf]  ;;  %2678 = vmatpush.bf16.msra.mxu2 %v9041_v48  ;;  %v9741_v62 = vor.u32 %v12834_v55, %v9740_v54  ;;  %2637 = vmatpush.bf16.msrb.mxu1 %v10029_v52  ;;  %v9358_v48 = vld [vmem:[#allocation8 + $0x5e0] sm:$0xf0]  ;;  %v8608_v55 = vld [vmem:[#allocation6 + $0x10] sm:$0xf] }
  0x6b   :  { %v12898_v57 = vld [vmem:[#allocation8 + $0xadc] sm:$0xf0]  ;;  %v9870_v52 = vld [vmem:[#allocation8 + $0x9e0] sm:$0xf0]  ;;  %v9361_v63 = vor.u32 %v12734_v47, %v9358_v48 }
  0x6c   :  { %v8616_v8 = vld [vmem:[#allocation6 + $0x18] sm:$0xf]  ;;  %v9997_v10 = vor.u32 %v12898_v57, %v9996_v56  ;;  %2624 = vmatpush.bf16.msrb.mxu0 %v9741_v62  ;;  %2666 = vmatpush.bf16.msrb.mxu3 %v8721_v11  ;;  %v12548_v56 = vld [vmem:[#allocation6 + $0x28] sm:$0xf0]  ;;  %v12614_v57 = vld [vmem:[#allocation8 + $0x204] sm:$0xf] }
  0x6d   :  { %v9708_v12 = vld [vmem:[#allocation8 + $0x880] sm:$0xf]  ;;  %v13842_v21 = vor.u32 %v12549_v9, %v8616_v8  ;;  %v8610_v62 = vld [vmem:[#allocation6 + $0x2c] sm:$0xf0]  ;;  %v9617_v8 = vor.u32 %v12798_v49, %v9614_v50  ;;  %v12926_v9 = vld [vmem:[#allocation8 + $0xbc4] sm:$0xf]  ;;  %v8881_v18 = vor.u32 %v12614_v57, %v8878_v60 }
  0x6e   :  { %v12826_v13 = vld [vmem:[#allocation8 + $0x89c] sm:$0xf0]  ;;  %2679 = vmatpush.bf16.msra.mxu2 %v9009_v61  ;;  %2638 = vmatpush.bf16.msrb.mxu1 %v9997_v10  ;;  %v12545_v61 = vld [vmem:[#allocation6 + $0x14] sm:$0xf]  ;;  %v10126_v10 = vld [vmem:[#allocation8 + $0xbe0] sm:$0xf0] }
  0x6f   :  { %v9964_v14 = vld [vmem:[#allocation8 + $0xa80] sm:$0xf]  ;;  %v9709_v23 = vor.u32 %v12826_v13, %v9708_v12  ;;  %10186 = vmatmul.msk.bf16.vlgmr.msrb.gmra.mxu2 %vm2560_vm0, %v13842_v21  ;;  %v12726_v11 = vld [vmem:[#allocation8 + $0x584] sm:$0xf]  ;;  %v9873_v12 = vor.u32 %v12862_v51, %v9870_v52  ;;  %v13846_v13 = vor.u32 %v12548_v56, %v8608_v55  ;;  %v10129_v25 = vor.u32 %v12926_v9, %v10126_v10 }
  0x70   :  { %v12890_v15 = vld [vmem:[#allocation8 + $0xa9c] sm:$0xf0]  ;;  %2667 = vmatpush.bf16.msrb.mxu3 %v8689_v27  ;;  %v9838_v24 = vld [vmem:[#allocation8 + $0x9a0] sm:$0xf0] }
  0x71   :  { %v9965_v26 = vor.u32 %v12890_v15, %v9964_v14  ;;  %v9676_v28 = vld [vmem:[#allocation8 + $0x840] sm:$0xf]  ;;  %2625 = vmatpush.bf16.msrb.mxu0 %v9709_v23  ;;  %v9326_v14 = vld [vmem:[#allocation8 + $0x5a0] sm:$0xf0] }
  0x72   :  { %v12818_v29 = vld [vmem:[#allocation8 + $0x85c] sm:$0xf0]  ;;  %2680 = vmatpush.bf16.msra.mxu2 %v8977_v22  ;;  %v12790_v15 = vld [vmem:[#allocation8 + $0x784] sm:$0xf]  ;;  %v13848_v22 = vor.u32 %v12545_v61, %v8610_v62 }
  0x73   :  { %v9932_v30 = vld [vmem:[#allocation8 + $0xa40] sm:$0xf]  ;;  %v9677_v38 = vor.u32 %v12818_v29, %v9676_v28  ;;  %2639 = vmatpush.bf16.msrb.mxu1 %v9965_v26  ;;  %v12854_v23 = vld [vmem:[#allocation8 + $0x984] sm:$0xf]  ;;  %v9329_v26 = vor.u32 %v12726_v11, %v9326_v14  ;;  %v9585_v27 = vor.u32 %v12790_v15, %v9582_v16 }
  0x74   :  { %v12882_v31 = vld [vmem:[#allocation8 + $0xa5c] sm:$0xf0]  ;;  %2668 = vmatpush.bf16.msrb.mxu3 %v8657_v43  ;;  %v12918_v28 = vld [vmem:[#allocation8 + $0xb84] sm:$0xf] }
  0x75   :  { %v9644_v39 = vld [vmem:[#allocation8 + $0x800] sm:$0xf]  ;;  %v9933_v42 = vor.u32 %v12882_v31, %v9932_v30  ;;  %2626 = vmatpush.bf16.msrb.mxu0 %v9677_v38  ;;  %v10094_v29 = vld [vmem:[#allocation8 + $0xba0] sm:$0xf0]  ;;  %v9841_v31 = vor.u32 %v12854_v23, %v9838_v24 }
  0x76   :  { %v12810_v40 = vld [vmem:[#allocation8 + $0x81c] sm:$0xf0]  ;;  %2681 = vmatpush.bf16.msra.mxu2 %v8945_v37  ;;  %v12718_v30 = vld [vmem:[#allocation8 + $0x544] sm:$0xf]  ;;  %v10097_v38 = vor.u32 %v12918_v28, %v10094_v29 }
  0x77   :  { %v9900_v41 = vld [vmem:[#allocation8 + $0xa00] sm:$0xf]  ;;  %v9645_v54 = vor.u32 %v12810_v40, %v9644_v39  ;;  %2640 = vmatpush.bf16.msrb.mxu1 %v9933_v42  ;;  %v9294_v32 = vld [vmem:[#allocation8 + $0x560] sm:$0xf0] }
  0x78   :  { %v12874_v44 = vld [vmem:[#allocation8 + $0xa1c] sm:$0xf0]  ;;  %2669 = vmatpush.bf16.msrb.mxu3 %v8625_v59  ;;  %v12782_v33 = vld [vmem:[#allocation8 + $0x744] sm:$0xf]  ;;  %v9297_v39 = vor.u32 %v12718_v30, %v9294_v32 }
  0x79   :  { %v9901_v58 = vor.u32 %v12874_v44, %v9900_v41  ;;  %2627 = vmatpush.bf16.msrb.mxu0 %v9645_v54  ;;  %v9550_v34 = vld [vmem:[#allocation8 + $0x760] sm:$0xf0] }
  0x7a   :  { %2682 = vmatpush.bf16.msra.mxu2 %v8913_v53  ;;  %v12846_v36 = vld [vmem:[#allocation8 + $0x944] sm:$0xf]  ;;  %v9553_v40 = vor.u32 %v12782_v33, %v9550_v34 }
  0x7b   :  { %2641 = vmatpush.bf16.msrb.mxu1 %v9901_v58  ;;  %v9806_v37 = vld [vmem:[#allocation8 + $0x960] sm:$0xf0]  ;;  %2670 = vmatmul.bf16.vlgmr.msrb.gmra.mxu3 %v13830_v17 }
  0x7c   :  { %2718 = vmatpush.bf16.msra.mxu3 %v9873_v12  ;;  %2628 = vmatmul.bf16.vlgmr.msrb.gmra.mxu0 %v13846_v13  ;;  %v12910_v41 = vld [vmem:[#allocation8 + $0xb44] sm:$0xf]  ;;  %v9809_v44 = vor.u32 %v12846_v36, %v9806_v37 }
  0x7d   :  { %2690 = vmatpush.bf16.msra.mxu0 %v9361_v63  ;;  %v10062_v42 = vld [vmem:[#allocation8 + $0xb60] sm:$0xf0] }
  0x7e   :  { %2683 = vmatpush.bf16.msra.mxu2 %v8881_v18  ;;  %2642 = vmatmul.bf16.vlgmr.msrb.gmra.mxu1 %v13848_v22  ;;  %v12710_v43 = vld [vmem:[#allocation8 + $0x504] sm:$0xf]  ;;  %v10065_v50 = vor.u32 %v12910_v41, %v10062_v42 }
  0x7f   :  { %2704 = vmatpush.bf16.msra.mxu1 %v9617_v8  ;;  %v9262_v45 = vld [vmem:[#allocation8 + $0x520] sm:$0xf0] }
  0x80   :  { %2719 = vmatpush.bf16.msra.mxu3 %v9841_v31  ;;  %v12774_v46 = vld [vmem:[#allocation8 + $0x704] sm:$0xf]  ;;  %v9265_v51 = vor.u32 %v12710_v43, %v9262_v45 }
  0x81   :  { %2691 = vmatpush.bf16.msra.mxu0 %v9329_v26  ;;  %v9518_v47 = vld [vmem:[#allocation8 + $0x720] sm:$0xf0]  ;;  %2684 = vmatmul.bf16.vlgmr.msra.gmra.mxu2 %v13837_v35 }
  0x82   :  { %2732 = vmatpush.bf16.msrb.mxu2 %v10129_v25  ;;  %v12838_v48 = vld [vmem:[#allocation8 + $0x904] sm:$0xf]  ;;  %v9521_v52 = vor.u32 %v12774_v46, %v9518_v47 }
  0x83   :  { %2705 = vmatpush.bf16.msra.mxu1 %v9585_v27  ;;  %v9774_v49 = vld [vmem:[#allocation8 + $0x920] sm:$0xf0] }
  0x84   :  { %v12902_v53 = vld [vmem:[#allocation8 + $0xb04] sm:$0xf]  ;;  %2720 = vmatpush.bf16.msra.mxu3 %v9809_v44  ;;  %v9777_v56 = vor.u32 %v12838_v48, %v9774_v49  ;;  %v8852_v49 = vld [vmem:[#allocation8 + $0x1c8] sm:$0xf] }
  0x85   :  { %2692 = vmatpush.bf16.msra.mxu0 %v9297_v39  ;;  %v10030_v54 = vld [vmem:[#allocation8 + $0xb20] sm:$0xf0] }
  0x86   :  { %2733 = vmatpush.bf16.msrb.mxu2 %v10097_v38  ;;  %v12702_v55 = vld [vmem:[#allocation8 + $0x4c4] sm:$0xf]  ;;  %v10033_v62 = vor.u32 %v12902_v53, %v10030_v54  ;;  %v12675_v53 = vld [vmem:[#allocation8 + $0x3e4] sm:$0xf0] }
  0x87   :  { %2706 = vmatpush.bf16.msra.mxu1 %v9553_v40  ;;  %v9230_v57 = vld [vmem:[#allocation8 + $0x4e0] sm:$0xf0] }
  0x88   :  { %v12766_v58 = vld [vmem:[#allocation8 + $0x6c4] sm:$0xf]  ;;  %v9233_v63 = vor.u32 %v12702_v55, %v9230_v57  ;;  %2721 = vmatpush.bf16.msra.mxu3 %v9777_v56 }
  0x89   :  { %v9486_v59 = vld [vmem:[#allocation8 + $0x6e0] sm:$0xf0]  ;;  %2693 = vmatpush.bf16.msra.mxu0 %v9265_v51  ;;  %v9108_v51 = vld [vmem:[#allocation8 + $0x3c8] sm:$0xf] }
  0x8a   :  { %v12830_v60 = vld [vmem:[#allocation8 + $0x8c4] sm:$0xf]  ;;  %2734 = vmatpush.bf16.msrb.mxu2 %v10065_v50  ;;  %v9489_v8 = vor.u32 %v12766_v58, %v9486_v59  ;;  %v12611_v50 = vld [vmem:[#allocation8 + $0x1e4] sm:$0xf0] }
  0x8b   :  { %v9742_v61 = vld [vmem:[#allocation8 + $0x8e0] sm:$0xf0]  ;;  %2707 = vmatpush.bf16.msra.mxu1 %v9521_v52 }
  0x8c   :  { %v12894_v9 = vld [vmem:[#allocation8 + $0xac4] sm:$0xf]  ;;  %v9745_v12 = vor.u32 %v12830_v60, %v9742_v61  ;;  %v8853_v61 = vor.u32 %v12611_v50, %v8852_v49  ;;  %v9268_v50 = vld [vmem:[#allocation8 + $0x508] sm:$0xf] }
  0x8d   :  { %v9998_v10 = vld [vmem:[#allocation8 + $0xae0] sm:$0xf0]  ;;  %2694 = vmatpush.bf16.msra.mxu0 %v9233_v63  ;;  %v12739_v63 = vld [vmem:[#allocation8 + $0x5e4] sm:$0xf0] }
  0x8e   :  { %v12694_v11 = vld [vmem:[#allocation8 + $0x484] sm:$0xf]  ;;  %2735 = vmatpush.bf16.msrb.mxu2 %v10033_v62  ;;  %v10001_v24 = vor.u32 %v12894_v9, %v9998_v10  ;;  %2722 = vmatpush.bf16.msra.mxu3 %v9745_v12  ;;  %v9364_v62 = vld [vmem:[#allocation8 + $0x5c8] sm:$0xf] }
  0x8f   :  { %v9198_v14 = vld [vmem:[#allocation8 + $0x4a0] sm:$0xf0]  ;;  %2708 = vmatpush.bf16.msra.mxu1 %v9489_v8  ;;  %v9109_v8 = vor.u32 %v12675_v53, %v9108_v51  ;;  %v9620_v10 = vld [vmem:[#allocation8 + $0x7c8] sm:$0xf] }
  0x90   :  { %v12758_v15 = vld [vmem:[#allocation8 + $0x684] sm:$0xf]  ;;  %v9201_v25 = vor.u32 %v12694_v11, %v9198_v14  ;;  %v12803_v11 = vld [vmem:[#allocation8 + $0x7e4] sm:$0xf0] }
  0x91   :  { %v9454_v16 = vld [vmem:[#allocation8 + $0x6a0] sm:$0xf0]  ;;  %v8820_v12 = vld [vmem:[#allocation8 + $0x188] sm:$0xf] }
  0x92   :  { %v12822_v18 = vld [vmem:[#allocation8 + $0x884] sm:$0xf]  ;;  %v9457_v26 = vor.u32 %v12758_v15, %v9454_v16  ;;  %2736 = vmatpush.bf16.msrb.mxu2 %v10001_v24  ;;  %2695 = vmatpush.bf16.msra.mxu0 %v9201_v25  ;;  %v12603_v15 = vld [vmem:[#allocation8 + $0x1a4] sm:$0xf0]  ;;  %v9621_v24 = vor.u32 %v12803_v11, %v9620_v10 }
  0x93   :  { %v9710_v23 = vld [vmem:[#allocation8 + $0x8a0] sm:$0xf0]  ;;  %v9076_v16 = vld [vmem:[#allocation8 + $0x388] sm:$0xf] }
  0x94   :  { %v12886_v27 = vld [vmem:[#allocation8 + $0xa84] sm:$0xf]  ;;  %v9713_v30 = vor.u32 %v12822_v18, %v9710_v23  ;;  %2709 = vmatpush.bf16.msra.mxu1 %v9457_v26  ;;  %v12667_v18 = vld [vmem:[#allocation8 + $0x3a4] sm:$0xf0]  ;;  %v9365_v23 = vor.u32 %v12739_v63, %v9364_v62 }
  0x95   :  { %v9966_v28 = vld [vmem:[#allocation8 + $0xaa0] sm:$0xf0]  ;;  %v9332_v25 = vld [vmem:[#allocation8 + $0x588] sm:$0xf] }
  0x96   :  { %v12686_v29 = vld [vmem:[#allocation8 + $0x444] sm:$0xf]  ;;  %v9969_v37 = vor.u32 %v12886_v27, %v9966_v28  ;;  %2723 = vmatpush.bf16.msra.mxu3 %v9713_v30  ;;  %v12731_v26 = vld [vmem:[#allocation8 + $0x5a4] sm:$0xf0]  ;;  %v8821_v27 = vor.u32 %v12603_v15, %v8820_v12  ;;  %v9077_v28 = vor.u32 %v12667_v18, %v9076_v16 }
  0x97   :  { %v9166_v31 = vld [vmem:[#allocation8 + $0x460] sm:$0xf0]  ;;  %v12795_v30 = vld [vmem:[#allocation8 + $0x7a4] sm:$0xf0] }
  0x98   :  { %v12750_v32 = vld [vmem:[#allocation8 + $0x644] sm:$0xf]  ;;  %v9169_v40 = vor.u32 %v12686_v29, %v9166_v31  ;;  %2737 = vmatpush.bf16.msrb.mxu2 %v9969_v37  ;;  %v9588_v29 = vld [vmem:[#allocation8 + $0x788] sm:$0xf] }
  0x99   :  { %v9422_v33 = vld [vmem:[#allocation8 + $0x660] sm:$0xf0]  ;;  %v8788_v31 = vld [vmem:[#allocation8 + $0x148] sm:$0xf]  ;;  %v9589_v37 = vor.u32 %v12795_v30, %v9588_v29 }
  0x9a   :  { %v12814_v34 = vld [vmem:[#allocation8 + $0x844] sm:$0xf]  ;;  %v9425_v41 = vor.u32 %v12750_v32, %v9422_v33  ;;  %2696 = vmatpush.bf16.msra.mxu0 %v9169_v40  ;;  %v12595_v32 = vld [vmem:[#allocation8 + $0x164] sm:$0xf0] }
  0x9b   :  { %v9678_v36 = vld [vmem:[#allocation8 + $0x860] sm:$0xf0]  ;;  %v9044_v33 = vld [vmem:[#allocation8 + $0x348] sm:$0xf]  ;;  %v8789_v40 = vor.u32 %v12595_v32, %v8788_v31 }
  0x9c   :  { %v12878_v38 = vld [vmem:[#allocation8 + $0xa44] sm:$0xf]  ;;  %v9681_v45 = vor.u32 %v12814_v34, %v9678_v36  ;;  %2710 = vmatpush.bf16.msra.mxu1 %v9425_v41  ;;  %v12659_v34 = vld [vmem:[#allocation8 + $0x364] sm:$0xf0]  ;;  %v9333_v36 = vor.u32 %v12731_v26, %v9332_v25 }
  0x9d   :  { %v9934_v39 = vld [vmem:[#allocation8 + $0xa60] sm:$0xf0]  ;;  %v9045_v41 = vor.u32 %v12659_v34, %v9044_v33  ;;  %v12715_v51 = vld [vmem:[#allocation8 + $0x524] sm:$0xf0] }
  0x9e   :  { %v12678_v42 = vld [vmem:[#allocation8 + $0x404] sm:$0xf]  ;;  %v9937_v52 = vor.u32 %v12878_v38, %v9934_v39  ;;  %2724 = vmatpush.bf16.msra.mxu3 %v9681_v45  ;;  %v9300_v38 = vld [vmem:[#allocation8 + $0x548] sm:$0xf] }
  0x9f   :  { %v9134_v43 = vld [vmem:[#allocation8 + $0x420] sm:$0xf0]  ;;  %v12723_v39 = vld [vmem:[#allocation8 + $0x564] sm:$0xf0] }
  0xa0   :  { %v12742_v44 = vld [vmem:[#allocation8 + $0x604] sm:$0xf]  ;;  %v9137_v56 = vor.u32 %v12678_v42, %v9134_v43  ;;  %2738 = vmatpush.bf16.msrb.mxu2 %v9937_v52  ;;  %v9556_v42 = vld [vmem:[#allocation8 + $0x748] sm:$0xf] }
  0xa1   :  { %v9390_v46 = vld [vmem:[#allocation8 + $0x620] sm:$0xf0]  ;;  %v12787_v43 = vld [vmem:[#allocation8 + $0x764] sm:$0xf0] }
  0xa2   :  { %v12806_v47 = vld [vmem:[#allocation8 + $0x804] sm:$0xf]  ;;  %v9393_v57 = vor.u32 %v12742_v44, %v9390_v46  ;;  %2697 = vmatpush.bf16.msra.mxu0 %v9137_v56  ;;  %v8756_v44 = vld [vmem:[#allocation8 + $0x108] sm:$0xf]  ;;  %v9557_v49 = vor.u32 %v12787_v43, %v9556_v42 }
  0xa3   :  { %v9646_v48 = vld [vmem:[#allocation8 + $0x820] sm:$0xf0]  ;;  %v12587_v45 = vld [vmem:[#allocation8 + $0x124] sm:$0xf0] }
  0xa4   :  { %v12934_v54 = vld [vmem:[#allocation8 + $0xc04] sm:$0xf]  ;;  %v9649_v60 = vor.u32 %v12806_v47, %v9646_v48  ;;  %2711 = vmatpush.bf16.msra.mxu1 %v9393_v57  ;;  %v9012_v46 = vld [vmem:[#allocation8 + $0x308] sm:$0xf]  ;;  %v9301_v48 = vor.u32 %v12723_v39, %v9300_v38  ;;  %v8757_v52 = vor.u32 %v12587_v45, %v8756_v44 }
  0xa5   :  { %v10158_v55 = vld [vmem:[#allocation8 + $0xc20] sm:$0xf0]  ;;  %2698 = vmatmul.bf16.vlgmr.msra.gmra.mxu0 %v13832_v19  ;;  %v12651_v47 = vld [vmem:[#allocation8 + $0x324] sm:$0xf0] }
  0xa6   :  { %v12870_v58 = vld [vmem:[#allocation8 + $0xa04] sm:$0xf]  ;;  %v10161_v9 = vor.u32 %v12934_v54, %v10158_v55  ;;  %2725 = vmatpush.bf16.msra.mxu3 %v9649_v60  ;;  %v9013_v53 = vor.u32 %v12651_v47, %v9012_v46  ;;  %v9524_v54 = vld [vmem:[#allocation8 + $0x708] sm:$0xf]  ;;  %v9269_v60 = vor.u32 %v12715_v51, %v9268_v50 }
  0xa7   :  { %v9902_v59 = vld [vmem:[#allocation8 + $0xa20] sm:$0xf0]  ;;  %2712 = vmatmul.bf16.vlgmr.msra.gmra.mxu1 %v13834_v20  ;;  %v12779_v55 = vld [vmem:[#allocation8 + $0x724] sm:$0xf0] }
  0xa8   :  { %v9905_v14 = vor.u32 %v12870_v58, %v9902_v59  ;;  %2760 = vmatpush.bf16.msrb.mxu1 %v8853_v61  ;;  %2753 = vmatpush.bf16.msrb.mxu0 %v10161_v9  ;;  %v8724_v56 = vld [vmem:[#allocation8 + $0xc8] sm:$0xf]  ;;  %v9525_v61 = vor.u32 %v12779_v55, %v9524_v54 }
  0xa9   :  { %2726 = vmatmul.bf16.vlgmr.msra.gmra.mxu3 %v13846_v13  ;;  %v12579_v57 = vld [vmem:[#allocation8 + $0xe4] sm:$0xf0] }
  0xaa   :  { %2774 = vmatpush.bf16.msrb.mxu3 %v9109_v8  ;;  %2739 = vmatpush.bf16.msrb.mxu2 %v9905_v14  ;;  %v8980_v58 = vld [vmem:[#allocation8 + $0x2c8] sm:$0xf]  ;;  %v8725_v8 = vor.u32 %v12579_v57, %v8724_v56 }
  0xab   :  { %v12643_v59 = vld [vmem:[#allocation8 + $0x2e4] sm:$0xf0] }
  0xac   :  { %2788 = vmatpush.bf16.msra.mxu0 %v9365_v23  ;;  %2761 = vmatpush.bf16.msrb.mxu1 %v8821_v27  ;;  %v9236_v62 = vld [vmem:[#allocation8 + $0x4c8] sm:$0xf]  ;;  %v8981_v9 = vor.u32 %v12643_v59, %v8980_v58 }
  0xad   :  { %2740 = vmatmul.bf16.vlgmr.msrb.gmra.mxu2 %v13848_v22  ;;  %v12707_v63 = vld [vmem:[#allocation8 + $0x4e4] sm:$0xf0] }
  0xae   :  { %2802 = vmatpush.bf16.msra.mxu2 %v9621_v24  ;;  %2775 = vmatpush.bf16.msrb.mxu3 %v9077_v28  ;;  %v9492_v10 = vld [vmem:[#allocation8 + $0x6c8] sm:$0xf]  ;;  %v9237_v18 = vor.u32 %v12707_v63, %v9236_v62  ;;  %v12607_v63 = vld [vmem:[#allocation8 + $0x1cc] sm:$0xf] }
  0xaf   :  { %v12771_v11 = vld [vmem:[#allocation8 + $0x6e4] sm:$0xf0] }
  0xb0   :  { %2789 = vmatpush.bf16.msra.mxu0 %v9333_v36  ;;  %2762 = vmatpush.bf16.msrb.mxu1 %v8789_v40  ;;  %v8692_v12 = vld [vmem:[#allocation8 + $0x88] sm:$0xf]  ;;  %v9493_v23 = vor.u32 %v12771_v11, %v9492_v10 }
  0xb1   :  { %v12571_v14 = vld [vmem:[#allocation8 + $0xa4] sm:$0xf0] }
  0xb2   :  { %2803 = vmatpush.bf16.msra.mxu2 %v9589_v37  ;;  %2776 = vmatpush.bf16.msrb.mxu3 %v9045_v41  ;;  %v8948_v15 = vld [vmem:[#allocation8 + $0x288] sm:$0xf]  ;;  %v8693_v26 = vor.u32 %v12571_v14, %v8692_v12 }
  0xb3   :  { %v12635_v16 = vld [vmem:[#allocation8 + $0x2a4] sm:$0xf0] }
  0xb4   :  { %2790 = vmatpush.bf16.msra.mxu0 %v9301_v48  ;;  %2763 = vmatpush.bf16.msrb.mxu1 %v8757_v52  ;;  %v9204_v24 = vld [vmem:[#allocation8 + $0x488] sm:$0xf]  ;;  %v8949_v27 = vor.u32 %v12635_v16, %v8948_v15 }
  0xb5   :  { %v12699_v25 = vld [vmem:[#allocation8 + $0x4a4] sm:$0xf0]  ;;  %10187 = vmatmul.msk.bf16.vlgmr.msrb.gmra.mxu0 %vm2560_vm0, %v13842_v21 }
  0xb6   :  { %2804 = vmatpush.bf16.msra.mxu2 %v9557_v49  ;;  %2777 = vmatpush.bf16.msrb.mxu3 %v9013_v53  ;;  %v9460_v28 = vld [vmem:[#allocation8 + $0x688] sm:$0xf]  ;;  %v9205_v34 = vor.u32 %v12699_v25, %v9204_v24  ;;  %v9110_v24 = vld [vmem:[#allocation8 + $0x3e8] sm:$0xf0] }
  0xb7   :  { %v12763_v29 = vld [vmem:[#allocation8 + $0x6a4] sm:$0xf0] }
  0xb8   :  { %2791 = vmatpush.bf16.msra.mxu0 %v9269_v60  ;;  %2764 = vmatpush.bf16.msrb.mxu1 %v8725_v8  ;;  %v8660_v30 = vld [vmem:[#allocation8 + $0x48] sm:$0xf]  ;;  %v9461_v36 = vor.u32 %v12763_v29, %v9460_v28  ;;  %v8854_v8 = vld [vmem:[#allocation8 + $0x1e8] sm:$0xf0] }
  0xb9   :  { %v12563_v31 = vld [vmem:[#allocation8 + $0x64] sm:$0xf0]  ;;  %v8822_v28 = vld [vmem:[#allocation8 + $0x1a8] sm:$0xf0] }
  0xba   :  { %2805 = vmatpush.bf16.msra.mxu2 %v9525_v61  ;;  %2778 = vmatpush.bf16.msrb.mxu3 %v8981_v9  ;;  %v8916_v32 = vld [vmem:[#allocation8 + $0x248] sm:$0xf]  ;;  %v8661_v40 = vor.u32 %v12563_v31, %v8660_v30 }
  0xbb   :  { %v12627_v33 = vld [vmem:[#allocation8 + $0x264] sm:$0xf0] }
  0xbc   :  { %2792 = vmatpush.bf16.msra.mxu0 %v9237_v18  ;;  %v9172_v37 = vld [vmem:[#allocation8 + $0x448] sm:$0xf]  ;;  %2765 = vmatpush.bf16.msrb.mxu1 %v8693_v26  ;;  %v8917_v41 = vor.u32 %v12627_v33, %v8916_v32  ;;  %v8857_v18 = vor.u32 %v12607_v63, %v8854_v8  ;;  %v12575_v8 = vld [vmem:[#allocation8 + $0xcc] sm:$0xf] }
  0xbd   :  { %v12691_v38 = vld [vmem:[#allocation8 + $0x464] sm:$0xf0] }
  0xbe   :  { %2806 = vmatpush.bf16.msra.mxu2 %v9493_v23  ;;  %v9428_v39 = vld [vmem:[#allocation8 + $0x648] sm:$0xf]  ;;  %2779 = vmatpush.bf16.msrb.mxu3 %v8949_v27  ;;  %v9173_v48 = vor.u32 %v12691_v38, %v9172_v37  ;;  %v12671_v23 = vld [vmem:[#allocation8 + $0x3cc] sm:$0xf] }
  0xbf   :  { %v12755_v42 = vld [vmem:[#allocation8 + $0x664] sm:$0xf0]  ;;  %v12599_v27 = vld [vmem:[#allocation8 + $0x18c] sm:$0xf]  ;;  %v9113_v33 = vor.u32 %v12671_v23, %v9110_v24 }
  0xc0   :  { %v8628_v43 = vld [vmem:[#allocation8 + $0x8] sm:$0xf]  ;;  %2793 = vmatpush.bf16.msra.mxu0 %v9205_v34  ;;  %v9429_v52 = vor.u32 %v12755_v42, %v9428_v39  ;;  %2766 = vmatpush.bf16.msrb.mxu1 %v8661_v40  ;;  %v8825_v34 = vor.u32 %v12599_v27, %v8822_v28  ;;  %v9078_v37 = vld [vmem:[#allocation8 + $0x3a8] sm:$0xf0] }
  0xc1   :  { %v12555_v44 = vld [vmem:[#allocation8 + $0x24] sm:$0xf0]  ;;  %v12591_v40 = vld [vmem:[#allocation8 + $0x14c] sm:$0xf] }
  0xc2   :  { %v8884_v45 = vld [vmem:[#allocation8 + $0x208] sm:$0xf]  ;;  %2807 = vmatpush.bf16.msra.mxu2 %v9461_v36  ;;  %2780 = vmatpush.bf16.msrb.mxu3 %v8917_v41  ;;  %v8629_v56 = vor.u32 %v12555_v44, %v8628_v43  ;;  %v12663_v36 = vld [vmem:[#allocation8 + $0x38c] sm:$0xf] }
  0xc3   :  { %v12619_v46 = vld [vmem:[#allocation8 + $0x224] sm:$0xf0]  ;;  %v8790_v41 = vld [vmem:[#allocation8 + $0x168] sm:$0xf0] }
  0xc4   :  { %v9876_v47 = vld [vmem:[#allocation8 + $0x9c8] sm:$0xf]  ;;  %v8885_v57 = vor.u32 %v12619_v46, %v8884_v45  ;;  %2794 = vmatpush.bf16.msra.mxu0 %v9173_v48  ;;  %2767 = vmatpush.bf16.msrb.mxu1 %v8629_v56  ;;  %v9081_v46 = vor.u32 %v12663_v36, %v9078_v37  ;;  %v12655_v48 = vld [vmem:[#allocation8 + $0x34c] sm:$0xf] }
  0xc5   :  { %v12867_v49 = vld [vmem:[#allocation8 + $0x9e4] sm:$0xf0]  ;;  %v8982_v23 = vld [vmem:[#allocation8 + $0x2e8] sm:$0xf0] }
  0xc6   :  { %v10132_v50 = vld [vmem:[#allocation8 + $0xbc8] sm:$0xf]  ;;  %v9877_v61 = vor.u32 %v12867_v49, %v9876_v47  ;;  %2808 = vmatpush.bf16.msra.mxu2 %v9429_v52  ;;  %2781 = vmatpush.bf16.msrb.mxu3 %v8885_v57  ;;  %v8793_v47 = vor.u32 %v12591_v40, %v8790_v41  ;;  %v9046_v49 = vld [vmem:[#allocation8 + $0x368] sm:$0xf0] }
  0xc7   :  { %v12931_v51 = vld [vmem:[#allocation8 + $0xbe4] sm:$0xf0]  ;;  %2768 = vmatmul.bf16.vlgmr.msrb.gmra.mxu1 %v13830_v17  ;;  %v12583_v52 = vld [vmem:[#allocation8 + $0x10c] sm:$0xf] }
  0xc8   :  { %v9140_v53 = vld [vmem:[#allocation8 + $0x408] sm:$0xf]  ;;  %v10133_v62 = vor.u32 %v12931_v51, %v10132_v50  ;;  %2816 = vmatpush.bf16.msra.mxu1 %v9877_v61  ;;  %v9014_v61 = vld [vmem:[#allocation8 + $0x328] sm:$0xf0] }
  0xc9   :  { %v12683_v54 = vld [vmem:[#allocation8 + $0x424] sm:$0xf0]  ;;  %2782 = vmatmul.bf16.vlgmr.msrb.gmra.mxu3 %v13837_v35  ;;  %v8694_v27 = vld [vmem:[#allocation8 + $0xa8] sm:$0xf0] }
  0xca   :  { %v9396_v55 = vld [vmem:[#allocation8 + $0x608] sm:$0xf]  ;;  %v9141_v10 = vor.u32 %v12683_v54, %v9140_v53  ;;  %2830 = vmatpush.bf16.msra.mxu3 %v10133_v62  ;;  %v8758_v53 = vld [vmem:[#allocation8 + $0x128] sm:$0xf0] }
  0xcb   :  { %v12747_v58 = vld [vmem:[#allocation8 + $0x624] sm:$0xf0]  ;;  %v8950_v36 = vld [vmem:[#allocation8 + $0x2a8] sm:$0xf0] }
  0xcc   :  { %v10164_v59 = vld [vmem:[#allocation8 + $0xc08] sm:$0xf]  ;;  %v9397_v15 = vor.u32 %v12747_v58, %v9396_v55  ;;  %2795 = vmatpush.bf16.msra.mxu0 %v9141_v10  ;;  %v9049_v58 = vor.u32 %v12655_v48, %v9046_v49  ;;  %v12559_v37 = vld [vmem:[#allocation8 + $0x4c] sm:$0xf] }
  0xcd   :  { %v12939_v60 = vld [vmem:[#allocation8 + $0xc24] sm:$0xf0]  ;;  %v8662_v40 = vld [vmem:[#allocation8 + $0x68] sm:$0xf0] }
  0xce   :  { %v9844_v9 = vld [vmem:[#allocation8 + $0x988] sm:$0xf]  ;;  %v10165_v16 = vor.u32 %v12939_v60, %v10164_v59  ;;  %2809 = vmatpush.bf16.msra.mxu2 %v9397_v15  ;;  %v8761_v59 = vor.u32 %v12583_v52, %v8758_v53  ;;  %v12647_v60 = vld [vmem:[#allocation8 + $0x30c] sm:$0xf] }
  0xcf   :  { %v12859_v11 = vld [vmem:[#allocation8 + $0x9a4] sm:$0xf0]  ;;  %2796 = vmatmul.bf16.vlgmr.msra.gmra.mxu0 %v13832_v19  ;;  %v9017_v15 = vor.u32 %v12647_v60, %v9014_v61  ;;  %v12799_v48 = vld [vmem:[#allocation8 + $0x7cc] sm:$0xf] }
  0xd0   :  { %v10100_v12 = vld [vmem:[#allocation8 + $0xb88] sm:$0xf]  ;;  %v9845_v25 = vor.u32 %v12859_v11, %v9844_v9  ;;  %2851 = vmatpush.bf16.msrb.mxu0 %v10165_v16  ;;  %v8726_v9 = vld [vmem:[#allocation8 + $0xe8] sm:$0xf0] }
  0xd1   :  { %v12923_v14 = vld [vmem:[#allocation8 + $0xba4] sm:$0xf0]  ;;  %2810 = vmatmul.bf16.vlgmr.msra.gmra.mxu2 %v13834_v20  ;;  %v8729_v16 = vor.u32 %v12575_v8, %v8726_v9  ;;  %v9622_v49 = vld [vmem:[#allocation8 + $0x7e8] sm:$0xf0] }
  0xd2   :  { %v10101_v26 = vor.u32 %v12923_v14, %v10100_v12  ;;  %v9812_v29 = vld [vmem:[#allocation8 + $0x948] sm:$0xf]  ;;  %2858 = vmatpush.bf16.msrb.mxu2 %v8857_v18  ;;  %2817 = vmatpush.bf16.msra.mxu1 %v9845_v25  ;;  %v12639_v18 = vld [vmem:[#allocation8 + $0x2cc] sm:$0xf] }
  0xd3   :  { %v12851_v30 = vld [vmem:[#allocation8 + $0x964] sm:$0xf0]  ;;  %v8918_v52 = vld [vmem:[#allocation8 + $0x268] sm:$0xf0] }
  0xd4   :  { %v10068_v31 = vld [vmem:[#allocation8 + $0xb48] sm:$0xf]  ;;  %2831 = vmatpush.bf16.msra.mxu3 %v10101_v26  ;;  %v9813_v38 = vor.u32 %v12851_v30, %v9812_v29  ;;  %2872 = vmatpush.bf16.msra.mxu0 %v9113_v33  ;;  %v12567_v26 = vld [vmem:[#allocation8 + $0x8c] sm:$0xf] }
  0xd5   :  { %v12915_v32 = vld [vmem:[#allocation8 + $0xb64] sm:$0xf0]  ;;  %v8697_v33 = vor.u32 %v12567_v26, %v8694_v27  ;;  %v9878_v60 = vld [vmem:[#allocation8 + $0x9e8] sm:$0xf0] }
  0xd6   :  { %v10069_v39 = vor.u32 %v12915_v32, %v10068_v31  ;;  %v9780_v42 = vld [vmem:[#allocation8 + $0x908] sm:$0xf]  ;;  %2859 = vmatpush.bf16.msrb.mxu2 %v8825_v34  ;;  %2818 = vmatpush.bf16.msra.mxu1 %v9813_v38  ;;  %v8985_v32 = vor.u32 %v12639_v18, %v8982_v23  ;;  %v12631_v34 = vld [vmem:[#allocation8 + $0x28c] sm:$0xf] }
  0xd7   :  { %v12843_v43 = vld [vmem:[#allocation8 + $0x924] sm:$0xf0]  ;;  %v12727_v61 = vld [vmem:[#allocation8 + $0x58c] sm:$0xf] }
  0xd8   :  { %v10036_v44 = vld [vmem:[#allocation8 + $0xb08] sm:$0xf]  ;;  %2832 = vmatpush.bf16.msra.mxu3 %v10069_v39  ;;  %v9781_v50 = vor.u32 %v12843_v43, %v9780_v42  ;;  %2873 = vmatpush.bf16.msra.mxu0 %v9081_v46  ;;  %v8953_v46 = vor.u32 %v12631_v34, %v8950_v36  ;;  %v12791_v8 = vld [vmem:[#allocation8 + $0x78c] sm:$0xf] }
  0xd9   :  { %v12907_v45 = vld [vmem:[#allocation8 + $0xb24] sm:$0xf0]  ;;  %v9590_v9 = vld [vmem:[#allocation8 + $0x7a8] sm:$0xf0] }
  0xda   :  { %v10037_v51 = vor.u32 %v12907_v45, %v10036_v44  ;;  %v9748_v54 = vld [vmem:[#allocation8 + $0x8c8] sm:$0xf]  ;;  %2860 = vmatpush.bf16.msrb.mxu2 %v8793_v47  ;;  %2819 = vmatpush.bf16.msra.mxu1 %v9781_v50  ;;  %v12735_v45 = vld [vmem:[#allocation8 + $0x5cc] sm:$0xf]  ;;  %v8665_v50 = vor.u32 %v12559_v37, %v8662_v40 }
  0xdb   :  { %v12835_v55 = vld [vmem:[#allocation8 + $0x8e4] sm:$0xf0]  ;;  %v9366_v47 = vld [vmem:[#allocation8 + $0x5e8] sm:$0xf0] }
  0xdc   :  { %v10004_v56 = vld [vmem:[#allocation8 + $0xac8] sm:$0xf]  ;;  %2833 = vmatpush.bf16.msra.mxu3 %v10037_v51  ;;  %v9749_v62 = vor.u32 %v12835_v55, %v9748_v54  ;;  %2874 = vmatpush.bf16.msra.mxu0 %v9049_v58  ;;  %v12623_v51 = vld [vmem:[#allocation8 + $0x24c] sm:$0xf]  ;;  %v9369_v58 = vor.u32 %v12735_v45, %v9366_v47 }
  0xdd   :  { %v12899_v57 = vld [vmem:[#allocation8 + $0xae4] sm:$0xf0]  ;;  %v12551_v55 = vld [vmem:[#allocation8 + $0xc] sm:$0xf] }
  0xde   :  { %v10005_v63 = vor.u32 %v12899_v57, %v10004_v56  ;;  %v9716_v10 = vld [vmem:[#allocation8 + $0x888] sm:$0xf]  ;;  %2861 = vmatpush.bf16.msrb.mxu2 %v8761_v59  ;;  %2820 = vmatpush.bf16.msra.mxu1 %v9749_v62  ;;  %v8630_v56 = vld [vmem:[#allocation8 + $0x28] sm:$0xf0]  ;;  %v9625_v59 = vor.u32 %v12799_v48, %v9622_v49 }
  0xdf   :  { %v12827_v11 = vld [vmem:[#allocation8 + $0x8a4] sm:$0xf0]  ;;  %10188 = vmatmul.msk.bf16.vlgmr.msrb.gmra.mxu0 %vm2560_vm0, %v13842_v21  ;;  %v12863_v57 = vld [vmem:[#allocation8 + $0x9cc] sm:$0xf] }
  0xe0   :  { %v9972_v12 = vld [vmem:[#allocation8 + $0xa88] sm:$0xf]  ;;  %2834 = vmatpush.bf16.msra.mxu3 %v10005_v63  ;;  %v9717_v24 = vor.u32 %v12827_v11, %v9716_v10  ;;  %2875 = vmatpush.bf16.msra.mxu0 %v9017_v15  ;;  %v9334_v62 = vld [vmem:[#allocation8 + $0x5a8] sm:$0xf0]  ;;  %v8921_v63 = vor.u32 %v12623_v51, %v8918_v52  ;;  %v8633_v11 = vor.u32 %v12551_v55, %v8630_v56 }
  0xe1   :  { %v12891_v14 = vld [vmem:[#allocation8 + $0xaa4] sm:$0xf0]  ;;  %v12615_v10 = vld [vmem:[#allocation8 + $0x20c] sm:$0xf] }
  0xe2   :  { %v9973_v25 = vor.u32 %v12891_v14, %v9972_v12  ;;  %v9684_v28 = vld [vmem:[#allocation8 + $0x848] sm:$0xf]  ;;  %2862 = vmatpush.bf16.msrb.mxu2 %v8729_v16  ;;  %2821 = vmatpush.bf16.msra.mxu1 %v9717_v24  ;;  %v8886_v12 = vld [vmem:[#allocation8 + $0x228] sm:$0xf0]  ;;  %v9881_v16 = vor.u32 %v12863_v57, %v9878_v60  ;;  %v9337_v24 = vor.u32 %v12727_v61, %v9334_v62  ;;  %v2573_v60 = vpop.f32.mrf.mxu0 }
  0xe3   :  { %v12819_v29 = vld [vmem:[#allocation8 + $0x864] sm:$0xf0]  ;;  %v12927_v14 = vld [vmem:[#allocation8 + $0xbcc] sm:$0xf] }
  0xe4   :  { %v9940_v30 = vld [vmem:[#allocation8 + $0xa48] sm:$0xf]  ;;  %2835 = vmatpush.bf16.msra.mxu3 %v9973_v25  ;;  %v9685_v38 = vor.u32 %v12819_v29, %v9684_v28  ;;  %2876 = vmatpush.bf16.msra.mxu0 %v8985_v32  ;;  %v10134_v15 = vld [vmem:[#allocation8 + $0xbe8] sm:$0xf0]  ;;  %v9593_v25 = vor.u32 %v12791_v8, %v9590_v9  ;;  %v8889_v29 = vor.u32 %v12615_v10, %v8886_v12 }
  0xe5   :  { %v12883_v31 = vld [vmem:[#allocation8 + $0xa64] sm:$0xf0]  ;;  %v12855_v26 = vld [vmem:[#allocation8 + $0x98c] sm:$0xf] }
  0xe6   :  { %v9941_v39 = vor.u32 %v12883_v31, %v9940_v30  ;;  %v9652_v41 = vld [vmem:[#allocation8 + $0x808] sm:$0xf]  ;;  %2863 = vmatpush.bf16.msrb.mxu2 %v8697_v33  ;;  %2822 = vmatpush.bf16.msra.mxu1 %v9685_v38  ;;  %v9846_v27 = vld [vmem:[#allocation8 + $0x9a8] sm:$0xf0]  ;;  %v10137_v33 = vor.u32 %v12927_v14, %v10134_v15 }
  0xe7   :  { %v12811_v42 = vld [vmem:[#allocation8 + $0x824] sm:$0xf0]  ;;  %v12719_v28 = vld [vmem:[#allocation8 + $0x54c] sm:$0xf]  ;;  %v9849_v36 = vor.u32 %v12855_v26, %v9846_v27 }
  0xe8   :  { %v9908_v43 = vld [vmem:[#allocation8 + $0xa08] sm:$0xf]  ;;  %2836 = vmatpush.bf16.msra.mxu3 %v9941_v39  ;;  %v9653_v53 = vor.u32 %v12811_v42, %v9652_v41  ;;  %2877 = vmatpush.bf16.msra.mxu0 %v8953_v46  ;;  %v9302_v30 = vld [vmem:[#allocation8 + $0x568] sm:$0xf0] }
  0xe9   :  { %v12875_v44 = vld [vmem:[#allocation8 + $0xa24] sm:$0xf0]  ;;  %v12783_v31 = vld [vmem:[#allocation8 + $0x74c] sm:$0xf]  ;;  %v9305_v39 = vor.u32 %v12719_v28, %v9302_v30 }
  0xea   :  { %v9909_v54 = vor.u32 %v12875_v44, %v9908_v43  ;;  %2864 = vmatpush.bf16.msrb.mxu2 %v8665_v50  ;;  %2823 = vmatpush.bf16.msra.mxu1 %v9653_v53  ;;  %v126_v18 = vld [vmem:[#allocation11] ss:$8 sm:$0xf]  ;;  %v9558_v32 = vld [vmem:[#allocation8 + $0x768] sm:$0xf0] }
  0xeb   :  { %v127_v23 = vld [vmem:[#allocation11] ss:$8 sm:$0xf0]  ;;  %v12919_v37 = vld [vmem:[#allocation8 + $0xb8c] sm:$0xf]  ;;  %v9561_v40 = vor.u32 %v12783_v31, %v9558_v32  ;;  %v2601_v32 = vpop.f32.mrf.mxu2 }
  0xec   :  { %2837 = vmatpush.bf16.msra.mxu3 %v9909_v54  ;;  %2878 = vmatpush.bf16.msra.mxu0 %v8921_v63  ;;  %v13867_v34 = vor.u32 %v127_v23, %v126_v18  ;;  %v10102_v38 = vld [vmem:[#allocation8 + $0xba8] sm:$0xf0] }
  0xed   :  { %2824 = vmatmul.bf16.vlgmr.msra.gmra.mxu1 %v13846_v13  ;;  %v12847_v41 = vld [vmem:[#allocation8 + $0x94c] sm:$0xf]  ;;  %v10105_v47 = vor.u32 %v12919_v37, %v10102_v38 }
  0xee   :  { %2886 = vmatpush.bf16.msrb.mxu1 %v9369_v58  ;;  %2865 = vmatpush.bf16.msrb.mxu2 %v8633_v11  ;;  %v9814_v42 = vld [vmem:[#allocation8 + $0x968] sm:$0xf0]  ;;  %v549_v48 = vperm.slane %v13867_v34, 0 }
  0xef   :  { %2838 = vmatmul.bf16.vlgmr.msra.gmra.mxu3 %v13848_v22  ;;  %v12711_v43 = vld [vmem:[#allocation8 + $0x50c] sm:$0xf]  ;;  %v9817_v49 = vor.u32 %v12847_v41, %v9814_v42 }
  0xf0   :  { %2900 = vmatpush.bf16.msrb.mxu3 %v9625_v59  ;;  %2879 = vmatpush.bf16.msra.mxu0 %v8889_v29  ;;  %v9270_v44 = vld [vmem:[#allocation8 + $0x528] sm:$0xf0]  ;;  %v2574_v62 = vadd.f32 %v2573_v60, %v549_v48 }
  0xf1   :  { %v12775_v45 = vld [vmem:[#allocation8 + $0x70c] sm:$0xf]  ;;  %2866 = vmatmul.bf16.vlgmr.msrb.gmra.mxu2 %v13830_v17  ;;  %v9273_v52 = vor.u32 %v12711_v43, %v9270_v44  ;;  %v2615_v43 = vpop.f32.mrf.mxu3 }
  0xf2   :  { %2914 = vmatpush.bf16.msra.mxu2 %v9881_v16  ;;  %2887 = vmatpush.bf16.msrb.mxu1 %v9337_v24  ;;  %v9526_v46 = vld [vmem:[#allocation8 + $0x728] sm:$0xf0]  ;;  %v2587_v24 = vpop.f32.mrf.mxu1 }
  0xf3   :  { %v12911_v50 = vld [vmem:[#allocation8 + $0xb4c] sm:$0xf]  ;;  %v9529_v53 = vor.u32 %v12775_v45, %v9526_v46  ;;  %2880 = vmatmul.bf16.vlgmr.msra.gmra.mxu0 %v13837_v35  ;;  %v2588_v26 = vadd.f32 %v2587_v24, %v2574_v62  ;;  %v9372_v24 = vld [vmem:[#allocation8 + $0x5d0] sm:$0xf] }
  0xf4   :  { %2901 = vmatpush.bf16.msrb.mxu3 %v9593_v25  ;;  %2928 = vmatpush.bf16.msrb.mxu0 %v10137_v33  ;;  %v10070_v51 = vld [vmem:[#allocation8 + $0xb68] sm:$0xf0] }
  0xf5   :  { %v12839_v54 = vld [vmem:[#allocation8 + $0x90c] sm:$0xf]  ;;  %v10073_v61 = vor.u32 %v12911_v50, %v10070_v51  ;;  %v2602_v38 = vadd.f32 %v2601_v32, %v2588_v26  ;;  %v12740_v26 = vld [vmem:[#allocation8 + $0x5ec] sm:$0xf0] }
  0xf6   :  { %2915 = vmatpush.bf16.msra.mxu2 %v9849_v36  ;;  %2888 = vmatpush.bf16.msrb.mxu1 %v9305_v39  ;;  %v9782_v55 = vld [vmem:[#allocation8 + $0x928] sm:$0xf0] }
  0xf7   :  { %v12703_v56 = vld [vmem:[#allocation8 + $0x4cc] sm:$0xf]  ;;  %v9785_v63 = vor.u32 %v12839_v54, %v9782_v55  ;;  %v13875_v45 = vadd.f32 %v2615_v43, %v2602_v38 }
  0xf8   :  { %2902 = vmatpush.bf16.msrb.mxu3 %v9561_v40  ;;  %v9238_v57 = vld [vmem:[#allocation8 + $0x4e8] sm:$0xf0]  ;;  %2929 = vmatpush.bf16.msrb.mxu0 %v10105_v47 }
  0xf9   :  { %v12767_v58 = vld [vmem:[#allocation8 + $0x6cc] sm:$0xf]  ;;  %v9241_v10 = vor.u32 %v12703_v56, %v9238_v57  ;;  %v8860_v57 = vld [vmem:[#allocation8 + $0x1d0] sm:$0xf] }
  0xfa   :  { %v9494_v59 = vld [vmem:[#allocation8 + $0x6e8] sm:$0xf0]  ;;  %2916 = vmatpush.bf16.msra.mxu2 %v9817_v49  ;;  %2889 = vmatpush.bf16.msrb.mxu1 %v9273_v52 }
  0xfb   :  { %v12903_v8 = vld [vmem:[#allocation8 + $0xb0c] sm:$0xf]  ;;  %v9497_v11 = vor.u32 %v12767_v58, %v9494_v59  ;;  %v12612_v59 = vld [vmem:[#allocation8 + $0x1ec] sm:$0xf0] }
  0xfc   :  { %v10038_v9 = vld [vmem:[#allocation8 + $0xb28] sm:$0xf0]  ;;  %2903 = vmatpush.bf16.msrb.mxu3 %v9529_v53  ;;  %2930 = vmatpush.bf16.msrb.mxu0 %v10073_v61 }
  0xfd   :  { %v12831_v12 = vld [vmem:[#allocation8 + $0x8cc] sm:$0xf]  ;;  %v10041_v25 = vor.u32 %v12903_v8, %v10038_v9 }
  0xfe   :  { %v9750_v14 = vld [vmem:[#allocation8 + $0x8e8] sm:$0xf0]  ;;  %2917 = vmatpush.bf16.msra.mxu2 %v9785_v63  ;;  %2890 = vmatpush.bf16.msrb.mxu1 %v9241_v10 }
  0xff   :  { %v12695_v15 = vld [vmem:[#allocation8 + $0x48c] sm:$0xf]  ;;  %v9753_v27 = vor.u32 %v12831_v12, %v9750_v14 }
 0x100   :  { %v9206_v16 = vld [vmem:[#allocation8 + $0x4a8] sm:$0xf0]  ;;  %2904 = vmatpush.bf16.msrb.mxu3 %v9497_v11  ;;  %2931 = vmatpush.bf16.msrb.mxu0 %v10041_v25  ;;  %v13877_v11 = vpop.f32.mrf.mxu2 }
 0x101   :  { %v12759_v18 = vld [vmem:[#allocation8 + $0x68c] sm:$0xf]  ;;  %v9209_v30 = vor.u32 %v12695_v15, %v9206_v16  ;;  %v8861_v15 = vor.u32 %v12612_v59, %v8860_v57  ;;  %v12660_v59 = vld [vmem:[#allocation8 + $0x36c] sm:$0xf0] }
 0x102   :  { %v9462_v23 = vld [vmem:[#allocation8 + $0x6a8] sm:$0xf0]  ;;  %2918 = vmatpush.bf16.msra.mxu2 %v9753_v27  ;;  %v8828_v27 = vld [vmem:[#allocation8 + $0x190] sm:$0xf] }
 0x103   :  { %v12895_v28 = vld [vmem:[#allocation8 + $0xacc] sm:$0xf]  ;;  %v9465_v31 = vor.u32 %v12759_v18, %v9462_v23  ;;  %2891 = vmatpush.bf16.msrb.mxu1 %v9209_v30  ;;  %v9116_v18 = vld [vmem:[#allocation8 + $0x3d0] sm:$0xf] }
 0x104   :  { %v10006_v29 = vld [vmem:[#allocation8 + $0xae8] sm:$0xf0]  ;;  %v12676_v23 = vld [vmem:[#allocation8 + $0x3ec] sm:$0xf0] }
 0x105   :  { %v12823_v33 = vld [vmem:[#allocation8 + $0x88c] sm:$0xf]  ;;  %v10009_v42 = vor.u32 %v12895_v28, %v10006_v29  ;;  %2905 = vmatpush.bf16.msrb.mxu3 %v9465_v31  ;;  %v12604_v28 = vld [vmem:[#allocation8 + $0x1ac] sm:$0xf0]  ;;  %v9117_v32 = vor.u32 %v12676_v23, %v9116_v18 }
 0x106   :  { %v9718_v36 = vld [vmem:[#allocation8 + $0x8a8] sm:$0xf0]  ;;  %v8829_v38 = vor.u32 %v12604_v28, %v8828_v27  ;;  %v12652_v18 = vld [vmem:[#allocation8 + $0x32c] sm:$0xf0] }
 0x107   :  { %v12687_v37 = vld [vmem:[#allocation8 + $0x44c] sm:$0xf]  ;;  %v9721_v44 = vor.u32 %v12823_v33, %v9718_v36  ;;  %2932 = vmatpush.bf16.msrb.mxu0 %v10009_v42  ;;  %v9628_v33 = vld [vmem:[#allocation8 + $0x7d0] sm:$0xf]  ;;  %v2575_v42 = vpop.f32.mrf.mxu0 }
 0x108   :  { %v9174_v39 = vld [vmem:[#allocation8 + $0x468] sm:$0xf0]  ;;  %v12804_v36 = vld [vmem:[#allocation8 + $0x7ec] sm:$0xf0] }
 0x109   :  { %v12751_v40 = vld [vmem:[#allocation8 + $0x64c] sm:$0xf]  ;;  %v9177_v50 = vor.u32 %v12687_v37, %v9174_v39  ;;  %2919 = vmatpush.bf16.msra.mxu2 %v9721_v44  ;;  %v9373_v37 = vor.u32 %v12740_v26, %v9372_v24  ;;  %v9084_v39 = vld [vmem:[#allocation8 + $0x390] sm:$0xf] }
 0x10a   :  { %v9430_v41 = vld [vmem:[#allocation8 + $0x668] sm:$0xf0]  ;;  %v12732_v44 = vld [vmem:[#allocation8 + $0x5ac] sm:$0xf0] }
 0x10b   :  { %v12887_v46 = vld [vmem:[#allocation8 + $0xa8c] sm:$0xf]  ;;  %v9433_v51 = vor.u32 %v12751_v40, %v9430_v41  ;;  %2892 = vmatpush.bf16.msrb.mxu1 %v9177_v50  ;;  %v12668_v40 = vld [vmem:[#allocation8 + $0x3ac] sm:$0xf0]  ;;  %v9629_v50 = vor.u32 %v12804_v36, %v9628_v33 }
 0x10c   :  { %v9974_v47 = vld [vmem:[#allocation8 + $0xaa8] sm:$0xf0]  ;;  %v9340_v41 = vld [vmem:[#allocation8 + $0x590] sm:$0xf] }
 0x10d   :  { %v12815_v49 = vld [vmem:[#allocation8 + $0x84c] sm:$0xf]  ;;  %v9977_v58 = vor.u32 %v12887_v46, %v9974_v47  ;;  %2906 = vmatpush.bf16.msrb.mxu3 %v9433_v51  ;;  %v8796_v46 = vld [vmem:[#allocation8 + $0x150] sm:$0xf]  ;;  %v9085_v51 = vor.u32 %v12668_v40, %v9084_v39 }
 0x10e   :  { %v9686_v52 = vld [vmem:[#allocation8 + $0x868] sm:$0xf0]  ;;  %v12596_v47 = vld [vmem:[#allocation8 + $0x16c] sm:$0xf0] }
 0x10f   :  { %v12679_v53 = vld [vmem:[#allocation8 + $0x40c] sm:$0xf]  ;;  %v9689_v62 = vor.u32 %v12815_v49, %v9686_v52  ;;  %2933 = vmatpush.bf16.msrb.mxu0 %v9977_v58  ;;  %v2589_v49 = vpop.f32.mrf.mxu1  ;;  %v9596_v52 = vld [vmem:[#allocation8 + $0x790] sm:$0xf]  ;;  %v8797_v57 = vor.u32 %v12596_v47, %v8796_v46  ;;  %v2629_v26 = vpop.f32.mrf.mxu0 }
 0x110   :  { %v9142_v54 = vld [vmem:[#allocation8 + $0x428] sm:$0xf0]  ;;  %v9052_v58 = vld [vmem:[#allocation8 + $0x350] sm:$0xf] }
 0x111   :  { %v12743_v55 = vld [vmem:[#allocation8 + $0x60c] sm:$0xf]  ;;  %v9145_v9 = vor.u32 %v12679_v53, %v9142_v54  ;;  %2920 = vmatpush.bf16.msra.mxu2 %v9689_v62  ;;  %v12796_v53 = vld [vmem:[#allocation8 + $0x7ac] sm:$0xf0]  ;;  %v2657_v54 = vpop.f32.mrf.mxu2 }
 0x112   :  { %v9398_v56 = vld [vmem:[#allocation8 + $0x628] sm:$0xf0]  ;;  %v8764_v62 = vld [vmem:[#allocation8 + $0x110] sm:$0xf] }
 0x113   :  { %v12935_v60 = vld [vmem:[#allocation8 + $0xc0c] sm:$0xf]  ;;  %v9401_v10 = vor.u32 %v12743_v55, %v9398_v56  ;;  %2893 = vmatpush.bf16.msrb.mxu1 %v9145_v9  ;;  %v2576_v55 = vadd.f32 %v2575_v42, %v549_v48  ;;  %v9341_v56 = vor.u32 %v12732_v44, %v9340_v41  ;;  %v9053_v9 = vor.u32 %v12660_v59, %v9052_v58  ;;  %v9020_v48 = vld [vmem:[#allocation8 + $0x310] sm:$0xf] }
 0x114   :  { %v10166_v61 = vld [vmem:[#allocation8 + $0xc28] sm:$0xf0]  ;;  %v9276_v23 = vld [vmem:[#allocation8 + $0x510] sm:$0xf] }
 0x115   :  { %v12879_v63 = vld [vmem:[#allocation8 + $0xa4c] sm:$0xf]  ;;  %v10169_v16 = vor.u32 %v12935_v60, %v10166_v61  ;;  %2907 = vmatpush.bf16.msrb.mxu3 %v9401_v10  ;;  %v9308_v60 = vld [vmem:[#allocation8 + $0x550] sm:$0xf] }
 0x116   :  { %v9942_v8 = vld [vmem:[#allocation8 + $0xa68] sm:$0xf0]  ;;  %2894 = vmatmul.bf16.vlgmr.msrb.gmra.mxu1 %v13832_v19  ;;  %v12724_v61 = vld [vmem:[#allocation8 + $0x56c] sm:$0xf0] }
 0x117   :  { %v12807_v12 = vld [vmem:[#allocation8 + $0x80c] sm:$0xf]  ;;  %v9945_v25 = vor.u32 %v12879_v63, %v9942_v8  ;;  %2949 = vmatpush.bf16.msra.mxu1 %v10169_v16  ;;  %v12588_v63 = vld [vmem:[#allocation8 + $0x12c] sm:$0xf0]  ;;  %v9597_v8 = vor.u32 %v12796_v53, %v9596_v52 }
 0x118   :  { %v9654_v14 = vld [vmem:[#allocation8 + $0x828] sm:$0xf0]  ;;  %2908 = vmatmul.bf16.vlgmr.msrb.gmra.mxu3 %v13834_v20  ;;  %v9564_v10 = vld [vmem:[#allocation8 + $0x750] sm:$0xf]  ;;  %v8765_v16 = vor.u32 %v12588_v63, %v8764_v62  ;;  %v2631_v62 = vpop.f32.mrf.mxu0 }
 0x119   :  { %v12871_v29 = vld [vmem:[#allocation8 + $0xa0c] sm:$0xf]  ;;  %v9657_v31 = vor.u32 %v12807_v12, %v9654_v14  ;;  %2956 = vmatpush.bf16.msra.mxu3 %v8861_v15  ;;  %2934 = vmatpush.bf16.msrb.mxu0 %v9945_v25  ;;  %v12788_v12 = vld [vmem:[#allocation8 + $0x76c] sm:$0xf0]  ;;  %v2590_v14 = vadd.f32 %v2589_v49, %v2576_v55  ;;  %v9309_v15 = vor.u32 %v12724_v61, %v9308_v60  ;;  %v2617_v25 = vpop.f32.mrf.mxu3 }
 0x11a   :  { %v9910_v30 = vld [vmem:[#allocation8 + $0xa28] sm:$0xf0]  ;;  %v12716_v24 = vld [vmem:[#allocation8 + $0x52c] sm:$0xf0] }
 0x11b   :  { %v9913_v43 = vor.u32 %v12871_v29, %v9910_v30  ;;  %2921 = vmatpush.bf16.msra.mxu2 %v9657_v31  ;;  %2970 = vmatpush.bf16.msrb.mxu1 %v9117_v32  ;;  %v8732_v27 = vld [vmem:[#allocation8 + $0xd0] sm:$0xf]  ;;  %v2630_v29 = vadd.f32 %v2629_v26, %v13875_v45  ;;  %v2643_v30 = vpop.f32.mrf.mxu1  ;;  %v9565_v31 = vor.u32 %v12788_v12, %v9564_v10 }
 0x11c   :  { %v12580_v28 = vld [vmem:[#allocation8 + $0xec] sm:$0xf0]  ;;  %v9021_v32 = vor.u32 %v12652_v18, %v9020_v48  ;;  %v9277_v33 = vor.u32 %v12716_v24, %v9276_v23  ;;  %v2604_v39 = vadd.f32 %v13877_v11, %v2590_v14 }
 0x11d   :  { %2957 = vmatpush.bf16.msra.mxu3 %v8829_v38  ;;  %2935 = vmatpush.bf16.msrb.mxu0 %v9913_v43  ;;  %v9532_v36 = vld [vmem:[#allocation8 + $0x710] sm:$0xf]  ;;  %v2659_v38 = vpop.f32.mrf.mxu2  ;;  %v2644_v40 = vadd.f32 %v2643_v30, %v2630_v29  ;;  %v8733_v41 = vor.u32 %v12580_v28, %v8732_v27 }
 0x11e   :  { %2922 = vmatmul.bf16.vlgmr.msra.gmra.mxu2 %v13846_v13  ;;  %v8988_v42 = vld [vmem:[#allocation8 + $0x2d0] sm:$0xf] }
 0x11f   :  { %2984 = vmatpush.bf16.msrb.mxu2 %v9373_v37  ;;  %2971 = vmatpush.bf16.msrb.mxu1 %v9085_v51  ;;  %v12780_v37 = vld [vmem:[#allocation8 + $0x72c] sm:$0xf0]  ;;  %v13887_v49 = vadd.f32 %v2657_v54, %v2644_v40  ;;  %v550_v51 = vperm.slane %v13867_v34, 1 }
 0x120   :  { %2936 = vmatmul.bf16.vlgmr.msrb.gmra.mxu0 %v13848_v22  ;;  %v12644_v43 = vld [vmem:[#allocation8 + $0x2ec] sm:$0xf0] }
 0x121   :  { %2998 = vmatpush.bf16.msra.mxu0 %v9629_v50  ;;  %2958 = vmatpush.bf16.msra.mxu3 %v8797_v57  ;;  %v9244_v44 = vld [vmem:[#allocation8 + $0x4d0] sm:$0xf]  ;;  %v9533_v50 = vor.u32 %v12780_v37, %v9532_v36  ;;  %v8989_v52 = vor.u32 %v12644_v43, %v8988_v42  ;;  %v3364_v40 = vmul.f32 0.2, %v13887_v49  ;;  %vm3348_vm1 = vcmp.gt.f32.partialorder %v13887_v49, 0.0 }
 0x122   :  { %v12708_v46 = vld [vmem:[#allocation8 + $0x4ec] sm:$0xf0] }
 0x123   :  { %2985 = vmatpush.bf16.msrb.mxu2 %v9341_v56  ;;  %2972 = vmatpush.bf16.msrb.mxu1 %v9053_v9  ;;  %v8700_v47 = vld [vmem:[#allocation8 + $0x90] sm:$0xf]  ;;  %v2618_v56 = vadd.f32 %v2617_v25, %v2604_v39  ;;  %v9245_v57 = vor.u32 %v12708_v46, %v9244_v44  ;;  %v2645_v10 = vpop.f32.mrf.mxu1 }
 0x124   :  { %v12572_v45 = vld [vmem:[#allocation8 + $0xac] sm:$0xf0] }
 0x125   :  { %2999 = vmatpush.bf16.msra.mxu0 %v9597_v8  ;;  %2959 = vmatpush.bf16.msra.mxu3 %v8765_v16  ;;  %v9500_v53 = vld [vmem:[#allocation8 + $0x6d0] sm:$0xf]  ;;  %v8701_v58 = vor.u32 %v12572_v45, %v8700_v47  ;;  %v2671_v8 = vpop.f32.mrf.mxu3  ;;  %v2632_v9 = vadd.f32 %v2631_v62, %v2618_v56  ;;  %v2685_v27 = vpop.f32.mrf.mxu2 }
 0x126   :  { %v12772_v11 = vld [vmem:[#allocation8 + $0x6ec] sm:$0xf0]  ;;  %10189 = vmatmul.msk.bf16.vlgmr.msra.gmra.mxu1 %vm2560_vm0, %v13842_v21  ;;  %v2672_v16 = vadd.f32 %v2671_v8, %v550_v51 }
 0x127   :  { %2986 = vmatpush.bf16.msrb.mxu2 %v9309_v15  ;;  %2973 = vmatpush.bf16.msrb.mxu1 %v9021_v32  ;;  %v8956_v55 = vld [vmem:[#allocation8 + $0x290] sm:$0xf]  ;;  %v9501_v12 = vor.u32 %v12772_v11, %v9500_v53  ;;  %v2646_v28 = vadd.f32 %v2645_v10, %v2632_v9  ;;  %v12608_v10 = vld [vmem:[#allocation8 + $0x1d4] sm:$0xf] }
 0x128   :  { %v12636_v59 = vld [vmem:[#allocation8 + $0x2ac] sm:$0xf0] }
 0x129   :  { %3000 = vmatpush.bf16.msra.mxu0 %v9565_v31  ;;  %2960 = vmatpush.bf16.msra.mxu3 %v8733_v41  ;;  %v9212_v60 = vld [vmem:[#allocation8 + $0x490] sm:$0xf]  ;;  %v8957_v18 = vor.u32 %v12636_v59, %v8956_v55  ;;  %v2660_v41 = vadd.f32 %v2659_v38, %v2646_v28 }
 0x12a   :  { %v12700_v61 = vld [vmem:[#allocation8 + $0x4ac] sm:$0xf0] }
 0x12b   :  { %2987 = vmatpush.bf16.msrb.mxu2 %v9277_v33  ;;  %v8668_v63 = vld [vmem:[#allocation8 + $0x50] sm:$0xf]  ;;  %2974 = vmatpush.bf16.msrb.mxu1 %v8989_v52  ;;  %v9213_v23 = vor.u32 %v12700_v61, %v9212_v60  ;;  %v13894_v33 = vadd.f32 %v2685_v27, %v2672_v16  ;;  %vm3356_vm2 = vcmp.gt.f32.partialorder %v2660_v41, 0.0 }
 0x12c   :  { %v12564_v54 = vld [vmem:[#allocation8 + $0x6c] sm:$0xf0] }
 0x12d   :  { %3001 = vmatpush.bf16.msra.mxu0 %v9533_v50  ;;  %v9468_v48 = vld [vmem:[#allocation8 + $0x690] sm:$0xf]  ;;  %2961 = vmatpush.bf16.msra.mxu3 %v8701_v58  ;;  %v8669_v29 = vor.u32 %v12564_v54, %v8668_v63  ;;  %v3372_v50 = vmul.f32 0.2, %v2660_v41  ;;  %v3380_v58 = vsel %vm3348_vm1, %v13887_v49, %v3364_v40  ;;  %v3406_v49 = vld [vmem:[%s14389_s1] sm:$0xff] }
 0x12e   :  { %v12764_v14 = vld [vmem:[#allocation8 + $0x6ac] sm:$0xf0] }
 0x12f   :  { %v8924_v15 = vld [vmem:[#allocation8 + $0x250] sm:$0xf]  ;;  %2988 = vmatpush.bf16.msrb.mxu2 %v9245_v57  ;;  %v9469_v42 = vor.u32 %v12764_v14, %v9468_v48  ;;  %2975 = vmatpush.bf16.msrb.mxu1 %v8957_v18  ;;  %v3388_v59 = vsel %vm3356_vm2, %v2660_v41, %v3372_v50  ;;  %v8862_v14 = vld [vmem:[#allocation8 + $0x1f0] sm:$0xf0]  ;;  %v2673_v50 = vpop.f32.mrf.mxu3 }
 0x130   :  { %v12628_v24 = vld [vmem:[#allocation8 + $0x26c] sm:$0xf0]  ;;  %v13901_v54 = vpack.c.bf16 %v3388_v59, %v3380_v58  ;;  %v9086_v41 = vld [vmem:[#allocation8 + $0x3b0] sm:$0xf0] }
 0x131   :  { %v9180_v25 = vld [vmem:[#allocation8 + $0x450] sm:$0xf]  ;;  %3002 = vmatpush.bf16.msra.mxu0 %v9501_v12  ;;  %v8925_v46 = vor.u32 %v12628_v24, %v8924_v15  ;;  %2962 = vmatpush.bf16.msra.mxu3 %v8669_v29  ;;  %v12672_v15 = vld [vmem:[#allocation8 + $0x3d4] sm:$0xf] }
 0x132   :  { %v12692_v26 = vld [vmem:[#allocation8 + $0x46c] sm:$0xf0] }
 0x133   :  { %v8636_v30 = vld [vmem:[#allocation8 + $0x10] sm:$0xf]  ;;  %2989 = vmatpush.bf16.msrb.mxu2 %v9213_v23  ;;  %v9181_v52 = vor.u32 %v12692_v26, %v9180_v25  ;;  %2976 = vmatpush.bf16.msrb.mxu1 %v8925_v46  ;;  %v9118_v23 = vld [vmem:[#allocation8 + $0x3f0] sm:$0xf0]  ;;  %v13751_v26 = vmov 0  }
 0x134   :  { %v12556_v31 = vld [vmem:[#allocation8 + $0x2c] sm:$0xf0]  ;;  %13540 = vset.pattern.permute.xlu0 %v13751_v26 }
 0x135   :  { %v9884_v32 = vld [vmem:[#allocation8 + $0x9d0] sm:$0xf]  ;;  %v8637_v53 = vor.u32 %v12556_v31, %v8636_v30  ;;  %3003 = vmatpush.bf16.msra.mxu0 %v9469_v42  ;;  %3409 = vperm.xlu0 %13540, %v3406_v49   ;;  %v8865_v30 = vor.u32 %v12608_v10, %v8862_v14  ;;  %v9121_v31 = vor.u32 %v12672_v15, %v9118_v23  ;;  %v8766_v14 = vld [vmem:[#allocation8 + $0x130] sm:$0xf0]  ;;  %v2713_v49 = vpop.f32.mrf.mxu1 }
 0x136   :  { %v12868_v36 = vld [vmem:[#allocation8 + $0x9ec] sm:$0xf0]  ;;  %v12648_v15 = vld [vmem:[#allocation8 + $0x314] sm:$0xf] }
 0x137   :  { %v9436_v37 = vld [vmem:[#allocation8 + $0x650] sm:$0xf]  ;;  %v9885_v55 = vor.u32 %v12868_v36, %v9884_v32  ;;  %2990 = vmatpush.bf16.msrb.mxu2 %v9181_v52  ;;  %2963 = vmatpush.bf16.msra.mxu3 %v8637_v53  ;;  %v12600_v36 = vld [vmem:[#allocation8 + $0x194] sm:$0xf] }
 0x138   :  { %v12756_v39 = vld [vmem:[#allocation8 + $0x66c] sm:$0xf0] }
 0x139   :  { %v8892_v43 = vld [vmem:[#allocation8 + $0x210] sm:$0xf]  ;;  %v9437_v60 = vor.u32 %v12756_v39, %v9436_v37  ;;  %v8830_v37 = vld [vmem:[#allocation8 + $0x1b0] sm:$0xf0] }
 0x13a   :  { %v12620_v44 = vld [vmem:[#allocation8 + $0x22c] sm:$0xf0]  ;;  %2964 = vmatmul.bf16.vlgmr.msra.gmra.mxu3 %v13830_v17  ;;  %v12664_v39 = vld [vmem:[#allocation8 + $0x394] sm:$0xf] }
 0x13b   :  { %v9148_v47 = vld [vmem:[#allocation8 + $0x410] sm:$0xf]  ;;  %v8893_v8 = vor.u32 %v12620_v44, %v8892_v43  ;;  %3012 = vmatpush.bf16.msrb.mxu3 %v9885_v55  ;;  %3004 = vmatpush.bf16.msra.mxu0 %v9437_v60  ;;  %v9089_v52 = vor.u32 %v12664_v39, %v9086_v41  ;;  %v12656_v55 = vld [vmem:[#allocation8 + $0x354] sm:$0xf] }
 0x13c   :  { %v12684_v45 = vld [vmem:[#allocation8 + $0x42c] sm:$0xf0]  ;;  %v8990_v39 = vld [vmem:[#allocation8 + $0x2f0] sm:$0xf0] }
 0x13d   :  { %v10140_v11 = vld [vmem:[#allocation8 + $0xbd0] sm:$0xf]  ;;  %v9149_v12 = vor.u32 %v12684_v45, %v9148_v47  ;;  %2977 = vmatpush.bf16.msrb.mxu1 %v8893_v8  ;;  %v8833_v47 = vor.u32 %v12600_v36, %v8830_v37  ;;  %v12592_v45 = vld [vmem:[#allocation8 + $0x154] sm:$0xf] }
 0x13e   :  { %v12932_v56 = vld [vmem:[#allocation8 + $0xbec] sm:$0xf0]  ;;  %v12640_v36 = vld [vmem:[#allocation8 + $0x2d4] sm:$0xf] }
 0x13f   :  { %v9852_v57 = vld [vmem:[#allocation8 + $0x990] sm:$0xf]  ;;  %v10141_v48 = vor.u32 %v12932_v56, %v10140_v11  ;;  %2991 = vmatpush.bf16.msrb.mxu2 %v9149_v12  ;;  %v8798_v11 = vld [vmem:[#allocation8 + $0x170] sm:$0xf0] }
 0x140   :  { %v12860_v38 = vld [vmem:[#allocation8 + $0x9ac] sm:$0xf0]  ;;  %2978 = vmatmul.bf16.vlgmr.msrb.gmra.mxu1 %v13837_v35  ;;  %v8801_v8 = vor.u32 %v12592_v45, %v8798_v11  ;;  %v8702_v11 = vld [vmem:[#allocation8 + $0xb0] sm:$0xf0] }
 0x141   :  { %v9404_v61 = vld [vmem:[#allocation8 + $0x610] sm:$0xf]  ;;  %v9853_v16 = vor.u32 %v12860_v38, %v9852_v57  ;;  %3026 = vmatpush.bf16.msra.mxu1 %v10141_v48  ;;  %v9054_v38 = vld [vmem:[#allocation8 + $0x370] sm:$0xf0] }
 0x142   :  { %v10172_v62 = vld [vmem:[#allocation8 + $0xc10] sm:$0xf]  ;;  %2992 = vmatmul.bf16.vlgmr.msrb.gmra.mxu2 %v13832_v19  ;;  %v9057_v10 = vor.u32 %v12656_v55, %v9054_v38  ;;  %v12584_v48 = vld [vmem:[#allocation8 + $0x114] sm:$0xf] }
 0x143   :  { %v12940_v63 = vld [vmem:[#allocation8 + $0xc2c] sm:$0xf0]  ;;  %3013 = vmatpush.bf16.msrb.mxu3 %v9853_v16  ;;  %v12632_v55 = vld [vmem:[#allocation8 + $0x294] sm:$0xf] }
 0x144   :  { %v12748_v9 = vld [vmem:[#allocation8 + $0x62c] sm:$0xf0]  ;;  %v10173_v18 = vor.u32 %v12940_v63, %v10172_v62  ;;  %v2699_v62 = vpop.f32.mrf.mxu0  ;;  %v2687_v63 = vpop.f32.mrf.mxu2  ;;  %v8958_v38 = vld [vmem:[#allocation8 + $0x2b0] sm:$0xf0] }
 0x145   :  { %v10108_v24 = vld [vmem:[#allocation8 + $0xb90] sm:$0xf]  ;;  %v9405_v27 = vor.u32 %v12748_v9, %v9404_v61  ;;  %v2700_v9 = vadd.f32 %v2699_v62, %v13894_v33  ;;  %v2674_v33 = vadd.f32 %v2673_v50, %v550_v51  ;;  %v8993_v50 = vor.u32 %v12640_v36, %v8990_v39 }
 0x146   :  { %v12924_v25 = vld [vmem:[#allocation8 + $0xbac] sm:$0xf0]  ;;  %3047 = vmatpush.bf16.msra.mxu2 %v10173_v18  ;;  %v9022_v18 = vld [vmem:[#allocation8 + $0x330] sm:$0xf0] }
 0x147   :  { %v9820_v28 = vld [vmem:[#allocation8 + $0x950] sm:$0xf]  ;;  %v10109_v32 = vor.u32 %v12924_v25, %v10108_v24  ;;  %3005 = vmatpush.bf16.msra.mxu0 %v9405_v27  ;;  %v2714_v25 = vadd.f32 %v2713_v49, %v2700_v9  ;;  %v2688_v51 = vadd.f32 %v2687_v63, %v2674_v33  ;;  %v12736_v9 = vld [vmem:[#allocation8 + $0x5d4] sm:$0xf]  ;;  %v2715_v49 = vpop.f32.mrf.mxu1 }
 0x148   :  { %v12852_v29 = vld [vmem:[#allocation8 + $0x96c] sm:$0xf0]  ;;  %v9374_v63 = vld [vmem:[#allocation8 + $0x5f0] sm:$0xf0] }
 0x149   :  { %v9821_v40 = vor.u32 %v12852_v29, %v9820_v28  ;;  %v10076_v42 = vld [vmem:[#allocation8 + $0xb50] sm:$0xf]  ;;  %3027 = vmatpush.bf16.msra.mxu1 %v10109_v32  ;;  %v8769_v28 = vor.u32 %v12584_v48, %v8766_v14  ;;  %v9025_v29 = vor.u32 %v12648_v15, %v9022_v18  ;;  %v8734_v32 = vld [vmem:[#allocation8 + $0xf0] sm:$0xf0] }
 0x14a   :  { %v12916_v43 = vld [vmem:[#allocation8 + $0xb6c] sm:$0xf0]  ;;  %3068 = vmatpush.bf16.msrb.mxu2 %v9121_v31  ;;  %3006 = vmatmul.bf16.vlgmr.msra.gmra.mxu0 %v13834_v20  ;;  %v12576_v31 = vld [vmem:[#allocation8 + $0xd4] sm:$0xf] }
 0x14b   :  { %v9788_v44 = vld [vmem:[#allocation8 + $0x910] sm:$0xf]  ;;  %3054 = vmatpush.bf16.msrb.mxu0 %v8865_v30  ;;  %v10077_v53 = vor.u32 %v12916_v43, %v10076_v42  ;;  %3014 = vmatpush.bf16.msrb.mxu3 %v9821_v40  ;;  %v2727_v42 = vpop.f32.mrf.mxu3  ;;  %v8737_v45 = vor.u32 %v12576_v31, %v8734_v32  ;;  %v12560_v14 = vld [vmem:[#allocation8 + $0x54] sm:$0xf] }
 0x14c   :  { %v12844_v46 = vld [vmem:[#allocation8 + $0x92c] sm:$0xf0]  ;;  %v8670_v15 = vld [vmem:[#allocation8 + $0x70] sm:$0xf0] }
 0x14d   :  { %v3407_v56 = vld [vmem:[%s14389_s1 + $0x8] sm:$0xff]  ;;  %v9789_v57 = vor.u32 %v12844_v46, %v9788_v44  ;;  %3028 = vmatpush.bf16.msra.mxu1 %v10077_v53  ;;  %v2728_v46 = vadd.f32 %v2727_v42, %v2714_v25 }
 0x14e   :  { %v10044_v58 = vld [vmem:[#allocation8 + $0xb10] sm:$0xf]  ;;  %3412 = vperm.xlu0 %13540, %v3407_v56   ;;  %3069 = vmatpush.bf16.msrb.mxu2 %v9089_v52  ;;  %v12568_v53 = vld [vmem:[#allocation8 + $0x94] sm:$0xf]  ;;  %v2741_v56 = vpop.f32.mrf.mxu2 }
 0x14f   :  { %v12908_v59 = vld [vmem:[#allocation8 + $0xb2c] sm:$0xf0]  ;;  %3055 = vmatpush.bf16.msrb.mxu0 %v8833_v47  ;;  %3015 = vmatpush.bf16.msrb.mxu3 %v9789_v57  ;;  %v2701_v47 = vpop.f32.mrf.mxu0  ;;  %v12624_v18 = vld [vmem:[#allocation8 + $0x254] sm:$0xf] }
 0x150   :  { %v9756_v60 = vld [vmem:[#allocation8 + $0x8d0] sm:$0xf]  ;;  %v10045_v12 = vor.u32 %v12908_v59, %v10044_v58  ;;  %v12728_v31 = vld [vmem:[#allocation8 + $0x594] sm:$0xf] }
 0x151   :  { %v12836_v61 = vld [vmem:[#allocation8 + $0x8ec] sm:$0xf0]  ;;  %v9342_v32 = vld [vmem:[#allocation8 + $0x5b0] sm:$0xf0] }
 0x152   :  { %v9757_v16 = vor.u32 %v12836_v61, %v9756_v60  ;;  %v10012_v23 = vld [vmem:[#allocation8 + $0xad0] sm:$0xf]  ;;  %3070 = vmatpush.bf16.msrb.mxu2 %v9057_v10  ;;  %3029 = vmatpush.bf16.msra.mxu1 %v10045_v12  ;;  %v2742_v60 = vadd.f32 %v2741_v56, %v2728_v46  ;;  %v2702_v10 = vadd.f32 %v2701_v47, %v2688_v51  ;;  %v12616_v42 = vld [vmem:[#allocation8 + $0x214] sm:$0xf] }
 0x153   :  { %v12900_v24 = vld [vmem:[#allocation8 + $0xaec] sm:$0xf0]  ;;  %3056 = vmatpush.bf16.msrb.mxu0 %v8801_v8  ;;  %v8705_v8 = vor.u32 %v12568_v53, %v8702_v11  ;;  %10190 = vmatmul.msk.bf16.vlgmr.msra.gmra.mxu2 %vm2560_vm0, %v13842_v21  ;;  %v8961_v12 = vor.u32 %v12632_v55, %v8958_v38  ;;  %v12864_v46 = vld [vmem:[#allocation8 + $0x9d4] sm:$0xf] }
 0x154   :  { %v9724_v26 = vld [vmem:[#allocation8 + $0x890] sm:$0xf]  ;;  %v10013_v30 = vor.u32 %v12900_v24, %v10012_v23  ;;  %3016 = vmatpush.bf16.msrb.mxu3 %v9757_v16  ;;  %v8926_v23 = vld [vmem:[#allocation8 + $0x270] sm:$0xf0]  ;;  %v9377_v24 = vor.u32 %v12736_v9, %v9374_v63  ;;  %v2716_v36 = vadd.f32 %v2715_v49, %v2702_v10 }
 0x155   :  { %v12828_v27 = vld [vmem:[#allocation8 + $0x8ac] sm:$0xf0]  ;;  %v8929_v39 = vor.u32 %v12624_v18, %v8926_v23  ;;  %v9886_v47 = vld [vmem:[#allocation8 + $0x9f0] sm:$0xf0] }
 0x156   :  { %v9725_v37 = vor.u32 %v12828_v27, %v9724_v26  ;;  %v9980_v40 = vld [vmem:[#allocation8 + $0xa90] sm:$0xf]  ;;  %3071 = vmatpush.bf16.msrb.mxu2 %v9025_v29  ;;  %3030 = vmatpush.bf16.msra.mxu1 %v10013_v30  ;;  %v12800_v27 = vld [vmem:[#allocation8 + $0x7d4] sm:$0xf]  ;;  %v8673_v29 = vor.u32 %v12560_v14, %v8670_v15  ;;  %v2743_v55 = vpop.f32.mrf.mxu2 }
 0x157   :  { %v12892_v41 = vld [vmem:[#allocation8 + $0xaac] sm:$0xf0]  ;;  %3057 = vmatpush.bf16.msrb.mxu0 %v8769_v28  ;;  %v2729_v28 = vpop.f32.mrf.mxu3  ;;  %v2755_v33 = vpop.f32.mrf.mxu0  ;;  %v9630_v30 = vld [vmem:[#allocation8 + $0x7f0] sm:$0xf0] }
 0x158   :  { %v9692_v43 = vld [vmem:[#allocation8 + $0x850] sm:$0xf]  ;;  %v9981_v52 = vor.u32 %v12892_v41, %v9980_v40  ;;  %3017 = vmatpush.bf16.msrb.mxu3 %v9725_v37  ;;  %v13918_v37 = vadd.f32 %v2755_v33, %v2742_v60  ;;  %v12552_v40 = vld [vmem:[#allocation8 + $0x14] sm:$0xf]  ;;  %v9633_v51 = vor.u32 %v12800_v27, %v9630_v30  ;;  %v9889_v60 = vor.u32 %v12864_v46, %v9886_v47 }
 0x159   :  { %v12820_v44 = vld [vmem:[#allocation8 + $0x86c] sm:$0xf0]  ;;  %v8638_v41 = vld [vmem:[#allocation8 + $0x30] sm:$0xf0] }
 0x15a   :  { %v9693_v57 = vor.u32 %v12820_v44, %v9692_v43  ;;  %v9948_v58 = vld [vmem:[#allocation8 + $0xa50] sm:$0xf]  ;;  %3072 = vmatpush.bf16.msrb.mxu2 %v8993_v50  ;;  %3031 = vmatpush.bf16.msra.mxu1 %v9981_v52  ;;  %v8894_v44 = vld [vmem:[#allocation8 + $0x230] sm:$0xf0]  ;;  %v9345_v50 = vor.u32 %v12728_v31, %v9342_v32  ;;  %v8641_v56 = vor.u32 %v12552_v40, %v8638_v41  ;;  %v3365_v23 = vmul.f32 0.2, %v13918_v37 }
 0x15b   :  { %v12884_v59 = vld [vmem:[#allocation8 + $0xa6c] sm:$0xf0]  ;;  %3058 = vmatpush.bf16.msrb.mxu0 %v8737_v45  ;;  %v2730_v45 = vadd.f32 %v2729_v28, %v2716_v36  ;;  %v12928_v52 = vld [vmem:[#allocation8 + $0xbd4] sm:$0xf]  ;;  %vm3349_vm3 = vcmp.gt.f32.partialorder %v13918_v37, 0.0 }
 0x15c   :  { %v9660_v61 = vld [vmem:[#allocation8 + $0x810] sm:$0xf]  ;;  %v9949_v48 = vor.u32 %v12884_v59, %v9948_v58  ;;  %3018 = vmatpush.bf16.msrb.mxu3 %v9693_v57  ;;  %v10142_v53 = vld [vmem:[#allocation8 + $0xbf0] sm:$0xf0]  ;;  %v8897_v59 = vor.u32 %v12616_v42, %v8894_v44  ;;  %v3381_v42 = vsel %vm3349_vm3, %v13918_v37, %v3365_v23 }
 0x15d   :  { %v12812_v62 = vld [vmem:[#allocation8 + $0x82c] sm:$0xf0]  ;;  %v12792_v11 = vld [vmem:[#allocation8 + $0x794] sm:$0xf]  ;;  %v2744_v9 = vadd.f32 %v2743_v55, %v2730_v45 }
 0x15e   :  { %v9661_v16 = vor.u32 %v12812_v62, %v9660_v61  ;;  %v9916_v25 = vld [vmem:[#allocation8 + $0xa10] sm:$0xf]  ;;  %3073 = vmatpush.bf16.msrb.mxu2 %v8961_v12  ;;  %3032 = vmatpush.bf16.msra.mxu1 %v9949_v48  ;;  %v9598_v57 = vld [vmem:[#allocation8 + $0x7b0] sm:$0xf0]  ;;  %v10145_v61 = vor.u32 %v12928_v52, %v10142_v53 }
 0x15f   :  { %v12876_v26 = vld [vmem:[#allocation8 + $0xa2c] sm:$0xf0]  ;;  %3059 = vmatpush.bf16.msrb.mxu0 %v8705_v8  ;;  %v12720_v38 = vld [vmem:[#allocation8 + $0x554] sm:$0xf]  ;;  %v9601_v63 = vor.u32 %v12792_v11, %v9598_v57  ;;  %v2757_v15 = vpop.f32.mrf.mxu0  ;;  %v2783_v23 = vpop.f32.mrf.mxu3 }
 0x160   :  { %3019 = vmatpush.bf16.msrb.mxu3 %v9661_v16  ;;  %v9917_v43 = vor.u32 %v12876_v26, %v9916_v25  ;;  %v9310_v58 = vld [vmem:[#allocation8 + $0x570] sm:$0xf0] }
 0x161   :  { %v12856_v62 = vld [vmem:[#allocation8 + $0x994] sm:$0xf]  ;;  %v9313_v10 = vor.u32 %v12720_v38, %v9310_v58 }
 0x162   :  { %3074 = vmatpush.bf16.msrb.mxu2 %v8929_v39  ;;  %3033 = vmatpush.bf16.msra.mxu1 %v9917_v43  ;;  %v9854_v8 = vld [vmem:[#allocation8 + $0x9b0] sm:$0xf0] }
 0x163   :  { %3060 = vmatpush.bf16.msrb.mxu0 %v8673_v29  ;;  %3020 = vmatmul.bf16.vlgmr.msrb.gmra.mxu3 %v13846_v13  ;;  %v12920_v12 = vld [vmem:[#allocation8 + $0xb94] sm:$0xf]  ;;  %v9857_v25 = vor.u32 %v12856_v62, %v9854_v8 }
 0x164   :  { %3082 = vmatpush.bf16.msra.mxu3 %v9377_v24  ;;  %v10110_v48 = vld [vmem:[#allocation8 + $0xbb0] sm:$0xf0]  ;;  %v2758_v24 = vadd.f32 %v2757_v15, %v2744_v9 }
 0x165   :  { %v12784_v14 = vld [vmem:[#allocation8 + $0x754] sm:$0xf]  ;;  %3034 = vmatmul.bf16.vlgmr.msra.gmra.mxu1 %v13848_v22  ;;  %v10113_v28 = vor.u32 %v12920_v12, %v10110_v48 }
 0x166   :  { %3096 = vmatpush.bf16.msrb.mxu1 %v9633_v51  ;;  %v9566_v49 = vld [vmem:[#allocation8 + $0x770] sm:$0xf0]  ;;  %3075 = vmatpush.bf16.msrb.mxu2 %v8897_v59  ;;  %vm3357_vm4 = vcmp.gt.f32.partialorder %v2758_v24, 0.0  ;;  %v3373_v30 = vmul.f32 0.2, %v2758_v24  ;;  %v2769_v59 = vpop.f32.mrf.mxu1 }
 0x167   :  { %3061 = vmatpush.bf16.msrb.mxu0 %v8641_v56  ;;  %v12712_v16 = vld [vmem:[#allocation8 + $0x514] sm:$0xf]  ;;  %v9569_v31 = vor.u32 %v12784_v14, %v9566_v49 }
 0x168   :  { %3083 = vmatpush.bf16.msra.mxu3 %v9345_v50  ;;  %v9278_v18 = vld [vmem:[#allocation8 + $0x530] sm:$0xf0]  ;;  %v3389_v43 = vsel %vm3357_vm4, %v2758_v24, %v3373_v30  ;;  %v551_v50 = vperm.slane %v13867_v34, 2 }
 0x169   :  { %v12848_v26 = vld [vmem:[#allocation8 + $0x954] sm:$0xf]  ;;  %v9281_v32 = vor.u32 %v12712_v16, %v9278_v18  ;;  %3076 = vmatmul.bf16.vlgmr.msrb.gmra.mxu2 %v13837_v35  ;;  %v13929_v46 = vpack.c.bf16 %v3389_v43, %v3381_v42 }
 0x16a   :  { %v9822_v27 = vld [vmem:[#allocation8 + $0x970] sm:$0xf0]  ;;  %3124 = vmatpush.bf16.msra.mxu2 %v10145_v61  ;;  %3097 = vmatpush.bf16.msrb.mxu1 %v9601_v63  ;;  %v2770_v9 = vadd.f32 %v2769_v59, %v551_v50 }
 0x16b   :  { %3110 = vmatpush.bf16.msra.mxu0 %v9889_v60  ;;  %v12912_v33 = vld [vmem:[#allocation8 + $0xb54] sm:$0xf]  ;;  %v9825_v44 = vor.u32 %v12848_v26, %v9822_v27  ;;  %v2797_v60 = vpop.f32.mrf.mxu0 }
 0x16c   :  { %v10078_v29 = vld [vmem:[#allocation8 + $0xb70] sm:$0xf0]  ;;  %3084 = vmatpush.bf16.msra.mxu3 %v9313_v10  ;;  %3062 = vmatmul.bf16.vlgmr.msrb.gmra.mxu0 %v13830_v17  ;;  %v2784_v27 = vadd.f32 %v2783_v23, %v2770_v9  ;;  %v8868_v9 = vld [vmem:[#allocation8 + $0x1d8] sm:$0xf] }
 0x16d   :  { %v12776_v36 = vld [vmem:[#allocation8 + $0x714] sm:$0xf]  ;;  %v10081_v47 = vor.u32 %v12912_v33, %v10078_v29  ;;  %v9380_v23 = vld [vmem:[#allocation8 + $0x5d8] sm:$0xf] }
 0x16e   :  { %v9534_v39 = vld [vmem:[#allocation8 + $0x730] sm:$0xf0]  ;;  %3125 = vmatpush.bf16.msra.mxu2 %v10113_v28  ;;  %3098 = vmatpush.bf16.msrb.mxu1 %v9569_v31 }
 0x16f   :  { %v12704_v40 = vld [vmem:[#allocation8 + $0x4d4] sm:$0xf]  ;;  %3111 = vmatpush.bf16.msra.mxu0 %v9857_v25  ;;  %v9537_v52 = vor.u32 %v12776_v36, %v9534_v39 }
 0x170   :  { %v9246_v41 = vld [vmem:[#allocation8 + $0x4f0] sm:$0xf0]  ;;  %3085 = vmatpush.bf16.msra.mxu3 %v9281_v32 }
 0x171   :  { %v12840_v45 = vld [vmem:[#allocation8 + $0x914] sm:$0xf]  ;;  %v9249_v53 = vor.u32 %v12704_v40, %v9246_v41  ;;  %v2798_v40 = vadd.f32 %v2797_v60, %v2784_v27  ;;  %v2811_v41 = vpop.f32.mrf.mxu2  ;;  %v12805_v27 = vld [vmem:[#allocation8 + $0x7f4] sm:$0xf0] }
 0x172   :  { %v9790_v51 = vld [vmem:[#allocation8 + $0x930] sm:$0xf0]  ;;  %3126 = vmatpush.bf16.msra.mxu2 %v10081_v47  ;;  %3099 = vmatpush.bf16.msrb.mxu1 %v9537_v52  ;;  %v2771_v47 = vpop.f32.mrf.mxu1 }
 0x173   :  { %v12904_v11 = vld [vmem:[#allocation8 + $0xb14] sm:$0xf]  ;;  %3112 = vmatpush.bf16.msra.mxu0 %v9825_v44  ;;  %v9793_v58 = vor.u32 %v12840_v45, %v9790_v51  ;;  %v2799_v45 = vpop.f32.mrf.mxu0 }
 0x174   :  { %v10046_v55 = vld [vmem:[#allocation8 + $0xb30] sm:$0xf0]  ;;  %3086 = vmatpush.bf16.msra.mxu3 %v9249_v53 }
 0x175   :  { %v12768_v56 = vld [vmem:[#allocation8 + $0x6d4] sm:$0xf]  ;;  %v10049_v61 = vor.u32 %v12904_v11, %v10046_v55  ;;  %v2772_v11 = vadd.f32 %v2771_v47, %v551_v50  ;;  %v13932_v55 = vadd.f32 %v2811_v41, %v2798_v40  ;;  %v9348_v47 = vld [vmem:[#allocation8 + $0x598] sm:$0xf] }
 0x176   :  { %v9502_v57 = vld [vmem:[#allocation8 + $0x6f0] sm:$0xf0] }
 0x177   :  { %v12696_v37 = vld [vmem:[#allocation8 + $0x494] sm:$0xf]  ;;  %v9505_v63 = vor.u32 %v12768_v56, %v9502_v57  ;;  %3113 = vmatpush.bf16.msra.mxu0 %v9793_v58  ;;  %3127 = vmatpush.bf16.msra.mxu2 %v10049_v61  ;;  %v9124_v61 = vld [vmem:[#allocation8 + $0x3d8] sm:$0xf] }
 0x178   :  { %v9214_v38 = vld [vmem:[#allocation8 + $0x4b0] sm:$0xf0] }
 0x179   :  { %v12832_v62 = vld [vmem:[#allocation8 + $0x8d4] sm:$0xf]  ;;  %v9217_v10 = vor.u32 %v12696_v37, %v9214_v38  ;;  %3100 = vmatpush.bf16.msrb.mxu1 %v9505_v63  ;;  %v12613_v63 = vld [vmem:[#allocation8 + $0x1f4] sm:$0xf0] }
 0x17a   :  { %v9758_v8 = vld [vmem:[#allocation8 + $0x8f0] sm:$0xf0] }
 0x17b   :  { %v12896_v12 = vld [vmem:[#allocation8 + $0xad4] sm:$0xf]  ;;  %v9761_v18 = vor.u32 %v12832_v62, %v9758_v8  ;;  %3087 = vmatpush.bf16.msra.mxu3 %v9217_v10  ;;  %v12677_v62 = vld [vmem:[#allocation8 + $0x3f4] sm:$0xf0] }
 0x17c   :  { %v10014_v48 = vld [vmem:[#allocation8 + $0xaf0] sm:$0xf0] }
 0x17d   :  { %v12760_v14 = vld [vmem:[#allocation8 + $0x694] sm:$0xf]  ;;  %v10017_v24 = vor.u32 %v12896_v12, %v10014_v48  ;;  %3114 = vmatpush.bf16.msra.mxu0 %v9761_v18  ;;  %v2785_v12 = vpop.f32.mrf.mxu3  ;;  %v9125_v18 = vor.u32 %v12677_v62, %v9124_v61  ;;  %v12725_v61 = vld [vmem:[#allocation8 + $0x574] sm:$0xf0] }
 0x17e   :  { %v9470_v15 = vld [vmem:[#allocation8 + $0x6b0] sm:$0xf0]  ;;  %v9572_v62 = vld [vmem:[#allocation8 + $0x758] sm:$0xf] }
 0x17f   :  { %v12688_v49 = vld [vmem:[#allocation8 + $0x454] sm:$0xf]  ;;  %v9473_v28 = vor.u32 %v12760_v14, %v9470_v15  ;;  %3128 = vmatpush.bf16.msra.mxu2 %v10017_v24  ;;  %v12741_v24 = vld [vmem:[#allocation8 + $0x5f4] sm:$0xf0] }
 0x180   :  { %v9182_v16 = vld [vmem:[#allocation8 + $0x470] sm:$0xf0]  ;;  %v9381_v41 = vor.u32 %v12741_v24, %v9380_v23  ;;  %v9540_v23 = vld [vmem:[#allocation8 + $0x718] sm:$0xf]  ;;  %v2825_v24 = vpop.f32.mrf.mxu1 }
 0x181   :  { %v12824_v25 = vld [vmem:[#allocation8 + $0x894] sm:$0xf]  ;;  %v9185_v33 = vor.u32 %v12688_v49, %v9182_v16  ;;  %3101 = vmatpush.bf16.msrb.mxu1 %v9473_v28  ;;  %v2786_v49 = vadd.f32 %v2785_v12, %v2772_v11  ;;  %v9092_v28 = vld [vmem:[#allocation8 + $0x398] sm:$0xf] }
 0x182   :  { %v9726_v26 = vld [vmem:[#allocation8 + $0x8b0] sm:$0xf0]  ;;  %v9060_v11 = vld [vmem:[#allocation8 + $0x358] sm:$0xf] }
 0x183   :  { %v12888_v29 = vld [vmem:[#allocation8 + $0xa94] sm:$0xf]  ;;  %v9729_v42 = vor.u32 %v12824_v25, %v9726_v26  ;;  %3088 = vmatpush.bf16.msra.mxu3 %v9185_v33  ;;  %v9636_v25 = vld [vmem:[#allocation8 + $0x7d8] sm:$0xf]  ;;  %v8869_v26 = vor.u32 %v12613_v63, %v8868_v9 }
 0x184   :  { %v9982_v30 = vld [vmem:[#allocation8 + $0xab0] sm:$0xf0]  ;;  %v12669_v33 = vld [vmem:[#allocation8 + $0x3b4] sm:$0xf0] }
 0x185   :  { %v12752_v31 = vld [vmem:[#allocation8 + $0x654] sm:$0xf]  ;;  %v9985_v51 = vor.u32 %v12888_v29, %v9982_v30  ;;  %3115 = vmatpush.bf16.msra.mxu0 %v9729_v42  ;;  %v2800_v29 = vadd.f32 %v2799_v45, %v2786_v49  ;;  %v2813_v30 = vpop.f32.mrf.mxu2  ;;  %v12733_v45 = vld [vmem:[#allocation8 + $0x5b4] sm:$0xf0] }
 0x186   :  { %v9438_v32 = vld [vmem:[#allocation8 + $0x670] sm:$0xf0]  ;;  %v12789_v9 = vld [vmem:[#allocation8 + $0x774] sm:$0xf0] }
 0x187   :  { %v12680_v36 = vld [vmem:[#allocation8 + $0x414] sm:$0xf]  ;;  %v9441_v56 = vor.u32 %v12752_v31, %v9438_v32  ;;  %3129 = vmatpush.bf16.msra.mxu2 %v9985_v51  ;;  %v8836_v32 = vld [vmem:[#allocation8 + $0x198] sm:$0xf]  ;;  %v13937_v42 = vadd.f32 %v2813_v30, %v2800_v29 }
 0x188   :  { %v9150_v39 = vld [vmem:[#allocation8 + $0x430] sm:$0xf0]  ;;  %v9604_v51 = vld [vmem:[#allocation8 + $0x798] sm:$0xf] }
 0x189   :  { %v12936_v43 = vld [vmem:[#allocation8 + $0xc14] sm:$0xf]  ;;  %v9153_v57 = vor.u32 %v12680_v36, %v9150_v39  ;;  %3102 = vmatpush.bf16.msrb.mxu1 %v9441_v56  ;;  %v12605_v36 = vld [vmem:[#allocation8 + $0x1b4] sm:$0xf0]  ;;  %v13934_v39 = vpop.f32.mrf.mxu0 }
 0x18a   :  { %v10174_v44 = vld [vmem:[#allocation8 + $0xc30] sm:$0xf0]  ;;  %v12661_v56 = vld [vmem:[#allocation8 + $0x374] sm:$0xf0] }
 0x18b   :  { %v12816_v52 = vld [vmem:[#allocation8 + $0x854] sm:$0xf]  ;;  %v10177_v60 = vor.u32 %v12936_v43, %v10174_v44  ;;  %3089 = vmatpush.bf16.msra.mxu3 %v9153_v57  ;;  %v9637_v43 = vor.u32 %v12805_v27, %v9636_v25  ;;  %v9093_v44 = vor.u32 %v12669_v33, %v9092_v28  ;;  %v8804_v57 = vld [vmem:[#allocation8 + $0x158] sm:$0xf]  ;;  %v2826_v33 = vadd.f32 %v2825_v24, %v13932_v55 }
 0x18c   :  { %v9694_v53 = vld [vmem:[#allocation8 + $0x870] sm:$0xf0]  ;;  %v9028_v63 = vld [vmem:[#allocation8 + $0x318] sm:$0xf]  ;;  %v552_v55 = vperm.slane %v13867_v34, 3 }
 0x18d   :  { %v12880_v37 = vld [vmem:[#allocation8 + $0xa54] sm:$0xf]  ;;  %v9697_v8 = vor.u32 %v12816_v52, %v9694_v53  ;;  %v8837_v52 = vor.u32 %v12605_v36, %v8836_v32  ;;  %v12797_v53 = vld [vmem:[#allocation8 + $0x7b4] sm:$0xf0] }
 0x18e   :  { %v9950_v38 = vld [vmem:[#allocation8 + $0xa70] sm:$0xf0]  ;;  %3090 = vmatmul.bf16.vlgmr.msra.gmra.mxu3 %v13832_v19  ;;  %v8772_v12 = vld [vmem:[#allocation8 + $0x118] sm:$0xf] }
 0x18f   :  { %v12744_v58 = vld [vmem:[#allocation8 + $0x614] sm:$0xf]  ;;  %v9953_v50 = vor.u32 %v12880_v37, %v9950_v38  ;;  %3145 = vmatpush.bf16.msrb.mxu3 %v10177_v60  ;;  %3116 = vmatpush.bf16.msra.mxu0 %v9697_v8  ;;  %v12597_v37 = vld [vmem:[#allocation8 + $0x174] sm:$0xf0]  ;;  %v9349_v38 = vor.u32 %v12733_v45, %v9348_v47 }
 0x190   :  { %v9406_v59 = vld [vmem:[#allocation8 + $0x630] sm:$0xf0]  ;;  %v9316_v60 = vld [vmem:[#allocation8 + $0x558] sm:$0xf]  ;;  %v8805_v8 = vor.u32 %v12597_v37, %v8804_v57 }
 0x191   :  { %v12808_v10 = vld [vmem:[#allocation8 + $0x814] sm:$0xf]  ;;  %v9409_v16 = vor.u32 %v12744_v58, %v9406_v59  ;;  %3130 = vmatpush.bf16.msra.mxu2 %v9953_v50  ;;  %v9605_v58 = vor.u32 %v12797_v53, %v9604_v51  ;;  %v9061_v59 = vor.u32 %v12661_v56, %v9060_v11  ;;  %v12589_v50 = vld [vmem:[#allocation8 + $0x134] sm:$0xf0] }
 0x192   :  { %v9662_v48 = vld [vmem:[#allocation8 + $0x830] sm:$0xf0]  ;;  %v8773_v25 = vor.u32 %v12589_v50, %v8772_v12  ;;  %v8996_v27 = vld [vmem:[#allocation8 + $0x2d8] sm:$0xf]  ;;  %v2867_v50 = vpop.f32.mrf.mxu2 }
 0x193   :  { %v12872_v14 = vld [vmem:[#allocation8 + $0xa14] sm:$0xf]  ;;  %v9665_v31 = vor.u32 %v12808_v10, %v9662_v48  ;;  %3103 = vmatpush.bf16.msrb.mxu1 %v9409_v16  ;;  %3166 = vmatpush.bf16.msra.mxu3 %v9125_v18  ;;  %v12653_v10 = vld [vmem:[#allocation8 + $0x334] sm:$0xf0]  ;;  %v13942_v48 = vpop.f32.mrf.mxu0 }
 0x194   :  { %v9918_v15 = vld [vmem:[#allocation8 + $0xa30] sm:$0xf0]  ;;  %v9029_v49 = vor.u32 %v12653_v10, %v9028_v63  ;;  %v9284_v16 = vld [vmem:[#allocation8 + $0x518] sm:$0xf] }
 0x195   :  { %v9921_v40 = vor.u32 %v12872_v14, %v9918_v15  ;;  %3117 = vmatpush.bf16.msra.mxu0 %v9665_v31  ;;  %v9317_v14 = vor.u32 %v12725_v61, %v9316_v60  ;;  %v9573_v15 = vor.u32 %v12789_v9, %v9572_v62  ;;  %v12717_v18 = vld [vmem:[#allocation8 + $0x534] sm:$0xf0] }
 0x196   :  { %3104 = vmatmul.bf16.vlgmr.msrb.gmra.mxu1 %v13834_v20  ;;  %v12645_v28 = vld [vmem:[#allocation8 + $0x2f4] sm:$0xf0]  ;;  %v9285_v31 = vor.u32 %v12717_v18, %v9284_v16  ;;  %v2868_v16 = vadd.f32 %v2867_v50, %v552_v55 }
 0x197   :  { %3152 = vmatpush.bf16.msra.mxu1 %v8869_v26  ;;  %3131 = vmatpush.bf16.msra.mxu2 %v9921_v40  ;;  %v12781_v26 = vld [vmem:[#allocation8 + $0x734] sm:$0xf0]  ;;  %v8997_v36 = vor.u32 %v12645_v28, %v8996_v27 }
 0x198   :  { %3167 = vmatpush.bf16.msra.mxu3 %v9093_v44  ;;  %3118 = vmatmul.bf16.vlgmr.msra.gmra.mxu0 %v13846_v13  ;;  %v8740_v29 = vld [vmem:[#allocation8 + $0xd8] sm:$0xf]  ;;  %v9541_v32 = vor.u32 %v12781_v26, %v9540_v23 }
 0x199   :  { %3180 = vmatpush.bf16.msrb.mxu0 %v9381_v41  ;;  %v12581_v30 = vld [vmem:[#allocation8 + $0xf4] sm:$0xf0] }
 0x19a   :  { %3132 = vmatmul.bf16.vlgmr.msra.gmra.mxu2 %v13848_v22  ;;  %v9252_v40 = vld [vmem:[#allocation8 + $0x4d8] sm:$0xf]  ;;  %v8741_v44 = vor.u32 %v12581_v30, %v8740_v29 }
 0x19b   :  { %3194 = vmatpush.bf16.msrb.mxu2 %v9637_v43  ;;  %3153 = vmatpush.bf16.msra.mxu1 %v8837_v52  ;;  %v12709_v41 = vld [vmem:[#allocation8 + $0x4f4] sm:$0xf0]  ;;  %v2839_v52 = vpop.f32.mrf.mxu3  ;;  %v2881_v61 = vpop.f32.mrf.mxu0 }
 0x19c   :  { %3168 = vmatpush.bf16.msra.mxu3 %v9061_v59  ;;  %v9508_v43 = vld [vmem:[#allocation8 + $0x6d8] sm:$0xf]  ;;  %v2840_v56 = vadd.f32 %v2839_v52, %v2826_v33  ;;  %v9253_v57 = vor.u32 %v12709_v41, %v9252_v40  ;;  %v13954_v29 = vadd.f32 %v2881_v61, %v2868_v16 }
 0x19d   :  { %3181 = vmatpush.bf16.msrb.mxu0 %v9349_v38  ;;  %v12773_v47 = vld [vmem:[#allocation8 + $0x6f4] sm:$0xf0] }
 0x19e   :  { %v8964_v45 = vld [vmem:[#allocation8 + $0x298] sm:$0xf]  ;;  %10191 = vmatmul.msk.bf16.vlgmr.msrb.gmra.mxu3 %vm2560_vm0, %v13842_v21  ;;  %v9509_v37 = vor.u32 %v12773_v47, %v9508_v43  ;;  %v13949_v62 = vadd.f32 %v13934_v39, %v2840_v56 }
 0x19f   :  { %3195 = vmatpush.bf16.msrb.mxu2 %v9605_v58  ;;  %3154 = vmatpush.bf16.msra.mxu1 %v8805_v8  ;;  %v12637_v51 = vld [vmem:[#allocation8 + $0x2b4] sm:$0xf0]  ;;  %v2827_v8 = vpop.f32.mrf.mxu1 }
 0x1a0   :  { %3169 = vmatpush.bf16.msra.mxu3 %v9029_v49  ;;  %v8708_v53 = vld [vmem:[#allocation8 + $0x98] sm:$0xf]  ;;  %v8965_v38 = vor.u32 %v12637_v51, %v8964_v45  ;;  %vm3350_vm5 = vcmp.gt.f32.partialorder %v13949_v62, 0.0 }
 0x1a1   :  { %3182 = vmatpush.bf16.msrb.mxu0 %v9317_v14  ;;  %v12573_v11 = vld [vmem:[#allocation8 + $0xb4] sm:$0xf0]  ;;  %v2828_v14 = vadd.f32 %v2827_v8, %v13937_v42 }
 0x1a2   :  { %v9220_v58 = vld [vmem:[#allocation8 + $0x498] sm:$0xf]  ;;  %v8709_v9 = vor.u32 %v12573_v11, %v8708_v53 }
 0x1a3   :  { %3196 = vmatpush.bf16.msrb.mxu2 %v9573_v15  ;;  %3155 = vmatpush.bf16.msra.mxu1 %v8773_v25  ;;  %v12701_v59 = vld [vmem:[#allocation8 + $0x4b4] sm:$0xf0] }
 0x1a4   :  { %3170 = vmatpush.bf16.msra.mxu3 %v8997_v36  ;;  %v9476_v60 = vld [vmem:[#allocation8 + $0x698] sm:$0xf]  ;;  %v9221_v18 = vor.u32 %v12701_v59, %v9220_v58  ;;  %v2841_v36 = vpop.f32.mrf.mxu3 }
 0x1a5   :  { %3183 = vmatpush.bf16.msrb.mxu0 %v9285_v31  ;;  %v12765_v63 = vld [vmem:[#allocation8 + $0x6b4] sm:$0xf0] }
 0x1a6   :  { %v8932_v10 = vld [vmem:[#allocation8 + $0x258] sm:$0xf]  ;;  %v9477_v25 = vor.u32 %v12765_v63, %v9476_v60  ;;  %v2869_v63 = vpop.f32.mrf.mxu2 }
 0x1a7   :  { %3197 = vmatpush.bf16.msrb.mxu2 %v9541_v32  ;;  %3156 = vmatpush.bf16.msra.mxu1 %v8741_v44  ;;  %v12629_v12 = vld [vmem:[#allocation8 + $0x274] sm:$0xf0]  ;;  %v2842_v44 = vadd.f32 %v2841_v36, %v2828_v14  ;;  %v2870_v14 = vadd.f32 %v2869_v63, %v552_v55 }
 0x1a8   :  { %v8676_v15 = vld [vmem:[#allocation8 + $0x58] sm:$0xf]  ;;  %3171 = vmatpush.bf16.msra.mxu3 %v8965_v38  ;;  %v8933_v26 = vor.u32 %v12629_v12, %v8932_v10  ;;  %v3366_v38 = vmul.f32 0.2, %v13949_v62 }
 0x1a9   :  { %v12565_v49 = vld [vmem:[#allocation8 + $0x74] sm:$0xf0]  ;;  %3184 = vmatpush.bf16.msrb.mxu0 %v9253_v57  ;;  %v12609_v57 = vld [vmem:[#allocation8 + $0x1dc] sm:$0xf]  ;;  %v2856_v58 = vadd.f32 %v13942_v48, %v2842_v44 }
 0x1aa   :  { %v9188_v23 = vld [vmem:[#allocation8 + $0x458] sm:$0xf]  ;;  %v8677_v42 = vor.u32 %v12565_v49, %v8676_v15  ;;  %v9094_v44 = vld [vmem:[#allocation8 + $0x3b8] sm:$0xf0] }
 0x1ab   :  { %v12693_v24 = vld [vmem:[#allocation8 + $0x474] sm:$0xf0]  ;;  %3198 = vmatpush.bf16.msrb.mxu2 %v9509_v37  ;;  %3157 = vmatpush.bf16.msra.mxu1 %v8709_v9  ;;  %v8870_v37 = vld [vmem:[#allocation8 + $0x1f8] sm:$0xf0]  ;;  %vm3358_vm6 = vcmp.gt.f32.partialorder %v2856_v58, 0.0 }
 0x1ac   :  { %v9444_v39 = vld [vmem:[#allocation8 + $0x658] sm:$0xf]  ;;  %v9189_v47 = vor.u32 %v12693_v24, %v9188_v23  ;;  %3172 = vmatpush.bf16.msra.mxu3 %v8933_v26  ;;  %v3374_v15 = vmul.f32 0.2, %v2856_v58  ;;  %v8873_v23 = vor.u32 %v12609_v57, %v8870_v37 }
 0x1ad   :  { %v12757_v27 = vld [vmem:[#allocation8 + $0x674] sm:$0xf0]  ;;  %3185 = vmatpush.bf16.msrb.mxu0 %v9221_v18  ;;  %v2883_v18 = vpop.f32.mrf.mxu0 }
 0x1ae   :  { %v8644_v28 = vld [vmem:[#allocation8 + $0x18] sm:$0xf]  ;;  %v9445_v53 = vor.u32 %v12757_v27, %v9444_v39  ;;  %v12673_v39 = vld [vmem:[#allocation8 + $0x3dc] sm:$0xf]  ;;  %v13961_v26 = vadd.f32 %v2883_v18, %v2870_v14  ;;  %v3382_v27 = vsel %vm3350_vm5, %v13949_v62, %v3366_v38  ;;  %v3390_v55 = vsel %vm3358_vm6, %v2856_v58, %v3374_v15 }
 0x1af   :  { %v12557_v33 = vld [vmem:[#allocation8 + $0x34] sm:$0xf0]  ;;  %3199 = vmatpush.bf16.msrb.mxu2 %v9477_v25  ;;  %3158 = vmatpush.bf16.msra.mxu1 %v8677_v42  ;;  %v9126_v25 = vld [vmem:[#allocation8 + $0x3f8] sm:$0xf0]  ;;  %v13966_v42 = vpack.c.bf16 %v3390_v55, %v3382_v27 }
 0x1b0   :  { %v8900_v30 = vld [vmem:[#allocation8 + $0x218] sm:$0xf]  ;;  %v8645_v59 = vor.u32 %v12557_v33, %v8644_v28  ;;  %v12601_v33 = vld [vmem:[#allocation8 + $0x19c] sm:$0xf] }
 0x1b1   :  { %v12621_v31 = vld [vmem:[#allocation8 + $0x234] sm:$0xf0]  ;;  %3186 = vmatpush.bf16.msrb.mxu0 %v9189_v47  ;;  %v12665_v62 = vld [vmem:[#allocation8 + $0x39c] sm:$0xf] }
 0x1b2   :  { %v9892_v32 = vld [vmem:[#allocation8 + $0x9d8] sm:$0xf]  ;;  %v8901_v11 = vor.u32 %v12621_v31, %v8900_v30  ;;  %v8838_v31 = vld [vmem:[#allocation8 + $0x1b8] sm:$0xf0]  ;;  %v9097_v57 = vor.u32 %v12665_v62, %v9094_v44 }
 0x1b3   :  { %v12869_v40 = vld [vmem:[#allocation8 + $0x9f4] sm:$0xf0]  ;;  %3200 = vmatpush.bf16.msrb.mxu2 %v9445_v53  ;;  %3159 = vmatpush.bf16.msra.mxu1 %v8645_v59  ;;  %v8841_v47 = vor.u32 %v12601_v33, %v8838_v31  ;;  %v8806_v53 = vld [vmem:[#allocation8 + $0x178] sm:$0xf0] }
 0x1b4   :  { %v10148_v41 = vld [vmem:[#allocation8 + $0xbd8] sm:$0xf]  ;;  %v9893_v10 = vor.u32 %v12869_v40, %v9892_v32  ;;  %3173 = vmatpush.bf16.msra.mxu3 %v8901_v11  ;;  %v9129_v40 = vor.u32 %v12673_v39, %v9126_v25  ;;  %v12657_v58 = vld [vmem:[#allocation8 + $0x35c] sm:$0xf] }
 0x1b5   :  { %v12933_v43 = vld [vmem:[#allocation8 + $0xbf4] sm:$0xf0]  ;;  %v9062_v59 = vld [vmem:[#allocation8 + $0x378] sm:$0xf0] }
 0x1b6   :  { %v9156_v45 = vld [vmem:[#allocation8 + $0x418] sm:$0xf]  ;;  %v10149_v60 = vor.u32 %v12933_v43, %v10148_v41  ;;  %3160 = vmatmul.bf16.vlgmr.msra.gmra.mxu1 %v13830_v17  ;;  %v9065_v15 = vor.u32 %v12657_v58, %v9062_v59  ;;  %v9030_v18 = vld [vmem:[#allocation8 + $0x338] sm:$0xf0] }
 0x1b7   :  { %v12685_v51 = vld [vmem:[#allocation8 + $0x434] sm:$0xf0]  ;;  %3208 = vmatpush.bf16.msrb.mxu1 %v9893_v10  ;;  %3174 = vmatmul.bf16.vlgmr.msra.gmra.mxu3 %v13837_v35  ;;  %v12577_v39 = vld [vmem:[#allocation8 + $0xdc] sm:$0xf] }
 0x1b8   :  { %v9412_v52 = vld [vmem:[#allocation8 + $0x618] sm:$0xf]  ;;  %v9157_v49 = vor.u32 %v12685_v51, %v9156_v45  ;;  %3222 = vmatpush.bf16.msrb.mxu3 %v10149_v60  ;;  %v12593_v51 = vld [vmem:[#allocation8 + $0x15c] sm:$0xf]  ;;  %v2895_v60 = vpop.f32.mrf.mxu1 }
 0x1b9   :  { %v12749_v56 = vld [vmem:[#allocation8 + $0x634] sm:$0xf0]  ;;  %v2896_v63 = vadd.f32 %v2895_v60, %v13954_v29  ;;  %v8742_v27 = vld [vmem:[#allocation8 + $0xf8] sm:$0xf0] }
 0x1ba   :  { %v9860_v61 = vld [vmem:[#allocation8 + $0x998] sm:$0xf]  ;;  %v9413_v48 = vor.u32 %v12749_v56, %v9412_v52  ;;  %3187 = vmatpush.bf16.msrb.mxu0 %v9157_v49  ;;  %v8745_v62 = vor.u32 %v12577_v39, %v8742_v27  ;;  %v12633_v59 = vld [vmem:[#allocation8 + $0x29c] sm:$0xf] }
 0x1bb   :  { %v10180_v8 = vld [vmem:[#allocation8 + $0xc18] sm:$0xf]  ;;  %v8966_v60 = vld [vmem:[#allocation8 + $0x2b8] sm:$0xf0] }
 0x1bc   :  { %v12941_v9 = vld [vmem:[#allocation8 + $0xc34] sm:$0xf0]  ;;  %3201 = vmatpush.bf16.msrb.mxu2 %v9413_v48  ;;  %v9382_v39 = vld [vmem:[#allocation8 + $0x5f8] sm:$0xf0] }
 0x1bd   :  { %v10116_v12 = vld [vmem:[#allocation8 + $0xb98] sm:$0xf]  ;;  %v10181_v24 = vor.u32 %v12941_v9, %v10180_v8  ;;  %3188 = vmatmul.bf16.vlgmr.msrb.gmra.mxu0 %v13832_v19  ;;  %v12585_v9 = vld [vmem:[#allocation8 + $0x11c] sm:$0xf] }
 0x1be   :  { %v12925_v50 = vld [vmem:[#allocation8 + $0xbb4] sm:$0xf0]  ;;  %v8934_v27 = vld [vmem:[#allocation8 + $0x278] sm:$0xf0] }
 0x1bf   :  { %v12861_v16 = vld [vmem:[#allocation8 + $0x9b4] sm:$0xf0]  ;;  %v10117_v28 = vor.u32 %v12925_v50, %v10116_v12  ;;  %3243 = vmatpush.bf16.msra.mxu0 %v10181_v24  ;;  %3202 = vmatmul.bf16.vlgmr.msrb.gmra.mxu2 %v13834_v20  ;;  %v8774_v12 = vld [vmem:[#allocation8 + $0x138] sm:$0xf0] }
 0x1c0   :  { %v9861_v30 = vor.u32 %v12861_v16, %v9860_v61  ;;  %v10084_v32 = vld [vmem:[#allocation8 + $0xb58] sm:$0xf]  ;;  %3250 = vmatpush.bf16.msra.mxu2 %v8873_v23  ;;  %v8809_v61 = vor.u32 %v12593_v51, %v8806_v53  ;;  %v12649_v16 = vld [vmem:[#allocation8 + $0x31c] sm:$0xf]  ;;  %v8777_v23 = vor.u32 %v12585_v9, %v8774_v12 }
 0x1c1   :  { %v12917_v36 = vld [vmem:[#allocation8 + $0xb74] sm:$0xf0]  ;;  %3223 = vmatpush.bf16.msrb.mxu3 %v10117_v28  ;;  %v2909_v28 = vpop.f32.mrf.mxu3  ;;  %v9033_v33 = vor.u32 %v12649_v16, %v9030_v18  ;;  %v12561_v9 = vld [vmem:[#allocation8 + $0x5c] sm:$0xf] }
 0x1c2   :  { %v9828_v41 = vld [vmem:[#allocation8 + $0x958] sm:$0xf]  ;;  %v10085_v45 = vor.u32 %v12917_v36, %v10084_v32  ;;  %3209 = vmatpush.bf16.msrb.mxu1 %v9861_v30  ;;  %v2910_v32 = vadd.f32 %v2909_v28, %v2896_v63  ;;  %v12641_v36 = vld [vmem:[#allocation8 + $0x2dc] sm:$0xf] }
 0x1c3   :  { %v12853_v43 = vld [vmem:[#allocation8 + $0x974] sm:$0xf0]  ;;  %3264 = vmatpush.bf16.msrb.mxu0 %v9129_v40  ;;  %v8998_v40 = vld [vmem:[#allocation8 + $0x2f8] sm:$0xf0] }
 0x1c4   :  { %v9829_v52 = vor.u32 %v12853_v43, %v9828_v41  ;;  %v10052_v11 = vld [vmem:[#allocation8 + $0xb18] sm:$0xf]  ;;  %3251 = vmatpush.bf16.msra.mxu2 %v8841_v47  ;;  %v2897_v41 = vpop.f32.mrf.mxu1  ;;  %v2937_v43 = vpop.f32.mrf.mxu0  ;;  %v12569_v47 = vld [vmem:[#allocation8 + $0x9c] sm:$0xf] }
 0x1c5   :  { %v12909_v56 = vld [vmem:[#allocation8 + $0xb34] sm:$0xf0]  ;;  %3224 = vmatpush.bf16.msrb.mxu3 %v10085_v45  ;;  %v2898_v45 = vadd.f32 %v2897_v41, %v13961_v26  ;;  %v8678_v63 = vld [vmem:[#allocation8 + $0x78] sm:$0xf0] }
 0x1c6   :  { %v9796_v37 = vld [vmem:[#allocation8 + $0x918] sm:$0xf]  ;;  %v10053_v8 = vor.u32 %v12909_v56, %v10052_v11  ;;  %3210 = vmatpush.bf16.msrb.mxu1 %v9829_v52  ;;  %v8710_v52 = vld [vmem:[#allocation8 + $0xb8] sm:$0xf0]  ;;  %v2923_v56 = vpop.f32.mrf.mxu2 }
 0x1c7   :  { %v12845_v38 = vld [vmem:[#allocation8 + $0x934] sm:$0xf0]  ;;  %3265 = vmatpush.bf16.msrb.mxu0 %v9097_v57  ;;  %v9001_v57 = vor.u32 %v12641_v36, %v8998_v40  ;;  %v2924_v58 = vadd.f32 %v2923_v56, %v2910_v32  ;;  %v12737_v16 = vld [vmem:[#allocation8 + $0x5dc] sm:$0xf] }
 0x1c8   :  { %v9797_v10 = vor.u32 %v12845_v38, %v9796_v37  ;;  %v10020_v50 = vld [vmem:[#allocation8 + $0xad8] sm:$0xf]  ;;  %3252 = vmatpush.bf16.msra.mxu2 %v8809_v61  ;;  %v8713_v61 = vor.u32 %v12569_v47, %v8710_v52  ;;  %v12801_v18 = vld [vmem:[#allocation8 + $0x7dc] sm:$0xf] }
 0x1c9   :  { %v12901_v14 = vld [vmem:[#allocation8 + $0xaf4] sm:$0xf0]  ;;  %3225 = vmatpush.bf16.msrb.mxu3 %v10053_v8  ;;  %v8646_v36 = vld [vmem:[#allocation8 + $0x38] sm:$0xf0] }
 0x1ca   :  { %v9764_v49 = vld [vmem:[#allocation8 + $0x8d8] sm:$0xf]  ;;  %v10021_v24 = vor.u32 %v12901_v14, %v10020_v50  ;;  %3211 = vmatpush.bf16.msrb.mxu1 %v9797_v10  ;;  %v2938_v10 = vadd.f32 %v2937_v43, %v2924_v58  ;;  %v12865_v40 = vld [vmem:[#allocation8 + $0x9dc] sm:$0xf] }
 0x1cb   :  { %v12837_v48 = vld [vmem:[#allocation8 + $0x8f4] sm:$0xf0]  ;;  %3266 = vmatpush.bf16.msrb.mxu0 %v9065_v15  ;;  %v9894_v41 = vld [vmem:[#allocation8 + $0x9f8] sm:$0xf0] }
 0x1cc   :  { %v9765_v25 = vor.u32 %v12837_v48, %v9764_v49  ;;  %v9988_v29 = vld [vmem:[#allocation8 + $0xa98] sm:$0xf]  ;;  %3253 = vmatpush.bf16.msra.mxu2 %v8777_v23  ;;  %v2911_v49 = vpop.f32.mrf.mxu3  ;;  %v8969_v48 = vor.u32 %v12633_v59, %v8966_v60  ;;  %v9638_v23 = vld [vmem:[#allocation8 + $0x7f8] sm:$0xf0]  ;;  %v9897_v60 = vor.u32 %v12865_v40, %v9894_v41 }
 0x1cd   :  { %v12893_v55 = vld [vmem:[#allocation8 + $0xab4] sm:$0xf0]  ;;  %3226 = vmatpush.bf16.msrb.mxu3 %v10021_v24  ;;  %10192 = vmatmul.msk.bf16.vlgmr.msra.gmra.mxu0 %vm2560_vm0, %v13842_v21  ;;  %v2912_v24 = vadd.f32 %v2911_v49, %v2898_v45  ;;  %v9641_v32 = vor.u32 %v12801_v18, %v9638_v23  ;;  %v12729_v45 = vld [vmem:[#allocation8 + $0x59c] sm:$0xf] }
 0x1ce   :  { %v9732_v30 = vld [vmem:[#allocation8 + $0x898] sm:$0xf]  ;;  %v9989_v44 = vor.u32 %v12893_v55, %v9988_v29  ;;  %3212 = vmatpush.bf16.msrb.mxu1 %v9765_v25  ;;  %v12625_v25 = vld [vmem:[#allocation8 + $0x25c] sm:$0xf]  ;;  %v2951_v29 = vpop.f32.mrf.mxu1  ;;  %v8681_v55 = vor.u32 %v12561_v9, %v8678_v63  ;;  %v2925_v43 = vpop.f32.mrf.mxu2 }
 0x1cf   :  { %v12829_v31 = vld [vmem:[#allocation8 + $0x8b4] sm:$0xf0]  ;;  %3267 = vmatpush.bf16.msrb.mxu0 %v9033_v33  ;;  %v12553_v33 = vld [vmem:[#allocation8 + $0x1c] sm:$0xf]  ;;  %v8937_v47 = vor.u32 %v12625_v25, %v8934_v27 }
 0x1d0   :  { %v9733_v51 = vor.u32 %v12829_v31, %v9732_v30  ;;  %v9956_v53 = vld [vmem:[#allocation8 + $0xa58] sm:$0xf]  ;;  %3254 = vmatpush.bf16.msra.mxu2 %v8745_v62  ;;  %v13976_v30 = vadd.f32 %v2951_v29, %v2938_v10  ;;  %v2939_v62 = vpop.f32.mrf.mxu0  ;;  %v9606_v52 = vld [vmem:[#allocation8 + $0x7b8] sm:$0xf0] }
 0x1d1   :  { %v12885_v11 = vld [vmem:[#allocation8 + $0xa74] sm:$0xf0]  ;;  %3227 = vmatpush.bf16.msrb.mxu3 %v9989_v44  ;;  %v9385_v44 = vor.u32 %v12737_v16, %v9382_v39  ;;  %v12617_v56 = vld [vmem:[#allocation8 + $0x21c] sm:$0xf] }
 0x1d2   :  { %v9700_v37 = vld [vmem:[#allocation8 + $0x858] sm:$0xf]  ;;  %v9957_v8 = vor.u32 %v12885_v11, %v9956_v53  ;;  %3213 = vmatpush.bf16.msrb.mxu1 %v9733_v51  ;;  %v12793_v51 = vld [vmem:[#allocation8 + $0x79c] sm:$0xf]  ;;  %v2926_v53 = vadd.f32 %v2925_v43, %v2912_v24  ;;  %v3367_v23 = vmul.f32 0.2, %v13976_v30 }
 0x1d3   :  { %v12821_v38 = vld [vmem:[#allocation8 + $0x874] sm:$0xf0]  ;;  %3268 = vmatpush.bf16.msrb.mxu0 %v9001_v57  ;;  %v9350_v11 = vld [vmem:[#allocation8 + $0x5b8] sm:$0xf0]  ;;  %vm3351_vm7 = vcmp.gt.f32.partialorder %v13976_v30, 0.0 }
 0x1d4   :  { %v9668_v26 = vld [vmem:[#allocation8 + $0x818] sm:$0xf]  ;;  %v9701_v12 = vor.u32 %v12821_v38, %v9700_v37  ;;  %3255 = vmatpush.bf16.msra.mxu2 %v8713_v61  ;;  %v8902_v57 = vld [vmem:[#allocation8 + $0x238] sm:$0xf0]  ;;  %v8649_v37 = vor.u32 %v12553_v33, %v8646_v36  ;;  %v2940_v59 = vadd.f32 %v2939_v62, %v2926_v53  ;;  %v9609_v61 = vor.u32 %v12793_v51, %v9606_v52 }
 0x1d5   :  { %v12813_v50 = vld [vmem:[#allocation8 + $0x834] sm:$0xf0]  ;;  %3228 = vmatpush.bf16.msrb.mxu3 %v9957_v8  ;;  %v12929_v38 = vld [vmem:[#allocation8 + $0xbdc] sm:$0xf]  ;;  %v9353_v9 = vor.u32 %v12729_v45, %v9350_v11  ;;  %v8905_v63 = vor.u32 %v12617_v56, %v8902_v57  ;;  %v3383_v62 = vsel %vm3351_vm7, %v13976_v30, %v3367_v23 }
 0x1d6   :  { %v9924_v14 = vld [vmem:[#allocation8 + $0xa18] sm:$0xf]  ;;  %3214 = vmatpush.bf16.msrb.mxu1 %v9701_v12  ;;  %v9669_v31 = vor.u32 %v12813_v50, %v9668_v26  ;;  %v10150_v58 = vld [vmem:[#allocation8 + $0xbf8] sm:$0xf0]  ;;  %v2953_v49 = vpop.f32.mrf.mxu1 }
 0x1d7   :  { %v12877_v15 = vld [vmem:[#allocation8 + $0xa34] sm:$0xf0]  ;;  %3269 = vmatpush.bf16.msrb.mxu0 %v8969_v48  ;;  %v12857_v8 = vld [vmem:[#allocation8 + $0x99c] sm:$0xf]  ;;  %v10153_v50 = vor.u32 %v12929_v38, %v10150_v58  ;;  %v2954_v24 = vadd.f32 %v2953_v49, %v2940_v59  ;;  %v553_v58 = vperm.slane %v13867_v34, 4 }
 0x1d8   :  { %v9925_v28 = vor.u32 %v12877_v15, %v9924_v14  ;;  %3256 = vmatpush.bf16.msra.mxu2 %v8681_v55  ;;  %v9862_v26 = vld [vmem:[#allocation8 + $0x9b8] sm:$0xf0] }
 0x1d9   :  { %v12785_v10 = vld [vmem:[#allocation8 + $0x75c] sm:$0xf]  ;;  %v9865_v39 = vor.u32 %v12857_v8, %v9862_v26  ;;  %vm3359_vm8 = vcmp.gt.f32.partialorder %v2954_v24, 0.0 }
 0x1da   :  { %3229 = vmatpush.bf16.msrb.mxu3 %v9925_v28  ;;  %3215 = vmatpush.bf16.msrb.mxu1 %v9669_v31  ;;  %v9574_v12 = vld [vmem:[#allocation8 + $0x778] sm:$0xf0]  ;;  %v3375_v31 = vmul.f32 0.2, %v2954_v24 }
 0x1db   :  { %3270 = vmatpush.bf16.msrb.mxu0 %v8937_v47  ;;  %v12721_v14 = vld [vmem:[#allocation8 + $0x55c] sm:$0xf]  ;;  %v9577_v25 = vor.u32 %v12785_v10, %v9574_v12  ;;  %v2965_v12 = vpop.f32.mrf.mxu3 }
 0x1dc   :  { %v9318_v15 = vld [vmem:[#allocation8 + $0x578] sm:$0xf0]  ;;  %3257 = vmatpush.bf16.msra.mxu2 %v8649_v37 }
 0x1dd   :  { %3230 = vmatmul.bf16.vlgmr.msrb.gmra.mxu3 %v13848_v22  ;;  %3216 = vmatmul.bf16.vlgmr.msrb.gmra.mxu1 %v13846_v13  ;;  %v12921_v48 = vld [vmem:[#allocation8 + $0xb9c] sm:$0xf]  ;;  %v9321_v55 = vor.u32 %v12721_v14, %v9318_v15  ;;  %v2966_v15 = vadd.f32 %v2965_v12, %v553_v58  ;;  %v12943_v12 = vld [vmem:[#allocation10 + $0xc] sm:$0xf] }
 0x1de   :  { %3292 = vmatpush.bf16.msra.mxu3 %v9641_v32  ;;  %3278 = vmatpush.bf16.msra.mxu1 %v9385_v44  ;;  %v10118_v16 = vld [vmem:[#allocation8 + $0xbb8] sm:$0xf0]  ;;  %v3391_v44 = vsel %vm3359_vm8, %v2954_v24, %v3375_v31  ;;  %v2979_v8 = vpop.f32.mrf.mxu1  ;;  %v2993_v31 = vpop.f32.mrf.mxu2 }
 0x1df   :  { %v12849_v18 = vld [vmem:[#allocation8 + $0x95c] sm:$0xf]  ;;  %3271 = vmatpush.bf16.msrb.mxu0 %v8905_v63  ;;  %v10121_v32 = vor.u32 %v12921_v48, %v10118_v16  ;;  %3258 = vmatmul.bf16.vlgmr.msra.gmra.mxu2 %v13830_v17  ;;  %v13984_v51 = vpack.c.bf16 %v3391_v44, %v3383_v62  ;;  %v10196_v44 = vld [vmem:[#allocation10] sm:$0xf] }
 0x1e0   :  { %3306 = vmatpush.bf16.msrb.mxu2 %v9897_v60  ;;  %v9830_v27 = vld [vmem:[#allocation8 + $0x978] sm:$0xf0] }
 0x1e1   :  { %v12713_v29 = vld [vmem:[#allocation8 + $0x51c] sm:$0xf]  ;;  %v9833_v40 = vor.u32 %v12849_v18, %v9830_v27  ;;  %v2980_v27 = vadd.f32 %v2979_v8, %v2966_v15 }
 0x1e2   :  { %3293 = vmatpush.bf16.msra.mxu3 %v9609_v61  ;;  %3279 = vmatpush.bf16.msra.mxu1 %v9353_v9  ;;  %v12777_v28 = vld [vmem:[#allocation8 + $0x71c] sm:$0xf] }
 0x1e3   :  { %v9542_v33 = vld [vmem:[#allocation8 + $0x738] sm:$0xf0]  ;;  %3320 = vmatpush.bf16.msra.mxu0 %v10153_v50 }
 0x1e4   :  { %v9286_v36 = vld [vmem:[#allocation8 + $0x538] sm:$0xf0]  ;;  %3307 = vmatpush.bf16.msrb.mxu2 %v9865_v39  ;;  %v9545_v47 = vor.u32 %v12777_v28, %v9542_v33  ;;  %3272 = vmatmul.bf16.vlgmr.msrb.gmra.mxu0 %v13837_v35  ;;  %v3007_v39 = vpop.f32.mrf.mxu0 }
 0x1e5   :  { %v12913_v41 = vld [vmem:[#allocation8 + $0xb5c] sm:$0xf]  ;;  %v9289_v52 = vor.u32 %v12713_v29, %v9286_v36 }
 0x1e6   :  { %v10086_v43 = vld [vmem:[#allocation8 + $0xb78] sm:$0xf0]  ;;  %3294 = vmatpush.bf16.msra.mxu3 %v9577_v25  ;;  %3280 = vmatpush.bf16.msra.mxu1 %v9321_v55 }
 0x1e7   :  { %v12841_v45 = vld [vmem:[#allocation8 + $0x91c] sm:$0xf]  ;;  %3321 = vmatpush.bf16.msra.mxu0 %v10121_v32  ;;  %v10089_v17 = vor.u32 %v12913_v41, %v10086_v43  ;;  %v2994_v41 = vadd.f32 %v2993_v31, %v2980_v27  ;;  %v10212_v27 = vld [vmem:[#allocation10 + $0x10] sm:$0xf] }
 0x1e8   :  { %v9798_v53 = vld [vmem:[#allocation8 + $0x938] sm:$0xf0]  ;;  %3308 = vmatpush.bf16.msrb.mxu2 %v9833_v40 }
 0x1e9   :  { %v12769_v11 = vld [vmem:[#allocation8 + $0x6dc] sm:$0xf]  ;;  %v9801_v59 = vor.u32 %v12841_v45, %v9798_v53 }
 0x1ea   :  { %v9510_v56 = vld [vmem:[#allocation8 + $0x6f8] sm:$0xf0]  ;;  %3295 = vmatpush.bf16.msra.mxu3 %v9545_v47  ;;  %3281 = vmatpush.bf16.msra.mxu1 %v9289_v52  ;;  %v12946_v47 = vld [vmem:[#allocation10 + $0x1c] sm:$0x10] }
 0x1eb   :  { %v12705_v57 = vld [vmem:[#allocation8 + $0x4dc] sm:$0xf]  ;;  %v9513_v60 = vor.u32 %v12769_v11, %v9510_v56  ;;  %3322 = vmatpush.bf16.msra.mxu0 %v10089_v17  ;;  %v10197_v8 = vor.u32 %v12946_v47, %v10196_v44  ;;  %v10220_v47 = vld [vmem:[#allocation10 + $0x18] sm:$0xf] }
 0x1ec   :  { %v9254_v37 = vld [vmem:[#allocation8 + $0x4f8] sm:$0xf0]  ;;  %3309 = vmatpush.bf16.msrb.mxu2 %v9801_v59 }
 0x1ed   :  { %v12905_v38 = vld [vmem:[#allocation8 + $0xb1c] sm:$0xf]  ;;  %v9257_v9 = vor.u32 %v12705_v57, %v9254_v37  ;;  %v13990_v37 = vadd.f32 %v3007_v39, %v2994_v41 }
 0x1ee   :  { %v10054_v30 = vld [vmem:[#allocation8 + $0xb38] sm:$0xf0]  ;;  %3296 = vmatpush.bf16.msra.mxu3 %v9513_v60  ;;  %v2967_v60 = vpop.f32.mrf.mxu3 }
 0x1ef   :  { %v12833_v61 = vld [vmem:[#allocation8 + $0x8dc] sm:$0xf]  ;;  %v10057_v35 = vor.u32 %v12905_v38, %v10054_v30  ;;  %3282 = vmatpush.bf16.msra.mxu1 %v9257_v9 }
 0x1f0   :  { %v9766_v63 = vld [vmem:[#allocation8 + $0x8f8] sm:$0xf0] }
 0x1f1   :  { %v12761_v26 = vld [vmem:[#allocation8 + $0x69c] sm:$0xf]  ;;  %v9769_v16 = vor.u32 %v12833_v61, %v9766_v63  ;;  %3323 = vmatpush.bf16.msra.mxu0 %v10057_v35  ;;  %v2981_v61 = vpop.f32.mrf.mxu1  ;;  %v12947_v35 = vld [vmem:[#allocation10 + $0x24] sm:$0x10] }
 0x1f2   :  { %v9478_v10 = vld [vmem:[#allocation8 + $0x6b8] sm:$0xf0] }
 0x1f3   :  { %v12697_v50 = vld [vmem:[#allocation8 + $0x49c] sm:$0xf]  ;;  %v9481_v18 = vor.u32 %v12761_v26, %v9478_v10  ;;  %3310 = vmatpush.bf16.msrb.mxu2 %v9769_v16  ;;  %v10204_v26 = vld [vmem:[#allocation10 + $0x8] sm:$0xf]  ;;  %v2968_v10 = vadd.f32 %v2967_v60, %v553_v58  ;;  %v10198_v16 = vld [vmem:[#allocation10 + $0x20] sm:$0x10]  ;;  %v2995_v58 = vpop.f32.mrf.mxu2 }
 0x1f4   :  { %v9222_v14 = vld [vmem:[#allocation8 + $0x4b8] sm:$0xf0]  ;;  %v10205_v31 = vor.u32 %v12947_v35, %v10204_v26 }
 0x1f5   :  { %v12897_v49 = vld [vmem:[#allocation8 + $0xadc] sm:$0xf]  ;;  %v9225_v25 = vor.u32 %v12697_v50, %v9222_v14  ;;  %3297 = vmatpush.bf16.msra.mxu3 %v9481_v18  ;;  %v10206_v50 = vld [vmem:[#allocation10 + $0x28] sm:$0x10]  ;;  %v3410_v18 = vpop.permute.xlu0 %3409 }
 0x1f6   :  { %v10022_v48 = vld [vmem:[#allocation8 + $0xaf8] sm:$0xf0] }
 0x1f7   :  { %v12825_v23 = vld [vmem:[#allocation8 + $0x89c] sm:$0xf]  ;;  %v10025_v33 = vor.u32 %v12897_v49, %v10022_v48  ;;  %3283 = vmatpush.bf16.msra.mxu1 %v9225_v25  ;;  %v12942_v48 = vld [vmem:[#allocation10 + $0x4] sm:$0xf] }
 0x1f8   :  { %v9734_v24 = vld [vmem:[#allocation8 + $0x8b8] sm:$0xf0] }
 0x1f9   :  { %v12689_v29 = vld [vmem:[#allocation8 + $0x45c] sm:$0xf]  ;;  %v9737_v45 = vor.u32 %v12825_v23, %v9734_v24  ;;  %3324 = vmatpush.bf16.msra.mxu0 %v10025_v33  ;;  %v2982_v24 = vadd.f32 %v2981_v61, %v2968_v10  ;;  %v13752_v10 = vmov 0.0  }
 0x1fa   :  { %v12753_v55 = vld [vmem:[#allocation8 + $0x65c] sm:$0xf] }
 0x1fb   :  { %v9446_v28 = vld [vmem:[#allocation8 + $0x678] sm:$0xf0]  ;;  %3311 = vmatpush.bf16.msrb.mxu2 %v9737_v45  ;;  %v12949_v45 = vld [vmem:[#allocation10 + $0x34] sm:$0x10]  ;;  %v3049_v60 = vpop.f32.mrf.mxu2 }
 0x1fc   :  { %v9190_v32 = vld [vmem:[#allocation8 + $0x478] sm:$0xf0]  ;;  %v9449_v52 = vor.u32 %v12753_v55, %v9446_v28  ;;  %v3482_v55 = vsel %vm3480_vm9, %v10197_v8, 0  ;;  %v3009_v28 = vpop.f32.mrf.mxu0 }
 0x1fd   :  { %v12889_v36 = vld [vmem:[#allocation8 + $0xa9c] sm:$0xf]  ;;  %v9193_v57 = vor.u32 %v12689_v29, %v9190_v32  ;;  %v12948_v29 = vld [vmem:[#allocation10 + $0x2c] sm:$0x10]  ;;  %v10209_v32 = vor.u32 %v12943_v12, %v10206_v50  ;;  %v3413_v8 = vpop.permute.xlu0 %3412  ;;  %v3035_v50 = vpop.f32.mrf.mxu1 }
 0x1fe   :  { %v9990_v40 = vld [vmem:[#allocation8 + $0xab8] sm:$0xf0]  ;;  %3298 = vmatpush.bf16.msra.mxu3 %v9449_v52  ;;  %v10213_v44 = vor.u32 %v12948_v29, %v10212_v27 }
 0x1ff   :  { %v12817_v43 = vld [vmem:[#allocation8 + $0x85c] sm:$0xf]  ;;  %v9993_v59 = vor.u32 %v12889_v36, %v9990_v40  ;;  %3284 = vmatpush.bf16.msra.mxu1 %v9193_v57  ;;  %v2996_v36 = vadd.f32 %v2995_v58, %v2982_v24  ;;  %v3404_v57 = vlaneseq }
 0x200   :  { %v9702_v62 = vld [vmem:[#allocation8 + $0x878] sm:$0xf0] }
 0x201   :  { %v12681_v53 = vld [vmem:[#allocation8 + $0x41c] sm:$0xf]  ;;  %v9705_v14 = vor.u32 %v12817_v43, %v9702_v62  ;;  %3325 = vmatpush.bf16.msra.mxu0 %v9993_v59  ;;  %v10201_v43 = vor.u32 %v12942_v48, %v10198_v16  ;;  %v3010_v52 = vadd.f32 %v3009_v28, %v2996_v36  ;;  %v3405_v61 = vand.u32 127, %v3404_v57 }
 0x202   :  { %v9158_v11 = vld [vmem:[#allocation8 + $0x438] sm:$0xf0] }
 0x203   :  { %v12745_v56 = vld [vmem:[#allocation8 + $0x61c] sm:$0xf]  ;;  %v9161_v23 = vor.u32 %v12681_v53, %v9158_v11  ;;  %3312 = vmatpush.bf16.msrb.mxu2 %v9705_v14  ;;  %v10221_v53 = vor.u32 %v12949_v45, %v10220_v47  ;;  %vm3414_vm10 = vcmp.eq.s32.totalorder %v3405_v61, %v3410_v18  ;;  %vm3415_vm11 = vcmp.eq.s32.totalorder %v3405_v61, %v3413_v8  ;;  %v3051_v14 = vpop.f32.mrf.mxu2 }
 0x204   :  { %v9414_v17 = vld [vmem:[#allocation8 + $0x638] sm:$0xf0]  ;;  %v3416_v35 = vsel %vm3414_vm10, 1.0, %v13752_v10  ;;  %v3417_v12 = vsel %vm3415_vm11, 1.0, %v13752_v10 }
 0x205   :  { %v12881_v38 = vld [vmem:[#allocation8 + $0xa5c] sm:$0xf]  ;;  %v9417_v15 = vor.u32 %v12745_v56, %v9414_v17  ;;  %3285 = vmatpush.bf16.msra.mxu1 %v9161_v23  ;;  %v3488_v56 = vsel %vm3480_vm9, %v10205_v31, 0  ;;  %v3491_v17 = vsel %vm3480_vm9, %v10209_v32, 0  ;;  %v3500_v59 = vsel %vm3480_vm9, %v10221_v53, 0  ;;  %v3037_v29 = vpop.f32.mrf.mxu1 }
 0x206   :  { %v9958_v30 = vld [vmem:[#allocation8 + $0xa78] sm:$0xf0]  ;;  %v3418_v16 = vpack.c.bf16 %v3417_v12, %v3416_v35 }
 0x207   :  { %v12937_v9 = vld [vmem:[#allocation8 + $0xc1c] sm:$0xf]  ;;  %v9961_v39 = vor.u32 %v12881_v38, %v9958_v30  ;;  %3299 = vmatpush.bf16.msra.mxu3 %v9417_v15  ;;  %v3485_v38 = vsel %vm3480_vm9, %v10201_v43, 0  ;;  %v3494_v30 = vsel %vm3480_vm9, %v10213_v44, 0 }
 0x208   :  { %v10182_v63 = vld [vmem:[#allocation8 + $0xc38] sm:$0xf0]  ;;  %3286 = vmatmul.bf16.vlgmr.msra.gmra.mxu1 %v13832_v19 }
 0x209   :  { %v12809_v49 = vld [vmem:[#allocation8 + $0x81c] sm:$0xf]  ;;  %v10185_v33 = vor.u32 %v12937_v9, %v10182_v63  ;;  %3326 = vmatpush.bf16.msra.mxu0 %v9961_v39  ;;  %v12944_v9 = vld [vmem:[#allocation10 + $0x14] sm:$0xf] }
 0x20a   :  { %v9670_v25 = vld [vmem:[#allocation8 + $0x838] sm:$0xf0]  ;;  %3300 = vmatmul.bf16.vlgmr.msra.gmra.mxu3 %v13834_v20  ;;  %v10214_v63 = vld [vmem:[#allocation10 + $0x30] sm:$0x10] }
 0x20b   :  { %v12873_v40 = vld [vmem:[#allocation8 + $0xa1c] sm:$0xf]  ;;  %v9673_v62 = vor.u32 %v12809_v49, %v9670_v25  ;;  %3512 = vmatpush.bf16.msrb.mxu3 %v3482_v55  ;;  %3341 = vmatpush.bf16.msrb.mxu1 %v10185_v33  ;;  %v10217_v15 = vor.u32 %v12944_v9, %v10214_v63  ;;  %v3021_v49 = vpop.f32.mrf.mxu3  ;;  %v3077_v27 = vpop.f32.mrf.mxu2 }
 0x20c   :  { %v9926_v41 = vld [vmem:[#allocation8 + $0xa38] sm:$0xf0]  ;;  %v3022_v48 = vadd.f32 %v3021_v49, %v13990_v37 }
 0x20d   :  { %v9929_v11 = vor.u32 %v12873_v40, %v9926_v41  ;;  %3313 = vmatpush.bf16.msrb.mxu2 %v9673_v62  ;;  %v12945_v20 = vld [vmem:[#allocation10 + $0x1c] sm:$0xf]  ;;  %v3497_v24 = vsel %vm3480_vm9, %v10217_v15, 0 }
 0x20e   :  { %v10222_v19 = vld [vmem:[#allocation10 + $0x38] sm:$0x10]  ;;  %v3036_v23 = vadd.f32 %v3035_v50, %v3022_v48  ;;  %v555_v50 = vperm.slane %v13867_v34, 6 }
 0x20f   :  { %3554 = vmatpush.bf16.msra.mxu3 %v3491_v17  ;;  %3327 = vmatpush.bf16.msra.mxu0 %v9929_v11  ;;  %v10225_v26 = vor.u32 %v12945_v20, %v10222_v19 }
 0x210   :  { %3526 = vmatpush.bf16.msra.mxu1 %v3485_v38  ;;  %3314 = vmatmul.bf16.vlgmr.msrb.gmra.mxu2 %v13846_v13  ;;  %v554_v13 = vperm.slane %v13867_v34, 5  ;;  %v3050_v25 = vadd.f32 %v3049_v60, %v3036_v23 }
 0x211   :  { %3540 = vmatpush.bf16.msra.mxu2 %v3488_v56  ;;  %v3503_v18 = vsel %vm3480_vm9, %v10225_v26, 0 }
 0x212   :  { %3328 = vmatmul.bf16.vlgmr.msra.gmra.mxu0 %v13848_v22  ;;  %v3063_v22 = vpop.f32.mrf.mxu0  ;;  %v3368_v32 = vmul.f32 0.2, %v3050_v25  ;;  %vm3352_vm13 = vcmp.gt.f32.partialorder %v3050_v25, 0.0 }
 0x213   :  { %3568 = vmatpush.bf16.msrb.mxu0 %v3494_v30  ;;  %v3064_v39 = vadd.f32 %v3063_v22, %v554_v13  ;;  %v3023_v37 = vpop.f32.mrf.mxu3  ;;  %v3105_v53 = vpop.f32.mrf.mxu1 }
 0x214   :  { %v3024_v55 = vadd.f32 %v3023_v37, %v3010_v52  ;;  %v3384_v43 = vsel %vm3352_vm13, %v3050_v25, %v3368_v32 }
 0x215   :  { %3596 = vmatpush.bf16.msrb.mxu2 %v3500_v59  ;;  %v3078_v58 = vadd.f32 %v3077_v27, %v3064_v39 }
 0x216   :  { %v3038_v28 = vadd.f32 %v3037_v29, %v3024_v55 }
 0x218   :  { %10193 = vmatmul.msk.bf16.vlgmr.msrb.gmra.mxu1 %vm2560_vm0, %v13842_v21  ;;  %v3052_v36 = vadd.f32 %v3051_v14, %v3038_v28  ;;  %v3079_v21 = vpop.f32.mrf.mxu2 }
 0x219   :  { %3582 = vmatpush.bf16.msrb.mxu1 %v3497_v24 }
 0x21a   :  { %10226 = vmatmul.msk.bf16.vlgmr.msrb.gmra.mxu3 %vm3476_vm12, %v3418_v16  ;;  %v3065_v33 = vpop.f32.mrf.mxu0  ;;  %vm3360_vm14 = vcmp.gt.f32.partialorder %v3052_v36, 0.0  ;;  %v3376_v40 = vmul.f32 0.2, %v3052_v36 }
 0x21b   :  { %3610 = vmatpush.bf16.msrb.mxu3 %v3503_v18  ;;  %v3066_v31 = vadd.f32 %v3065_v33, %v554_v13  ;;  %v3091_v47 = vpop.f32.mrf.mxu3  ;;  %v3107_v59 = vpop.f32.mrf.mxu1 }
 0x21c   :  { %v3392_v62 = vsel %vm3360_vm14, %v3052_v36, %v3376_v40  ;;  %v3092_v52 = vadd.f32 %v3091_v47, %v3078_v58 }
 0x21d   :  { %v3080_v41 = vadd.f32 %v3079_v21, %v3066_v31  ;;  %v14013_v44 = vpack.c.bf16 %v3392_v62, %v3384_v43 }
 0x21e   :  { %v3106_v11 = vadd.f32 %v3105_v53, %v3092_v52 }
 0x220   :  { %10228 = vmatmul.msk.bf16.vlgmr.msra.gmra.mxu2 %vm3476_vm12, %v3418_v16  ;;  %v3133_v17 = vpop.f32.mrf.mxu2 }
 0x222   :  { %10230 = vmatmul.msk.bf16.vlgmr.msrb.gmra.mxu0 %vm3476_vm12, %v3418_v16  ;;  %v3119_v45 = vpop.f32.mrf.mxu0 }
 0x223   :  { %v3120_v56 = vadd.f32 %v3119_v45, %v3106_v11  ;;  %v3093_v38 = vpop.f32.mrf.mxu3 }
 0x224   :  { %v3094_v30 = vadd.f32 %v3093_v38, %v3080_v41 }
 0x225   :  { %v3134_v57 = vadd.f32 %v3133_v17, %v3120_v56 }
 0x226   :  { %v3108_v61 = vadd.f32 %v3107_v59, %v3094_v30 }
 0x228   :  { %10227 = vmatmul.msk.bf16.vlgmr.msra.gmra.mxu1 %vm3476_vm12, %v3418_v16  ;;  %v3135_v20 = vpop.f32.mrf.mxu2 }
 0x22a   :  { %10229 = vmatmul.msk.bf16.vlgmr.msra.gmra.mxu3 %vm3476_vm12, %v3418_v16  ;;  %v3121_v60 = vpop.f32.mrf.mxu0 }
 0x22b   :  { %v3122_v8 = vadd.f32 %v3121_v60, %v3108_v61  ;;  %v3147_v9 = vpop.f32.mrf.mxu3  ;;  %v556_v60 = vperm.slane %v13867_v34, 7 }
 0x22c   :  { %v3148_v63 = vadd.f32 %v3147_v9, %v3134_v57 }
 0x22d   :  { %v3136_v19 = vadd.f32 %v3135_v20, %v3122_v8 }
 0x22e   :  { %v3369_v10 = vmul.f32 0.2, %v3148_v63  ;;  %vm3353_vm15 = vcmp.gt.f32.partialorder %v3148_v63, 0.0 }
 0x230   :  { %10232 = vmatmul.msk.bf16.vlgmr.msrb.gmra.mxu2 %vm3476_vm12, %v3418_v16  ;;  %v3385_v14 = vsel %vm3353_vm15, %v3148_v63, %v3369_v10 }
 0x233   :  { %v3149_v26 = vpop.f32.mrf.mxu3  ;;  %v3161_v13 = vpop.f32.mrf.mxu1 }
 0x234   :  { %v3150_v35 = vadd.f32 %v3149_v26, %v3136_v19  ;;  %v3162_v22 = vadd.f32 %v3161_v13, %v555_v50 }
 0x236   :  { %vm3361_vm0 = vcmp.gt.f32.partialorder %v3150_v35, 0.0  ;;  %v3377_v12 = vmul.f32 0.2, %v3150_v35 }
 0x238   :  { %10231 = vmatmul.msk.bf16.vlgmr.msrb.gmra.mxu1 %vm3476_vm12, %v3418_v16  ;;  %v3393_v15 = vsel %vm3361_vm0, %v3150_v35, %v3377_v12 }
 0x239   :  { %v14030_v49 = vpack.c.bf16 %v3393_v15, %v3385_v14 }
 0x23a   :  { %10233 = vmatmul.msk.bf16.vlgmr.msrb.gmra.mxu3 %vm3476_vm12, %v3418_v16  ;;  %v3189_v48 = vpop.f32.mrf.mxu0 }
 0x23b   :  { %v3175_v16 = vpop.f32.mrf.mxu3  ;;  %v3163_v39 = vpop.f32.mrf.mxu1 }
 0x23c   :  { %v3176_v18 = vadd.f32 %v3175_v16, %v3162_v22  ;;  %v3164_v27 = vadd.f32 %v3163_v39, %v555_v50  ;;  %v130_v16 = vld [vmem:[#allocation11 + $0x1] ss:$8 sm:$0xf] }
 0x23e   :  { %v3190_v23 = vadd.f32 %v3189_v48, %v3176_v18  ;;  %v131_v18 = vld [vmem:[#allocation11 + $0x1] ss:$8 sm:$0xf0] }
 0x23f   :  { %v14035_v39 = vor.u32 %v131_v18, %v130_v16 }
 0x242   :  { %v3203_v24 = vpop.f32.mrf.mxu2  ;;  %v3191_v37 = vpop.f32.mrf.mxu0 }
 0x243   :  { %v3204_v25 = vadd.f32 %v3203_v24, %v3190_v23  ;;  %v3177_v29 = vpop.f32.mrf.mxu3 }
 0x244   :  { %v3178_v58 = vadd.f32 %v3177_v29, %v3164_v27 }
 0x246   :  { %v3192_v31 = vadd.f32 %v3191_v37, %v3178_v58  ;;  %v3428_v58 = vperm.slane %v14035_v39, 0 }
 0x24a   :  { %v3245_v55 = vpop.f32.mrf.mxu0  ;;  %v3205_v40 = vpop.f32.mrf.mxu2 }
 0x24b   :  { %v3206_v41 = vadd.f32 %v3205_v40, %v3192_v31 }
 0x252   :  { %v3247_v32 = vpop.f32.mrf.mxu0 }
 0x25a   :  { %v3217_v28 = vpop.f32.mrf.mxu1 }
 0x25b   :  { %v3218_v33 = vadd.f32 %v3217_v28, %v3204_v25  ;;  %v3432_v28 = vperm.slane %v14035_v39, 4 }
 0x260   :  { %v3231_v36 = vpop.f32.mrf.mxu3 }
 0x261   :  { %v3232_v21 = vadd.f32 %v3231_v36, %v3218_v33  ;;  %v3273_v53 = vpop.f32.mrf.mxu0 }
 0x262   :  { %v3219_v43 = vpop.f32.mrf.mxu1  ;;  %v3259_v57 = vpop.f32.mrf.mxu2 }
 0x263   :  { %v3246_v62 = vadd.f32 %v3245_v55, %v3232_v21  ;;  %v3220_v47 = vadd.f32 %v3219_v43, %v3206_v41  ;;  %v3260_v8 = vadd.f32 %v3259_v57, %v556_v60 }
 0x265   :  { %v3370_v11 = vmul.f32 0.2, %v3246_v62  ;;  %vm3354_vm1 = vcmp.gt.f32.partialorder %v3246_v62, 0.0  ;;  %v3274_v9 = vadd.f32 %v3273_v53, %v3260_v8 }
 0x267   :  { %v3386_v38 = vsel %vm3354_vm1, %v3246_v62, %v3370_v11  ;;  %v3430_v62 = vperm.slane %v14035_v39, 2 }
 0x268   :  { %v3233_v45 = vpop.f32.mrf.mxu3 }
 0x269   :  { %v3234_v52 = vadd.f32 %v3233_v45, %v3220_v47  ;;  %v3275_v61 = vpop.f32.mrf.mxu0 }
 0x26a   :  { %v3261_v20 = vpop.f32.mrf.mxu2 }
 0x26b   :  { %v3248_v56 = vadd.f32 %v3247_v32, %v3234_v52  ;;  %v3262_v63 = vadd.f32 %v3261_v20, %v556_v60 }
 0x26d   :  { %vm3362_vm2 = vcmp.gt.f32.partialorder %v3248_v56, 0.0  ;;  %v3378_v17 = vmul.f32 0.2, %v3248_v56  ;;  %v3276_v50 = vadd.f32 %v3275_v61, %v3262_v63  ;;  %v3429_v63 = vperm.slane %v14035_v39, 1 }
 0x26f   :  { %v3394_v30 = vsel %vm3362_vm2, %v3248_v56, %v3378_v17 }
 0x270   :  { %v14032_v59 = vpack.c.bf16 %v3394_v30, %v3386_v38 }
 0x285   :  { %v3287_v19 = vpop.f32.mrf.mxu1 }
 0x286   :  { %v3288_v35 = vadd.f32 %v3287_v19, %v3274_v9 }
 0x28d   :  { %v3301_v26 = vpop.f32.mrf.mxu3  ;;  %v3289_v12 = vpop.f32.mrf.mxu1 }
 0x28e   :  { %v3302_v15 = vadd.f32 %v3301_v26, %v3288_v35  ;;  %v3290_v13 = vadd.f32 %v3289_v12, %v3276_v50 }
 0x28f   :  { %v3329_v10 = vpop.f32.mrf.mxu0 }
 0x293   :  { %v3315_v14 = vpop.f32.mrf.mxu2 }
 0x294   :  { %v3316_v23 = vadd.f32 %v3315_v14, %v3302_v15 }
 0x295   :  { %v3303_v48 = vpop.f32.mrf.mxu3  ;;  %v3343_v24 = vpop.f32.mrf.mxu1 }
 0x296   :  { %v3304_v34 = vadd.f32 %v3303_v48, %v3290_v13  ;;  %v3330_v27 = vadd.f32 %v3329_v10, %v3316_v23  ;;  %v3431_v23 = vperm.slane %v14035_v39, 3 }
 0x297   :  { %v3331_v22 = vpop.f32.mrf.mxu0 }
 0x298   :  { %v3344_v29 = vadd.f32 %v3343_v24, %v3330_v27 }
 0x29a   :  { %v3371_v32 = vmul.f32 0.2, %v3344_v29  ;;  %vm3355_vm3 = vcmp.gt.f32.partialorder %v3344_v29, 0.0 }
 0x29b   :  { %v3317_v25 = vpop.f32.mrf.mxu2 }
 0x29c   :  { %v3318_v37 = vadd.f32 %v3317_v25, %v3304_v34  ;;  %v3387_v45 = vsel %vm3355_vm3, %v3344_v29, %v3371_v32 }
 0x29d   :  { %v3514_v55 = vpop.f32.mrf.mxu3  ;;  %v3345_v40 = vpop.f32.mrf.mxu1 }
 0x29e   :  { %v3332_v31 = vadd.f32 %v3331_v22, %v3318_v37  ;;  %v3515_v36 = vadd.f32 %v3514_v55, %v3428_v58 }
 0x29f   :  { %v3570_v33 = vpop.f32.mrf.mxu0 }
 0x2a0   :  { %v3571_v21 = vadd.f32 %v3570_v33, %v3432_v28  ;;  %v3346_v41 = vadd.f32 %v3345_v40, %v3332_v31  ;;  %vm3617_vm5 = vcmp.gt.f32.partialorder %v3515_v36, 0.0  ;;  %v3633_v52 = vmul.f32 0.2, %v3515_v36 }
 0x2a2   :  { %vm3363_vm4 = vcmp.gt.f32.partialorder %v3346_v41, 0.0  ;;  %v3379_v47 = vmul.f32 0.2, %v3346_v41  ;;  %vm3621_vm6 = vcmp.gt.f32.partialorder %v3571_v21, 0.0  ;;  %v3637_v53 = vmul.f32 0.2, %v3571_v21 }
 0x2a3   :  { %v3542_v43 = vpop.f32.mrf.mxu2  ;;  %v3649_v19 = vsel %vm3617_vm5, %v3515_v36, %v3633_v52 }
 0x2a4   :  { %v3395_v11 = vsel %vm3363_vm4, %v3346_v41, %v3379_v47  ;;  %v3543_v38 = vadd.f32 %v3542_v43, %v3430_v62  ;;  %v3653_v9 = vsel %vm3621_vm6, %v3571_v21, %v3637_v53 }
 0x2a5   :  { %v3516_v56 = vpop.f32.mrf.mxu3  ;;  %v14040_v57 = vpack.c.bf16 %v3395_v11, %v3387_v45  ;;  %v3528_v20 = vpop.f32.mrf.mxu1 }
 0x2a6   :  { %v3517_v30 = vadd.f32 %v3516_v56, %v3428_v58  ;;  %v3635_v10 = vmul.f32 0.2, %v3543_v38  ;;  %vm3619_vm9 = vcmp.gt.f32.partialorder %v3543_v38, 0.0  ;;  %v3529_v48 = vadd.f32 %v3528_v20, %v3429_v63 }
 0x2a7   :  { %v3572_v17 = vpop.f32.mrf.mxu0  ;;  %v3434_v58 = vperm.slane %v14035_v39, 6 }
 0x2a8   :  { %v3573_v60 = vadd.f32 %v3572_v17, %v3432_v28  ;;  %vm3625_vm7 = vcmp.gt.f32.partialorder %v3517_v30, 0.0  ;;  %v3641_v61 = vmul.f32 0.2, %v3517_v30  ;;  %v3651_v16 = vsel %vm3619_vm9, %v3543_v38, %v3635_v10 }
 0x2a9   :  { %v3634_v25 = vmul.f32 0.2, %v3529_v48  ;;  %vm3618_vm11 = vcmp.gt.f32.partialorder %v3529_v48, 0.0 }
 0x2aa   :  { %vm3629_vm8 = vcmp.gt.f32.partialorder %v3573_v60, 0.0  ;;  %v3645_v8 = vmul.f32 0.2, %v3573_v60  ;;  %v3657_v35 = vsel %vm3625_vm7, %v3517_v30, %v3641_v61 }
 0x2ab   :  { %v3544_v26 = vpop.f32.mrf.mxu2  ;;  %v14044_v14 = vpack.c.bf16 %v3657_v35, %v3649_v19  ;;  %v3650_v28 = vsel %vm3618_vm11, %v3529_v48, %v3634_v25 }
 0x2ac   :  { %v3661_v12 = vsel %vm3629_vm8, %v3573_v60, %v3645_v8  ;;  %v3545_v50 = vadd.f32 %v3544_v26, %v3430_v62  ;;  %v3433_v62 = vperm.slane %v14035_v39, 5  ;;  %v3435_v8 = vperm.slane %v14035_v39, 7 }
 0x2ad   :  { %v14046_v15 = vpack.c.bf16 %v3661_v12, %v3653_v9  ;;  %v3556_v22 = vpop.f32.mrf.mxu3  ;;  %v3530_v24 = vpop.f32.mrf.mxu1 }
 0x2ae   :  { %vm3627_vm10 = vcmp.gt.f32.partialorder %v3545_v50, 0.0  ;;  %v3643_v13 = vmul.f32 0.2, %v3545_v50  ;;  %v3531_v27 = vadd.f32 %v3530_v24, %v3429_v63  ;;  %v3557_v29 = vadd.f32 %v3556_v22, %v3431_v23 }
 0x2b0   :  { %v3659_v18 = vsel %vm3627_vm10, %v3545_v50, %v3643_v13  ;;  %vm3626_vm12 = vcmp.gt.f32.partialorder %v3531_v27, 0.0  ;;  %v3642_v55 = vmul.f32 0.2, %v3531_v27  ;;  %v3636_v32 = vmul.f32 0.2, %v3557_v29 }
 0x2b1   :  { %v14049_v34 = vpack.c.bf16 %v3659_v18, %v3651_v16  ;;  %vm3620_vm13 = vcmp.gt.f32.partialorder %v3557_v29, 0.0 }
 0x2b2   :  { %v3658_v33 = vsel %vm3626_vm12, %v3531_v27, %v3642_v55  ;;  %v3652_v45 = vsel %vm3620_vm13, %v3557_v29, %v3636_v32 }
 0x2b3   :  { %v3598_v37 = vpop.f32.mrf.mxu2  ;;  %v14052_v36 = vpack.c.bf16 %v3658_v33, %v3650_v28 }
 0x2b4   :  { %v3599_v40 = vadd.f32 %v3598_v37, %v3434_v58 }
 0x2b5   :  { %v3558_v31 = vpop.f32.mrf.mxu3  ;;  %v3584_v43 = vpop.f32.mrf.mxu1 }
 0x2b6   :  { %v3559_v21 = vadd.f32 %v3558_v31, %v3431_v23  ;;  %v3639_v52 = vmul.f32 0.2, %v3599_v40  ;;  %vm3623_vm15 = vcmp.gt.f32.partialorder %v3599_v40, 0.0  ;;  %v3585_v38 = vadd.f32 %v3584_v43, %v3433_v62 }
 0x2b8   :  { %vm3628_vm14 = vcmp.gt.f32.partialorder %v3559_v21, 0.0  ;;  %v3644_v41 = vmul.f32 0.2, %v3559_v21  ;;  %v3655_v60 = vsel %vm3623_vm15, %v3599_v40, %v3639_v52  ;;  %v3638_v9 = vmul.f32 0.2, %v3585_v38 }
 0x2b9   :  { %vm3622_vm1 = vcmp.gt.f32.partialorder %v3585_v38, 0.0 }
 0x2ba   :  { %v3660_v53 = vsel %vm3628_vm14, %v3559_v21, %v3644_v41  ;;  %v3654_v35 = vsel %vm3622_vm1, %v3585_v38, %v3638_v9 }
 0x2bb   :  { %v3600_v47 = vpop.f32.mrf.mxu2  ;;  %v14055_v56 = vpack.c.bf16 %v3660_v53, %v3652_v45 }
 0x2bc   :  { %v3601_v11 = vadd.f32 %v3600_v47, %v3434_v58 }
 0x2bd   :  { %v3612_v30 = vpop.f32.mrf.mxu3  ;;  %v3586_v19 = vpop.f32.mrf.mxu1 }
 0x2be   :  { %vm3631_vm0 = vcmp.gt.f32.partialorder %v3601_v11, 0.0  ;;  %v3647_v17 = vmul.f32 0.2, %v3601_v11  ;;  %v3587_v63 = vadd.f32 %v3586_v19, %v3433_v62  ;;  %v3613_v26 = vadd.f32 %v3612_v30, %v3435_v8 }
 0x2c0   :  { %v3663_v61 = vsel %vm3631_vm0, %v3601_v11, %v3647_v17  ;;  %vm3630_vm2 = vcmp.gt.f32.partialorder %v3587_v63, 0.0  ;;  %v3646_v10 = vmul.f32 0.2, %v3587_v63  ;;  %v3640_v13 = vmul.f32 0.2, %v3613_v26 }
 0x2c1   :  { %v14058_v20 = vpack.c.bf16 %v3663_v61, %v3655_v60  ;;  %vm3624_vm3 = vcmp.gt.f32.partialorder %v3613_v26, 0.0 }
 0x2c2   :  { %v3662_v12 = vsel %vm3630_vm2, %v3587_v63, %v3646_v10  ;;  %v3656_v39 = vsel %vm3624_vm3, %v3613_v26, %v3640_v13 }
 0x2c3   :  { %v14060_v48 = vpack.c.bf16 %v3662_v12, %v3654_v35 }
 0x2c5   :  { %v3614_v50 = vpop.f32.mrf.mxu3 }
 0x2c6   :  { %v3615_v22 = vadd.f32 %v3614_v50, %v3435_v8 }
 0x2c8   :  { %vm3632_vm4 = vcmp.gt.f32.partialorder %v3615_v22, 0.0  ;;  %v3648_v16 = vmul.f32 0.2, %v3615_v22 }
 0x2ca   :  { %v3664_v18 = vsel %vm3632_vm4, %v3615_v22, %v3648_v16 }
 0x2cb   :  { %v14062_v23 = vpack.c.bf16 %v3664_v18, %v3656_v39 }
 0x2cc   :  { %13737 = dma.done.wait [#allocation5], 32768 }
 0x2cd   :  { %13738 = vsyncadd [#allocation5], 4294934528 }
 0x2ce   :  { %13739 = dma.done.wait [#allocation5 + $0x1], 32768 }
 0x2cf   :  { %13740 = vsyncadd [#allocation5 + $0x1], 4294934528  ;;  %v10348_v24 = vld [vmem:[#allocation3 + $0xe0] sm:$0xf]  ;;  %v13236_v25 = vld [vmem:[#allocation3 + $0xec] sm:$0xf0] }
 0x2d0   :  { %v10476_v27 = vld [vmem:[#allocation3 + $0x1e0] sm:$0xf]  ;;  %v10349_v37 = vor.u32 %v13236_v25, %v10348_v24  ;;  %v13268_v29 = vld [vmem:[#allocation3 + $0x1ec] sm:$0xf0]  ;;  %v13038_v4 = vld [vmem:[#allocation2 + $0x2c4] sm:$0xf] }
 0x2d1   :  { %v10604_v58 = vld [vmem:[#allocation3 + $0x2e0] sm:$0xf]  ;;  %v13300_v55 = vld [vmem:[#allocation3 + $0x2ec] sm:$0xf0]  ;;  %v10477_v28 = vor.u32 %v13268_v29, %v10476_v27  ;;  %v11620_v2 = vld [vmem:[#allocation2 + $0x2c8] sm:$0xf] }
 0x2d2   :  { %v10605_v33 = vor.u32 %v13300_v55, %v10604_v58  ;;  %v10732_v31 = vld [vmem:[#allocation3 + $0x3e0] sm:$0xf]  ;;  %v13332_v32 = vld [vmem:[#allocation3 + $0x3ec] sm:$0xf0]  ;;  %5471 = vmatpush.bf16.msra.mxu0 %v10349_v37  ;;  %vm7806_vm11 = vcmask 1040384   ;;  %vm7808_vm3 = vcmask 1042434  }
 0x2d3   :  { %v10332_v40 = vld [vmem:[#allocation3 + $0xc0] sm:$0xf]  ;;  %v10733_v21 = vor.u32 %v13332_v32, %v10732_v31  ;;  %v13232_v41 = vld [vmem:[#allocation3 + $0xcc] sm:$0xf0]  ;;  %5485 = vmatpush.bf16.msra.mxu1 %v10477_v28  ;;  %vm7810_vm4 = vcmask 1041408  }
 0x2d4   :  { %v10460_v43 = vld [vmem:[#allocation3 + $0x1c0] sm:$0xf]  ;;  %v13264_v62 = vld [vmem:[#allocation3 + $0x1cc] sm:$0xf0]  ;;  %5499 = vmatpush.bf16.msra.mxu2 %v10605_v33  ;;  %v10333_v47 = vor.u32 %v13232_v41, %v10332_v40 }
 0x2d5   :  { %v10461_v45 = vor.u32 %v13264_v62, %v10460_v43  ;;  %v10588_v52 = vld [vmem:[#allocation3 + $0x2c0] sm:$0xf]  ;;  %v13296_v53 = vld [vmem:[#allocation3 + $0x2cc] sm:$0xf0]  ;;  %5513 = vmatpush.bf16.msra.mxu3 %v10733_v21 }
 0x2d6   :  { %v10716_v11 = vld [vmem:[#allocation3 + $0x3c0] sm:$0xf]  ;;  %v10589_v17 = vor.u32 %v13296_v53, %v10588_v52  ;;  %v13328_v38 = vld [vmem:[#allocation3 + $0x3cc] sm:$0xf0]  ;;  %5472 = vmatpush.bf16.msra.mxu0 %v10333_v47 }
 0x2d7   :  { %v10316_v30 = vld [vmem:[#allocation3 + $0xa0] sm:$0xf]  ;;  %v13228_v60 = vld [vmem:[#allocation3 + $0xac] sm:$0xf0]  ;;  %v10717_v61 = vor.u32 %v13328_v38, %v10716_v11  ;;  %5486 = vmatpush.bf16.msra.mxu1 %v10461_v45 }
 0x2d8   :  { %v10444_v8 = vld [vmem:[#allocation3 + $0x1a0] sm:$0xf]  ;;  %v13260_v19 = vld [vmem:[#allocation3 + $0x1ac] sm:$0xf0]  ;;  %v10317_v63 = vor.u32 %v13228_v60, %v10316_v30  ;;  %5500 = vmatpush.bf16.msra.mxu2 %v10589_v17 }
 0x2d9   :  { %v10572_v9 = vld [vmem:[#allocation3 + $0x2a0] sm:$0xf]  ;;  %v13292_v26 = vld [vmem:[#allocation3 + $0x2ac] sm:$0xf0]  ;;  %v10445_v12 = vor.u32 %v13260_v19, %v10444_v8  ;;  %5514 = vmatpush.bf16.msra.mxu3 %v10717_v61 }
 0x2da   :  { %v10700_v10 = vld [vmem:[#allocation3 + $0x3a0] sm:$0xf]  ;;  %v13324_v35 = vld [vmem:[#allocation3 + $0x3ac] sm:$0xf0]  ;;  %v10573_v50 = vor.u32 %v13292_v26, %v10572_v9  ;;  %5473 = vmatpush.bf16.msra.mxu0 %v10317_v63 }
 0x2db   :  { %v10300_v13 = vld [vmem:[#allocation3 + $0x80] sm:$0xf]  ;;  %v13224_v22 = vld [vmem:[#allocation3 + $0x8c] sm:$0xf0]  ;;  %v10701_v39 = vor.u32 %v13324_v35, %v10700_v10  ;;  %5487 = vmatpush.bf16.msra.mxu1 %v10445_v12 }
 0x2dc   :  { %v10428_v16 = vld [vmem:[#allocation3 + $0x180] sm:$0xf]  ;;  %v13256_v18 = vld [vmem:[#allocation3 + $0x18c] sm:$0xf0]  ;;  %v10301_v29 = vor.u32 %v13224_v22, %v10300_v13  ;;  %5501 = vmatpush.bf16.msra.mxu2 %v10573_v50 }
 0x2dd   :  { %v10556_v24 = vld [vmem:[#allocation3 + $0x280] sm:$0xf]  ;;  %v13288_v25 = vld [vmem:[#allocation3 + $0x28c] sm:$0xf0]  ;;  %v10429_v58 = vor.u32 %v13256_v18, %v10428_v16  ;;  %5515 = vmatpush.bf16.msra.mxu3 %v10701_v39 }
 0x2de   :  { %v10684_v27 = vld [vmem:[#allocation3 + $0x380] sm:$0xf]  ;;  %v13320_v37 = vld [vmem:[#allocation3 + $0x38c] sm:$0xf0]  ;;  %v10557_v55 = vor.u32 %v13288_v25, %v10556_v24  ;;  %5474 = vmatpush.bf16.msra.mxu0 %v10301_v29 }
 0x2df   :  { %v10284_v28 = vld [vmem:[#allocation3 + $0x60] sm:$0xf]  ;;  %v13220_v33 = vld [vmem:[#allocation3 + $0x6c] sm:$0xf0]  ;;  %v10685_v32 = vor.u32 %v13320_v37, %v10684_v27  ;;  %5488 = vmatpush.bf16.msra.mxu1 %v10429_v58 }
 0x2e0   :  { %v10412_v31 = vld [vmem:[#allocation3 + $0x160] sm:$0xf]  ;;  %v13252_v40 = vld [vmem:[#allocation3 + $0x16c] sm:$0xf0]  ;;  %v10285_v47 = vor.u32 %v13220_v33, %v10284_v28  ;;  %5502 = vmatpush.bf16.msra.mxu2 %v10557_v55 }
 0x2e1   :  { %v10540_v21 = vld [vmem:[#allocation3 + $0x260] sm:$0xf]  ;;  %v13284_v41 = vld [vmem:[#allocation3 + $0x26c] sm:$0xf0]  ;;  %v10413_v45 = vor.u32 %v13252_v40, %v10412_v31  ;;  %5516 = vmatpush.bf16.msra.mxu3 %v10685_v32 }
 0x2e2   :  { %v10668_v43 = vld [vmem:[#allocation3 + $0x360] sm:$0xf]  ;;  %v13316_v62 = vld [vmem:[#allocation3 + $0x36c] sm:$0xf0]  ;;  %v10541_v52 = vor.u32 %v13284_v41, %v10540_v21  ;;  %5475 = vmatpush.bf16.msra.mxu0 %v10285_v47 }
 0x2e3   :  { %v10268_v53 = vld [vmem:[#allocation3 + $0x40] sm:$0xf]  ;;  %v13216_v11 = vld [vmem:[#allocation3 + $0x4c] sm:$0xf0]  ;;  %v10669_v38 = vor.u32 %v13316_v62, %v10668_v43  ;;  %5489 = vmatpush.bf16.msra.mxu1 %v10413_v45 }
 0x2e4   :  { %v10396_v17 = vld [vmem:[#allocation3 + $0x140] sm:$0xf]  ;;  %v13248_v30 = vld [vmem:[#allocation3 + $0x14c] sm:$0xf0]  ;;  %v10269_v9 = vor.u32 %v13216_v11, %v10268_v53  ;;  %5503 = vmatpush.bf16.msra.mxu2 %v10541_v52 }
 0x2e5   :  { %v10524_v60 = vld [vmem:[#allocation3 + $0x240] sm:$0xf]  ;;  %v13280_v61 = vld [vmem:[#allocation3 + $0x24c] sm:$0xf0]  ;;  %v10397_v63 = vor.u32 %v13248_v30, %v10396_v17  ;;  %5517 = vmatpush.bf16.msra.mxu3 %v10669_v38 }
 0x2e6   :  { %v10652_v8 = vld [vmem:[#allocation3 + $0x340] sm:$0xf]  ;;  %v13312_v19 = vld [vmem:[#allocation3 + $0x34c] sm:$0xf0]  ;;  %v10525_v26 = vor.u32 %v13280_v61, %v10524_v60  ;;  %5476 = vmatpush.bf16.msra.mxu0 %v10269_v9 }
 0x2e7   :  { %v10252_v10 = vld [vmem:[#allocation3 + $0x20] sm:$0xf]  ;;  %v13212_v35 = vld [vmem:[#allocation3 + $0x2c] sm:$0xf0]  ;;  %v10653_v50 = vor.u32 %v13312_v19, %v10652_v8  ;;  %5490 = vmatpush.bf16.msra.mxu1 %v10397_v63 }
 0x2e8   :  { %v10380_v12 = vld [vmem:[#allocation3 + $0x120] sm:$0xf]  ;;  %v13244_v13 = vld [vmem:[#allocation3 + $0x12c] sm:$0xf0]  ;;  %v10253_v24 = vor.u32 %v13212_v35, %v10252_v10  ;;  %5504 = vmatpush.bf16.msra.mxu2 %v10525_v26 }
 0x2e9   :  { %v10508_v22 = vld [vmem:[#allocation3 + $0x220] sm:$0xf]  ;;  %v13276_v16 = vld [vmem:[#allocation3 + $0x22c] sm:$0xf0]  ;;  %v10381_v37 = vor.u32 %v13244_v13, %v10380_v12  ;;  %5518 = vmatpush.bf16.msra.mxu3 %v10653_v50 }
 0x2ea   :  { %v10636_v39 = vld [vmem:[#allocation3 + $0x320] sm:$0xf]  ;;  %v13308_v18 = vld [vmem:[#allocation3 + $0x32c] sm:$0xf0]  ;;  %v10509_v29 = vor.u32 %v13276_v16, %v10508_v22  ;;  %5477 = vmatpush.bf16.msra.mxu0 %v10253_v24 }
 0x2eb   :  { %v10236_v25 = vld [vmem:[#allocation3] sm:$0xf]  ;;  %v13208_v27 = vld [vmem:[#allocation3 + $0xc] sm:$0xf0]  ;;  %v10637_v33 = vor.u32 %v13308_v18, %v10636_v39  ;;  %5491 = vmatpush.bf16.msra.mxu1 %v10381_v37 }
 0x2ec   :  { %v10364_v58 = vld [vmem:[#allocation3 + $0x100] sm:$0xf]  ;;  %v13240_v55 = vld [vmem:[#allocation3 + $0x10c] sm:$0xf0]  ;;  %v10237_v62 = vor.u32 %v13208_v27, %v10236_v25  ;;  %5505 = vmatpush.bf16.msra.mxu2 %v10509_v29 }
 0x2ed   :  { %v10492_v28 = vld [vmem:[#allocation3 + $0x200] sm:$0xf]  ;;  %v13272_v31 = vld [vmem:[#allocation3 + $0x20c] sm:$0xf0]  ;;  %v10365_v53 = vor.u32 %v13240_v55, %v10364_v58  ;;  %5519 = vmatpush.bf16.msra.mxu3 %v10637_v33 }
 0x2ee   :  { %v10620_v32 = vld [vmem:[#allocation3 + $0x300] sm:$0xf]  ;;  %v13304_v40 = vld [vmem:[#allocation3 + $0x30c] sm:$0xf0]  ;;  %v10493_v11 = vor.u32 %v13272_v31, %v10492_v28  ;;  %5478 = vmatpush.bf16.msra.mxu0 %v10237_v62 }
 0x2ef   :  { %v10860_v21 = vld [vmem:[#allocation3 + $0x4e0] sm:$0xf]  ;;  %v13364_v41 = vld [vmem:[#allocation3 + $0x4ec] sm:$0xf0]  ;;  %v10621_v30 = vor.u32 %v13304_v40, %v10620_v32  ;;  %5492 = vmatpush.bf16.msra.mxu1 %v10365_v53 }
 0x2f0   :  { %v10988_v43 = vld [vmem:[#allocation3 + $0x5e0] sm:$0xf]  ;;  %v13396_v47 = vld [vmem:[#allocation3 + $0x5ec] sm:$0xf0]  ;;  %v10861_v60 = vor.u32 %v13364_v41, %v10860_v21  ;;  %5506 = vmatpush.bf16.msra.mxu2 %v10493_v11 }
 0x2f1   :  { %v11116_v45 = vld [vmem:[#allocation3 + $0x6e0] sm:$0xf]  ;;  %v13428_v52 = vld [vmem:[#allocation3 + $0x6ec] sm:$0xf0]  ;;  %v10989_v61 = vor.u32 %v13396_v47, %v10988_v43  ;;  %5520 = vmatpush.bf16.msra.mxu3 %v10621_v30  ;;  %5479 = vmatmul.bf16.vlgmr.msra.gmra.mxu0 %v14044_v14 }
 0x2f2   :  { %v11244_v17 = vld [vmem:[#allocation3 + $0x7e0] sm:$0xf]  ;;  %v13460_v38 = vld [vmem:[#allocation3 + $0x7ec] sm:$0xf0]  ;;  %v11117_v8 = vor.u32 %v13428_v52, %v11116_v45  ;;  %5527 = vmatpush.bf16.msrb.mxu0 %v10861_v60  ;;  %5493 = vmatmul.bf16.vlgmr.msra.gmra.mxu1 %v14052_v36 }
 0x2f3   :  { %v10844_v19 = vld [vmem:[#allocation3 + $0x4c0] sm:$0xf]  ;;  %v13360_v9 = vld [vmem:[#allocation3 + $0x4cc] sm:$0xf0]  ;;  %v11245_v26 = vor.u32 %v13460_v38, %v11244_v17  ;;  %5541 = vmatpush.bf16.msrb.mxu1 %v10989_v61  ;;  %5507 = vmatmul.bf16.vlgmr.msra.gmra.mxu2 %v14049_v34 }
 0x2f4   :  { %v10972_v63 = vld [vmem:[#allocation3 + $0x5c0] sm:$0xf]  ;;  %v13392_v10 = vld [vmem:[#allocation3 + $0x5cc] sm:$0xf0]  ;;  %v10845_v22 = vor.u32 %v13360_v9, %v10844_v19  ;;  %5555 = vmatpush.bf16.msrb.mxu2 %v11117_v8  ;;  %5521 = vmatmul.bf16.vlgmr.msra.gmra.mxu3 %v14055_v56 }
 0x2f5   :  { %v11100_v35 = vld [vmem:[#allocation3 + $0x6c0] sm:$0xf]  ;;  %v13424_v12 = vld [vmem:[#allocation3 + $0x6cc] sm:$0xf0]  ;;  %v10973_v16 = vor.u32 %v13392_v10, %v10972_v63  ;;  %5569 = vmatpush.bf16.msrb.mxu3 %v11245_v26 }
 0x2f6   :  { %v11228_v50 = vld [vmem:[#allocation3 + $0x7c0] sm:$0xf]  ;;  %v13456_v13 = vld [vmem:[#allocation3 + $0x7cc] sm:$0xf0]  ;;  %v11101_v39 = vor.u32 %v13424_v12, %v11100_v35  ;;  %5528 = vmatpush.bf16.msrb.mxu0 %v10845_v22 }
 0x2f7   :  { %v10828_v18 = vld [vmem:[#allocation3 + $0x4a0] sm:$0xf]  ;;  %v13356_v24 = vld [vmem:[#allocation3 + $0x4ac] sm:$0xf0]  ;;  %v11229_v27 = vor.u32 %v13456_v13, %v11228_v50  ;;  %5542 = vmatpush.bf16.msrb.mxu1 %v10973_v16 }
 0x2f8   :  { %v10956_v25 = vld [vmem:[#allocation3 + $0x5a0] sm:$0xf]  ;;  %v13388_v37 = vld [vmem:[#allocation3 + $0x5ac] sm:$0xf0]  ;;  %v10829_v33 = vor.u32 %v13356_v24, %v10828_v18  ;;  %5556 = vmatpush.bf16.msrb.mxu2 %v11101_v39 }
 0x2f9   :  { %v11084_v29 = vld [vmem:[#allocation3 + $0x6a0] sm:$0xf]  ;;  %v13420_v58 = vld [vmem:[#allocation3 + $0x6ac] sm:$0xf0]  ;;  %v10957_v31 = vor.u32 %v13388_v37, %v10956_v25  ;;  %5570 = vmatpush.bf16.msrb.mxu3 %v11229_v27 }
 0x2fa   :  { %v11212_v55 = vld [vmem:[#allocation3 + $0x7a0] sm:$0xf]  ;;  %v13452_v28 = vld [vmem:[#allocation3 + $0x7ac] sm:$0xf0]  ;;  %v11085_v32 = vor.u32 %v13420_v58, %v11084_v29  ;;  %5529 = vmatpush.bf16.msrb.mxu0 %v10829_v33 }
 0x2fb   :  { %v10812_v40 = vld [vmem:[#allocation3 + $0x480] sm:$0xf]  ;;  %v13352_v21 = vld [vmem:[#allocation3 + $0x48c] sm:$0xf0]  ;;  %v11213_v43 = vor.u32 %v13452_v28, %v11212_v55  ;;  %5543 = vmatpush.bf16.msrb.mxu1 %v10957_v31 }
 0x2fc   :  { %v10940_v41 = vld [vmem:[#allocation3 + $0x580] sm:$0xf]  ;;  %v13384_v62 = vld [vmem:[#allocation3 + $0x58c] sm:$0xf0]  ;;  %v10813_v11 = vor.u32 %v13352_v21, %v10812_v40  ;;  %5557 = vmatpush.bf16.msrb.mxu2 %v11085_v32 }
 0x2fd   :  { %v11068_v47 = vld [vmem:[#allocation3 + $0x680] sm:$0xf]  ;;  %v13416_v45 = vld [vmem:[#allocation3 + $0x68c] sm:$0xf0]  ;;  %v10941_v17 = vor.u32 %v13384_v62, %v10940_v41  ;;  %5571 = vmatpush.bf16.msrb.mxu3 %v11213_v43 }
 0x2fe   :  { %v11196_v52 = vld [vmem:[#allocation3 + $0x780] sm:$0xf]  ;;  %v13448_v53 = vld [vmem:[#allocation3 + $0x78c] sm:$0xf0]  ;;  %v11069_v38 = vor.u32 %v13416_v45, %v11068_v47  ;;  %5530 = vmatpush.bf16.msrb.mxu0 %v10813_v11 }
 0x2ff   :  { %v10796_v30 = vld [vmem:[#allocation3 + $0x460] sm:$0xf]  ;;  %v13348_v60 = vld [vmem:[#allocation3 + $0x46c] sm:$0xf0]  ;;  %v11197_v8 = vor.u32 %v13448_v53, %v11196_v52  ;;  %5544 = vmatpush.bf16.msrb.mxu1 %v10941_v17 }
 0x300   :  { %v10924_v61 = vld [vmem:[#allocation3 + $0x560] sm:$0xf]  ;;  %v13380_v19 = vld [vmem:[#allocation3 + $0x56c] sm:$0xf0]  ;;  %v10797_v35 = vor.u32 %v13348_v60, %v10796_v30  ;;  %5558 = vmatpush.bf16.msrb.mxu2 %v11069_v38 }
 0x301   :  { %v11052_v9 = vld [vmem:[#allocation3 + $0x660] sm:$0xf]  ;;  %v13412_v63 = vld [vmem:[#allocation3 + $0x66c] sm:$0xf0]  ;;  %v10925_v12 = vor.u32 %v13380_v19, %v10924_v61  ;;  %5572 = vmatpush.bf16.msrb.mxu3 %v11197_v8 }
 0x302   :  { %v11180_v26 = vld [vmem:[#allocation3 + $0x760] sm:$0xf]  ;;  %v13444_v10 = vld [vmem:[#allocation3 + $0x76c] sm:$0xf0]  ;;  %v11053_v50 = vor.u32 %v13412_v63, %v11052_v9  ;;  %5531 = vmatpush.bf16.msrb.mxu0 %v10797_v35  ;;  %v13234_v9 = vld [vmem:[#allocation3 + $0xe4] sm:$0xf] }
 0x303   :  { %v10780_v13 = vld [vmem:[#allocation3 + $0x440] sm:$0xf]  ;;  %v13344_v22 = vld [vmem:[#allocation3 + $0x44c] sm:$0xf0]  ;;  %v11181_v39 = vor.u32 %v13444_v10, %v11180_v26  ;;  %5545 = vmatpush.bf16.msrb.mxu1 %v10925_v12  ;;  %v10350_v63 = vld [vmem:[#allocation3 + $0xf0] sm:$0xf0] }
 0x304   :  { %v10908_v16 = vld [vmem:[#allocation3 + $0x540] sm:$0xf]  ;;  %v13376_v18 = vld [vmem:[#allocation3 + $0x54c] sm:$0xf0]  ;;  %v10781_v29 = vor.u32 %v13344_v22, %v10780_v13  ;;  %5559 = vmatpush.bf16.msrb.mxu2 %v11053_v50  ;;  %v13266_v26 = vld [vmem:[#allocation3 + $0x1e4] sm:$0xf] }
 0x305   :  { %v11036_v24 = vld [vmem:[#allocation3 + $0x640] sm:$0xf]  ;;  %v13408_v25 = vld [vmem:[#allocation3 + $0x64c] sm:$0xf0]  ;;  %v10909_v58 = vor.u32 %v13376_v18, %v10908_v16  ;;  %5573 = vmatpush.bf16.msrb.mxu3 %v11181_v39  ;;  %v10478_v35 = vld [vmem:[#allocation3 + $0x1f0] sm:$0xf0] }
 0x306   :  { %v11164_v27 = vld [vmem:[#allocation3 + $0x740] sm:$0xf]  ;;  %v13440_v37 = vld [vmem:[#allocation3 + $0x74c] sm:$0xf0]  ;;  %v11037_v55 = vor.u32 %v13408_v25, %v11036_v24  ;;  %5532 = vmatpush.bf16.msrb.mxu0 %v10781_v29  ;;  %v13298_v12 = vld [vmem:[#allocation3 + $0x2e4] sm:$0xf]  ;;  %v10353_v24 = vor.u32 %v13234_v9, %v10350_v63  ;;  %v10481_v25 = vor.u32 %v13266_v26, %v10478_v35 }
 0x307   :  { %v10764_v28 = vld [vmem:[#allocation3 + $0x420] sm:$0xf]  ;;  %v13340_v33 = vld [vmem:[#allocation3 + $0x42c] sm:$0xf0]  ;;  %v11165_v32 = vor.u32 %v13440_v37, %v11164_v27  ;;  %5546 = vmatpush.bf16.msrb.mxu1 %v10909_v58  ;;  %v10606_v50 = vld [vmem:[#allocation3 + $0x2f0] sm:$0xf0] }
 0x308   :  { %v10892_v31 = vld [vmem:[#allocation3 + $0x520] sm:$0xf]  ;;  %v13372_v40 = vld [vmem:[#allocation3 + $0x52c] sm:$0xf0]  ;;  %v10765_v47 = vor.u32 %v13340_v33, %v10764_v28  ;;  %5560 = vmatpush.bf16.msrb.mxu2 %v11037_v55  ;;  %v13330_v16 = vld [vmem:[#allocation3 + $0x3e4] sm:$0xf]  ;;  %v10609_v27 = vor.u32 %v13298_v12, %v10606_v50 }
 0x309   :  { %v11020_v21 = vld [vmem:[#allocation3 + $0x620] sm:$0xf]  ;;  %v13404_v41 = vld [vmem:[#allocation3 + $0x62c] sm:$0xf0]  ;;  %v10893_v53 = vor.u32 %v13372_v40, %v10892_v31  ;;  %5574 = vmatpush.bf16.msrb.mxu3 %v11165_v32  ;;  %v10734_v39 = vld [vmem:[#allocation3 + $0x3f0] sm:$0xf0] }
 0x30a   :  { %v11148_v43 = vld [vmem:[#allocation3 + $0x720] sm:$0xf]  ;;  %v13436_v62 = vld [vmem:[#allocation3 + $0x72c] sm:$0xf0]  ;;  %v11021_v11 = vor.u32 %v13404_v41, %v11020_v21  ;;  %5533 = vmatpush.bf16.msrb.mxu0 %v10765_v47  ;;  %v13230_v37 = vld [vmem:[#allocation3 + $0xc4] sm:$0xf]  ;;  %v10737_v55 = vor.u32 %v13330_v16, %v10734_v39 }
 0x30b   :  { %v10748_v45 = vld [vmem:[#allocation3 + $0x400] sm:$0xf]  ;;  %v13336_v52 = vld [vmem:[#allocation3 + $0x40c] sm:$0xf0]  ;;  %v11149_v60 = vor.u32 %v13436_v62, %v11148_v43  ;;  %5547 = vmatpush.bf16.msrb.mxu1 %v10893_v53  ;;  %v10334_v29 = vld [vmem:[#allocation3 + $0xd0] sm:$0xf0] }
 0x30c   :  { %v10876_v17 = vld [vmem:[#allocation3 + $0x500] sm:$0xf]  ;;  %v13368_v38 = vld [vmem:[#allocation3 + $0x50c] sm:$0xf0]  ;;  %v10749_v10 = vor.u32 %v13336_v52, %v10748_v45  ;;  %5561 = vmatpush.bf16.msrb.mxu2 %v11021_v11  ;;  %v13262_v58 = vld [vmem:[#allocation3 + $0x1c4] sm:$0xf]  ;;  %v10337_v21 = vor.u32 %v13230_v37, %v10334_v29 }
 0x30d   :  { %v11004_v30 = vld [vmem:[#allocation3 + $0x600] sm:$0xf]  ;;  %v13400_v61 = vld [vmem:[#allocation3 + $0x60c] sm:$0xf0]  ;;  %v10877_v13 = vor.u32 %v13368_v38, %v10876_v17  ;;  %5575 = vmatpush.bf16.msrb.mxu3 %v11149_v60  ;;  %v10462_v28 = vld [vmem:[#allocation3 + $0x1d0] sm:$0xf0] }
 0x30e   :  { %v11132_v8 = vld [vmem:[#allocation3 + $0x700] sm:$0xf]  ;;  %v13432_v19 = vld [vmem:[#allocation3 + $0x70c] sm:$0xf0]  ;;  %v11005_v22 = vor.u32 %v13400_v61, %v11004_v30  ;;  %5534 = vmatpush.bf16.msrb.mxu0 %v10749_v10  ;;  %v13294_v33 = vld [vmem:[#allocation3 + $0x2c4] sm:$0xf]  ;;  %v10465_v41 = vor.u32 %v13262_v58, %v10462_v28 }
 0x30f   :  { %v11133_v18 = vor.u32 %v13432_v19, %v11132_v8  ;;  %v10590_v31 = vld [vmem:[#allocation3 + $0x2d0] sm:$0xf0]  ;;  %5548 = vmatpush.bf16.msrb.mxu1 %v10877_v13  ;;  %v13326_v32 = vld [vmem:[#allocation3 + $0x3c4] sm:$0xf] }
 0x310   :  { %5562 = vmatpush.bf16.msrb.mxu2 %v11005_v22  ;;  %v10718_v40 = vld [vmem:[#allocation3 + $0x3d0] sm:$0xf0]  ;;  %v10593_v43 = vor.u32 %v13294_v33, %v10590_v31  ;;  %v13226_v62 = vld [vmem:[#allocation3 + $0xa4] sm:$0xf] }
 0x311   :  { %5576 = vmatpush.bf16.msrb.mxu3 %v11133_v18  ;;  %v10318_v47 = vld [vmem:[#allocation3 + $0xb0] sm:$0xf0]  ;;  %v13258_v45 = vld [vmem:[#allocation3 + $0x1a4] sm:$0xf]  ;;  %5535 = vmatmul.bf16.vlgmr.msrb.gmra.mxu0 %v14046_v15  ;;  %v10721_v52 = vor.u32 %v13326_v32, %v10718_v40 }
 0x312   :  { %5583 = vmatpush.bf16.msra.mxu0 %v10353_v24  ;;  %v10446_v53 = vld [vmem:[#allocation3 + $0x1b0] sm:$0xf0]  ;;  %v13290_v11 = vld [vmem:[#allocation3 + $0x2a4] sm:$0xf]  ;;  %5549 = vmatmul.bf16.vlgmr.msrb.gmra.mxu1 %v14060_v48  ;;  %v10321_v60 = vor.u32 %v13226_v62, %v10318_v47 }
 0x313   :  { %5597 = vmatpush.bf16.msra.mxu1 %v10481_v25  ;;  %v10574_v17 = vld [vmem:[#allocation3 + $0x2b0] sm:$0xf0]  ;;  %5563 = vmatmul.bf16.vlgmr.msrb.gmra.mxu2 %v14058_v20  ;;  %v13322_v38 = vld [vmem:[#allocation3 + $0x3a4] sm:$0xf]  ;;  %v10449_v61 = vor.u32 %v13258_v45, %v10446_v53 }
 0x314   :  { %5611 = vmatpush.bf16.msra.mxu2 %v10609_v27  ;;  %v10702_v30 = vld [vmem:[#allocation3 + $0x3b0] sm:$0xf0]  ;;  %5577 = vmatmul.bf16.vlgmr.msrb.gmra.mxu3 %v14062_v23  ;;  %v10577_v8 = vor.u32 %v13290_v11, %v10574_v17  ;;  %v13222_v19 = vld [vmem:[#allocation3 + $0x84] sm:$0xf] }
 0x315   :  { %5625 = vmatpush.bf16.msra.mxu3 %v10737_v55  ;;  %v10302_v9 = vld [vmem:[#allocation3 + $0x90] sm:$0xf0]  ;;  %v13254_v63 = vld [vmem:[#allocation3 + $0x184] sm:$0xf]  ;;  %v10705_v26 = vor.u32 %v13322_v38, %v10702_v30 }
 0x316   :  { %5584 = vmatpush.bf16.msra.mxu0 %v10337_v21  ;;  %v10430_v10 = vld [vmem:[#allocation3 + $0x190] sm:$0xf0]  ;;  %v13286_v35 = vld [vmem:[#allocation3 + $0x284] sm:$0xf]  ;;  %v10305_v22 = vor.u32 %v13222_v19, %v10302_v9 }
 0x317   :  { %5598 = vmatpush.bf16.msra.mxu1 %v10465_v41  ;;  %v10558_v12 = vld [vmem:[#allocation3 + $0x290] sm:$0xf0]  ;;  %v13318_v50 = vld [vmem:[#allocation3 + $0x384] sm:$0xf]  ;;  %v10433_v16 = vor.u32 %v13254_v63, %v10430_v10 }
 0x318   :  { %5612 = vmatpush.bf16.msra.mxu2 %v10593_v43  ;;  %v10686_v13 = vld [vmem:[#allocation3 + $0x390] sm:$0xf0]  ;;  %v10561_v39 = vor.u32 %v13286_v35, %v10558_v12  ;;  %v13218_v18 = vld [vmem:[#allocation3 + $0x64] sm:$0xf] }
 0x319   :  { %5626 = vmatpush.bf16.msra.mxu3 %v10721_v52  ;;  %v10286_v24 = vld [vmem:[#allocation3 + $0x70] sm:$0xf0]  ;;  %v13250_v25 = vld [vmem:[#allocation3 + $0x164] sm:$0xf]  ;;  %v10689_v27 = vor.u32 %v13318_v50, %v10686_v13 }
 0x31a   :  { %5585 = vmatpush.bf16.msra.mxu0 %v10321_v60  ;;  %v10414_v37 = vld [vmem:[#allocation3 + $0x170] sm:$0xf0]  ;;  %v13282_v29 = vld [vmem:[#allocation3 + $0x264] sm:$0xf]  ;;  %v10289_v33 = vor.u32 %v13218_v18, %v10286_v24 }
 0x31b   :  { %5599 = vmatpush.bf16.msra.mxu1 %v10449_v61  ;;  %v10542_v58 = vld [vmem:[#allocation3 + $0x270] sm:$0xf0]  ;;  %v13314_v55 = vld [vmem:[#allocation3 + $0x364] sm:$0xf]  ;;  %v10417_v31 = vor.u32 %v13250_v25, %v10414_v37 }
 0x31c   :  { %5613 = vmatpush.bf16.msra.mxu2 %v10577_v8  ;;  %v10670_v28 = vld [vmem:[#allocation3 + $0x370] sm:$0xf0]  ;;  %v10545_v32 = vor.u32 %v13282_v29, %v10542_v58  ;;  %v13214_v40 = vld [vmem:[#allocation3 + $0x44] sm:$0xf] }
 0x31d   :  { %5627 = vmatpush.bf16.msra.mxu3 %v10705_v26  ;;  %v10270_v21 = vld [vmem:[#allocation3 + $0x50] sm:$0xf0]  ;;  %v13246_v41 = vld [vmem:[#allocation3 + $0x144] sm:$0xf]  ;;  %v10673_v43 = vor.u32 %v13314_v55, %v10670_v28 }
 0x31e   :  { %5586 = vmatpush.bf16.msra.mxu0 %v10305_v22  ;;  %v10398_v62 = vld [vmem:[#allocation3 + $0x150] sm:$0xf0]  ;;  %v13278_v47 = vld [vmem:[#allocation3 + $0x244] sm:$0xf]  ;;  %v10273_v11 = vor.u32 %v13214_v40, %v10270_v21 }
 0x31f   :  { %5600 = vmatpush.bf16.msra.mxu1 %v10433_v16  ;;  %v10526_v45 = vld [vmem:[#allocation3 + $0x250] sm:$0xf0]  ;;  %v13310_v52 = vld [vmem:[#allocation3 + $0x344] sm:$0xf]  ;;  %v10401_v17 = vor.u32 %v13246_v41, %v10398_v62 }
 0x320   :  { %5614 = vmatpush.bf16.msra.mxu2 %v10561_v39  ;;  %v10654_v53 = vld [vmem:[#allocation3 + $0x350] sm:$0xf0]  ;;  %v10529_v38 = vor.u32 %v13278_v47, %v10526_v45  ;;  %v13210_v30 = vld [vmem:[#allocation3 + $0x24] sm:$0xf] }
 0x321   :  { %5628 = vmatpush.bf16.msra.mxu3 %v10689_v27  ;;  %v10254_v60 = vld [vmem:[#allocation3 + $0x30] sm:$0xf0]  ;;  %v13242_v61 = vld [vmem:[#allocation3 + $0x124] sm:$0xf]  ;;  %v10657_v8 = vor.u32 %v13310_v52, %v10654_v53 }
 0x322   :  { %5587 = vmatpush.bf16.msra.mxu0 %v10289_v33  ;;  %v10382_v19 = vld [vmem:[#allocation3 + $0x130] sm:$0xf0]  ;;  %v13274_v9 = vld [vmem:[#allocation3 + $0x224] sm:$0xf]  ;;  %v10257_v35 = vor.u32 %v13210_v30, %v10254_v60 }
 0x323   :  { %5601 = vmatpush.bf16.msra.mxu1 %v10417_v31  ;;  %v10510_v63 = vld [vmem:[#allocation3 + $0x230] sm:$0xf0]  ;;  %v13306_v26 = vld [vmem:[#allocation3 + $0x324] sm:$0xf]  ;;  %v10385_v13 = vor.u32 %v13242_v61, %v10382_v19 }
 0x324   :  { %5615 = vmatpush.bf16.msra.mxu2 %v10545_v32  ;;  %v10638_v10 = vld [vmem:[#allocation3 + $0x330] sm:$0xf0]  ;;  %v13206_v12 = vld [vmem:[#allocation3 + $0x4] sm:$0xf]  ;;  %v10513_v22 = vor.u32 %v13274_v9, %v10510_v63 }
 0x325   :  { %5629 = vmatpush.bf16.msra.mxu3 %v10673_v43  ;;  %v10238_v50 = vld [vmem:[#allocation3 + $0x10] sm:$0xf0]  ;;  %v13238_v16 = vld [vmem:[#allocation3 + $0x104] sm:$0xf]  ;;  %v10641_v24 = vor.u32 %v13306_v26, %v10638_v10 }
 0x326   :  { %5588 = vmatpush.bf16.msra.mxu0 %v10273_v11  ;;  %v10366_v39 = vld [vmem:[#allocation3 + $0x110] sm:$0xf0]  ;;  %v13270_v18 = vld [vmem:[#allocation3 + $0x204] sm:$0xf]  ;;  %v10241_v28 = vor.u32 %v13206_v12, %v10238_v50 }
 0x327   :  { %5602 = vmatpush.bf16.msra.mxu1 %v10401_v17  ;;  %v10494_v25 = vld [vmem:[#allocation3 + $0x210] sm:$0xf0]  ;;  %v13302_v27 = vld [vmem:[#allocation3 + $0x304] sm:$0xf]  ;;  %v10369_v40 = vor.u32 %v13238_v16, %v10366_v39 }
 0x328   :  { %5616 = vmatpush.bf16.msra.mxu2 %v10529_v38  ;;  %v10622_v37 = vld [vmem:[#allocation3 + $0x310] sm:$0xf0]  ;;  %v13362_v29 = vld [vmem:[#allocation3 + $0x4e4] sm:$0xf]  ;;  %v10497_v21 = vor.u32 %v13270_v18, %v10494_v25 }
 0x329   :  { %5630 = vmatpush.bf16.msra.mxu3 %v10657_v8  ;;  %v10862_v58 = vld [vmem:[#allocation3 + $0x4f0] sm:$0xf0]  ;;  %v13394_v55 = vld [vmem:[#allocation3 + $0x5e4] sm:$0xf]  ;;  %v10625_v62 = vor.u32 %v13302_v27, %v10622_v37 }
 0x32a   :  { %5589 = vmatpush.bf16.msra.mxu0 %v10257_v35  ;;  %v10990_v33 = vld [vmem:[#allocation3 + $0x5f0] sm:$0xf0]  ;;  %v13426_v31 = vld [vmem:[#allocation3 + $0x6e4] sm:$0xf]  ;;  %v10865_v47 = vor.u32 %v13362_v29, %v10862_v58 }
 0x32b   :  { %v11118_v32 = vld [vmem:[#allocation3 + $0x6f0] sm:$0xf0]  ;;  %5603 = vmatpush.bf16.msra.mxu1 %v10385_v13  ;;  %v13458_v41 = vld [vmem:[#allocation3 + $0x7e4] sm:$0xf]  ;;  %v10993_v45 = vor.u32 %v13394_v55, %v10990_v33 }
 0x32c   :  { %5617 = vmatpush.bf16.msra.mxu2 %v10513_v22  ;;  %v11246_v43 = vld [vmem:[#allocation3 + $0x7f0] sm:$0xf0]  ;;  %v11121_v52 = vor.u32 %v13426_v31, %v11118_v32  ;;  %v13358_v53 = vld [vmem:[#allocation3 + $0x4c4] sm:$0xf] }
 0x32d   :  { %5631 = vmatpush.bf16.msra.mxu3 %v10641_v24  ;;  %v10846_v11 = vld [vmem:[#allocation3 + $0x4d0] sm:$0xf0]  ;;  %v13390_v17 = vld [vmem:[#allocation3 + $0x5c4] sm:$0xf]  ;;  %v11249_v38 = vor.u32 %v13458_v41, %v11246_v43 }
 0x32e   :  { %5590 = vmatpush.bf16.msra.mxu0 %v10241_v28  ;;  %v10974_v30 = vld [vmem:[#allocation3 + $0x5d0] sm:$0xf0]  ;;  %v13422_v60 = vld [vmem:[#allocation3 + $0x6c4] sm:$0xf]  ;;  %v10849_v9 = vor.u32 %v13358_v53, %v10846_v11 }
 0x32f   :  { %v11102_v61 = vld [vmem:[#allocation3 + $0x6d0] sm:$0xf0]  ;;  %5604 = vmatpush.bf16.msra.mxu1 %v10369_v40  ;;  %v13454_v8 = vld [vmem:[#allocation3 + $0x7c4] sm:$0xf]  ;;  %v10977_v63 = vor.u32 %v13390_v17, %v10974_v30 }
 0x330   :  { %5618 = vmatpush.bf16.msra.mxu2 %v10497_v21  ;;  %v11230_v19 = vld [vmem:[#allocation3 + $0x7d0] sm:$0xf0]  ;;  %v11105_v26 = vor.u32 %v13422_v60, %v11102_v61  ;;  %v13354_v10 = vld [vmem:[#allocation3 + $0x4a4] sm:$0xf] }
 0x331   :  { %5632 = vmatpush.bf16.msra.mxu3 %v10625_v62  ;;  %v10830_v35 = vld [vmem:[#allocation3 + $0x4b0] sm:$0xf0]  ;;  %v13386_v12 = vld [vmem:[#allocation3 + $0x5a4] sm:$0xf]  ;;  %v11233_v50 = vor.u32 %v13454_v8, %v11230_v19  ;;  %5591 = vmatmul.bf16.vlgmr.msra.gmra.mxu0 %v14044_v14 }
 0x332   :  { %5639 = vmatpush.bf16.msrb.mxu0 %v10865_v47  ;;  %v10958_v13 = vld [vmem:[#allocation3 + $0x5b0] sm:$0xf0]  ;;  %v13418_v22 = vld [vmem:[#allocation3 + $0x6a4] sm:$0xf]  ;;  %5605 = vmatmul.bf16.vlgmr.msra.gmra.mxu1 %v14052_v36  ;;  %v10833_v24 = vor.u32 %v13354_v10, %v10830_v35 }
 0x333   :  { %5653 = vmatpush.bf16.msrb.mxu1 %v10993_v45  ;;  %v11086_v16 = vld [vmem:[#allocation3 + $0x6b0] sm:$0xf0]  ;;  %v13450_v39 = vld [vmem:[#allocation3 + $0x7a4] sm:$0xf]  ;;  %5619 = vmatmul.bf16.vlgmr.msra.gmra.mxu2 %v14049_v34  ;;  %v10961_v25 = vor.u32 %v13386_v12, %v10958_v13 }
 0x334   :  { %5667 = vmatpush.bf16.msrb.mxu2 %v11121_v52  ;;  %v11214_v18 = vld [vmem:[#allocation3 + $0x7b0] sm:$0xf0]  ;;  %5633 = vmatmul.bf16.vlgmr.msra.gmra.mxu3 %v14055_v56  ;;  %v11089_v27 = vor.u32 %v13418_v22, %v11086_v16  ;;  %v13350_v37 = vld [vmem:[#allocation3 + $0x484] sm:$0xf] }
 0x335   :  { %5681 = vmatpush.bf16.msrb.mxu3 %v11249_v38  ;;  %v10814_v29 = vld [vmem:[#allocation3 + $0x490] sm:$0xf0]  ;;  %v13382_v58 = vld [vmem:[#allocation3 + $0x584] sm:$0xf]  ;;  %v11217_v55 = vor.u32 %v13450_v39, %v11214_v18 }
 0x336   :  { %5640 = vmatpush.bf16.msrb.mxu0 %v10849_v9  ;;  %v10942_v28 = vld [vmem:[#allocation3 + $0x590] sm:$0xf0]  ;;  %v13414_v33 = vld [vmem:[#allocation3 + $0x684] sm:$0xf]  ;;  %v10817_v21 = vor.u32 %v13350_v37, %v10814_v29 }
 0x337   :  { %5654 = vmatpush.bf16.msrb.mxu1 %v10977_v63  ;;  %v11070_v31 = vld [vmem:[#allocation3 + $0x690] sm:$0xf0]  ;;  %v13446_v32 = vld [vmem:[#allocation3 + $0x784] sm:$0xf]  ;;  %v10945_v41 = vor.u32 %v13382_v58, %v10942_v28 }
 0x338   :  { %5668 = vmatpush.bf16.msrb.mxu2 %v11105_v26  ;;  %v11198_v40 = vld [vmem:[#allocation3 + $0x790] sm:$0xf0]  ;;  %v11073_v43 = vor.u32 %v13414_v33, %v11070_v31  ;;  %v13346_v62 = vld [vmem:[#allocation3 + $0x464] sm:$0xf] }
 0x339   :  { %5682 = vmatpush.bf16.msrb.mxu3 %v11233_v50  ;;  %v10798_v47 = vld [vmem:[#allocation3 + $0x470] sm:$0xf0]  ;;  %v13378_v45 = vld [vmem:[#allocation3 + $0x564] sm:$0xf]  ;;  %v11201_v52 = vor.u32 %v13446_v32, %v11198_v40 }
 0x33a   :  { %5641 = vmatpush.bf16.msrb.mxu0 %v10833_v24  ;;  %v10926_v53 = vld [vmem:[#allocation3 + $0x570] sm:$0xf0]  ;;  %v13410_v11 = vld [vmem:[#allocation3 + $0x664] sm:$0xf]  ;;  %v10801_v60 = vor.u32 %v13346_v62, %v10798_v47 }
 0x33b   :  { %5655 = vmatpush.bf16.msrb.mxu1 %v10961_v25  ;;  %v11054_v17 = vld [vmem:[#allocation3 + $0x670] sm:$0xf0]  ;;  %v13442_v38 = vld [vmem:[#allocation3 + $0x764] sm:$0xf]  ;;  %v10929_v61 = vor.u32 %v13378_v45, %v10926_v53 }
 0x33c   :  { %5669 = vmatpush.bf16.msrb.mxu2 %v11089_v27  ;;  %v11182_v30 = vld [vmem:[#allocation3 + $0x770] sm:$0xf0]  ;;  %v11057_v8 = vor.u32 %v13410_v11, %v11054_v17  ;;  %v13342_v19 = vld [vmem:[#allocation3 + $0x444] sm:$0xf]  ;;  %v10356_v11 = vld [vmem:[#allocation3 + $0xe8] sm:$0xf] }
 0x33d   :  { %5683 = vmatpush.bf16.msrb.mxu3 %v11217_v55  ;;  %v10782_v9 = vld [vmem:[#allocation3 + $0x450] sm:$0xf0]  ;;  %v13374_v63 = vld [vmem:[#allocation3 + $0x544] sm:$0xf]  ;;  %v11185_v26 = vor.u32 %v13442_v38, %v11182_v30  ;;  %v13237_v17 = vld [vmem:[#allocation3 + $0xf4] sm:$0xf0] }
 0x33e   :  { %5642 = vmatpush.bf16.msrb.mxu0 %v10817_v21  ;;  %v10910_v10 = vld [vmem:[#allocation3 + $0x550] sm:$0xf0]  ;;  %v13406_v35 = vld [vmem:[#allocation3 + $0x644] sm:$0xf]  ;;  %v10785_v22 = vor.u32 %v13342_v19, %v10782_v9  ;;  %v10484_v38 = vld [vmem:[#allocation3 + $0x1e8] sm:$0xf] }
 0x33f   :  { %5656 = vmatpush.bf16.msrb.mxu1 %v10945_v41  ;;  %v11038_v12 = vld [vmem:[#allocation3 + $0x650] sm:$0xf0]  ;;  %v13438_v50 = vld [vmem:[#allocation3 + $0x744] sm:$0xf]  ;;  %v10913_v16 = vor.u32 %v13374_v63, %v10910_v10  ;;  %v10740_v63 = vld [vmem:[#allocation3 + $0x3e8] sm:$0xf] }
 0x340   :  { %5670 = vmatpush.bf16.msrb.mxu2 %v11073_v43  ;;  %v11166_v13 = vld [vmem:[#allocation3 + $0x750] sm:$0xf0]  ;;  %v11041_v39 = vor.u32 %v13406_v35, %v11038_v12  ;;  %v13338_v18 = vld [vmem:[#allocation3 + $0x424] sm:$0xf]  ;;  %v10357_v35 = vor.u32 %v13237_v17, %v10356_v11  ;;  %v13225_v11 = vld [vmem:[#allocation3 + $0x94] sm:$0xf0] }
 0x341   :  { %5684 = vmatpush.bf16.msrb.mxu3 %v11201_v52  ;;  %v10766_v24 = vld [vmem:[#allocation3 + $0x430] sm:$0xf0]  ;;  %v13370_v25 = vld [vmem:[#allocation3 + $0x524] sm:$0xf]  ;;  %v11169_v27 = vor.u32 %v13438_v50, %v11166_v13  ;;  %v10340_v13 = vld [vmem:[#allocation3 + $0xc8] sm:$0xf] }
 0x342   :  { %5643 = vmatpush.bf16.msrb.mxu0 %v10801_v60  ;;  %v10894_v37 = vld [vmem:[#allocation3 + $0x530] sm:$0xf0]  ;;  %v13402_v29 = vld [vmem:[#allocation3 + $0x624] sm:$0xf]  ;;  %v10769_v33 = vor.u32 %v13338_v18, %v10766_v24  ;;  %v13269_v60 = vld [vmem:[#allocation3 + $0x1f4] sm:$0xf0] }
 0x343   :  { %5657 = vmatpush.bf16.msrb.mxu1 %v10929_v61  ;;  %v11022_v58 = vld [vmem:[#allocation3 + $0x630] sm:$0xf0]  ;;  %v13434_v55 = vld [vmem:[#allocation3 + $0x724] sm:$0xf]  ;;  %v10897_v40 = vor.u32 %v13370_v25, %v10894_v37  ;;  %v10612_v61 = vld [vmem:[#allocation3 + $0x2e8] sm:$0xf]  ;;  %v10485_v12 = vor.u32 %v13269_v60, %v10484_v38 }
 0x344   :  { %5671 = vmatpush.bf16.msrb.mxu2 %v11057_v8  ;;  %v11150_v28 = vld [vmem:[#allocation3 + $0x730] sm:$0xf0]  ;;  %v13334_v31 = vld [vmem:[#allocation3 + $0x404] sm:$0xf]  ;;  %v11025_v21 = vor.u32 %v13402_v29, %v11022_v58  ;;  %v13301_v8 = vld [vmem:[#allocation3 + $0x2f4] sm:$0xf0] }
 0x345   :  { %5685 = vmatpush.bf16.msrb.mxu3 %v11185_v26  ;;  %v10750_v32 = vld [vmem:[#allocation3 + $0x410] sm:$0xf0]  ;;  %v13366_v41 = vld [vmem:[#allocation3 + $0x504] sm:$0xf]  ;;  %v11153_v47 = vor.u32 %v13434_v55, %v11150_v28  ;;  %v13333_v26 = vld [vmem:[#allocation3 + $0x3f4] sm:$0xf0]  ;;  %v10613_v50 = vor.u32 %v13301_v8, %v10612_v61 }
 0x346   :  { %5644 = vmatpush.bf16.msrb.mxu0 %v10785_v22  ;;  %v10878_v43 = vld [vmem:[#allocation3 + $0x510] sm:$0xf0]  ;;  %v13398_v62 = vld [vmem:[#allocation3 + $0x604] sm:$0xf]  ;;  %v10753_v30 = vor.u32 %v13334_v31, %v10750_v32  ;;  %v13233_v22 = vld [vmem:[#allocation3 + $0xd4] sm:$0xf0] }
 0x347   :  { %5658 = vmatpush.bf16.msrb.mxu1 %v10913_v16  ;;  %v11006_v45 = vld [vmem:[#allocation3 + $0x610] sm:$0xf0]  ;;  %v13430_v52 = vld [vmem:[#allocation3 + $0x704] sm:$0xf]  ;;  %v10881_v19 = vor.u32 %v13366_v41, %v10878_v43  ;;  %v10468_v16 = vld [vmem:[#allocation3 + $0x1c8] sm:$0xf]  ;;  %v10341_v29 = vor.u32 %v13233_v22, %v10340_v13 }
 0x348   :  { %5672 = vmatpush.bf16.msrb.mxu2 %v11041_v39  ;;  %v11134_v53 = vld [vmem:[#allocation3 + $0x710] sm:$0xf0]  ;;  %v11009_v9 = vor.u32 %v13398_v62, %v11006_v45  ;;  %v10741_v39 = vor.u32 %v13333_v26, %v10740_v63  ;;  %v13265_v18 = vld [vmem:[#allocation3 + $0x1d4] sm:$0xf0]  ;;  %v10596_v24 = vld [vmem:[#allocation3 + $0x2c8] sm:$0xf] }
 0x349   :  { %5686 = vmatpush.bf16.msrb.mxu3 %v11169_v27  ;;  %v11137_v10 = vor.u32 %v13430_v52, %v11134_v53  ;;  %v13297_v25 = vld [vmem:[#allocation3 + $0x2d4] sm:$0xf0]  ;;  %v10724_v27 = vld [vmem:[#allocation3 + $0x3c8] sm:$0xf]  ;;  %v10469_v58 = vor.u32 %v13265_v18, %v10468_v16 }
 0x34a   :  { %5645 = vmatpush.bf16.msrb.mxu0 %v10769_v33  ;;  %v13329_v37 = vld [vmem:[#allocation3 + $0x3d4] sm:$0xf0]  ;;  %v10597_v55 = vor.u32 %v13297_v25, %v10596_v24  ;;  %v10324_v28 = vld [vmem:[#allocation3 + $0xa8] sm:$0xf] }
 0x34b   :  { %5659 = vmatpush.bf16.msrb.mxu1 %v10897_v40  ;;  %v13229_v33 = vld [vmem:[#allocation3 + $0xb4] sm:$0xf0]  ;;  %v10452_v31 = vld [vmem:[#allocation3 + $0x1a8] sm:$0xf]  ;;  %v10725_v32 = vor.u32 %v13329_v37, %v10724_v27 }
 0x34c   :  { %5673 = vmatpush.bf16.msrb.mxu2 %v11025_v21  ;;  %v13261_v40 = vld [vmem:[#allocation3 + $0x1b4] sm:$0xf0]  ;;  %v10580_v21 = vld [vmem:[#allocation3 + $0x2a8] sm:$0xf] }
 0x34d   :  { %5687 = vmatpush.bf16.msrb.mxu3 %v11153_v47  ;;  %v13293_v41 = vld [vmem:[#allocation3 + $0x2b4] sm:$0xf0]  ;;  %v10708_v43 = vld [vmem:[#allocation3 + $0x3a8] sm:$0xf]  ;;  %v10325_v47 = vor.u32 %v13229_v33, %v10324_v28  ;;  %v10453_v45 = vor.u32 %v13261_v40, %v10452_v31 }
 0x34e   :  { %5646 = vmatpush.bf16.msrb.mxu0 %v10753_v30  ;;  %v13325_v62 = vld [vmem:[#allocation3 + $0x3b4] sm:$0xf0]  ;;  %v10581_v52 = vor.u32 %v13293_v41, %v10580_v21  ;;  %v10308_v53 = vld [vmem:[#allocation3 + $0x88] sm:$0xf] }
 0x34f   :  { %5660 = vmatpush.bf16.msrb.mxu1 %v10881_v19  ;;  %v10436_v17 = vld [vmem:[#allocation3 + $0x188] sm:$0xf]  ;;  %v10709_v38 = vor.u32 %v13325_v62, %v10708_v43  ;;  %v13257_v30 = vld [vmem:[#allocation3 + $0x194] sm:$0xf0] }
 0x350   :  { %5674 = vmatpush.bf16.msrb.mxu2 %v11009_v9  ;;  %v10564_v60 = vld [vmem:[#allocation3 + $0x288] sm:$0xf]  ;;  %v13289_v61 = vld [vmem:[#allocation3 + $0x294] sm:$0xf0]  ;;  %v10309_v9 = vor.u32 %v13225_v11, %v10308_v53  ;;  %v10437_v63 = vor.u32 %v13257_v30, %v10436_v17 }
 0x351   :  { %5688 = vmatpush.bf16.msrb.mxu3 %v11137_v10  ;;  %5647 = vmatmul.bf16.vlgmr.msrb.gmra.mxu0 %v14046_v15  ;;  %v10692_v8 = vld [vmem:[#allocation3 + $0x388] sm:$0xf]  ;;  %v13321_v19 = vld [vmem:[#allocation3 + $0x394] sm:$0xf0]  ;;  %v10565_v26 = vor.u32 %v13289_v61, %v10564_v60 }
 0x352   :  { %5695 = vmatpush.bf16.msra.mxu0 %v10357_v35  ;;  %5661 = vmatmul.bf16.vlgmr.msrb.gmra.mxu1 %v14060_v48  ;;  %v10292_v10 = vld [vmem:[#allocation3 + $0x68] sm:$0xf]  ;;  %v13221_v35 = vld [vmem:[#allocation3 + $0x74] sm:$0xf0] }
 0x353   :  { %5709 = vmatpush.bf16.msra.mxu1 %v10485_v12  ;;  %5675 = vmatmul.bf16.vlgmr.msrb.gmra.mxu2 %v14058_v20  ;;  %v10420_v12 = vld [vmem:[#allocation3 + $0x168] sm:$0xf]  ;;  %v13253_v13 = vld [vmem:[#allocation3 + $0x174] sm:$0xf0]  ;;  %v10293_v24 = vor.u32 %v13221_v35, %v10292_v10 }
 0x354   :  { %5723 = vmatpush.bf16.msra.mxu2 %v10613_v50  ;;  %5689 = vmatmul.bf16.vlgmr.msrb.gmra.mxu3 %v14062_v23  ;;  %v10693_v50 = vor.u32 %v13321_v19, %v10692_v8  ;;  %v10548_v22 = vld [vmem:[#allocation3 + $0x268] sm:$0xf]  ;;  %v13285_v16 = vld [vmem:[#allocation3 + $0x274] sm:$0xf0]  ;;  %v10421_v25 = vor.u32 %v13253_v13, %v10420_v12 }
 0x355   :  { %5737 = vmatpush.bf16.msra.mxu3 %v10741_v39  ;;  %v10676_v39 = vld [vmem:[#allocation3 + $0x368] sm:$0xf]  ;;  %v13317_v18 = vld [vmem:[#allocation3 + $0x374] sm:$0xf0]  ;;  %v10549_v27 = vor.u32 %v13285_v16, %v10548_v22 }
 0x356   :  { %5696 = vmatpush.bf16.msra.mxu0 %v10341_v29  ;;  %v10276_v37 = vld [vmem:[#allocation3 + $0x48] sm:$0xf]  ;;  %v13217_v29 = vld [vmem:[#allocation3 + $0x54] sm:$0xf0] }
 0x357   :  { %5710 = vmatpush.bf16.msra.mxu1 %v10469_v58  ;;  %v10404_v58 = vld [vmem:[#allocation3 + $0x148] sm:$0xf]  ;;  %v13249_v28 = vld [vmem:[#allocation3 + $0x154] sm:$0xf0]  ;;  %v10277_v21 = vor.u32 %v13217_v29, %v10276_v37 }
 0x358   :  { %5724 = vmatpush.bf16.msra.mxu2 %v10597_v55  ;;  %v10677_v55 = vor.u32 %v13317_v18, %v10676_v39  ;;  %v10532_v33 = vld [vmem:[#allocation3 + $0x248] sm:$0xf]  ;;  %v13281_v31 = vld [vmem:[#allocation3 + $0x254] sm:$0xf0]  ;;  %v10405_v41 = vor.u32 %v13249_v28, %v10404_v58 }
 0x359   :  { %5738 = vmatpush.bf16.msra.mxu3 %v10725_v32  ;;  %v10660_v32 = vld [vmem:[#allocation3 + $0x348] sm:$0xf]  ;;  %v13313_v40 = vld [vmem:[#allocation3 + $0x354] sm:$0xf0]  ;;  %v10533_v43 = vor.u32 %v13281_v31, %v10532_v33 }
 0x35a   :  { %5697 = vmatpush.bf16.msra.mxu0 %v10325_v47  ;;  %v10260_v62 = vld [vmem:[#allocation3 + $0x28] sm:$0xf]  ;;  %v13213_v47 = vld [vmem:[#allocation3 + $0x34] sm:$0xf0] }
 0x35b   :  { %5711 = vmatpush.bf16.msra.mxu1 %v10453_v45  ;;  %v10388_v45 = vld [vmem:[#allocation3 + $0x128] sm:$0xf]  ;;  %v13245_v53 = vld [vmem:[#allocation3 + $0x134] sm:$0xf0]  ;;  %v10261_v60 = vor.u32 %v13213_v47, %v10260_v62 }
 0x35c   :  { %5725 = vmatpush.bf16.msra.mxu2 %v10581_v52  ;;  %v10661_v52 = vor.u32 %v13313_v40, %v10660_v32  ;;  %v10516_v11 = vld [vmem:[#allocation3 + $0x228] sm:$0xf]  ;;  %v13277_v17 = vld [vmem:[#allocation3 + $0x234] sm:$0xf0]  ;;  %v10389_v19 = vor.u32 %v13245_v53, %v10388_v45 }
 0x35d   :  { %5739 = vmatpush.bf16.msra.mxu3 %v10709_v38  ;;  %v10644_v38 = vld [vmem:[#allocation3 + $0x328] sm:$0xf]  ;;  %v13309_v30 = vld [vmem:[#allocation3 + $0x334] sm:$0xf0] }
 0x35e   :  { %5698 = vmatpush.bf16.msra.mxu0 %v10309_v9  ;;  %v10244_v61 = vld [vmem:[#allocation3 + $0x8] sm:$0xf]  ;;  %v13209_v8 = vld [vmem:[#allocation3 + $0x14] sm:$0xf0]  ;;  %v10517_v9 = vor.u32 %v13277_v17, %v10516_v11  ;;  %v10645_v35 = vor.u32 %v13309_v30, %v10644_v38 }
 0x35f   :  { %5712 = vmatpush.bf16.msra.mxu1 %v10437_v63  ;;  %v10372_v63 = vld [vmem:[#allocation3 + $0x108] sm:$0xf]  ;;  %v13273_v12 = vld [vmem:[#allocation3 + $0x214] sm:$0xf0]  ;;  %v10245_v18 = vor.u32 %v13209_v8, %v10244_v61 }
 0x360   :  { %5726 = vmatpush.bf16.msra.mxu2 %v10565_v26  ;;  %v13241_v26 = vld [vmem:[#allocation3 + $0x114] sm:$0xf0]  ;;  %v10500_v10 = vld [vmem:[#allocation3 + $0x208] sm:$0xf] }
 0x361   :  { %5740 = vmatpush.bf16.msra.mxu3 %v10693_v50  ;;  %v10628_v50 = vld [vmem:[#allocation3 + $0x308] sm:$0xf]  ;;  %v13305_v13 = vld [vmem:[#allocation3 + $0x314] sm:$0xf0]  ;;  %v10373_v37 = vor.u32 %v13241_v26, %v10372_v63  ;;  %v10501_v29 = vor.u32 %v13273_v12, %v10500_v10 }
 0x362   :  { %5699 = vmatpush.bf16.msra.mxu0 %v10293_v24  ;;  %v10868_v22 = vld [vmem:[#allocation3 + $0x4e8] sm:$0xf]  ;;  %v13365_v16 = vld [vmem:[#allocation3 + $0x4f4] sm:$0xf0]  ;;  %v10629_v28 = vor.u32 %v13305_v13, %v10628_v50 }
 0x363   :  { %5713 = vmatpush.bf16.msra.mxu1 %v10421_v25  ;;  %v10996_v39 = vld [vmem:[#allocation3 + $0x5e8] sm:$0xf]  ;;  %v13397_v24 = vld [vmem:[#allocation3 + $0x5f4] sm:$0xf0]  ;;  %v10869_v33 = vor.u32 %v13365_v16, %v10868_v22 }
 0x364   :  { %5727 = vmatpush.bf16.msra.mxu2 %v10549_v27  ;;  %v11124_v25 = vld [vmem:[#allocation3 + $0x6e8] sm:$0xf]  ;;  %v13429_v27 = vld [vmem:[#allocation3 + $0x6f4] sm:$0xf0]  ;;  %v10997_v31 = vor.u32 %v13397_v24, %v10996_v39 }
 0x365   :  { %5741 = vmatpush.bf16.msra.mxu3 %v10677_v55  ;;  %v11252_v58 = vld [vmem:[#allocation3 + $0x7e8] sm:$0xf]  ;;  %v13461_v55 = vld [vmem:[#allocation3 + $0x7f4] sm:$0xf0]  ;;  %v11125_v32 = vor.u32 %v13429_v27, %v11124_v25 }
 0x366   :  { %5700 = vmatpush.bf16.msra.mxu0 %v10277_v21  ;;  %v10852_v40 = vld [vmem:[#allocation3 + $0x4c8] sm:$0xf]  ;;  %v13361_v21 = vld [vmem:[#allocation3 + $0x4d4] sm:$0xf0] }
 0x367   :  { %5714 = vmatpush.bf16.msra.mxu1 %v10405_v41  ;;  %v10980_v41 = vld [vmem:[#allocation3 + $0x5c8] sm:$0xf]  ;;  %v13393_v62 = vld [vmem:[#allocation3 + $0x5d4] sm:$0xf0]  ;;  %v10853_v11 = vor.u32 %v13361_v21, %v10852_v40 }
 0x368   :  { %5728 = vmatpush.bf16.msra.mxu2 %v10533_v43  ;;  %v11253_v43 = vor.u32 %v13461_v55, %v11252_v58  ;;  %v11108_v47 = vld [vmem:[#allocation3 + $0x6c8] sm:$0xf]  ;;  %v13425_v45 = vld [vmem:[#allocation3 + $0x6d4] sm:$0xf0]  ;;  %v10981_v17 = vor.u32 %v13393_v62, %v10980_v41 }
 0x369   :  { %5742 = vmatpush.bf16.msra.mxu3 %v10661_v52  ;;  %v11236_v52 = vld [vmem:[#allocation3 + $0x7c8] sm:$0xf]  ;;  %v13457_v53 = vld [vmem:[#allocation3 + $0x7d4] sm:$0xf0]  ;;  %v11109_v38 = vor.u32 %v13425_v45, %v11108_v47 }
 0x36a   :  { %5701 = vmatpush.bf16.msra.mxu0 %v10261_v60  ;;  %v10836_v30 = vld [vmem:[#allocation3 + $0x4a8] sm:$0xf]  ;;  %v13357_v60 = vld [vmem:[#allocation3 + $0x4b4] sm:$0xf0]  ;;  %v11237_v8 = vor.u32 %v13457_v53, %v11236_v52 }
 0x36b   :  { %5715 = vmatpush.bf16.msra.mxu1 %v10389_v19  ;;  %v10964_v61 = vld [vmem:[#allocation3 + $0x5a8] sm:$0xf]  ;;  %v13389_v19 = vld [vmem:[#allocation3 + $0x5b4] sm:$0xf0] }
 0x36c   :  { %5729 = vmatpush.bf16.msra.mxu2 %v10517_v9  ;;  %v11092_v9 = vld [vmem:[#allocation3 + $0x6a8] sm:$0xf]  ;;  %v13421_v63 = vld [vmem:[#allocation3 + $0x6b4] sm:$0xf0]  ;;  %v10965_v12 = vor.u32 %v13389_v19, %v10964_v61 }
 0x36d   :  { %5743 = vmatpush.bf16.msra.mxu3 %v10645_v35  ;;  %v11220_v26 = vld [vmem:[#allocation3 + $0x7a8] sm:$0xf]  ;;  %v13453_v10 = vld [vmem:[#allocation3 + $0x7b4] sm:$0xf0]  ;;  %v10837_v35 = vor.u32 %v13357_v60, %v10836_v30  ;;  %v11093_v50 = vor.u32 %v13421_v63, %v11092_v9 }
 0x36e   :  { %5702 = vmatpush.bf16.msra.mxu0 %v10245_v18  ;;  %v10820_v13 = vld [vmem:[#allocation3 + $0x488] sm:$0xf]  ;;  %v13353_v22 = vld [vmem:[#allocation3 + $0x494] sm:$0xf0]  ;;  %v11221_v39 = vor.u32 %v13453_v10, %v11220_v26  ;;  %v5480_v58 = vpop.f32.mrf.mxu0 }
 0x36f   :  { %5716 = vmatpush.bf16.msra.mxu1 %v10373_v37  ;;  %v10948_v16 = vld [vmem:[#allocation3 + $0x588] sm:$0xf]  ;;  %v13385_v18 = vld [vmem:[#allocation3 + $0x594] sm:$0xf0]  ;;  %v5494_v55 = vpop.f32.mrf.mxu1 }
 0x370   :  { %5730 = vmatpush.bf16.msra.mxu2 %v10501_v29  ;;  %v11076_v24 = vld [vmem:[#allocation3 + $0x688] sm:$0xf]  ;;  %v13417_v25 = vld [vmem:[#allocation3 + $0x694] sm:$0xf0]  ;;  %v10821_v29 = vor.u32 %v13353_v22, %v10820_v13  ;;  %v5495_v21 = vadd.f32 %v5494_v55, %v5480_v58 }
 0x371   :  { %5744 = vmatpush.bf16.msra.mxu3 %v10629_v28  ;;  %5703 = vmatmul.bf16.vlgmr.msra.gmra.mxu0 %v14044_v14  ;;  %v11204_v27 = vld [vmem:[#allocation3 + $0x788] sm:$0xf]  ;;  %v13449_v37 = vld [vmem:[#allocation3 + $0x794] sm:$0xf0]  ;;  %v10949_v28 = vor.u32 %v13385_v18, %v10948_v16 }
 0x372   :  { %5751 = vmatpush.bf16.msrb.mxu0 %v10869_v33  ;;  %5717 = vmatmul.bf16.vlgmr.msra.gmra.mxu1 %v14052_v36  ;;  %v11077_v33 = vor.u32 %v13417_v25, %v11076_v24  ;;  %v10932_v40 = vld [vmem:[#allocation3 + $0x568] sm:$0xf]  ;;  %v11205_v41 = vor.u32 %v13449_v37, %v11204_v27  ;;  %v13413_v47 = vld [vmem:[#allocation3 + $0x674] sm:$0xf0] }
 0x373   :  { %5765 = vmatpush.bf16.msrb.mxu1 %v10997_v31  ;;  %5731 = vmatmul.bf16.vlgmr.msra.gmra.mxu2 %v14049_v34  ;;  %v10804_v31 = vld [vmem:[#allocation3 + $0x468] sm:$0xf]  ;;  %v13445_v52 = vld [vmem:[#allocation3 + $0x774] sm:$0xf0] }
 0x374   :  { %5779 = vmatpush.bf16.msrb.mxu2 %v11125_v32  ;;  %5745 = vmatmul.bf16.vlgmr.msra.gmra.mxu3 %v14055_v56  ;;  %v13349_v32 = vld [vmem:[#allocation3 + $0x474] sm:$0xf0]  ;;  %v11060_v62 = vld [vmem:[#allocation3 + $0x668] sm:$0xf] }
 0x375   :  { %5793 = vmatpush.bf16.msrb.mxu3 %v11253_v43  ;;  %v13381_v43 = vld [vmem:[#allocation3 + $0x574] sm:$0xf0]  ;;  %v11188_v45 = vld [vmem:[#allocation3 + $0x768] sm:$0xf]  ;;  %v10805_v53 = vor.u32 %v13349_v32, %v10804_v31 }
 0x376   :  { %5752 = vmatpush.bf16.msrb.mxu0 %v10853_v11  ;;  %v10933_v11 = vor.u32 %v13381_v43, %v10932_v40  ;;  %v13345_v30 = vld [vmem:[#allocation3 + $0x454] sm:$0xf0]  ;;  %v10916_v60 = vld [vmem:[#allocation3 + $0x548] sm:$0xf]  ;;  %v11189_v61 = vor.u32 %v13445_v52, %v11188_v45  ;;  %v5508_v63 = vpop.f32.mrf.mxu2 }
 0x377   :  { %5766 = vmatpush.bf16.msrb.mxu1 %v10981_v17  ;;  %v11061_v17 = vor.u32 %v13413_v47, %v11060_v62  ;;  %v11044_v19 = vld [vmem:[#allocation3 + $0x648] sm:$0xf]  ;;  %v13409_v9 = vld [vmem:[#allocation3 + $0x654] sm:$0xf0] }
 0x378   :  { %5780 = vmatpush.bf16.msrb.mxu2 %v11109_v38  ;;  %v10788_v38 = vld [vmem:[#allocation3 + $0x448] sm:$0xf]  ;;  %v13441_v10 = vld [vmem:[#allocation3 + $0x754] sm:$0xf0]  ;;  %v11045_v22 = vor.u32 %v13409_v9, %v11044_v19  ;;  %v13331_v9 = vld [vmem:[#allocation3 + $0x3ec] sm:$0xf] }
 0x379   :  { %5794 = vmatpush.bf16.msrb.mxu3 %v11237_v8  ;;  %v13377_v8 = vld [vmem:[#allocation3 + $0x554] sm:$0xf0]  ;;  %v11172_v26 = vld [vmem:[#allocation3 + $0x748] sm:$0xf] }
 0x37a   :  { %5753 = vmatpush.bf16.msrb.mxu0 %v10837_v35  ;;  %v5509_v35 = vadd.f32 %v5508_v63, %v5495_v21  ;;  %v10917_v13 = vor.u32 %v13377_v8, %v10916_v60  ;;  %v10772_v16 = vld [vmem:[#allocation3 + $0x428] sm:$0xf]  ;;  %v11173_v25 = vor.u32 %v13441_v10, %v11172_v26  ;;  %v13373_v27 = vld [vmem:[#allocation3 + $0x534] sm:$0xf0]  ;;  %v13299_v60 = vld [vmem:[#allocation3 + $0x2ec] sm:$0xf] }
 0x37b   :  { %5767 = vmatpush.bf16.msrb.mxu1 %v10965_v12  ;;  %v10789_v12 = vor.u32 %v13345_v30, %v10788_v38  ;;  %v10900_v18 = vld [vmem:[#allocation3 + $0x528] sm:$0xf]  ;;  %v13437_v55 = vld [vmem:[#allocation3 + $0x734] sm:$0xf0]  ;;  %v10486_v30 = vld [vmem:[#allocation3 + $0x1f8] sm:$0xf0] }
 0x37c   :  { %5781 = vmatpush.bf16.msrb.mxu2 %v11093_v50  ;;  %v5522_v50 = vpop.f32.mrf.mxu3  ;;  %v11028_v37 = vld [vmem:[#allocation3 + $0x628] sm:$0xf]  ;;  %v13337_v31 = vld [vmem:[#allocation3 + $0x414] sm:$0xf0]  ;;  %v10901_v32 = vor.u32 %v13373_v27, %v10900_v18  ;;  %v10742_v63 = vld [vmem:[#allocation3 + $0x3f8] sm:$0xf0] }
 0x37d   :  { %5795 = vmatpush.bf16.msrb.mxu3 %v11221_v39  ;;  %v13341_v39 = vld [vmem:[#allocation3 + $0x434] sm:$0xf0]  ;;  %v14084_v24 = vadd.f32 %v5522_v50, %v5509_v35  ;;  %v11156_v58 = vld [vmem:[#allocation3 + $0x728] sm:$0xf]  ;;  %v14086_v50 = vpop.f32.mrf.mxu0  ;;  %v10470_v18 = vld [vmem:[#allocation3 + $0x1d8] sm:$0xf0] }
 0x37e   :  { %5754 = vmatpush.bf16.msrb.mxu0 %v10821_v29  ;;  %v13405_v29 = vld [vmem:[#allocation3 + $0x634] sm:$0xf0]  ;;  %v10884_v21 = vld [vmem:[#allocation3 + $0x508] sm:$0xf]  ;;  %v11157_v62 = vor.u32 %v13437_v55, %v11156_v58  ;;  %v10598_v27 = vld [vmem:[#allocation3 + $0x2d8] sm:$0xf0]  ;;  %v14088_v58 = vpop.f32.mrf.mxu1 }
 0x37f   :  { %5768 = vmatpush.bf16.msrb.mxu1 %v10949_v28  ;;  %v10773_v28 = vor.u32 %v13341_v39, %v10772_v16  ;;  %v11029_v40 = vor.u32 %v13405_v29, %v11028_v37  ;;  %v11012_v43 = vld [vmem:[#allocation3 + $0x608] sm:$0xf]  ;;  %v13401_v47 = vld [vmem:[#allocation3 + $0x614] sm:$0xf0]  ;;  %v13263_v16 = vld [vmem:[#allocation3 + $0x1cc] sm:$0xf]  ;;  %v10745_v39 = vor.u32 %v13331_v9, %v10742_v63 }
 0x380   :  { %5782 = vmatpush.bf16.msrb.mxu2 %v11077_v33  ;;  %v10756_v33 = vld [vmem:[#allocation3 + $0x408] sm:$0xf]  ;;  %v13433_v52 = vld [vmem:[#allocation3 + $0x714] sm:$0xf0]  ;;  %v11013_v19 = vor.u32 %v13401_v47, %v11012_v43  ;;  %v13327_v37 = vld [vmem:[#allocation3 + $0x3cc] sm:$0xf] }
 0x381   :  { %5796 = vmatpush.bf16.msrb.mxu3 %v11205_v41  ;;  %v13369_v41 = vld [vmem:[#allocation3 + $0x514] sm:$0xf0]  ;;  %v11140_v45 = vld [vmem:[#allocation3 + $0x708] sm:$0xf]  ;;  %v10757_v38 = vor.u32 %v13337_v31, %v10756_v33  ;;  %v10726_v29 = vld [vmem:[#allocation3 + $0x3d8] sm:$0xf0] }
 0x382   :  { %5755 = vmatpush.bf16.msrb.mxu0 %v10805_v53  ;;  %v13235_v53 = vld [vmem:[#allocation3 + $0xec] sm:$0xf]  ;;  %v10885_v8 = vor.u32 %v13369_v41, %v10884_v21  ;;  %v11141_v26 = vor.u32 %v13433_v52, %v11140_v45  ;;  %v10729_v21 = vor.u32 %v13327_v37, %v10726_v29  ;;  %v10454_v41 = vld [vmem:[#allocation3 + $0x1b8] sm:$0xf0] }
 0x383   :  { %5769 = vmatpush.bf16.msrb.mxu1 %v10933_v11  ;;  %v10358_v11 = vld [vmem:[#allocation3 + $0xf8] sm:$0xf0]  ;;  %v13227_v31 = vld [vmem:[#allocation3 + $0xac] sm:$0xf] }
 0x384   :  { %5783 = vmatpush.bf16.msrb.mxu2 %v11061_v17  ;;  %v13267_v17 = vld [vmem:[#allocation3 + $0x1ec] sm:$0xf]  ;;  %v10361_v10 = vor.u32 %v13235_v53, %v10358_v11  ;;  %v10710_v45 = vld [vmem:[#allocation3 + $0x3b8] sm:$0xf0]  ;;  %v14094_v53 = vpop.f32.mrf.mxu2 }
 0x385   :  { %5797 = vmatpush.bf16.msrb.mxu3 %v11189_v61  ;;  %v10614_v61 = vld [vmem:[#allocation3 + $0x2f8] sm:$0xf0]  ;;  %v10489_v35 = vor.u32 %v13267_v17, %v10486_v30  ;;  %v13291_v43 = vld [vmem:[#allocation3 + $0x2ac] sm:$0xf] }
 0x386   :  { %5756 = vmatpush.bf16.msrb.mxu0 %v10789_v12  ;;  %v10617_v12 = vor.u32 %v13299_v60, %v10614_v61  ;;  %v13323_v47 = vld [vmem:[#allocation3 + $0x3ac] sm:$0xf]  ;;  %v10310_v30 = vld [vmem:[#allocation3 + $0x98] sm:$0xf0] }
 0x387   :  { %5770 = vmatpush.bf16.msrb.mxu1 %v10917_v13  ;;  %v13231_v13 = vld [vmem:[#allocation3 + $0xcc] sm:$0xf]  ;;  %v10713_v61 = vor.u32 %v13323_v47, %v10710_v45  ;;  %v10566_v63 = vld [vmem:[#allocation3 + $0x298] sm:$0xf0] }
 0x388   :  { %5784 = vmatpush.bf16.msrb.mxu2 %v11045_v22  ;;  %v10342_v22 = vld [vmem:[#allocation3 + $0xd8] sm:$0xf0]  ;;  %v13255_v60 = vld [vmem:[#allocation3 + $0x18c] sm:$0xf] }
 0x389   :  { %5798 = vmatpush.bf16.msrb.mxu3 %v11173_v25  ;;  %v13295_v25 = vld [vmem:[#allocation3 + $0x2cc] sm:$0xf]  ;;  %v10345_v55 = vor.u32 %v13231_v13, %v10342_v22 }
 0x38a   :  { %5757 = vmatpush.bf16.msrb.mxu0 %v10773_v28  ;;  %v10473_v28 = vor.u32 %v13263_v16, %v10470_v18  ;;  %v10601_v33 = vor.u32 %v13295_v25, %v10598_v27  ;;  %v13287_v9 = vld [vmem:[#allocation3 + $0x28c] sm:$0xf]  ;;  %v10294_v25 = vld [vmem:[#allocation3 + $0x78] sm:$0xf0] }
 0x38b   :  { %5771 = vmatpush.bf16.msrb.mxu1 %v10901_v32  ;;  %v10326_v32 = vld [vmem:[#allocation3 + $0xb8] sm:$0xf0]  ;;  %v10569_v16 = vor.u32 %v13287_v9, %v10566_v63  ;;  %v13219_v18 = vld [vmem:[#allocation3 + $0x6c] sm:$0xf] }
 0x38c   :  { %5785 = vmatpush.bf16.msrb.mxu2 %v11029_v40  ;;  %v13259_v40 = vld [vmem:[#allocation3 + $0x1ac] sm:$0xf]  ;;  %v10329_v52 = vor.u32 %v13227_v31, %v10326_v32  ;;  %v10678_v32 = vld [vmem:[#allocation3 + $0x378] sm:$0xf0] }
 0x38d   :  { %5799 = vmatpush.bf16.msrb.mxu3 %v11157_v62  ;;  %v10582_v62 = vld [vmem:[#allocation3 + $0x2b8] sm:$0xf0]  ;;  %v10457_v11 = vor.u32 %v13259_v40, %v10454_v41  ;;  %v13251_v27 = vld [vmem:[#allocation3 + $0x16c] sm:$0xf]  ;;  %v10297_v40 = vor.u32 %v13219_v18, %v10294_v25 }
 0x38e   :  { %5758 = vmatpush.bf16.msrb.mxu0 %v10757_v38  ;;  %v10585_v17 = vor.u32 %v13291_v43, %v10582_v62  ;;  %v13223_v38 = vld [vmem:[#allocation3 + $0x8c] sm:$0xf]  ;;  %v10278_v43 = vld [vmem:[#allocation3 + $0x58] sm:$0xf0] }
 0x38f   :  { %5772 = vmatpush.bf16.msrb.mxu1 %v10885_v8  ;;  %v14096_v8 = vpop.f32.mrf.mxu3  ;;  %v10313_v13 = vor.u32 %v13223_v38, %v10310_v30  ;;  %v13315_v31 = vld [vmem:[#allocation3 + $0x36c] sm:$0xf]  ;;  %v10646_v25 = vld [vmem:[#allocation3 + $0x338] sm:$0xf0] }
 0x390   :  { %5786 = vmatpush.bf16.msrb.mxu2 %v11013_v19  ;;  %v10438_v19 = vld [vmem:[#allocation3 + $0x198] sm:$0xf0]  ;;  %v13215_v41 = vld [vmem:[#allocation3 + $0x4c] sm:$0xf]  ;;  %v10681_v47 = vor.u32 %v13315_v31, %v10678_v32 }
 0x391   :  { %5800 = vmatpush.bf16.msrb.mxu3 %v11141_v26  ;;  %5759 = vmatmul.bf16.vlgmr.msrb.gmra.mxu0 %v14046_v15  ;;  %v5536_v26 = vpop.f32.mrf.mxu0  ;;  %v10441_v22 = vor.u32 %v13255_v60, %v10438_v19  ;;  %v13247_v62 = vld [vmem:[#allocation3 + $0x14c] sm:$0xf]  ;;  %v10662_v60 = vld [vmem:[#allocation3 + $0x358] sm:$0xf0]  ;;  %v10281_v19 = vor.u32 %v13215_v41, %v10278_v43 }
 0x392   :  { %5807 = vmatpush.bf16.msra.mxu0 %v10361_v10  ;;  %5773 = vmatmul.bf16.vlgmr.msrb.gmra.mxu1 %v14060_v48  ;;  %v13319_v10 = vld [vmem:[#allocation3 + $0x38c] sm:$0xf]  ;;  %v10374_v31 = vld [vmem:[#allocation3 + $0x118] sm:$0xf0] }
 0x393   :  { %5821 = vmatpush.bf16.msra.mxu1 %v10489_v35  ;;  %5787 = vmatmul.bf16.vlgmr.msrb.gmra.mxu2 %v14058_v20  ;;  %v10694_v35 = vld [vmem:[#allocation3 + $0x398] sm:$0xf0]  ;;  %v13311_v30 = vld [vmem:[#allocation3 + $0x34c] sm:$0xf] }
 0x394   :  { %5835 = vmatpush.bf16.msra.mxu2 %v10617_v12  ;;  %5801 = vmatmul.bf16.vlgmr.msrb.gmra.mxu3 %v14062_v23  ;;  %v5537_v12 = vadd.f32 %v5536_v26, %v14084_v24  ;;  %v10697_v37 = vor.u32 %v13319_v10, %v10694_v35  ;;  %v13211_v10 = vld [vmem:[#allocation3 + $0x2c] sm:$0xf]  ;;  %v10262_v35 = vld [vmem:[#allocation3 + $0x38] sm:$0xf0] }
 0x395   :  { %5849 = vmatpush.bf16.msra.mxu3 %v10745_v39  ;;  %v5550_v39 = vpop.f32.mrf.mxu1  ;;  %v13307_v18 = vld [vmem:[#allocation3 + $0x32c] sm:$0xf]  ;;  %v10630_v41 = vld [vmem:[#allocation3 + $0x318] sm:$0xf0] }
 0x396   :  { %5808 = vmatpush.bf16.msra.mxu0 %v10345_v55  ;;  %v5551_v29 = vadd.f32 %v5550_v39, %v5537_v12  ;;  %v10422_v55 = vld [vmem:[#allocation3 + $0x178] sm:$0xf0]  ;;  %v5564_v45 = vpop.f32.mrf.mxu2  ;;  %v13243_v12 = vld [vmem:[#allocation3 + $0x12c] sm:$0xf] }
 0x397   :  { %5822 = vmatpush.bf16.msra.mxu1 %v10473_v28  ;;  %v13283_v28 = vld [vmem:[#allocation3 + $0x26c] sm:$0xf]  ;;  %v10425_v24 = vor.u32 %v13251_v27, %v10422_v55  ;;  %v10518_v39 = vld [vmem:[#allocation3 + $0x238] sm:$0xf0]  ;;  %v10265_v27 = vor.u32 %v13211_v10, %v10262_v35 }
 0x398   :  { %5836 = vmatpush.bf16.msra.mxu2 %v10601_v33  ;;  %v10550_v33 = vld [vmem:[#allocation3 + $0x278] sm:$0xf0]  ;;  %v5565_v38 = vadd.f32 %v5564_v45, %v5551_v29  ;;  %v13271_v32 = vld [vmem:[#allocation3 + $0x20c] sm:$0xf] }
 0x399   :  { %5850 = vmatpush.bf16.msra.mxu3 %v10729_v21  ;;  %v10553_v21 = vor.u32 %v13283_v28, %v10550_v33  ;;  %v10246_v29 = vld [vmem:[#allocation3 + $0x18] sm:$0xf0]  ;;  %v13239_v33 = vld [vmem:[#allocation3 + $0x10c] sm:$0xf] }
 0x39a   :  { %5809 = vmatpush.bf16.msra.mxu0 %v10329_v52  ;;  %v10406_v52 = vld [vmem:[#allocation3 + $0x158] sm:$0xf0]  ;;  %v13363_v43 = vld [vmem:[#allocation3 + $0x4ec] sm:$0xf] }
 0x39b   :  { %5823 = vmatpush.bf16.msra.mxu1 %v10457_v11  ;;  %v13279_v11 = vld [vmem:[#allocation3 + $0x24c] sm:$0xf]  ;;  %v10409_v63 = vor.u32 %v13247_v62, %v10406_v52  ;;  %v10870_v62 = vld [vmem:[#allocation3 + $0x4f8] sm:$0xf0] }
 0x39c   :  { %5837 = vmatpush.bf16.msra.mxu2 %v10585_v17  ;;  %v10534_v17 = vld [vmem:[#allocation3 + $0x258] sm:$0xf0]  ;;  %v13359_v35 = vld [vmem:[#allocation3 + $0x4cc] sm:$0xf] }
 0x39d   :  { %5851 = vmatpush.bf16.msra.mxu3 %v10713_v61  ;;  %v5578_v61 = vpop.f32.mrf.mxu3  ;;  %v10537_v26 = vor.u32 %v13279_v11, %v10534_v17  ;;  %v10998_v52 = vld [vmem:[#allocation3 + $0x5f8] sm:$0xf0]  ;;  %v13427_v11 = vld [vmem:[#allocation3 + $0x6ec] sm:$0xf] }
 0x39e   :  { %5810 = vmatpush.bf16.msra.mxu0 %v10313_v13  ;;  %v14099_v9 = vadd.f32 %v5578_v61, %v5565_v38  ;;  %v10665_v13 = vor.u32 %v13311_v30, %v10662_v60  ;;  %v11126_v17 = vld [vmem:[#allocation3 + $0x6f8] sm:$0xf0]  ;;  %v10377_v38 = vor.u32 %v13239_v33, %v10374_v31  ;;  %v13459_v60 = vld [vmem:[#allocation3 + $0x7ec] sm:$0xf] }
 0x39f   :  { %5824 = vmatpush.bf16.msra.mxu1 %v10441_v22  ;;  %v10390_v22 = vld [vmem:[#allocation3 + $0x138] sm:$0xf0]  ;;  %v11129_v10 = vor.u32 %v13427_v11, %v11126_v17  ;;  %v13355_v31 = vld [vmem:[#allocation3 + $0x4ac] sm:$0xf] }
 0x3a0   :  { %5838 = vmatpush.bf16.msra.mxu2 %v10569_v16  ;;  %v13275_v16 = vld [vmem:[#allocation3 + $0x22c] sm:$0xf]  ;;  %v10393_v55 = vor.u32 %v13243_v12, %v10390_v22  ;;  %v11254_v61 = vld [vmem:[#allocation3 + $0x7f8] sm:$0xf0] }
 0x3a1   :  { %5852 = vmatpush.bf16.msra.mxu3 %v10697_v37  ;;  %v13207_v37 = vld [vmem:[#allocation3 + $0xc] sm:$0xf]  ;;  %v10521_v28 = vor.u32 %v13275_v16, %v10518_v39  ;;  %v10854_v12 = vld [vmem:[#allocation3 + $0x4d8] sm:$0xf0]  ;;  %v11257_v22 = vor.u32 %v13459_v60, %v11254_v61  ;;  %v14109_v60 = vpop.f32.mrf.mxu2 }
 0x3a2   :  { %5811 = vmatpush.bf16.msra.mxu0 %v10297_v40  ;;  %v10649_v40 = vor.u32 %v13307_v18, %v10646_v25  ;;  %v10249_v45 = vor.u32 %v13207_v37, %v10246_v29  ;;  %v10982_v16 = vld [vmem:[#allocation3 + $0x5d8] sm:$0xf0]  ;;  %v13423_v39 = vld [vmem:[#allocation3 + $0x6cc] sm:$0xf]  ;;  %v14101_v37 = vpop.f32.mrf.mxu0  ;;  %v14103_v29 = vpop.f32.mrf.mxu1 }
 0x3a3   :  { %5825 = vmatpush.bf16.msra.mxu1 %v10425_v24  ;;  %v10502_v24 = vld [vmem:[#allocation3 + $0x218] sm:$0xf0]  ;;  %v13455_v25 = vld [vmem:[#allocation3 + $0x7cc] sm:$0xf] }
 0x3a4   :  { %5839 = vmatpush.bf16.msra.mxu2 %v10553_v21  ;;  %v13303_v21 = vld [vmem:[#allocation3 + $0x30c] sm:$0xf]  ;;  %v10505_v30 = vor.u32 %v13271_v32, %v10502_v24  ;;  %v11110_v18 = vld [vmem:[#allocation3 + $0x6d8] sm:$0xf0] }
 0x3a5   :  { %5853 = vmatpush.bf16.msra.mxu3 %v10681_v47  ;;  %v13395_v47 = vld [vmem:[#allocation3 + $0x5ec] sm:$0xf]  ;;  %v11113_v33 = vor.u32 %v13423_v39, %v11110_v18  ;;  %v10838_v32 = vld [vmem:[#allocation3 + $0x4b8] sm:$0xf0] }
 0x3a6   :  { %5812 = vmatpush.bf16.msra.mxu0 %v10281_v19  ;;  %v10633_v19 = vor.u32 %v13303_v21, %v10630_v41  ;;  %v10966_v21 = vld [vmem:[#allocation3 + $0x5b8] sm:$0xf0]  ;;  %v13419_v41 = vld [vmem:[#allocation3 + $0x6ac] sm:$0xf] }
 0x3a7   :  { %5826 = vmatpush.bf16.msra.mxu1 %v10409_v63  ;;  %v10873_v63 = vor.u32 %v13363_v43, %v10870_v62  ;;  %v11094_v43 = vld [vmem:[#allocation3 + $0x6b8] sm:$0xf0]  ;;  %v13451_v62 = vld [vmem:[#allocation3 + $0x7ac] sm:$0xf] }
 0x3a8   :  { %5840 = vmatpush.bf16.msra.mxu2 %v10537_v26  ;;  %v11001_v26 = vor.u32 %v13395_v47, %v10998_v52  ;;  %v11222_v47 = vld [vmem:[#allocation3 + $0x7b8] sm:$0xf0]  ;;  %v11097_v11 = vor.u32 %v13419_v41, %v11094_v43  ;;  %v13351_v17 = vld [vmem:[#allocation3 + $0x48c] sm:$0xf] }
 0x3a9   :  { %5854 = vmatpush.bf16.msra.mxu3 %v10665_v13  ;;  %v13391_v13 = vld [vmem:[#allocation3 + $0x5cc] sm:$0xf]  ;;  %v10950_v61 = vld [vmem:[#allocation3 + $0x598] sm:$0xf0] }
 0x3aa   :  { %5813 = vmatpush.bf16.msra.mxu0 %v10265_v27  ;;  %v11238_v27 = vld [vmem:[#allocation3 + $0x7d8] sm:$0xf0]  ;;  %v13379_v39 = vld [vmem:[#allocation3 + $0x56c] sm:$0xf] }
 0x3ab   :  { %5827 = vmatpush.bf16.msra.mxu1 %v10393_v55  ;;  %v10857_v55 = vor.u32 %v13359_v35, %v10854_v12  ;;  %v11241_v24 = vor.u32 %v13455_v25, %v11238_v27  ;;  %v10934_v27 = vld [vmem:[#allocation3 + $0x578] sm:$0xf0]  ;;  %v13375_v43 = vld [vmem:[#allocation3 + $0x54c] sm:$0xf] }
 0x3ac   :  { %5841 = vmatpush.bf16.msra.mxu2 %v10521_v28  ;;  %v10985_v28 = vor.u32 %v13391_v13, %v10982_v16  ;;  %v10806_v16 = vld [vmem:[#allocation3 + $0x478] sm:$0xf0] }
 0x3ad   :  { %5855 = vmatpush.bf16.msra.mxu3 %v10649_v40  ;;  %v13387_v40 = vld [vmem:[#allocation3 + $0x5ac] sm:$0xf]  ;;  %v10790_v41 = vld [vmem:[#allocation3 + $0x458] sm:$0xf0] }
 0x3ae   :  { %5814 = vmatpush.bf16.msra.mxu0 %v10249_v45  ;;  %v10841_v45 = vor.u32 %v13355_v31, %v10838_v32  ;;  %v10969_v52 = vor.u32 %v13387_v40, %v10966_v21  ;;  %v11190_v31 = vld [vmem:[#allocation3 + $0x778] sm:$0xf0]  ;;  %v10937_v40 = vor.u32 %v13379_v39, %v10934_v27  ;;  %v13343_v21 = vld [vmem:[#allocation3 + $0x44c] sm:$0xf] }
 0x3af   :  { %5828 = vmatpush.bf16.msra.mxu1 %v10377_v38  ;;  %v10822_v38 = vld [vmem:[#allocation3 + $0x498] sm:$0xf0]  ;;  %v5606_v35 = vpop.f32.mrf.mxu1 }
 0x3b0   :  { %5842 = vmatpush.bf16.msra.mxu2 %v10505_v30  ;;  %v13383_v30 = vld [vmem:[#allocation3 + $0x58c] sm:$0xf]  ;;  %v11158_v39 = vld [vmem:[#allocation3 + $0x738] sm:$0xf0] }
 0x3b1   :  { %5856 = vmatpush.bf16.msra.mxu3 %v10633_v19  ;;  %5815 = vmatmul.bf16.vlgmr.msra.gmra.mxu0 %v14044_v14  ;;  %v11225_v14 = vor.u32 %v13451_v62, %v11222_v47  ;;  %v13415_v19 = vld [vmem:[#allocation3 + $0x68c] sm:$0xf]  ;;  %v10953_v12 = vor.u32 %v13383_v30, %v10950_v61  ;;  %v10918_v47 = vld [vmem:[#allocation3 + $0x558] sm:$0xf0] }
 0x3b2   :  { %5863 = vmatpush.bf16.msrb.mxu0 %v10873_v63  ;;  %5829 = vmatmul.bf16.vlgmr.msra.gmra.mxu1 %v14052_v36  ;;  %v14111_v63 = vpop.f32.mrf.mxu3  ;;  %v13447_v36 = vld [vmem:[#allocation3 + $0x78c] sm:$0xf]  ;;  %v10758_v27 = vld [vmem:[#allocation3 + $0x418] sm:$0xf0] }
 0x3b3   :  { %5877 = vmatpush.bf16.msrb.mxu1 %v11001_v26  ;;  %5843 = vmatmul.bf16.vlgmr.msra.gmra.mxu2 %v14049_v34  ;;  %v11078_v34 = vld [vmem:[#allocation3 + $0x698] sm:$0xf0] }
 0x3b4   :  { %5891 = vmatpush.bf16.msrb.mxu2 %v11129_v10  ;;  %5857 = vmatmul.bf16.vlgmr.msra.gmra.mxu3 %v14055_v56  ;;  %v11206_v26 = vld [vmem:[#allocation3 + $0x798] sm:$0xf0]  ;;  %v10825_v56 = vor.u32 %v13351_v17, %v10822_v38  ;;  %v5592_v10 = vpop.f32.mrf.mxu0  ;;  %v11081_v13 = vor.u32 %v13415_v19, %v11078_v34  ;;  %v13439_v17 = vld [vmem:[#allocation3 + $0x74c] sm:$0xf]  ;;  %v10921_v19 = vor.u32 %v13375_v43, %v10918_v47  ;;  %v11372_v43 = vld [vmem:[#allocation2 + $0xe0] sm:$0xf] }
 0x3b5   :  { %5905 = vmatpush.bf16.msrb.mxu3 %v11257_v22  ;;  %v13347_v22 = vld [vmem:[#allocation3 + $0x46c] sm:$0xf]  ;;  %v5607_v18 = vadd.f32 %v5606_v35, %v5592_v10  ;;  %v11209_v25 = vor.u32 %v13447_v36, %v11206_v26  ;;  %v11174_v38 = vld [vmem:[#allocation3 + $0x758] sm:$0xf0]  ;;  %v11500_v47 = vld [vmem:[#allocation2 + $0x1e0] sm:$0xf] }
 0x3b6   :  { %5864 = vmatpush.bf16.msrb.mxu0 %v10857_v55  ;;  %v13411_v55 = vld [vmem:[#allocation3 + $0x66c] sm:$0xf]  ;;  %v10809_v32 = vor.u32 %v13347_v22, %v10806_v16  ;;  %v10774_v26 = vld [vmem:[#allocation3 + $0x438] sm:$0xf0]  ;;  %v11177_v35 = vor.u32 %v13439_v17, %v11174_v38  ;;  %v13044_v17 = vld [vmem:[#allocation2 + $0x2ec] sm:$0xf0] }
 0x3b7   :  { %5878 = vmatpush.bf16.msrb.mxu1 %v10985_v28  ;;  %v11062_v28 = vld [vmem:[#allocation3 + $0x678] sm:$0xf0]  ;;  %v13339_v36 = vld [vmem:[#allocation3 + $0x42c] sm:$0xf] }
 0x3b8   :  { %5892 = vmatpush.bf16.msrb.mxu2 %v11113_v33  ;;  %v13443_v33 = vld [vmem:[#allocation3 + $0x76c] sm:$0xf]  ;;  %v11030_v22 = vld [vmem:[#allocation3 + $0x638] sm:$0xf0] }
 0x3b9   :  { %5906 = vmatpush.bf16.msrb.mxu3 %v11241_v24  ;;  %v11065_v24 = vor.u32 %v13411_v55, %v11062_v28  ;;  %v11193_v62 = vor.u32 %v13443_v33, %v11190_v31  ;;  %v13435_v16 = vld [vmem:[#allocation3 + $0x72c] sm:$0xf]  ;;  %v10886_v31 = vld [vmem:[#allocation3 + $0x518] sm:$0xf0] }
 0x3ba   :  { %5865 = vmatpush.bf16.msrb.mxu0 %v10841_v45  ;;  %v13407_v45 = vld [vmem:[#allocation3 + $0x64c] sm:$0xf]  ;;  %v5634_v61 = vpop.f32.mrf.mxu3 }
 0x3bb   :  { %5879 = vmatpush.bf16.msrb.mxu1 %v10969_v52  ;;  %v11046_v52 = vld [vmem:[#allocation3 + $0x658] sm:$0xf0]  ;;  %v13367_v33 = vld [vmem:[#allocation3 + $0x50c] sm:$0xf] }
 0x3bc   :  { %5893 = vmatpush.bf16.msrb.mxu2 %v11097_v11  ;;  %v5620_v11 = vpop.f32.mrf.mxu2  ;;  %v11049_v34 = vor.u32 %v13407_v45, %v11046_v52  ;;  %v13012_v52 = vld [vmem:[#allocation2 + $0x1ec] sm:$0xf0]  ;;  %v10889_v38 = vor.u32 %v13367_v33, %v10886_v31 }
 0x3bd   :  { %5907 = vmatpush.bf16.msrb.mxu3 %v11225_v14  ;;  %v5621_v30 = vadd.f32 %v5620_v11, %v5607_v18  ;;  %v10793_v14 = vor.u32 %v13343_v21, %v10790_v41  ;;  %v10777_v18 = vor.u32 %v13339_v36, %v10774_v26  ;;  %v13431_v21 = vld [vmem:[#allocation3 + $0x70c] sm:$0xf]  ;;  %v11142_v41 = vld [vmem:[#allocation3 + $0x718] sm:$0xf0]  ;;  %v11628_v11 = vld [vmem:[#allocation2 + $0x2e0] sm:$0xf]  ;;  %v11501_v36 = vor.u32 %v13012_v52, %v11500_v47 }
 0x3be   :  { %5866 = vmatpush.bf16.msrb.mxu0 %v10825_v56  ;;  %v13371_v56 = vld [vmem:[#allocation3 + $0x52c] sm:$0xf]  ;;  %v11629_v26 = vor.u32 %v13044_v17, %v11628_v11  ;;  %v11724_v47 = vld [vmem:[#allocation2 + $0x3a0] sm:$0xf] }
 0x3bf   :  { %5880 = vmatpush.bf16.msrb.mxu1 %v10953_v12  ;;  %v14113_v10 = vadd.f32 %v5634_v61, %v5621_v30  ;;  %v10902_v12 = vld [vmem:[#allocation3 + $0x538] sm:$0xf0]  ;;  %v13076_v61 = vld [vmem:[#allocation2 + $0x3ec] sm:$0xf0] }
 0x3c0   :  { %5894 = vmatpush.bf16.msrb.mxu2 %v11081_v13  ;;  %v13403_v13 = vld [vmem:[#allocation3 + $0x62c] sm:$0xf]  ;;  %v10905_v55 = vor.u32 %v13371_v56, %v10902_v12  ;;  %v14115_v56 = vpop.f32.mrf.mxu0  ;;  %v12976_v12 = vld [vmem:[#allocation2 + $0xcc] sm:$0xf0] }
 0x3c1   :  { %5908 = vmatpush.bf16.msrb.mxu3 %v11209_v25  ;;  %v13335_v25 = vld [vmem:[#allocation3 + $0x40c] sm:$0xf]  ;;  %v11033_v28 = vor.u32 %v13403_v13, %v11030_v22  ;;  %v11484_v13 = vld [vmem:[#allocation2 + $0x1c0] sm:$0xf] }
 0x3c2   :  { %5867 = vmatpush.bf16.msrb.mxu0 %v10809_v32  ;;  %v13399_v32 = vld [vmem:[#allocation3 + $0x60c] sm:$0xf]  ;;  %v10761_v45 = vor.u32 %v13335_v25, %v10758_v27  ;;  %v11740_v25 = vld [vmem:[#allocation2 + $0x3c0] sm:$0xf]  ;;  %v13072_v27 = vld [vmem:[#allocation2 + $0x3cc] sm:$0xf0] }
 0x3c3   :  { %5881 = vmatpush.bf16.msrb.mxu1 %v10937_v40  ;;  %v11161_v40 = vor.u32 %v13435_v16, %v11158_v39  ;;  %v13008_v16 = vld [vmem:[#allocation2 + $0x1cc] sm:$0xf0]  ;;  %v11612_v39 = vld [vmem:[#allocation2 + $0x2c0] sm:$0xf] }
 0x3c4   :  { %5895 = vmatpush.bf16.msrb.mxu2 %v11065_v24  ;;  %v11014_v24 = vld [vmem:[#allocation3 + $0x618] sm:$0xf0]  ;;  %v11485_v33 = vor.u32 %v13008_v16, %v11484_v13  ;;  %v14123_v11 = vpop.f32.mrf.mxu2 }
 0x3c5   :  { %5909 = vmatpush.bf16.msrb.mxu3 %v11193_v62  ;;  %v12980_v62 = vld [vmem:[#allocation2 + $0xec] sm:$0xf0]  ;;  %v11017_v30 = vor.u32 %v13399_v32, %v11014_v24  ;;  %v11340_v32 = vld [vmem:[#allocation2 + $0xa0] sm:$0xf] }
 0x3c6   :  { %5868 = vmatpush.bf16.msrb.mxu0 %v10793_v14  ;;  %v11756_v14 = vld [vmem:[#allocation2 + $0x3e0] sm:$0xf] }
 0x3c7   :  { %5882 = vmatpush.bf16.msrb.mxu1 %v10921_v19  ;;  %v11145_v19 = vor.u32 %v13431_v21, %v11142_v41  ;;  %v11757_v22 = vor.u32 %v13076_v61, %v11756_v14  ;;  %v11468_v24 = vld [vmem:[#allocation2 + $0x1a0] sm:$0xf]  ;;  %v11741_v21 = vor.u32 %v13072_v27, %v11740_v25  ;;  %v13004_v41 = vld [vmem:[#allocation2 + $0x1ac] sm:$0xf0] }
 0x3c8   :  { %5896 = vmatpush.bf16.msrb.mxu2 %v11049_v34  ;;  %v11373_v34 = vor.u32 %v12980_v62, %v11372_v43  ;;  %v11596_v43 = vld [vmem:[#allocation2 + $0x2a0] sm:$0xf]  ;;  %v13036_v62 = vld [vmem:[#allocation2 + $0x2ac] sm:$0xf0]  ;;  %v11469_v17 = vor.u32 %v13004_v41, %v11468_v24 }
 0x3c9   :  { %5910 = vmatpush.bf16.msrb.mxu3 %v11177_v35  ;;  %v11356_v35 = vld [vmem:[#allocation2 + $0xc0] sm:$0xf]  ;;  %v13060_v24 = vld [vmem:[#allocation2 + $0x36c] sm:$0xf0] }
 0x3ca   :  { %5869 = vmatpush.bf16.msrb.mxu0 %v10777_v18  ;;  %v13040_v18 = vld [vmem:[#allocation2 + $0x2cc] sm:$0xf0]  ;;  %v11452_v14 = vld [vmem:[#allocation2 + $0x180] sm:$0xf] }
 0x3cb   :  { %5883 = vmatpush.bf16.msrb.mxu1 %v10905_v55  ;;  %v14117_v55 = vpop.f32.mrf.mxu1  ;;  %v11613_v31 = vor.u32 %v13040_v18, %v11612_v39  ;;  %v11308_v39 = vld [vmem:[#allocation2 + $0x60] sm:$0xf]  ;;  %v12964_v18 = vld [vmem:[#allocation2 + $0x6c] sm:$0xf0] }
 0x3cc   :  { %5897 = vmatpush.bf16.msrb.mxu2 %v11033_v28  ;;  %v11357_v28 = vor.u32 %v12976_v12, %v11356_v35  ;;  %v11436_v25 = vld [vmem:[#allocation2 + $0x160] sm:$0xf] }
 0x3cd   :  { %5911 = vmatpush.bf16.msrb.mxu3 %v11161_v40  ;;  %v12972_v40 = vld [vmem:[#allocation2 + $0xac] sm:$0xf0] }
 0x3ce   :  { %5870 = vmatpush.bf16.msrb.mxu0 %v10761_v45  ;;  %v13068_v45 = vld [vmem:[#allocation2 + $0x3ac] sm:$0xf0]  ;;  %v11341_v52 = vor.u32 %v12972_v40, %v11340_v32  ;;  %v11692_v40 = vld [vmem:[#allocation2 + $0x360] sm:$0xf] }
 0x3cf   :  { %5884 = vmatpush.bf16.msrb.mxu1 %v10889_v38  ;;  %v11324_v38 = vld [vmem:[#allocation2 + $0x80] sm:$0xf]  ;;  %v11725_v61 = vor.u32 %v13068_v45, %v11724_v47  ;;  %v13028_v32 = vld [vmem:[#allocation2 + $0x26c] sm:$0xf0]  ;;  %v11693_v45 = vor.u32 %v13060_v24, %v11692_v40 }
 0x3d0   :  { %5898 = vmatpush.bf16.msrb.mxu2 %v11017_v30  ;;  %v12968_v30 = vld [vmem:[#allocation2 + $0x8c] sm:$0xf0]  ;;  %v11420_v47 = vld [vmem:[#allocation2 + $0x140] sm:$0xf] }
 0x3d1   :  { %5912 = vmatpush.bf16.msrb.mxu3 %v11145_v19  ;;  %5871 = vmatmul.bf16.vlgmr.msrb.gmra.mxu0 %v14046_v15  ;;  %v11597_v15 = vor.u32 %v13036_v62, %v11596_v43  ;;  %v11580_v19 = vld [vmem:[#allocation2 + $0x280] sm:$0xf]  ;;  %v11325_v12 = vor.u32 %v12968_v30, %v11324_v38  ;;  %v12960_v62 = vld [vmem:[#allocation2 + $0x4c] sm:$0xf0] }
 0x3d2   :  { %7199 = vmatpush.bf16.msra.mxu0 %v11373_v34  ;;  %5885 = vmatmul.bf16.vlgmr.msrb.gmra.mxu1 %v14060_v48  ;;  %v13000_v48 = vld [vmem:[#allocation2 + $0x18c] sm:$0xf0]  ;;  %v11292_v43 = vld [vmem:[#allocation2 + $0x40] sm:$0xf] }
 0x3d3   :  { %7213 = vmatpush.bf16.msra.mxu1 %v11501_v36  ;;  %5899 = vmatmul.bf16.vlgmr.msrb.gmra.mxu2 %v14058_v20  ;;  %v14125_v20 = vpop.f32.mrf.mxu3  ;;  %v13032_v34 = vld [vmem:[#allocation2 + $0x28c] sm:$0xf0]  ;;  %v5648_v36 = vpop.f32.mrf.mxu0  ;;  %v11453_v13 = vor.u32 %v13000_v48, %v11452_v14  ;;  %v11676_v14 = vld [vmem:[#allocation2 + $0x340] sm:$0xf] }
 0x3d4   :  { %7227 = vmatpush.bf16.msra.mxu2 %v11629_v26  ;;  %5913 = vmatmul.bf16.vlgmr.msrb.gmra.mxu3 %v14062_v23  ;;  %v11708_v23 = vld [vmem:[#allocation2 + $0x380] sm:$0xf]  ;;  %v13064_v26 = vld [vmem:[#allocation2 + $0x38c] sm:$0xf0]  ;;  %v5649_v35 = vadd.f32 %v5648_v36, %v14113_v10  ;;  %v5662_v16 = vpop.f32.mrf.mxu1 }
 0x3d5   :  { %7241 = vmatpush.bf16.msra.mxu3 %v11757_v22  ;;  %v11581_v22 = vor.u32 %v13032_v34, %v11580_v19  ;;  %v11709_v27 = vor.u32 %v13064_v26, %v11708_v23  ;;  %v13024_v38 = vld [vmem:[#allocation2 + $0x24c] sm:$0xf0]  ;;  %v11293_v19 = vor.u32 %v12960_v62, %v11292_v43  ;;  %v11276_v26 = vld [vmem:[#allocation2 + $0x20] sm:$0xf] }
 0x3d6   :  { %7200 = vmatpush.bf16.msra.mxu0 %v11357_v28  ;;  %v5663_v28 = vadd.f32 %v5662_v16, %v5649_v35  ;;  %v12956_v35 = vld [vmem:[#allocation2 + $0x2c] sm:$0xf0]  ;;  %v11532_v16 = vld [vmem:[#allocation2 + $0x220] sm:$0xf] }
 0x3d7   :  { %7214 = vmatpush.bf16.msra.mxu1 %v11485_v33  ;;  %v12996_v33 = vld [vmem:[#allocation2 + $0x16c] sm:$0xf0]  ;;  %v11388_v40 = vld [vmem:[#allocation2 + $0x100] sm:$0xf] }
 0x3d8   :  { %7228 = vmatpush.bf16.msra.mxu2 %v11613_v31  ;;  %v11564_v31 = vld [vmem:[#allocation2 + $0x260] sm:$0xf]  ;;  %v11437_v10 = vor.u32 %v12996_v33, %v11436_v25  ;;  %v13052_v25 = vld [vmem:[#allocation2 + $0x32c] sm:$0xf0] }
 0x3d9   :  { %7242 = vmatpush.bf16.msra.mxu3 %v11741_v21  ;;  %v11309_v21 = vor.u32 %v12964_v18, %v11308_v39  ;;  %v11565_v41 = vor.u32 %v13028_v32, %v11564_v31  ;;  %v13020_v39 = vld [vmem:[#allocation2 + $0x22c] sm:$0xf0]  ;;  %v11660_v18 = vld [vmem:[#allocation2 + $0x320] sm:$0xf] }
 0x3da   :  { %7201 = vmatpush.bf16.msra.mxu0 %v11341_v52  ;;  %v5676_v52 = vpop.f32.mrf.mxu2  ;;  %v12952_v33 = vld [vmem:[#allocation2 + $0xc] sm:$0xf0]  ;;  %v11533_v32 = vor.u32 %v13020_v39, %v11532_v16  ;;  %v11644_v43 = vld [vmem:[#allocation2 + $0x300] sm:$0xf] }
 0x3db   :  { %7215 = vmatpush.bf16.msra.mxu1 %v11469_v17  ;;  %v12992_v17 = vld [vmem:[#allocation2 + $0x14c] sm:$0xf0]  ;;  %v5677_v30 = vadd.f32 %v5676_v52, %v5663_v28  ;;  %v5690_v48 = vpop.f32.mrf.mxu3  ;;  %v11260_v28 = vld [vmem:[#allocation2] sm:$0xf] }
 0x3dc   :  { %7229 = vmatpush.bf16.msra.mxu2 %v11597_v15  ;;  %v11548_v15 = vld [vmem:[#allocation2 + $0x240] sm:$0xf]  ;;  %v11421_v36 = vor.u32 %v12992_v17, %v11420_v47  ;;  %v12984_v24 = vld [vmem:[#allocation2 + $0x10c] sm:$0xf0]  ;;  %v11261_v17 = vor.u32 %v12952_v33, %v11260_v28 }
 0x3dd   :  { %7243 = vmatpush.bf16.msra.mxu3 %v11725_v61  ;;  %v13056_v61 = vld [vmem:[#allocation2 + $0x34c] sm:$0xf0]  ;;  %v14128_v34 = vadd.f32 %v5690_v48, %v5677_v30  ;;  %v11549_v23 = vor.u32 %v13024_v38, %v11548_v15  ;;  %v11884_v47 = vld [vmem:[#allocation2 + $0x4e0] sm:$0xf] }
 0x3de   :  { %7202 = vmatpush.bf16.msra.mxu0 %v11325_v12  ;;  %v11404_v12 = vld [vmem:[#allocation2 + $0x120] sm:$0xf]  ;;  %v13048_v62 = vld [vmem:[#allocation2 + $0x30c] sm:$0xf0] }
 0x3df   :  { %7216 = vmatpush.bf16.msra.mxu1 %v11453_v13  ;;  %v11677_v13 = vor.u32 %v13056_v61, %v11676_v14  ;;  %v12012_v52 = vld [vmem:[#allocation2 + $0x5e0] sm:$0xf]  ;;  %v13140_v15 = vld [vmem:[#allocation2 + $0x5ec] sm:$0xf0]  ;;  %v11389_v14 = vor.u32 %v12984_v24, %v11388_v40 }
 0x3e0   :  { %7230 = vmatpush.bf16.msra.mxu2 %v11581_v22  ;;  %v12988_v22 = vld [vmem:[#allocation2 + $0x12c] sm:$0xf0]  ;;  %v12140_v38 = vld [vmem:[#allocation2 + $0x6e0] sm:$0xf] }
 0x3e1   :  { %7244 = vmatpush.bf16.msra.mxu3 %v11709_v27  ;;  %v11277_v27 = vor.u32 %v12956_v35, %v11276_v26  ;;  %v11405_v31 = vor.u32 %v12988_v22, %v11404_v12  ;;  %v13172_v30 = vld [vmem:[#allocation2 + $0x6ec] sm:$0xf0]  ;;  %v12268_v48 = vld [vmem:[#allocation2 + $0x7e0] sm:$0xf]  ;;  %v12013_v26 = vor.u32 %v13140_v15, %v12012_v52 }
 0x3e2   :  { %7203 = vmatpush.bf16.msra.mxu0 %v11309_v21  ;;  %v11516_v21 = vld [vmem:[#allocation2 + $0x200] sm:$0xf]  ;;  %v12141_v35 = vor.u32 %v13172_v30, %v12140_v38  ;;  %v13136_v39 = vld [vmem:[#allocation2 + $0x5cc] sm:$0xf0] }
 0x3e3   :  { %7217 = vmatpush.bf16.msra.mxu1 %v11437_v10  ;;  %v11661_v10 = vor.u32 %v13052_v25, %v11660_v18  ;;  %v11868_v12 = vld [vmem:[#allocation2 + $0x4c0] sm:$0xf]  ;;  %v13168_v25 = vld [vmem:[#allocation2 + $0x6cc] sm:$0xf0] }
 0x3e4   :  { %7231 = vmatpush.bf16.msra.mxu2 %v11565_v41  ;;  %v13016_v41 = vld [vmem:[#allocation2 + $0x20c] sm:$0xf0]  ;;  %v11996_v22 = vld [vmem:[#allocation2 + $0x5c0] sm:$0xf] }
 0x3e5   :  { %7245 = vmatpush.bf16.msra.mxu3 %v11693_v45  ;;  %v13108_v45 = vld [vmem:[#allocation2 + $0x4ec] sm:$0xf0]  ;;  %v11517_v61 = vor.u32 %v13016_v41, %v11516_v21  ;;  %v12124_v18 = vld [vmem:[#allocation2 + $0x6c0] sm:$0xf]  ;;  %v11997_v40 = vor.u32 %v13136_v39, %v11996_v22 }
 0x3e6   :  { %7204 = vmatpush.bf16.msra.mxu0 %v11293_v19  ;;  %v13204_v19 = vld [vmem:[#allocation2 + $0x7ec] sm:$0xf0]  ;;  %v12252_v28 = vld [vmem:[#allocation2 + $0x7c0] sm:$0xf]  ;;  %v12125_v24 = vor.u32 %v13168_v25, %v12124_v18 }
 0x3e7   :  { %7218 = vmatpush.bf16.msra.mxu1 %v11421_v36  ;;  %v11645_v36 = vor.u32 %v13048_v62, %v11644_v43  ;;  %v12269_v16 = vor.u32 %v13204_v19, %v12268_v48  ;;  %v13200_v33 = vld [vmem:[#allocation2 + $0x7cc] sm:$0xf0]  ;;  %v11852_v21 = vld [vmem:[#allocation2 + $0x4a0] sm:$0xf]  ;;  %v14138_v19 = vpop.f32.mrf.mxu2 }
 0x3e8   :  { %7232 = vmatpush.bf16.msra.mxu2 %v11549_v23  ;;  %v11885_v23 = vor.u32 %v13108_v45, %v11884_v47  ;;  %v11980_v41 = vld [vmem:[#allocation2 + $0x5a0] sm:$0xf]  ;;  %v12253_v43 = vor.u32 %v13200_v33, %v12252_v28  ;;  %v13132_v62 = vld [vmem:[#allocation2 + $0x5ac] sm:$0xf0] }
 0x3e9   :  { %7246 = vmatpush.bf16.msra.mxu3 %v11677_v13  ;;  %v13104_v13 = vld [vmem:[#allocation2 + $0x4cc] sm:$0xf0]  ;;  %v12108_v47 = vld [vmem:[#allocation2 + $0x6a0] sm:$0xf]  ;;  %v11981_v38 = vor.u32 %v13132_v62, %v11980_v41 }
 0x3ea   :  { %7205 = vmatpush.bf16.msra.mxu0 %v11277_v27  ;;  %v14130_v27 = vpop.f32.mrf.mxu0  ;;  %v13164_v45 = vld [vmem:[#allocation2 + $0x6ac] sm:$0xf0]  ;;  %v12236_v52 = vld [vmem:[#allocation2 + $0x7a0] sm:$0xf] }
 0x3eb   :  { %7219 = vmatpush.bf16.msra.mxu1 %v11405_v31  ;;  %v14132_v31 = vpop.f32.mrf.mxu1  ;;  %v12109_v30 = vor.u32 %v13164_v45, %v12108_v47  ;;  %v11964_v48 = vld [vmem:[#allocation2 + $0x580] sm:$0xf]  ;;  %v13192_v22 = vld [vmem:[#allocation2 + $0x78c] sm:$0xf0] }
 0x3ec   :  { %7233 = vmatpush.bf16.msra.mxu2 %v11533_v32  ;;  %v11869_v32 = vor.u32 %v13104_v13, %v11868_v12  ;;  %v14140_v12 = vpop.f32.mrf.mxu3  ;;  %v12220_v13 = vld [vmem:[#allocation2 + $0x780] sm:$0xf]  ;;  %v13188_v47 = vld [vmem:[#allocation2 + $0x76c] sm:$0xf0] }
 0x3ed   :  { %7247 = vmatpush.bf16.msra.mxu3 %v11661_v10  ;;  %v13100_v10 = vld [vmem:[#allocation2 + $0x4ac] sm:$0xf0]  ;;  %v11820_v33 = vld [vmem:[#allocation2 + $0x460] sm:$0xf] }
 0x3ee   :  { %7206 = vmatpush.bf16.msra.mxu0 %v11261_v17  ;;  %v13196_v17 = vld [vmem:[#allocation2 + $0x7ac] sm:$0xf0]  ;;  %v11853_v15 = vor.u32 %v13100_v10, %v11852_v21  ;;  %v12221_v21 = vor.u32 %v13192_v22, %v12220_v13  ;;  %v12076_v41 = vld [vmem:[#allocation2 + $0x660] sm:$0xf] }
 0x3ef   :  { %7220 = vmatpush.bf16.msra.mxu1 %v11389_v14  ;;  %v11836_v14 = vld [vmem:[#allocation2 + $0x480] sm:$0xf]  ;;  %v13124_v10 = vld [vmem:[#allocation2 + $0x56c] sm:$0xf0] }
 0x3f0   :  { %7234 = vmatpush.bf16.msra.mxu2 %v11517_v61  ;;  %v13096_v61 = vld [vmem:[#allocation2 + $0x48c] sm:$0xf0]  ;;  %v12204_v62 = vld [vmem:[#allocation2 + $0x760] sm:$0xf] }
 0x3f1   :  { %7248 = vmatpush.bf16.msra.mxu3 %v11645_v36  ;;  %7207 = vmatmul.bf16.vlgmr.msra.gmra.mxu0 %v13901_v54  ;;  %v12237_v36 = vor.u32 %v13196_v17, %v12236_v52  ;;  %v11837_v39 = vor.u32 %v13096_v61, %v11836_v14  ;;  %v11804_v52 = vld [vmem:[#allocation2 + $0x440] sm:$0xf]  ;;  %v13120_v14 = vld [vmem:[#allocation2 + $0x54c] sm:$0xf0]  ;;  %v12205_v61 = vor.u32 %v13188_v47, %v12204_v62 }
 0x3f2   :  { %7255 = vmatpush.bf16.msrb.mxu0 %v11885_v23  ;;  %7221 = vmatmul.bf16.vlgmr.msra.gmra.mxu1 %v13929_v46  ;;  %v13128_v23 = vld [vmem:[#allocation2 + $0x58c] sm:$0xf0]  ;;  %v12044_v62 = vld [vmem:[#allocation2 + $0x620] sm:$0xf] }
 0x3f3   :  { %7269 = vmatpush.bf16.msrb.mxu1 %v12013_v26  ;;  %7235 = vmatmul.bf16.vlgmr.msra.gmra.mxu2 %v13966_v42  ;;  %v12092_v26 = vld [vmem:[#allocation2 + $0x680] sm:$0xf]  ;;  %v5718_v18 = vpop.f32.mrf.mxu1  ;;  %v11965_v25 = vor.u32 %v13128_v23, %v11964_v48 }
 0x3f4   :  { %7283 = vmatpush.bf16.msrb.mxu2 %v12141_v35  ;;  %7249 = vmatmul.bf16.vlgmr.msra.gmra.mxu3 %v13984_v51  ;;  %v13160_v35 = vld [vmem:[#allocation2 + $0x68c] sm:$0xf0]  ;;  %v12060_v48 = vld [vmem:[#allocation2 + $0x640] sm:$0xf] }
 0x3f5   :  { %7297 = vmatpush.bf16.msrb.mxu3 %v12269_v16  ;;  %v5704_v16 = vpop.f32.mrf.mxu0  ;;  %v12093_v28 = vor.u32 %v13160_v35, %v12092_v26  ;;  %v12188_v26 = vld [vmem:[#allocation2 + $0x740] sm:$0xf]  ;;  %v13184_v35 = vld [vmem:[#allocation2 + $0x74c] sm:$0xf0] }
 0x3f6   :  { %7256 = vmatpush.bf16.msrb.mxu0 %v11869_v32  ;;  %v13092_v32 = vld [vmem:[#allocation2 + $0x46c] sm:$0xf0]  ;;  %v5732_v23 = vpop.f32.mrf.mxu2  ;;  %v12172_v47 = vld [vmem:[#allocation2 + $0x720] sm:$0xf] }
 0x3f7   :  { %7270 = vmatpush.bf16.msrb.mxu1 %v11997_v40  ;;  %v11948_v40 = vld [vmem:[#allocation2 + $0x560] sm:$0xf]  ;;  %v11821_v45 = vor.u32 %v13092_v32, %v11820_v33  ;;  %v5746_v22 = vpop.f32.mrf.mxu3  ;;  %v13084_v32 = vld [vmem:[#allocation2 + $0x42c] sm:$0xf0] }
 0x3f8   :  { %7284 = vmatpush.bf16.msrb.mxu2 %v12125_v24  ;;  %v5719_v24 = vadd.f32 %v5718_v18, %v5704_v16  ;;  %v11949_v17 = vor.u32 %v13124_v10, %v11948_v40  ;;  %v11788_v33 = vld [vmem:[#allocation2 + $0x420] sm:$0xf] }
 0x3f9   :  { %7298 = vmatpush.bf16.msrb.mxu3 %v12253_v43  ;;  %v13156_v43 = vld [vmem:[#allocation2 + $0x66c] sm:$0xf0]  ;;  %v11916_v40 = vld [vmem:[#allocation2 + $0x520] sm:$0xf] }
 0x3fa   :  { %7257 = vmatpush.bf16.msrb.mxu0 %v11853_v15  ;;  %v12077_v15 = vor.u32 %v13156_v43, %v12076_v41  ;;  %v5733_v13 = vadd.f32 %v5732_v23, %v5719_v24  ;;  %v12189_v41 = vor.u32 %v13184_v35, %v12188_v26  ;;  %v13116_v43 = vld [vmem:[#allocation2 + $0x52c] sm:$0xf0]  ;;  %v12156_v26 = vld [vmem:[#allocation2 + $0x700] sm:$0xf] }
 0x3fb   :  { %7271 = vmatpush.bf16.msrb.mxu1 %v11981_v38  ;;  %v13088_v38 = vld [vmem:[#allocation2 + $0x44c] sm:$0xf0] }
 0x3fc   :  { %7285 = vmatpush.bf16.msrb.mxu2 %v12109_v30  ;;  %v11932_v30 = vld [vmem:[#allocation2 + $0x540] sm:$0xf]  ;;  %v11805_v16 = vor.u32 %v13088_v38, %v11804_v52  ;;  %v13148_v24 = vld [vmem:[#allocation2 + $0x62c] sm:$0xf0]  ;;  %v11789_v52 = vor.u32 %v13084_v32, %v11788_v33  ;;  %v11502_v32 = vld [vmem:[#allocation2 + $0x1f0] sm:$0xf0] }
 0x3fd   :  { %7299 = vmatpush.bf16.msrb.mxu3 %v12237_v36  ;;  %v13152_v36 = vld [vmem:[#allocation2 + $0x64c] sm:$0xf0]  ;;  %v5706_v18 = vpop.f32.mrf.mxu0  ;;  %v11772_v38 = vld [vmem:[#allocation2 + $0x400] sm:$0xf] }
 0x3fe   :  { %7258 = vmatpush.bf16.msrb.mxu0 %v11837_v39  ;;  %v11933_v39 = vor.u32 %v13120_v14, %v11932_v30  ;;  %v13080_v30 = vld [vmem:[#allocation2 + $0x40c] sm:$0xf0]  ;;  %v11900_v14 = vld [vmem:[#allocation2 + $0x500] sm:$0xf] }
 0x3ff   :  { %7272 = vmatpush.bf16.msrb.mxu1 %v11965_v25  ;;  %v5720_v25 = vpop.f32.mrf.mxu1  ;;  %v13176_v35 = vld [vmem:[#allocation2 + $0x70c] sm:$0xf0]  ;;  %v11773_v33 = vor.u32 %v13080_v30, %v11772_v38  ;;  %v13006_v38 = vld [vmem:[#allocation2 + $0x1c4] sm:$0xf] }
 0x400   :  { %7286 = vmatpush.bf16.msrb.mxu2 %v12093_v28  ;;  %v12061_v28 = vor.u32 %v13152_v36, %v12060_v48  ;;  %v5721_v10 = vadd.f32 %v5720_v25, %v5706_v18  ;;  %v13112_v48 = vld [vmem:[#allocation2 + $0x50c] sm:$0xf0]  ;;  %v12028_v36 = vld [vmem:[#allocation2 + $0x600] sm:$0xf]  ;;  %v11374_v18 = vld [vmem:[#allocation2 + $0xf0] sm:$0xf0] }
 0x401   :  { %7300 = vmatpush.bf16.msrb.mxu3 %v12221_v21  ;;  %v14142_v21 = vadd.f32 %v5746_v22, %v5733_v13  ;;  %v5734_v13 = vpop.f32.mrf.mxu2  ;;  %v12978_v22 = vld [vmem:[#allocation2 + $0xe4] sm:$0xf] }
 0x402   :  { %7259 = vmatpush.bf16.msrb.mxu0 %v11821_v45  ;;  %v13180_v45 = vld [vmem:[#allocation2 + $0x72c] sm:$0xf0]  ;;  %v13010_v25 = vld [vmem:[#allocation2 + $0x1e4] sm:$0xf]  ;;  %v11377_v7 = vor.u32 %v12978_v22, %v11374_v18  ;;  %v11470_v18 = vld [vmem:[#allocation2 + $0x1b0] sm:$0xf0] }
 0x403   :  { %7273 = vmatpush.bf16.msrb.mxu1 %v11949_v17  ;;  %v11917_v17 = vor.u32 %v13116_v43, %v11916_v40  ;;  %v12173_v23 = vor.u32 %v13180_v45, %v12172_v47  ;;  %v5748_v40 = vpop.f32.mrf.mxu3  ;;  %v11901_v43 = vor.u32 %v13112_v48, %v11900_v14  ;;  %v12157_v45 = vor.u32 %v13176_v35, %v12156_v26  ;;  %v11742_v14 = vld [vmem:[#allocation2 + $0x3d0] sm:$0xf0]  ;;  %v13002_v35 = vld [vmem:[#allocation2 + $0x1a4] sm:$0xf] }
 0x404   :  { %7287 = vmatpush.bf16.msrb.mxu2 %v12077_v15  ;;  %v12045_v15 = vor.u32 %v13148_v24, %v12044_v62  ;;  %v11758_v24 = vld [vmem:[#allocation2 + $0x3f0] sm:$0xf0]  ;;  %v11505_v6 = vor.u32 %v13010_v25, %v11502_v32  ;;  %v13034_v25 = vld [vmem:[#allocation2 + $0x2a4] sm:$0xf] }
 0x405   :  { %7301 = vmatpush.bf16.msrb.mxu3 %v12205_v61  ;;  %v13144_v61 = vld [vmem:[#allocation2 + $0x60c] sm:$0xf0]  ;;  %v11342_v26 = vld [vmem:[#allocation2 + $0xb0] sm:$0xf0]  ;;  %v12966_v32 = vld [vmem:[#allocation2 + $0x84] sm:$0xf] }
 0x406   :  { %7260 = vmatpush.bf16.msrb.mxu0 %v11805_v16  ;;  %v5735_v16 = vadd.f32 %v5734_v13, %v5721_v10  ;;  %v12029_v62 = vor.u32 %v13144_v61, %v12028_v36  ;;  %v12974_v10 = vld [vmem:[#allocation2 + $0xc4] sm:$0xf]  ;;  %v11486_v13 = vld [vmem:[#allocation2 + $0x1d0] sm:$0xf0] }
 0x407   :  { %7274 = vmatpush.bf16.msrb.mxu1 %v11933_v39  ;;  %v13042_v39 = vld [vmem:[#allocation2 + $0x2e4] sm:$0xf]  ;;  %v11489_v36 = vor.u32 %v13006_v38, %v11486_v13 }
 0x408   :  { %7288 = vmatpush.bf16.msrb.mxu2 %v12061_v28  ;;  %v11630_v28 = vld [vmem:[#allocation2 + $0x2f0] sm:$0xf0]  ;;  %v14144_v47 = vadd.f32 %v5748_v40, %v5735_v16  ;;  %v12970_v61 = vld [vmem:[#allocation2 + $0xa4] sm:$0xf] }
 0x409   :  { %7302 = vmatpush.bf16.msrb.mxu3 %v12189_v41  ;;  %v13074_v41 = vld [vmem:[#allocation2 + $0x3e4] sm:$0xf]  ;;  %v11633_v5 = vor.u32 %v13042_v39, %v11630_v28  ;;  %v11598_v16 = vld [vmem:[#allocation2 + $0x2b0] sm:$0xf0] }
 0x40a   :  { %7261 = vmatpush.bf16.msrb.mxu0 %v11789_v52  ;;  %v11358_v52 = vld [vmem:[#allocation2 + $0xd0] sm:$0xf0]  ;;  %v11761_v30 = vor.u32 %v13074_v41, %v11758_v24  ;;  %v12998_v28 = vld [vmem:[#allocation2 + $0x184] sm:$0xf] }
 0x40b   :  { %7275 = vmatpush.bf16.msrb.mxu1 %v11917_v17  ;;  %v11614_v17 = vld [vmem:[#allocation2 + $0x2d0] sm:$0xf0]  ;;  %v11361_v48 = vor.u32 %v12974_v10, %v11358_v52 }
 0x40c   :  { %7289 = vmatpush.bf16.msrb.mxu2 %v12045_v15  ;;  %v13070_v15 = vld [vmem:[#allocation2 + $0x3c4] sm:$0xf]  ;;  %v11326_v39 = vld [vmem:[#allocation2 + $0x90] sm:$0xf0] }
 0x40d   :  { %7303 = vmatpush.bf16.msrb.mxu3 %v12173_v23  ;;  %v11617_v23 = vor.u32 %v13038_v4, %v11614_v17  ;;  %v11745_v22 = vor.u32 %v13070_v15, %v11742_v14  ;;  %v11345_v4 = vor.u32 %v12970_v61, %v11342_v26  ;;  %v11582_v41 = vld [vmem:[#allocation2 + $0x290] sm:$0xf0]  ;;  %v11329_v38 = vor.u32 %v12966_v32, %v11326_v39  ;;  %v12962_v15 = vld [vmem:[#allocation2 + $0x64] sm:$0xf] }
 0x40e   :  { %7262 = vmatpush.bf16.msrb.mxu0 %v11773_v33  ;;  %v11726_v33 = vld [vmem:[#allocation2 + $0x3b0] sm:$0xf0]  ;;  %v5760_v24 = vpop.f32.mrf.mxu0  ;;  %v13026_v26 = vld [vmem:[#allocation2 + $0x264] sm:$0xf] }
 0x40f   :  { %7276 = vmatpush.bf16.msrb.mxu1 %v11901_v43  ;;  %v11454_v43 = vld [vmem:[#allocation2 + $0x190] sm:$0xf0]  ;;  %v5761_v52 = vadd.f32 %v5760_v24, %v14142_v21  ;;  %v13022_v39 = vld [vmem:[#allocation2 + $0x244] sm:$0xf] }
 0x410   :  { %7290 = vmatpush.bf16.msrb.mxu2 %v12029_v62  ;;  %v13030_v62 = vld [vmem:[#allocation2 + $0x284] sm:$0xf]  ;;  %v11710_v10 = vld [vmem:[#allocation2 + $0x390] sm:$0xf0]  ;;  %v11457_v13 = vor.u32 %v12998_v28, %v11454_v43 }
 0x411   :  { %7304 = vmatpush.bf16.msrb.mxu3 %v12157_v45  ;;  %7263 = vmatmul.bf16.vlgmr.msrb.gmra.mxu0 %v14013_v44  ;;  %v13062_v45 = vld [vmem:[#allocation2 + $0x384] sm:$0xf]  ;;  %v11585_v17 = vor.u32 %v13030_v62, %v11582_v41  ;;  %v11310_v14 = vld [vmem:[#allocation2 + $0x70] sm:$0xf0] }
 0x412   :  { %7311 = vmatpush.bf16.msra.mxu0 %v11377_v7  ;;  %7277 = vmatmul.bf16.vlgmr.msrb.gmra.mxu1 %v14030_v49  ;;  %v13066_v7 = vld [vmem:[#allocation2 + $0x3a4] sm:$0xf]  ;;  %v11438_v61 = vld [vmem:[#allocation2 + $0x170] sm:$0xf0] }
 0x413   :  { %7325 = vmatpush.bf16.msra.mxu1 %v11505_v6  ;;  %7291 = vmatmul.bf16.vlgmr.msrb.gmra.mxu2 %v14032_v59  ;;  %v11601_v6 = vor.u32 %v13034_v25, %v11598_v16  ;;  %v11729_v40 = vor.u32 %v13066_v7, %v11726_v33  ;;  %v11313_v25 = vor.u32 %v12962_v15, %v11310_v14  ;;  %v12958_v7 = vld [vmem:[#allocation2 + $0x44] sm:$0xf]  ;;  %v11294_v33 = vld [vmem:[#allocation2 + $0x50] sm:$0xf0] }
 0x414   :  { %7339 = vmatpush.bf16.msra.mxu2 %v11633_v5  ;;  %7305 = vmatmul.bf16.vlgmr.msrb.gmra.mxu3 %v14040_v57  ;;  %v11473_v5 = vor.u32 %v13002_v35, %v11470_v18  ;;  %v11566_v35 = vld [vmem:[#allocation2 + $0x270] sm:$0xf0]  ;;  %v13054_v41 = vld [vmem:[#allocation2 + $0x344] sm:$0xf] }
 0x415   :  { %7353 = vmatpush.bf16.msra.mxu3 %v11761_v30  ;;  %v5774_v30 = vpop.f32.mrf.mxu1  ;;  %v11694_v18 = vld [vmem:[#allocation2 + $0x370] sm:$0xf0]  ;;  %v11569_v16 = vor.u32 %v13026_v26, %v11566_v35  ;;  %v12986_v14 = vld [vmem:[#allocation2 + $0x124] sm:$0xf] }
 0x416   :  { %7312 = vmatpush.bf16.msra.mxu0 %v11361_v48  ;;  %v12994_v48 = vld [vmem:[#allocation2 + $0x164] sm:$0xf]  ;;  %v11422_v32 = vld [vmem:[#allocation2 + $0x150] sm:$0xf0]  ;;  %v5762_v43 = vpop.f32.mrf.mxu0 }
 0x417   :  { %7326 = vmatpush.bf16.msra.mxu1 %v11489_v36  ;;  %v11713_v36 = vor.u32 %v13062_v45, %v11710_v10  ;;  %v11441_v21 = vor.u32 %v12994_v48, %v11438_v61  ;;  %v11550_v28 = vld [vmem:[#allocation2 + $0x250] sm:$0xf0]  ;;  %v5802_v62 = vpop.f32.mrf.mxu3  ;;  %v5763_v45 = vadd.f32 %v5762_v43, %v14144_v47  ;;  %v11297_v10 = vor.u32 %v12958_v7, %v11294_v33  ;;  %v13018_v61 = vld [vmem:[#allocation2 + $0x224] sm:$0xf] }
 0x418   :  { %7340 = vmatpush.bf16.msra.mxu2 %v11617_v23  ;;  %v5775_v23 = vadd.f32 %v5774_v30, %v5761_v52  ;;  %v11678_v24 = vld [vmem:[#allocation2 + $0x350] sm:$0xf0]  ;;  %v13050_v35 = vld [vmem:[#allocation2 + $0x324] sm:$0xf] }
 0x419   :  { %7354 = vmatpush.bf16.msra.mxu3 %v11745_v22  ;;  %v13058_v22 = vld [vmem:[#allocation2 + $0x364] sm:$0xf]  ;;  %v11278_v15 = vld [vmem:[#allocation2 + $0x30] sm:$0xf0]  ;;  %v11681_v48 = vor.u32 %v13054_v41, %v11678_v24 }
 0x41a   :  { %7313 = vmatpush.bf16.msra.mxu0 %v11345_v4  ;;  %v12990_v4 = vld [vmem:[#allocation2 + $0x144] sm:$0xf]  ;;  %v11534_v26 = vld [vmem:[#allocation2 + $0x230] sm:$0xf0] }
 0x41b   :  { %7327 = vmatpush.bf16.msra.mxu1 %v11473_v5  ;;  %v11697_v5 = vor.u32 %v13058_v22, %v11694_v18  ;;  %v11425_v30 = vor.u32 %v12990_v4, %v11422_v32  ;;  %v11662_v22 = vld [vmem:[#allocation2 + $0x330] sm:$0xf0]  ;;  %v12950_v18 = vld [vmem:[#allocation2 + $0x4] sm:$0xf] }
 0x41c   :  { %7341 = vmatpush.bf16.msra.mxu2 %v11601_v6  ;;  %v5788_v6 = vpop.f32.mrf.mxu2  ;;  %v12982_v7 = vld [vmem:[#allocation2 + $0x104] sm:$0xf]  ;;  %v11390_v33 = vld [vmem:[#allocation2 + $0x110] sm:$0xf0] }
 0x41d   :  { %7355 = vmatpush.bf16.msra.mxu3 %v11729_v40  ;;  %v5789_v40 = vadd.f32 %v5788_v6, %v5775_v23  ;;  %v5776_v52 = vpop.f32.mrf.mxu1  ;;  %v11406_v23 = vld [vmem:[#allocation2 + $0x130] sm:$0xf0]  ;;  %v13014_v4 = vld [vmem:[#allocation2 + $0x204] sm:$0xf] }
 0x41e   :  { %7314 = vmatpush.bf16.msra.mxu0 %v11329_v38  ;;  %v11518_v32 = vld [vmem:[#allocation2 + $0x210] sm:$0xf0]  ;;  %v13138_v24 = vld [vmem:[#allocation2 + $0x5e4] sm:$0xf] }
 0x41f   :  { %7328 = vmatpush.bf16.msra.mxu1 %v11457_v13  ;;  %v14152_v38 = vadd.f32 %v5802_v62, %v5789_v40  ;;  %v11553_v13 = vor.u32 %v13022_v39, %v11550_v28  ;;  %v13046_v39 = vld [vmem:[#allocation2 + $0x304] sm:$0xf]  ;;  %v11646_v28 = vld [vmem:[#allocation2 + $0x310] sm:$0xf0]  ;;  %v5804_v43 = vpop.f32.mrf.mxu3 }
 0x420   :  { %7342 = vmatpush.bf16.msra.mxu2 %v11585_v17  ;;  %v12954_v17 = vld [vmem:[#allocation2 + $0x24] sm:$0xf]  ;;  %v11886_v41 = vld [vmem:[#allocation2 + $0x4f0] sm:$0xf0] }
 0x421   :  { %7356 = vmatpush.bf16.msra.mxu3 %v11713_v36  ;;  %v5777_v36 = vadd.f32 %v5776_v52, %v5763_v45  ;;  %v11281_v47 = vor.u32 %v12954_v17, %v11278_v15  ;;  %v13106_v62 = vld [vmem:[#allocation2 + $0x4e4] sm:$0xf]  ;;  %v11393_v17 = vor.u32 %v12982_v7, %v11390_v33  ;;  %v11521_v15 = vor.u32 %v13014_v4, %v11518_v32  ;;  %v12254_v7 = vld [vmem:[#allocation2 + $0x7d0] sm:$0xf0] }
 0x422   :  { %7315 = vmatpush.bf16.msra.mxu0 %v11313_v25  ;;  %v11262_v25 = vld [vmem:[#allocation2 + $0x10] sm:$0xf0]  ;;  %v13170_v52 = vld [vmem:[#allocation2 + $0x6e4] sm:$0xf] }
 0x423   :  { %7329 = vmatpush.bf16.msra.mxu1 %v11441_v21  ;;  %v11409_v21 = vor.u32 %v12986_v14, %v11406_v23  ;;  %v11265_v45 = vor.u32 %v12950_v18, %v11262_v25  ;;  %v13202_v14 = vld [vmem:[#allocation2 + $0x7e4] sm:$0xf]  ;;  %v11649_v23 = vor.u32 %v13046_v39, %v11646_v28  ;;  %v11998_v25 = vld [vmem:[#allocation2 + $0x5d0] sm:$0xf0] }
 0x424   :  { %7343 = vmatpush.bf16.msra.mxu2 %v11569_v16  ;;  %v11537_v16 = vor.u32 %v13018_v61, %v11534_v26  ;;  %v5790_v6 = vpop.f32.mrf.mxu2  ;;  %v13098_v32 = vld [vmem:[#allocation2 + $0x4a4] sm:$0xf]  ;;  %v11854_v39 = vld [vmem:[#allocation2 + $0x4b0] sm:$0xf0] }
 0x425   :  { %7357 = vmatpush.bf16.msra.mxu3 %v11697_v5  ;;  %v11665_v5 = vor.u32 %v13050_v35, %v11662_v22  ;;  %v5791_v40 = vadd.f32 %v5790_v6, %v5777_v36  ;;  %v11889_v36 = vor.u32 %v13106_v62, %v11886_v41  ;;  %v13102_v35 = vld [vmem:[#allocation2 + $0x4c4] sm:$0xf]  ;;  %v11870_v22 = vld [vmem:[#allocation2 + $0x4d0] sm:$0xf0] }
 0x426   :  { %7316 = vmatpush.bf16.msra.mxu0 %v11297_v10  ;;  %v12014_v10 = vld [vmem:[#allocation2 + $0x5f0] sm:$0xf0]  ;;  %v13166_v6 = vld [vmem:[#allocation2 + $0x6c4] sm:$0xf]  ;;  %v11873_v33 = vor.u32 %v13102_v35, %v11870_v22 }
 0x427   :  { %7330 = vmatpush.bf16.msra.mxu1 %v11425_v30  ;;  %v12142_v30 = vld [vmem:[#allocation2 + $0x6f0] sm:$0xf0]  ;;  %v12017_v61 = vor.u32 %v13138_v24, %v12014_v10  ;;  %v13130_v28 = vld [vmem:[#allocation2 + $0x5a4] sm:$0xf]  ;;  %v11857_v10 = vor.u32 %v13098_v32, %v11854_v39 }
 0x428   :  { %7344 = vmatpush.bf16.msra.mxu2 %v11553_v13  ;;  %v14154_v13 = vadd.f32 %v5804_v43, %v5791_v40  ;;  %v12145_v26 = vor.u32 %v13170_v52, %v12142_v30  ;;  %v11982_v43 = vld [vmem:[#allocation2 + $0x5b0] sm:$0xf0]  ;;  %v13162_v62 = vld [vmem:[#allocation2 + $0x6a4] sm:$0xf] }
 0x429   :  { %7358 = vmatpush.bf16.msra.mxu3 %v11681_v48  ;;  %v12270_v48 = vld [vmem:[#allocation2 + $0x7f0] sm:$0xf0]  ;;  %v13194_v24 = vld [vmem:[#allocation2 + $0x7a4] sm:$0xf]  ;;  %v11985_v52 = vor.u32 %v13130_v28, %v11982_v43 }
 0x42a   :  { %7317 = vmatpush.bf16.msra.mxu0 %v11281_v47  ;;  %v13134_v47 = vld [vmem:[#allocation2 + $0x5c4] sm:$0xf]  ;;  %v12273_v18 = vor.u32 %v13202_v14, %v12270_v48  ;;  %v12110_v41 = vld [vmem:[#allocation2 + $0x6b0] sm:$0xf0] }
 0x42b   :  { %7331 = vmatpush.bf16.msra.mxu1 %v11409_v21  ;;  %v12126_v21 = vld [vmem:[#allocation2 + $0x6d0] sm:$0xf0]  ;;  %v12001_v4 = vor.u32 %v13134_v47, %v11998_v25  ;;  %v12113_v30 = vor.u32 %v13162_v62, %v12110_v41  ;;  %v13126_v14 = vld [vmem:[#allocation2 + $0x584] sm:$0xf] }
 0x42c   :  { %7345 = vmatpush.bf16.msra.mxu2 %v11537_v16  ;;  %v13198_v16 = vld [vmem:[#allocation2 + $0x7c4] sm:$0xf]  ;;  %v12222_v35 = vld [vmem:[#allocation2 + $0x790] sm:$0xf0] }
 0x42d   :  { %7359 = vmatpush.bf16.msra.mxu3 %v11665_v5  ;;  %v12129_v5 = vor.u32 %v13166_v6, %v12126_v21  ;;  %v12257_v40 = vor.u32 %v13198_v16, %v12254_v7  ;;  %v13090_v21 = vld [vmem:[#allocation2 + $0x464] sm:$0xf]  ;;  %v11822_v16 = vld [vmem:[#allocation2 + $0x470] sm:$0xf0] }
 0x42e   :  { %7318 = vmatpush.bf16.msra.mxu0 %v11265_v45  ;;  %v12238_v45 = vld [vmem:[#allocation2 + $0x7b0] sm:$0xf0]  ;;  %v5816_v22 = vpop.f32.mrf.mxu0  ;;  %v13122_v7 = vld [vmem:[#allocation2 + $0x564] sm:$0xf]  ;;  %v11825_v43 = vor.u32 %v13090_v21, %v11822_v16 }
 0x42f   :  { %7332 = vmatpush.bf16.msra.mxu1 %v11393_v17  ;;  %v13094_v17 = vld [vmem:[#allocation2 + $0x484] sm:$0xf]  ;;  %v12241_v48 = vor.u32 %v13194_v24, %v12238_v45  ;;  %v12078_v39 = vld [vmem:[#allocation2 + $0x670] sm:$0xf0] }
 0x430   :  { %7346 = vmatpush.bf16.msra.mxu2 %v11521_v15  ;;  %v11838_v15 = vld [vmem:[#allocation2 + $0x490] sm:$0xf0]  ;;  %v13154_v32 = vld [vmem:[#allocation2 + $0x664] sm:$0xf] }
 0x431   :  { %7360 = vmatpush.bf16.msra.mxu3 %v11649_v23  ;;  %7319 = vmatmul.bf16.vlgmr.msra.gmra.mxu0 %v13901_v54  ;;  %v11966_v23 = vld [vmem:[#allocation2 + $0x590] sm:$0xf0]  ;;  %v11841_v47 = vor.u32 %v13094_v17, %v11838_v15  ;;  %v13186_v28 = vld [vmem:[#allocation2 + $0x764] sm:$0xf]  ;;  %v12081_v24 = vor.u32 %v13154_v32, %v12078_v39 }
 0x432   :  { %7367 = vmatpush.bf16.msrb.mxu0 %v11889_v36  ;;  %7333 = vmatmul.bf16.vlgmr.msra.gmra.mxu1 %v13929_v46  ;;  %v13158_v36 = vld [vmem:[#allocation2 + $0x684] sm:$0xf]  ;;  %v11969_v25 = vor.u32 %v13126_v14, %v11966_v23  ;;  %v11806_v45 = vld [vmem:[#allocation2 + $0x450] sm:$0xf0] }
 0x433   :  { %7381 = vmatpush.bf16.msrb.mxu1 %v12017_v61  ;;  %7347 = vmatmul.bf16.vlgmr.msra.gmra.mxu2 %v13966_v42  ;;  %v12094_v61 = vld [vmem:[#allocation2 + $0x690] sm:$0xf0]  ;;  %v13086_v62 = vld [vmem:[#allocation2 + $0x444] sm:$0xf] }
 0x434   :  { %7395 = vmatpush.bf16.msrb.mxu2 %v12145_v26  ;;  %7361 = vmatmul.bf16.vlgmr.msra.gmra.mxu3 %v13984_v51  ;;  %v13190_v26 = vld [vmem:[#allocation2 + $0x784] sm:$0xf]  ;;  %v12097_v6 = vor.u32 %v13158_v36, %v12094_v61  ;;  %v12062_v15 = vld [vmem:[#allocation2 + $0x650] sm:$0xf0] }
 0x435   :  { %7409 = vmatpush.bf16.msrb.mxu3 %v12273_v18  ;;  %v5830_v18 = vpop.f32.mrf.mxu1  ;;  %v13150_v17 = vld [vmem:[#allocation2 + $0x644] sm:$0xf]  ;;  %v12190_v23 = vld [vmem:[#allocation2 + $0x750] sm:$0xf0] }
 0x436   :  { %7368 = vmatpush.bf16.msrb.mxu0 %v11873_v33  ;;  %v5831_v33 = vadd.f32 %v5830_v18, %v5816_v22  ;;  %v5844_v14 = vpop.f32.mrf.mxu2  ;;  %v5818_v22 = vpop.f32.mrf.mxu0  ;;  %v12065_v18 = vor.u32 %v13150_v17, %v12062_v15  ;;  %v13114_v21 = vld [vmem:[#allocation2 + $0x524] sm:$0xf] }
 0x437   :  { %7382 = vmatpush.bf16.msrb.mxu1 %v12001_v4  ;;  %v12225_v4 = vor.u32 %v13190_v26, %v12222_v35  ;;  %v5858_v61 = vpop.f32.mrf.mxu3  ;;  %v11809_v26 = vor.u32 %v13086_v62, %v11806_v45  ;;  %v13146_v32 = vld [vmem:[#allocation2 + $0x624] sm:$0xf]  ;;  %v11774_v62 = vld [vmem:[#allocation2 + $0x410] sm:$0xf0] }
 0x438   :  { %7396 = vmatpush.bf16.msrb.mxu2 %v12129_v5  ;;  %v11950_v5 = vld [vmem:[#allocation2 + $0x570] sm:$0xf0]  ;;  %v5845_v36 = vadd.f32 %v5844_v14, %v5831_v33  ;;  %v13178_v39 = vld [vmem:[#allocation2 + $0x724] sm:$0xf] }
 0x439   :  { %7410 = vmatpush.bf16.msrb.mxu3 %v12257_v40  ;;  %v12206_v40 = vld [vmem:[#allocation2 + $0x770] sm:$0xf0]  ;;  %v11953_v41 = vor.u32 %v13122_v7, %v11950_v5  ;;  %v13110_v45 = vld [vmem:[#allocation2 + $0x504] sm:$0xf] }
 0x43a   :  { %7369 = vmatpush.bf16.msrb.mxu0 %v11857_v10  ;;  %v13118_v10 = vld [vmem:[#allocation2 + $0x544] sm:$0xf]  ;;  %v14160_v16 = vadd.f32 %v5858_v61, %v5845_v36  ;;  %v11918_v5 = vld [vmem:[#allocation2 + $0x530] sm:$0xf0]  ;;  %v12981_v36 = vld [vmem:[#allocation2 + $0xf4] sm:$0xf0] }
 0x43b   :  { %7383 = vmatpush.bf16.msrb.mxu1 %v11985_v52  ;;  %v11934_v52 = vld [vmem:[#allocation2 + $0x550] sm:$0xf0]  ;;  %v13174_v15 = vld [vmem:[#allocation2 + $0x704] sm:$0xf]  ;;  %v11508_v61 = vld [vmem:[#allocation2 + $0x1e8] sm:$0xf] }
 0x43c   :  { %7397 = vmatpush.bf16.msrb.mxu2 %v12113_v30  ;;  %v12209_v30 = vor.u32 %v13186_v28, %v12206_v40  ;;  %v11937_v35 = vor.u32 %v13118_v10, %v11934_v52  ;;  %v12046_v33 = vld [vmem:[#allocation2 + $0x630] sm:$0xf0]  ;;  %v13142_v52 = vld [vmem:[#allocation2 + $0x604] sm:$0xf] }
 0x43d   :  { %7411 = vmatpush.bf16.msrb.mxu3 %v12241_v48  ;;  %v13182_v48 = vld [vmem:[#allocation2 + $0x744] sm:$0xf]  ;;  %v12174_v28 = vld [vmem:[#allocation2 + $0x730] sm:$0xf0] }
 0x43e   :  { %7370 = vmatpush.bf16.msrb.mxu0 %v11841_v47  ;;  %v5832_v47 = vpop.f32.mrf.mxu1  ;;  %v11902_v10 = vld [vmem:[#allocation2 + $0x510] sm:$0xf0]  ;;  %v12177_v17 = vor.u32 %v13178_v39, %v12174_v28 }
 0x43f   :  { %7384 = vmatpush.bf16.msrb.mxu1 %v11969_v25  ;;  %v13082_v25 = vld [vmem:[#allocation2 + $0x424] sm:$0xf]  ;;  %v5833_v7 = vadd.f32 %v5832_v47, %v5818_v22  ;;  %v12158_v14 = vld [vmem:[#allocation2 + $0x710] sm:$0xf0]  ;;  %v13013_v47 = vld [vmem:[#allocation2 + $0x1f4] sm:$0xf0] }
 0x440   :  { %7398 = vmatpush.bf16.msrb.mxu2 %v12097_v6  ;;  %v11790_v6 = vld [vmem:[#allocation2 + $0x430] sm:$0xf0]  ;;  %v11509_v28 = vor.u32 %v13013_v47, %v11508_v61  ;;  %v11604_v61 = vld [vmem:[#allocation2 + $0x2a8] sm:$0xf]  ;;  %v13069_v47 = vld [vmem:[#allocation2 + $0x3b4] sm:$0xf0] }
 0x441   :  { %7412 = vmatpush.bf16.msrb.mxu3 %v12225_v4  ;;  %v12193_v4 = vor.u32 %v13182_v48, %v12190_v23  ;;  %v11793_v40 = vor.u32 %v13082_v25, %v11790_v6  ;;  %v5846_v48 = vpop.f32.mrf.mxu2  ;;  %v11380_v23 = vld [vmem:[#allocation2 + $0xe8] sm:$0xf]  ;;  %v5860_v25 = vpop.f32.mrf.mxu3  ;;  %v11905_v6 = vor.u32 %v13110_v45, %v11902_v10  ;;  %v13073_v45 = vld [vmem:[#allocation2 + $0x3d4] sm:$0xf0] }
 0x442   :  { %7371 = vmatpush.bf16.msrb.mxu0 %v11825_v43  ;;  %v13078_v43 = vld [vmem:[#allocation2 + $0x404] sm:$0xf]  ;;  %v11381_v39 = vor.u32 %v12981_v36, %v11380_v23  ;;  %v13005_v36 = vld [vmem:[#allocation2 + $0x1b4] sm:$0xf0] }
 0x443   :  { %7385 = vmatpush.bf16.msrb.mxu1 %v11953_v41  ;;  %v11921_v41 = vor.u32 %v13114_v21, %v11918_v5  ;;  %v11777_v22 = vor.u32 %v13078_v43, %v11774_v62  ;;  %v13077_v5 = vld [vmem:[#allocation2 + $0x3f4] sm:$0xf0]  ;;  %v11492_v43 = vld [vmem:[#allocation2 + $0x1c8] sm:$0xf] }
 0x444   :  { %7399 = vmatpush.bf16.msrb.mxu2 %v12081_v24  ;;  %v12049_v24 = vor.u32 %v13146_v32, %v12046_v33  ;;  %v12161_v33 = vor.u32 %v13174_v15, %v12158_v14  ;;  %v12973_v15 = vld [vmem:[#allocation2 + $0xb4] sm:$0xf0]  ;;  %v11476_v14 = vld [vmem:[#allocation2 + $0x1a8] sm:$0xf] }
 0x445   :  { %7413 = vmatpush.bf16.msrb.mxu3 %v12209_v30  ;;  %v12030_v30 = vld [vmem:[#allocation2 + $0x610] sm:$0xf0] }
 0x446   :  { %7372 = vmatpush.bf16.msrb.mxu0 %v11809_v26  ;;  %v5847_v26 = vadd.f32 %v5846_v48, %v5833_v7  ;;  %v12033_v21 = vor.u32 %v13142_v52, %v12030_v30  ;;  %v11364_v7 = vld [vmem:[#allocation2 + $0xc8] sm:$0xf]  ;;  %v13009_v48 = vld [vmem:[#allocation2 + $0x1d4] sm:$0xf0] }
 0x447   :  { %7386 = vmatpush.bf16.msrb.mxu1 %v11937_v35  ;;  %v11636_v35 = vld [vmem:[#allocation2 + $0x2e8] sm:$0xf]  ;;  %v11493_v52 = vor.u32 %v13009_v48, %v11492_v43 }
 0x448   :  { %7400 = vmatpush.bf16.msrb.mxu2 %v12065_v18  ;;  %v13045_v18 = vld [vmem:[#allocation2 + $0x2f4] sm:$0xf0]  ;;  %v14162_v32 = vadd.f32 %v5860_v25, %v5847_v26  ;;  %v11348_v30 = vld [vmem:[#allocation2 + $0xa8] sm:$0xf] }
 0x449   :  { %7414 = vmatpush.bf16.msrb.mxu3 %v12193_v4  ;;  %v11764_v4 = vld [vmem:[#allocation2 + $0x3e8] sm:$0xf]  ;;  %v11637_v3 = vor.u32 %v13045_v18, %v11636_v35  ;;  %v13037_v26 = vld [vmem:[#allocation2 + $0x2b4] sm:$0xf0] }
 0x44a   :  { %7373 = vmatpush.bf16.msrb.mxu0 %v11793_v40  ;;  %v12977_v40 = vld [vmem:[#allocation2 + $0xd4] sm:$0xf0]  ;;  %v11765_v62 = vor.u32 %v13077_v5, %v11764_v4  ;;  %v11605_v35 = vor.u32 %v13037_v26, %v11604_v61  ;;  %v11332_v18 = vld [vmem:[#allocation2 + $0x88] sm:$0xf] }
 0x44b   :  { %7387 = vmatpush.bf16.msrb.mxu1 %v11921_v41  ;;  %v13041_v41 = vld [vmem:[#allocation2 + $0x2d4] sm:$0xf0]  ;;  %v11365_v10 = vor.u32 %v12977_v40, %v11364_v7  ;;  %v11588_v5 = vld [vmem:[#allocation2 + $0x288] sm:$0xf] }
 0x44c   :  { %7401 = vmatpush.bf16.msrb.mxu2 %v12049_v24  ;;  %v11748_v24 = vld [vmem:[#allocation2 + $0x3c8] sm:$0xf]  ;;  %v12969_v25 = vld [vmem:[#allocation2 + $0x94] sm:$0xf0] }
 0x44d   :  { %7415 = vmatpush.bf16.msrb.mxu3 %v12177_v17  ;;  %v11621_v17 = vor.u32 %v13041_v41, %v11620_v2  ;;  %v11749_v23 = vor.u32 %v13073_v45, %v11748_v24  ;;  %v11349_v2 = vor.u32 %v12973_v15, %v11348_v30  ;;  %v13001_v4 = vld [vmem:[#allocation2 + $0x194] sm:$0xf0]  ;;  %v11333_v43 = vor.u32 %v12969_v25, %v11332_v18  ;;  %v11316_v24 = vld [vmem:[#allocation2 + $0x68] sm:$0xf] }
 0x44e   :  { %7374 = vmatpush.bf16.msrb.mxu0 %v11777_v22  ;;  %v11732_v22 = vld [vmem:[#allocation2 + $0x3a8] sm:$0xf]  ;;  %v13065_v7 = vld [vmem:[#allocation2 + $0x394] sm:$0xf0] }
 0x44f   :  { %7388 = vmatpush.bf16.msrb.mxu1 %v11905_v6  ;;  %v11460_v6 = vld [vmem:[#allocation2 + $0x188] sm:$0xf]  ;;  %v12965_v45 = vld [vmem:[#allocation2 + $0x74] sm:$0xf0] }
 0x450   :  { %7402 = vmatpush.bf16.msrb.mxu2 %v12033_v21  ;;  %v11733_v21 = vor.u32 %v13069_v47, %v11732_v22  ;;  %v11461_v48 = vor.u32 %v13001_v4, %v11460_v6  ;;  %v12997_v30 = vld [vmem:[#allocation2 + $0x174] sm:$0xf0]  ;;  %v11572_v15 = vld [vmem:[#allocation2 + $0x268] sm:$0xf]  ;;  %v11317_v61 = vor.u32 %v12965_v45, %v11316_v24 }
 0x451   :  { %7416 = vmatpush.bf16.msrb.mxu3 %v12161_v33  ;;  %7375 = vmatmul.bf16.vlgmr.msrb.gmra.mxu0 %v14013_v44  ;;  %v13033_v33 = vld [vmem:[#allocation2 + $0x294] sm:$0xf0]  ;;  %v11300_v22 = vld [vmem:[#allocation2 + $0x48] sm:$0xf] }
 0x452   :  { %7423 = vmatpush.bf16.msra.mxu0 %v11381_v39  ;;  %7389 = vmatmul.bf16.vlgmr.msrb.gmra.mxu1 %v14030_v49  ;;  %v5872_v39 = vpop.f32.mrf.mxu0  ;;  %v11589_v41 = vor.u32 %v13033_v33, %v11588_v5  ;;  %v12961_v47 = vld [vmem:[#allocation2 + $0x54] sm:$0xf0]  ;;  %v11556_v25 = vld [vmem:[#allocation2 + $0x248] sm:$0xf] }
 0x453   :  { %7437 = vmatpush.bf16.msra.mxu1 %v11509_v28  ;;  %7403 = vmatmul.bf16.vlgmr.msrb.gmra.mxu2 %v14032_v59  ;;  %v11716_v28 = vld [vmem:[#allocation2 + $0x388] sm:$0xf]  ;;  %v5873_v40 = vadd.f32 %v5872_v39, %v14160_v16  ;;  %v12993_v18 = vld [vmem:[#allocation2 + $0x154] sm:$0xf0] }
 0x454   :  { %7451 = vmatpush.bf16.msra.mxu2 %v11637_v3  ;;  %7417 = vmatmul.bf16.vlgmr.msrb.gmra.mxu3 %v14040_v57  ;;  %v11477_v3 = vor.u32 %v13005_v36, %v11476_v14  ;;  %v13029_v14 = vld [vmem:[#allocation2 + $0x274] sm:$0xf0]  ;;  %v11684_v33 = vld [vmem:[#allocation2 + $0x348] sm:$0xf] }
 0x455   :  { %7465 = vmatpush.bf16.msra.mxu3 %v11765_v62  ;;  %v5886_v62 = vpop.f32.mrf.mxu1  ;;  %v13061_v36 = vld [vmem:[#allocation2 + $0x374] sm:$0xf0]  ;;  %v11573_v26 = vor.u32 %v13029_v14, %v11572_v15  ;;  %v11412_v45 = vld [vmem:[#allocation2 + $0x128] sm:$0xf] }
 0x456   :  { %7424 = vmatpush.bf16.msra.mxu0 %v11365_v10  ;;  %v11444_v10 = vld [vmem:[#allocation2 + $0x168] sm:$0xf]  ;;  %v13025_v6 = vld [vmem:[#allocation2 + $0x254] sm:$0xf0] }
 0x457   :  { %7438 = vmatpush.bf16.msra.mxu1 %v11493_v52  ;;  %v11717_v52 = vor.u32 %v13065_v7, %v11716_v28  ;;  %v11445_v16 = vor.u32 %v12997_v30, %v11444_v10  ;;  %v5914_v5 = vpop.f32.mrf.mxu3  ;;  %v13057_v39 = vld [vmem:[#allocation2 + $0x354] sm:$0xf0]  ;;  %v11301_v7 = vor.u32 %v12961_v47, %v11300_v22  ;;  %v11540_v30 = vld [vmem:[#allocation2 + $0x228] sm:$0xf] }
 0x458   :  { %7452 = vmatpush.bf16.msra.mxu2 %v11621_v17  ;;  %v5887_v17 = vadd.f32 %v5886_v62, %v5873_v40  ;;  %v12957_v24 = vld [vmem:[#allocation2 + $0x34] sm:$0xf0]  ;;  %v11685_v10 = vor.u32 %v13057_v39, %v11684_v33  ;;  %v11668_v14 = vld [vmem:[#allocation2 + $0x328] sm:$0xf] }
 0x459   :  { %7466 = vmatpush.bf16.msra.mxu3 %v11749_v23  ;;  %v11700_v23 = vld [vmem:[#allocation2 + $0x368] sm:$0xf]  ;;  %v13021_v15 = vld [vmem:[#allocation2 + $0x234] sm:$0xf0] }
 0x45a   :  { %7425 = vmatpush.bf16.msra.mxu0 %v11349_v2  ;;  %v11428_v2 = vld [vmem:[#allocation2 + $0x148] sm:$0xf]  ;;  %v5874_v4 = vpop.f32.mrf.mxu0  ;;  %v12985_v47 = vld [vmem:[#allocation2 + $0x114] sm:$0xf0] }
 0x45b   :  { %7439 = vmatpush.bf16.msra.mxu1 %v11477_v3  ;;  %v11701_v3 = vor.u32 %v13061_v36, %v11700_v23  ;;  %v5875_v28 = vadd.f32 %v5874_v4, %v14162_v32  ;;  %v11429_v62 = vor.u32 %v12993_v18, %v11428_v2  ;;  %v13053_v23 = vld [vmem:[#allocation2 + $0x334] sm:$0xf0]  ;;  %v11268_v36 = vld [vmem:[#allocation2 + $0x8] sm:$0xf] }
 0x45c   :  { %7453 = vmatpush.bf16.msra.mxu2 %v11605_v35  ;;  %v5900_v35 = vpop.f32.mrf.mxu2  ;;  %v11396_v22 = vld [vmem:[#allocation2 + $0x108] sm:$0xf]  ;;  %v13017_v18 = vld [vmem:[#allocation2 + $0x214] sm:$0xf0] }
 0x45d   :  { %7467 = vmatpush.bf16.msra.mxu3 %v11733_v21  ;;  %v5901_v21 = vadd.f32 %v5900_v35, %v5887_v17  ;;  %v5888_v40 = vpop.f32.mrf.mxu1  ;;  %v12989_v17 = vld [vmem:[#allocation2 + $0x134] sm:$0xf0]  ;;  %v11524_v2 = vld [vmem:[#allocation2 + $0x208] sm:$0xf] }
 0x45e   :  { %7426 = vmatpush.bf16.msra.mxu0 %v11333_v43  ;;  %v13109_v33 = vld [vmem:[#allocation2 + $0x4f4] sm:$0xf0]  ;;  %v12020_v39 = vld [vmem:[#allocation2 + $0x5e8] sm:$0xf] }
 0x45f   :  { %7440 = vmatpush.bf16.msra.mxu1 %v11461_v48  ;;  %v14170_v43 = vadd.f32 %v5914_v5, %v5901_v21  ;;  %v11557_v48 = vor.u32 %v13025_v6, %v11556_v25  ;;  %v11652_v25 = vld [vmem:[#allocation2 + $0x308] sm:$0xf]  ;;  %v13049_v6 = vld [vmem:[#allocation2 + $0x314] sm:$0xf0]  ;;  %v5916_v4 = vpop.f32.mrf.mxu3 }
 0x460   :  { %7454 = vmatpush.bf16.msra.mxu2 %v11589_v41  ;;  %v11284_v41 = vld [vmem:[#allocation2 + $0x28] sm:$0xf] }
 0x461   :  { %7468 = vmatpush.bf16.msra.mxu3 %v11717_v52  ;;  %v5889_v52 = vadd.f32 %v5888_v40, %v5875_v28  ;;  %v11285_v32 = vor.u32 %v12957_v24, %v11284_v41  ;;  %v11892_v5 = vld [vmem:[#allocation2 + $0x4e8] sm:$0xf]  ;;  %v5497_v28 = vadd.f32 %v14088_v58, %v14086_v50  ;;  %v13141_v40 = vld [vmem:[#allocation2 + $0x5f4] sm:$0xf0]  ;;  %v11397_v24 = vor.u32 %v12985_v47, %v11396_v22 }
 0x462   :  { %7427 = vmatpush.bf16.msra.mxu0 %v11317_v61  ;;  %v12953_v61 = vld [vmem:[#allocation2 + $0x14] sm:$0xf0]  ;;  %v12004_v58 = vld [vmem:[#allocation2 + $0x5c8] sm:$0xf] }
 0x463   :  { %7441 = vmatpush.bf16.msra.mxu1 %v11445_v16  ;;  %v11413_v16 = vor.u32 %v12989_v17, %v11412_v45  ;;  %v11525_v45 = vor.u32 %v13017_v18, %v11524_v2  ;;  %v11653_v17 = vor.u32 %v13049_v6, %v11652_v25  ;;  %v13105_v50 = vld [vmem:[#allocation2 + $0x4d4] sm:$0xf0]  ;;  %v12260_v22 = vld [vmem:[#allocation2 + $0x7c8] sm:$0xf] }
 0x464   :  { %7455 = vmatpush.bf16.msra.mxu2 %v11573_v26  ;;  %v11541_v26 = vor.u32 %v13021_v15, %v11540_v30  ;;  %v5902_v35 = vpop.f32.mrf.mxu2  ;;  %v11893_v30 = vor.u32 %v13109_v33, %v11892_v5  ;;  %v12021_v15 = vor.u32 %v13141_v40, %v12020_v39  ;;  %v13201_v47 = vld [vmem:[#allocation2 + $0x7d4] sm:$0xf0]  ;;  %v11860_v18 = vld [vmem:[#allocation2 + $0x4a8] sm:$0xf] }
 0x465   :  { %7469 = vmatpush.bf16.msra.mxu3 %v11701_v3  ;;  %v11669_v3 = vor.u32 %v13053_v23, %v11668_v14  ;;  %v5903_v21 = vadd.f32 %v5902_v35, %v5889_v52  ;;  %v13205_v52 = vld [vmem:[#allocation2 + $0x7f4] sm:$0xf0]  ;;  %v11876_v23 = vld [vmem:[#allocation2 + $0x4c8] sm:$0xf] }
 0x466   :  { %7428 = vmatpush.bf16.msra.mxu0 %v11301_v7  ;;  %v11269_v7 = vor.u32 %v12953_v61, %v11268_v36  ;;  %v13137_v61 = vld [vmem:[#allocation2 + $0x5d4] sm:$0xf0]  ;;  %v11877_v2 = vor.u32 %v13105_v50, %v11876_v23  ;;  %v11988_v6 = vld [vmem:[#allocation2 + $0x5a8] sm:$0xf] }
 0x467   :  { %7442 = vmatpush.bf16.msra.mxu1 %v11429_v62  ;;  %v12148_v62 = vld [vmem:[#allocation2 + $0x6e8] sm:$0xf]  ;;  %v14174_v41 = vadd.f32 %v5916_v4, %v5903_v21  ;;  %v13101_v25 = vld [vmem:[#allocation2 + $0x4b4] sm:$0xf0]  ;;  %v12261_v21 = vor.u32 %v13201_v47, %v12260_v22 }
 0x468   :  { %7456 = vmatpush.bf16.msra.mxu2 %v11557_v48  ;;  %v13173_v48 = vld [vmem:[#allocation2 + $0x6f4] sm:$0xf0]  ;;  %v12116_v5 = vld [vmem:[#allocation2 + $0x6a8] sm:$0xf]  ;;  %v11861_v40 = vor.u32 %v13101_v25, %v11860_v18 }
 0x469   :  { %7470 = vmatpush.bf16.msra.mxu3 %v11685_v10  ;;  %v12276_v10 = vld [vmem:[#allocation2 + $0x7e8] sm:$0xf]  ;;  %v12149_v14 = vor.u32 %v13173_v48, %v12148_v62  ;;  %v13133_v4 = vld [vmem:[#allocation2 + $0x5b4] sm:$0xf0] }
 0x46a   :  { %7429 = vmatpush.bf16.msra.mxu0 %v11285_v32  ;;  %v5511_v32 = vadd.f32 %v14094_v53, %v5497_v28  ;;  %v12277_v36 = vor.u32 %v13205_v52, %v12276_v10  ;;  %v13165_v33 = vld [vmem:[#allocation2 + $0x6b4] sm:$0xf0]  ;;  %v12244_v39 = vld [vmem:[#allocation2 + $0x7a8] sm:$0xf] }
 0x46b   :  { %7443 = vmatpush.bf16.msra.mxu1 %v11413_v16  ;;  %v12132_v16 = vld [vmem:[#allocation2 + $0x6c8] sm:$0xf]  ;;  %v13197_v28 = vld [vmem:[#allocation2 + $0x7b4] sm:$0xf0]  ;;  %v12117_v62 = vor.u32 %v13165_v33, %v12116_v5 }
 0x46c   :  { %7457 = vmatpush.bf16.msra.mxu2 %v11541_v26  ;;  %v13169_v26 = vld [vmem:[#allocation2 + $0x6d4] sm:$0xf0]  ;;  %v5525_v53 = vadd.f32 %v14096_v8, %v5511_v32  ;;  %v11989_v8 = vor.u32 %v13133_v4, %v11988_v6  ;;  %v11844_v48 = vld [vmem:[#allocation2 + $0x488] sm:$0xf]  ;;  %v12245_v10 = vor.u32 %v13197_v28, %v12244_v39 }
 0x46d   :  { %7471 = vmatpush.bf16.msra.mxu3 %v11669_v3  ;;  %v12005_v3 = vor.u32 %v13137_v61, %v12004_v58  ;;  %v12133_v35 = vor.u32 %v13169_v26, %v12132_v16  ;;  %v13129_v52 = vld [vmem:[#allocation2 + $0x594] sm:$0xf0]  ;;  %v11828_v16 = vld [vmem:[#allocation2 + $0x468] sm:$0xf] }
 0x46e   :  { %7430 = vmatpush.bf16.msra.mxu0 %v11269_v7  ;;  %v5539_v7 = vadd.f32 %v14101_v37, %v5525_v53  ;;  %v13193_v23 = vld [vmem:[#allocation2 + $0x794] sm:$0xf0]  ;;  %v11956_v22 = vld [vmem:[#allocation2 + $0x568] sm:$0xf] }
 0x46f   :  { %7444 = vmatpush.bf16.msra.mxu1 %v11397_v24  ;;  %v13097_v24 = vld [vmem:[#allocation2 + $0x494] sm:$0xf0]  ;;  %v7222_v32 = vpop.f32.mrf.mxu1  ;;  %v12084_v18 = vld [vmem:[#allocation2 + $0x668] sm:$0xf] }
 0x470   :  { %7458 = vmatpush.bf16.msra.mxu2 %v11525_v45  ;;  %v11972_v45 = vld [vmem:[#allocation2 + $0x588] sm:$0xf]  ;;  %v5553_v37 = vadd.f32 %v14103_v29, %v5539_v7  ;;  %v11845_v58 = vor.u32 %v13097_v24, %v11844_v48  ;;  %v13093_v26 = vld [vmem:[#allocation2 + $0x474] sm:$0xf0] }
 0x471   :  { %7472 = vmatpush.bf16.msra.mxu3 %v11653_v17  ;;  %7431 = vmatmul.bf16.vlgmr.msra.gmra.mxu0 %v13901_v54  ;;  %v12100_v17 = vld [vmem:[#allocation2 + $0x688] sm:$0xf]  ;;  %v13157_v29 = vld [vmem:[#allocation2 + $0x674] sm:$0xf0] }
 0x472   :  { %7479 = vmatpush.bf16.msrb.mxu0 %v11893_v30  ;;  %7445 = vmatmul.bf16.vlgmr.msra.gmra.mxu1 %v13929_v46  ;;  %v13161_v30 = vld [vmem:[#allocation2 + $0x694] sm:$0xf0]  ;;  %v5567_v47 = vadd.f32 %v14109_v60, %v5553_v37  ;;  %v12212_v25 = vld [vmem:[#allocation2 + $0x768] sm:$0xf] }
 0x473   :  { %7493 = vmatpush.bf16.msrb.mxu1 %v12021_v15  ;;  %7459 = vmatmul.bf16.vlgmr.msra.gmra.mxu2 %v13966_v42  ;;  %v7208_v15 = vpop.f32.mrf.mxu0  ;;  %v12101_v61 = vor.u32 %v13161_v30, %v12100_v17  ;;  %v13189_v6 = vld [vmem:[#allocation2 + $0x774] sm:$0xf0]  ;;  %v11812_v4 = vld [vmem:[#allocation2 + $0x448] sm:$0xf] }
 0x474   :  { %7507 = vmatpush.bf16.msrb.mxu2 %v12149_v14  ;;  %7473 = vmatmul.bf16.vlgmr.msra.gmra.mxu3 %v13984_v51  ;;  %v12228_v14 = vld [vmem:[#allocation2 + $0x788] sm:$0xf]  ;;  %v7209_v50 = vadd.f32 %v7208_v15, %v14099_v9  ;;  %v11829_v9 = vor.u32 %v13093_v26, %v11828_v16  ;;  %v13089_v5 = vld [vmem:[#allocation2 + $0x454] sm:$0xf0]  ;;  %v5581_v39 = vadd.f32 %v14111_v63, %v5567_v47 }
 0x475   :  { %7521 = vmatpush.bf16.msrb.mxu3 %v12277_v36  ;;  %v11973_v36 = vor.u32 %v13129_v52, %v11972_v45  ;;  %v11940_v33 = vld [vmem:[#allocation2 + $0x548] sm:$0xf]  ;;  %v12213_v60 = vor.u32 %v13189_v6, %v12212_v25  ;;  %v13121_v7 = vld [vmem:[#allocation2 + $0x554] sm:$0xf0]  ;;  %v11813_v17 = vor.u32 %v13089_v5, %v11812_v4 }
 0x476   :  { %7480 = vmatpush.bf16.msrb.mxu0 %v11877_v2  ;;  %v12229_v2 = vor.u32 %v13193_v23, %v12228_v14  ;;  %v7236_v28 = vpop.f32.mrf.mxu2  ;;  %v12196_v45 = vld [vmem:[#allocation2 + $0x748] sm:$0xf]  ;;  %v11941_v63 = vor.u32 %v13121_v7, %v11940_v33  ;;  %v13085_v37 = vld [vmem:[#allocation2 + $0x434] sm:$0xf0]  ;;  %v13011_v7 = vld [vmem:[#allocation2 + $0x1ec] sm:$0xf] }
 0x477   :  { %7494 = vmatpush.bf16.msrb.mxu1 %v12005_v3  ;;  %v7223_v3 = vadd.f32 %v7222_v32, %v7209_v50  ;;  %v7250_v24 = vpop.f32.mrf.mxu3  ;;  %v7224_v30 = vpop.f32.mrf.mxu1  ;;  %v11796_v23 = vld [vmem:[#allocation2 + $0x428] sm:$0xf]  ;;  %v13149_v16 = vld [vmem:[#allocation2 + $0x634] sm:$0xf0] }
 0x478   :  { %7508 = vmatpush.bf16.msrb.mxu2 %v12133_v35  ;;  %v13125_v35 = vld [vmem:[#allocation2 + $0x574] sm:$0xf0]  ;;  %v11924_v50 = vld [vmem:[#allocation2 + $0x528] sm:$0xf]  ;;  %v11797_v47 = vor.u32 %v13085_v37, %v11796_v23  ;;  %v12975_v37 = vld [vmem:[#allocation2 + $0xcc] sm:$0xf] }
 0x479   :  { %7522 = vmatpush.bf16.msrb.mxu3 %v12261_v21  ;;  %v11957_v53 = vor.u32 %v13125_v35, %v11956_v22  ;;  %v12085_v21 = vor.u32 %v13157_v29, %v12084_v18  ;;  %v12180_v26 = vld [vmem:[#allocation2 + $0x728] sm:$0xf]  ;;  %v13181_v22 = vld [vmem:[#allocation2 + $0x734] sm:$0xf0] }
 0x47a   :  { %7481 = vmatpush.bf16.msrb.mxu0 %v11861_v40  ;;  %v12068_v40 = vld [vmem:[#allocation2 + $0x648] sm:$0xf]  ;;  %v13113_v25 = vld [vmem:[#allocation2 + $0x514] sm:$0xf0] }
 0x47b   :  { %7495 = vmatpush.bf16.msrb.mxu1 %v11989_v8  ;;  %v13153_v8 = vld [vmem:[#allocation2 + $0x654] sm:$0xf0]  ;;  %v7210_v48 = vpop.f32.mrf.mxu0  ;;  %v11908_v29 = vld [vmem:[#allocation2 + $0x508] sm:$0xf] }
 0x47c   :  { %7509 = vmatpush.bf16.msrb.mxu2 %v12117_v62  ;;  %v7237_v62 = vadd.f32 %v7236_v28, %v7223_v3  ;;  %v7211_v52 = vadd.f32 %v7210_v48, %v5581_v39  ;;  %v12069_v14 = vor.u32 %v13153_v8, %v12068_v40  ;;  %v13081_v3 = vld [vmem:[#allocation2 + $0x414] sm:$0xf0]  ;;  %v12036_v6 = vld [vmem:[#allocation2 + $0x608] sm:$0xf]  ;;  %v11382_v28 = vld [vmem:[#allocation2 + $0xf8] sm:$0xf0] }
 0x47d   :  { %7523 = vmatpush.bf16.msrb.mxu3 %v12245_v10  ;;  %v13185_v10 = vld [vmem:[#allocation2 + $0x754] sm:$0xf0]  ;;  %v12164_v4 = vld [vmem:[#allocation2 + $0x708] sm:$0xf]  ;;  %v11510_v8 = vld [vmem:[#allocation2 + $0x1f8] sm:$0xf0] }
 0x47e   :  { %7482 = vmatpush.bf16.msrb.mxu0 %v11845_v58  ;;  %v14187_v15 = vadd.f32 %v7250_v24, %v7237_v62  ;;  %v12197_v58 = vor.u32 %v13185_v10, %v12196_v45  ;;  %v7225_v32 = vadd.f32 %v7224_v30, %v7211_v52  ;;  %v13177_v5 = vld [vmem:[#allocation2 + $0x714] sm:$0xf0]  ;;  %v13043_v62 = vld [vmem:[#allocation2 + $0x2ec] sm:$0xf]  ;;  %v11638_v48 = vld [vmem:[#allocation2 + $0x2f8] sm:$0xf0]  ;;  %v11909_v45 = vor.u32 %v13113_v25, %v11908_v29 }
 0x47f   :  { %7496 = vmatpush.bf16.msrb.mxu1 %v11973_v36  ;;  %v13117_v36 = vld [vmem:[#allocation2 + $0x534] sm:$0xf0]  ;;  %v7252_v39 = vpop.f32.mrf.mxu3  ;;  %v13075_v52 = vld [vmem:[#allocation2 + $0x3ec] sm:$0xf]  ;;  %v12165_v30 = vor.u32 %v13177_v5, %v12164_v4  ;;  %v11641_v23 = vor.u32 %v13043_v62, %v11638_v48  ;;  %v11734_v4 = vld [vmem:[#allocation2 + $0x3b8] sm:$0xf0] }
 0x480   :  { %7510 = vmatpush.bf16.msrb.mxu2 %v12101_v61  ;;  %v12052_v61 = vld [vmem:[#allocation2 + $0x628] sm:$0xf]  ;;  %v11925_v35 = vor.u32 %v13117_v36, %v11924_v50  ;;  %v11366_v50 = vld [vmem:[#allocation2 + $0xd8] sm:$0xf0]  ;;  %v13003_v29 = vld [vmem:[#allocation2 + $0x1ac] sm:$0xf] }
 0x481   :  { %7524 = vmatpush.bf16.msrb.mxu3 %v12229_v2  ;;  %v11780_v2 = vld [vmem:[#allocation2 + $0x408] sm:$0xf]  ;;  %v12053_v18 = vor.u32 %v13149_v16, %v12052_v61  ;;  %v11494_v36 = vld [vmem:[#allocation2 + $0x1d8] sm:$0xf0]  ;;  %v13039_v61 = vld [vmem:[#allocation2 + $0x2cc] sm:$0xf] }
 0x482   :  { %7483 = vmatpush.bf16.msrb.mxu0 %v11829_v9  ;;  %v12181_v9 = vor.u32 %v13181_v22, %v12180_v26  ;;  %v11781_v40 = vor.u32 %v13081_v3, %v11780_v2  ;;  %v11622_v16 = vld [vmem:[#allocation2 + $0x2d8] sm:$0xf0]  ;;  %v13071_v26 = vld [vmem:[#allocation2 + $0x3cc] sm:$0xf] }
 0x483   :  { %7497 = vmatpush.bf16.msrb.mxu1 %v11957_v53  ;;  %v7238_v53 = vpop.f32.mrf.mxu2  ;;  %v11750_v22 = vld [vmem:[#allocation2 + $0x3d8] sm:$0xf0]  ;;  %v11625_v3 = vor.u32 %v13039_v61, %v11622_v16  ;;  %v13031_v62 = vld [vmem:[#allocation2 + $0x28c] sm:$0xf] }
 0x484   :  { %7511 = vmatpush.bf16.msrb.mxu2 %v12085_v21  ;;  %v13145_v21 = vld [vmem:[#allocation2 + $0x614] sm:$0xf0]  ;;  %v7239_v33 = vadd.f32 %v7238_v53, %v7225_v32  ;;  %v11753_v25 = vor.u32 %v13071_v26, %v11750_v22  ;;  %v11606_v53 = vld [vmem:[#allocation2 + $0x2b8] sm:$0xf0]  ;;  %v13027_v16 = vld [vmem:[#allocation2 + $0x26c] sm:$0xf] }
 0x485   :  { %7525 = vmatpush.bf16.msrb.mxu3 %v12213_v60  ;;  %v12979_v60 = vld [vmem:[#allocation2 + $0xec] sm:$0xf]  ;;  %v12037_v10 = vor.u32 %v13145_v21, %v12036_v6  ;;  %v11478_v6 = vld [vmem:[#allocation2 + $0x1b8] sm:$0xf0] }
 0x486   :  { %7484 = vmatpush.bf16.msrb.mxu0 %v11813_v17  ;;  %v14189_v24 = vadd.f32 %v7252_v39, %v7239_v33  ;;  %v11766_v17 = vld [vmem:[#allocation2 + $0x3f8] sm:$0xf0]  ;;  %v13067_v21 = vld [vmem:[#allocation2 + $0x3ac] sm:$0xf]  ;;  %v11481_v33 = vor.u32 %v13003_v29, %v11478_v6 }
 0x487   :  { %7498 = vmatpush.bf16.msrb.mxu1 %v11941_v63  ;;  %v11385_v63 = vor.u32 %v12979_v60, %v11382_v28  ;;  %v11769_v32 = vor.u32 %v13075_v52, %v11766_v17  ;;  %v12967_v60 = vld [vmem:[#allocation2 + $0x8c] sm:$0xf]  ;;  %v11334_v28 = vld [vmem:[#allocation2 + $0x98] sm:$0xf0] }
 0x488   :  { %7512 = vmatpush.bf16.msrb.mxu2 %v12069_v14  ;;  %v11513_v14 = vor.u32 %v13011_v7, %v11510_v8  ;;  %v12999_v7 = vld [vmem:[#allocation2 + $0x18c] sm:$0xf]  ;;  %v11462_v8 = vld [vmem:[#allocation2 + $0x198] sm:$0xf0] }
 0x489   :  { %7526 = vmatpush.bf16.msrb.mxu3 %v12197_v58  ;;  %v13007_v58 = vld [vmem:[#allocation2 + $0x1cc] sm:$0xf]  ;;  %v11590_v48 = vld [vmem:[#allocation2 + $0x298] sm:$0xf0] }
 0x48a   :  { %7485 = vmatpush.bf16.msrb.mxu0 %v11797_v47  ;;  %v11369_v47 = vor.u32 %v12975_v37, %v11366_v50  ;;  %v11497_v2 = vor.u32 %v13007_v58, %v11494_v36  ;;  %v11718_v52 = vld [vmem:[#allocation2 + $0x398] sm:$0xf0]  ;;  %v12963_v37 = vld [vmem:[#allocation2 + $0x6c] sm:$0xf] }
 0x48b   :  { %7499 = vmatpush.bf16.msrb.mxu1 %v11925_v35  ;;  %v12971_v35 = vld [vmem:[#allocation2 + $0xac] sm:$0xf]  ;;  %v11318_v50 = vld [vmem:[#allocation2 + $0x78] sm:$0xf0] }
 0x48c   :  { %7513 = vmatpush.bf16.msrb.mxu2 %v12053_v18  ;;  %v11350_v18 = vld [vmem:[#allocation2 + $0xb8] sm:$0xf0]  ;;  %v12995_v58 = vld [vmem:[#allocation2 + $0x16c] sm:$0xf] }
 0x48d   :  { %7527 = vmatpush.bf16.msrb.mxu3 %v12181_v9  ;;  %v13035_v9 = vld [vmem:[#allocation2 + $0x2ac] sm:$0xf]  ;;  %v11353_v5 = vor.u32 %v12971_v35, %v11350_v18  ;;  %v11446_v61 = vld [vmem:[#allocation2 + $0x178] sm:$0xf0] }
 0x48e   :  { %7486 = vmatpush.bf16.msrb.mxu0 %v11781_v40  ;;  %v11609_v39 = vor.u32 %v13035_v9, %v11606_v53  ;;  %v11737_v40 = vor.u32 %v13067_v21, %v11734_v4  ;;  %v11574_v26 = vld [vmem:[#allocation2 + $0x278] sm:$0xf0]  ;;  %v13059_v22 = vld [vmem:[#allocation2 + $0x36c] sm:$0xf] }
 0x48f   :  { %7500 = vmatpush.bf16.msrb.mxu1 %v11909_v45  ;;  %v7264_v45 = vpop.f32.mrf.mxu0  ;;  %v12959_v35 = vld [vmem:[#allocation2 + $0x4c] sm:$0xf]  ;;  %v11302_v18 = vld [vmem:[#allocation2 + $0x58] sm:$0xf0] }
 0x490   :  { %7514 = vmatpush.bf16.msrb.mxu2 %v12037_v10  ;;  %v13063_v10 = vld [vmem:[#allocation2 + $0x38c] sm:$0xf]  ;;  %v7265_v17 = vadd.f32 %v7264_v45, %v14187_v15  ;;  %v11449_v15 = vor.u32 %v12995_v58, %v11446_v61  ;;  %v11430_v9 = vld [vmem:[#allocation2 + $0x158] sm:$0xf0] }
 0x491   :  { %7528 = vmatpush.bf16.msrb.mxu3 %v12165_v30  ;;  %7487 = vmatmul.bf16.vlgmr.msrb.gmra.mxu0 %v14013_v44  ;;  %v11337_v30 = vor.u32 %v12967_v60, %v11334_v28  ;;  %v12991_v29 = vld [vmem:[#allocation2 + $0x14c] sm:$0xf]  ;;  %v11558_v21 = vld [vmem:[#allocation2 + $0x258] sm:$0xf0]  ;;  %v13756_v28 = vmov 16.0  }
 0x492   :  { %7535 = vmatpush.bf16.msra.mxu0 %v11385_v63  ;;  %7501 = vmatmul.bf16.vlgmr.msrb.gmra.mxu1 %v14030_v49  ;;  %v7278_v63 = vpop.f32.mrf.mxu1  ;;  %v13023_v53 = vld [vmem:[#allocation2 + $0x24c] sm:$0xf]  ;;  %v11686_v60 = vld [vmem:[#allocation2 + $0x358] sm:$0xf0]  ;;  %13541 = vrcp.f32 %v13756_v28 }
 0x493   :  { %7549 = vmatpush.bf16.msra.mxu1 %v11513_v14  ;;  %7515 = vmatmul.bf16.vlgmr.msrb.gmra.mxu2 %v14032_v59  ;;  %v11465_v14 = vor.u32 %v12999_v7, %v11462_v8  ;;  %v7279_v36 = vadd.f32 %v7278_v63, %v7265_v17  ;;  %v11561_v45 = vor.u32 %v13023_v53, %v11558_v21  ;;  %v12987_v17 = vld [vmem:[#allocation2 + $0x12c] sm:$0xf]  ;;  %v11270_v61 = vld [vmem:[#allocation2 + $0x18] sm:$0xf0] }
 0x494   :  { %7563 = vmatpush.bf16.msra.mxu2 %v11641_v23  ;;  %7529 = vmatmul.bf16.vlgmr.msrb.gmra.mxu3 %v14040_v57  ;;  %v11593_v23 = vor.u32 %v13031_v62, %v11590_v48  ;;  %v11433_v48 = vor.u32 %v12991_v29, %v11430_v9  ;;  %v13051_v58 = vld [vmem:[#allocation2 + $0x32c] sm:$0xf]  ;;  %v11894_v21 = vld [vmem:[#allocation2 + $0x4f8] sm:$0xf0] }
 0x495   :  { %7577 = vmatpush.bf16.msra.mxu3 %v11769_v32  ;;  %v11721_v32 = vor.u32 %v13063_v10, %v11718_v52  ;;  %v12955_v10 = vld [vmem:[#allocation2 + $0x2c] sm:$0xf]  ;;  %v11286_v52 = vld [vmem:[#allocation2 + $0x38] sm:$0xf0] }
 0x496   :  { %7536 = vmatpush.bf16.msra.mxu0 %v11369_v47  ;;  %v11702_v47 = vld [vmem:[#allocation2 + $0x378] sm:$0xf0]  ;;  %v7292_v6 = vpop.f32.mrf.mxu2  ;;  %v13047_v29 = vld [vmem:[#allocation2 + $0x30c] sm:$0xf] }
 0x497   :  { %7550 = vmatpush.bf16.msra.mxu1 %v11497_v2  ;;  %v11321_v2 = vor.u32 %v12963_v37, %v11318_v50  ;;  %v7293_v4 = vadd.f32 %v7292_v6, %v7279_v36  ;;  %v11542_v37 = vld [vmem:[#allocation2 + $0x238] sm:$0xf0]  ;;  %v7648_v50 = vperm.slane %v13814_v0, 0  ;;  %v12951_v36 = vld [vmem:[#allocation2 + $0xc] sm:$0xf] }
 0x498   :  { %7564 = vmatpush.bf16.msra.mxu2 %v11625_v3  ;;  %v11577_v3 = vor.u32 %v13027_v16, %v11574_v26  ;;  %v12983_v16 = vld [vmem:[#allocation2 + $0x10c] sm:$0xf]  ;;  %v14198_v26 = vpop.eup %13541 }
 0x499   :  { %7578 = vmatpush.bf16.msra.mxu3 %v11753_v25  ;;  %v11705_v25 = vor.u32 %v13059_v22, %v11702_v47  ;;  %v13107_v6 = vld [vmem:[#allocation2 + $0x4ec] sm:$0xf]  ;;  %vm7733_vm5 = vweird.f32 %v14198_v26 }
 0x49a   :  { %7537 = vmatpush.bf16.msra.mxu0 %v11353_v5  ;;  %v7266_v5 = vpop.f32.mrf.mxu0  ;;  %v7280_v8 = vpop.f32.mrf.mxu1 }
 0x49b   :  { %7551 = vmatpush.bf16.msra.mxu1 %v11481_v33  ;;  %v7306_v33 = vpop.f32.mrf.mxu3  ;;  %v7267_v7 = vadd.f32 %v7266_v5, %v14189_v24  ;;  %v11670_v24 = vld [vmem:[#allocation2 + $0x338] sm:$0xf0] }
 0x49c   :  { %7565 = vmatpush.bf16.msra.mxu2 %v11609_v39  ;;  %v13055_v39 = vld [vmem:[#allocation2 + $0x34c] sm:$0xf]  ;;  %v7307_v62 = vadd.f32 %v7306_v33, %v7293_v4  ;;  %v12022_v5 = vld [vmem:[#allocation2 + $0x5f8] sm:$0xf0]  ;;  %v5609_v33 = vadd.f32 %v14117_v55, %v14115_v56 }
 0x49d   :  { %7579 = vmatpush.bf16.msra.mxu3 %v11737_v40  ;;  %v11305_v40 = vor.u32 %v12959_v35, %v11302_v18  ;;  %v7281_v63 = vadd.f32 %v7280_v8, %v7267_v7  ;;  %v11673_v35 = vor.u32 %v13051_v58, %v11670_v24  ;;  %v13139_v4 = vld [vmem:[#allocation2 + $0x5ec] sm:$0xf]  ;;  %v12006_v58 = vld [vmem:[#allocation2 + $0x5d8] sm:$0xf0] }
 0x49e   :  { %7538 = vmatpush.bf16.msra.mxu0 %v11337_v30  ;;  %v11689_v30 = vor.u32 %v13055_v39, %v11686_v60  ;;  %v7294_v18 = vpop.f32.mrf.mxu2  ;;  %v7729_v39 = vmul.f32 16.0, %v14198_v26  ;;  %v11273_v60 = vor.u32 %v12951_v36, %v11270_v61  ;;  %v13171_v7 = vld [vmem:[#allocation2 + $0x6ec] sm:$0xf]  ;;  %v14203_v8 = vadd.f32 %v7648_v50, %v7307_v62  ;;  %v12134_v61 = vld [vmem:[#allocation2 + $0x6d8] sm:$0xf0] }
 0x49f   :  { %7552 = vmatpush.bf16.msra.mxu1 %v11465_v14  ;;  %v11414_v14 = vld [vmem:[#allocation2 + $0x138] sm:$0xf0]  ;;  %v7295_v9 = vadd.f32 %v7294_v18, %v7281_v63  ;;  %v13103_v63 = vld [vmem:[#allocation2 + $0x4cc] sm:$0xf]  ;;  %v12025_v55 = vor.u32 %v13139_v4, %v12022_v5  ;;  %v5623_v62 = vadd.f32 %v14123_v11, %v5609_v33 }
 0x4a0   :  { %7566 = vmatpush.bf16.msra.mxu2 %v11593_v23  ;;  %v13019_v23 = vld [vmem:[#allocation2 + $0x22c] sm:$0xf]  ;;  %v11417_v22 = vor.u32 %v12987_v17, %v11414_v14  ;;  %v7730_v24 = vsub.f32 1.0, %v7729_v39  ;;  %v11990_v4 = vld [vmem:[#allocation2 + $0x5b8] sm:$0xf0] }
 0x4a1   :  { %7580 = vmatpush.bf16.msra.mxu3 %v11721_v32  ;;  %v11289_v32 = vor.u32 %v12955_v10, %v11286_v52  ;;  %v11545_v47 = vor.u32 %v13019_v23, %v11542_v37  ;;  %v13203_v10 = vld [vmem:[#allocation2 + $0x7ec] sm:$0xf]  ;;  %v12278_v52 = vld [vmem:[#allocation2 + $0x7f8] sm:$0xf0] }
 0x4a2   :  { %7539 = vmatpush.bf16.msra.mxu0 %v11321_v2  ;;  %v11398_v2 = vld [vmem:[#allocation2 + $0x118] sm:$0xf0]  ;;  %v13135_v37 = vld [vmem:[#allocation2 + $0x5cc] sm:$0xf] }
 0x4a3   :  { %7553 = vmatpush.bf16.msra.mxu1 %v11449_v15  ;;  %v13015_v15 = vld [vmem:[#allocation2 + $0x20c] sm:$0xf]  ;;  %v7308_v53 = vpop.f32.mrf.mxu3  ;;  %v11401_v28 = vor.u32 %v12983_v16, %v11398_v2  ;;  %v11878_v23 = vld [vmem:[#allocation2 + $0x4d8] sm:$0xf0]  ;;  %v7664_v16 = vmul.f32 %v14203_v8, %v14203_v8  ;;  %v12009_v18 = vor.u32 %v13135_v37, %v12006_v58 }
 0x4a4   :  { %7567 = vmatpush.bf16.msra.mxu2 %v11577_v3  ;;  %v11526_v3 = vld [vmem:[#allocation2 + $0x218] sm:$0xf0]  ;;  %v13167_v36 = vld [vmem:[#allocation2 + $0x6cc] sm:$0xf]  ;;  %v11881_v11 = vor.u32 %v13103_v63, %v11878_v23 }
 0x4a5   :  { %7581 = vmatpush.bf16.msra.mxu3 %v11705_v25  ;;  %v11654_v25 = vld [vmem:[#allocation2 + $0x318] sm:$0xf0]  ;;  %v13163_v5 = vld [vmem:[#allocation2 + $0x6ac] sm:$0xf] }
 0x4a6   :  { %7540 = vmatpush.bf16.msra.mxu0 %v11305_v40  ;;  %v12150_v40 = vld [vmem:[#allocation2 + $0x6f8] sm:$0xf0]  ;;  %v11657_v17 = vor.u32 %v13047_v29, %v11654_v25  ;;  %v12137_v29 = vor.u32 %v13167_v36, %v12134_v61  ;;  %v13191_v37 = vld [vmem:[#allocation2 + $0x78c] sm:$0xf] }
 0x4a7   :  { %7554 = vmatpush.bf16.msra.mxu1 %v11433_v48  ;;  %v7309_v48 = vadd.f32 %v7308_v53, %v7295_v9  ;;  %v12153_v14 = vor.u32 %v13171_v7, %v12150_v40  ;;  %v12262_v2 = vld [vmem:[#allocation2 + $0x7d8] sm:$0xf0]  ;;  %v5637_v9 = vadd.f32 %v14125_v20, %v5623_v62  ;;  %v7731_v53 = vmul.f32 %v14198_v26, %v7730_v24  ;;  %v13091_v61 = vld [vmem:[#allocation2 + $0x46c] sm:$0xf] }
 0x4a8   :  { %7568 = vmatpush.bf16.msra.mxu2 %v11561_v45  ;;  %v11529_v45 = vor.u32 %v13015_v15, %v11526_v3  ;;  %v13099_v15 = vld [vmem:[#allocation2 + $0x4ac] sm:$0xf]  ;;  %v11862_v25 = vld [vmem:[#allocation2 + $0x4b8] sm:$0xf0] }
 0x4a9   :  { %7582 = vmatpush.bf16.msra.mxu3 %v11689_v30  ;;  %v11897_v30 = vor.u32 %v13107_v6, %v11894_v21  ;;  %v14205_v56 = vadd.f32 %v7648_v50, %v7309_v48  ;;  %v13131_v6 = vld [vmem:[#allocation2 + $0x5ac] sm:$0xf]  ;;  %v12118_v33 = vld [vmem:[#allocation2 + $0x6b8] sm:$0xf0]  ;;  %v5651_v40 = vadd.f32 %v14130_v27, %v5637_v9  ;;  %v11865_v20 = vor.u32 %v13099_v15, %v11862_v25 }
 0x4aa   :  { %7541 = vmatpush.bf16.msra.mxu0 %v11289_v32  ;;  %v12281_v32 = vor.u32 %v13203_v10, %v12278_v52  ;;  %v12246_v7 = vld [vmem:[#allocation2 + $0x7b8] sm:$0xf0]  ;;  %v13095_v48 = vld [vmem:[#allocation2 + $0x48c] sm:$0xf]  ;;  %v11993_v10 = vor.u32 %v13131_v6, %v11990_v4  ;;  %v12121_v52 = vor.u32 %v13163_v5, %v12118_v33 }
 0x4ab   :  { %7555 = vmatpush.bf16.msra.mxu1 %v11417_v22  ;;  %v7668_v22 = vmul.f32 %v14205_v56, %v14205_v56  ;;  %v7672_v50 = vadd.f32 %v14205_v56, %v14203_v8  ;;  %v11974_v63 = vld [vmem:[#allocation2 + $0x598] sm:$0xf0]  ;;  %v5665_v62 = vadd.f32 %v14132_v31, %v5651_v40  ;;  %v13187_v9 = vld [vmem:[#allocation2 + $0x76c] sm:$0xf] }
 0x4ac   :  { %7569 = vmatpush.bf16.msra.mxu2 %v11545_v47  ;;  %v13199_v47 = vld [vmem:[#allocation2 + $0x7cc] sm:$0xf]  ;;  %v12102_v27 = vld [vmem:[#allocation2 + $0x698] sm:$0xf0] }
 0x4ad   :  { %7583 = vmatpush.bf16.msra.mxu3 %v11673_v35  ;;  %v7673_v3 = vrot.slane %v7672_v50, 4  ;;  %v7700_v35 = vadd.f32 %v7668_v22, %v7664_v16  ;;  %v12265_v21 = vor.u32 %v13199_v47, %v12262_v2  ;;  %v12230_v58 = vld [vmem:[#allocation2 + $0x798] sm:$0xf0]  ;;  %v13087_v5 = vld [vmem:[#allocation2 + $0x44c] sm:$0xf] }
 0x4ae   :  { %7542 = vmatpush.bf16.msra.mxu0 %v11273_v60  ;;  %v7320_v23 = vpop.f32.mrf.mxu0  ;;  %v11830_v16 = vld [vmem:[#allocation2 + $0x478] sm:$0xf0] }
 0x4af   :  { %7556 = vmatpush.bf16.msra.mxu1 %v11401_v28  ;;  %v7674_v39 = vadd.f32 %v7673_v3, %v7672_v50  ;;  %v7701_v60 = vrot.slane %v7700_v35, 4  ;;  %v13195_v28 = vld [vmem:[#allocation2 + $0x7ac] sm:$0xf]  ;;  %v7321_v24 = vadd.f32 %v7320_v23, %v14128_v34  ;;  %v7334_v36 = vpop.f32.mrf.mxu1  ;;  %v11958_v15 = vld [vmem:[#allocation2 + $0x578] sm:$0xf0]  ;;  %v5679_v3 = vadd.f32 %v14138_v19, %v5665_v62 }
 0x4b0   :  { %7570 = vmatpush.bf16.msra.mxu2 %v11529_v45  ;;  %v12233_v34 = vor.u32 %v13191_v37, %v12230_v58  ;;  %v13083_v37 = vld [vmem:[#allocation2 + $0x42c] sm:$0xf]  ;;  %v11798_v58 = vld [vmem:[#allocation2 + $0x438] sm:$0xf0] }
 0x4b1   :  { %7584 = vmatpush.bf16.msra.mxu3 %v11657_v17  ;;  %7543 = vmatmul.bf16.vlgmr.msra.gmra.mxu0 %v13901_v54  ;;  %v7675_v54 = vrot.slane %v7674_v39, 2  ;;  %v7702_v45 = vadd.f32 %v7701_v60, %v7700_v35  ;;  %v11846_v17 = vld [vmem:[#allocation2 + $0x498] sm:$0xf0]  ;;  %v7335_v35 = vadd.f32 %v7334_v36, %v7321_v24  ;;  %v13119_v60 = vld [vmem:[#allocation2 + $0x54c] sm:$0xf] }
 0x4b2   :  { %7591 = vmatpush.bf16.msrb.mxu0 %v11897_v30  ;;  %7557 = vmatmul.bf16.vlgmr.msra.gmra.mxu1 %v13929_v46  ;;  %v13127_v30 = vld [vmem:[#allocation2 + $0x58c] sm:$0xf]  ;;  %v12249_v46 = vor.u32 %v13195_v28, %v12246_v7  ;;  %v11942_v28 = vld [vmem:[#allocation2 + $0x558] sm:$0xf0]  ;;  %v5693_v7 = vadd.f32 %v14140_v12, %v5679_v3 }
 0x4b3   :  { %7605 = vmatpush.bf16.msrb.mxu1 %v12025_v55  ;;  %7571 = vmatmul.bf16.vlgmr.msra.gmra.mxu2 %v13966_v42  ;;  %v7732_v42 = vadd.f32 %v14198_v26, %v7731_v53  ;;  %v13159_v55 = vld [vmem:[#allocation2 + $0x68c] sm:$0xf]  ;;  %v11977_v47 = vor.u32 %v13127_v30, %v11974_v63  ;;  %v12214_v53 = vld [vmem:[#allocation2 + $0x778] sm:$0xf0] }
 0x4b4   :  { %7619 = vmatpush.bf16.msrb.mxu2 %v12153_v14  ;;  %7585 = vmatmul.bf16.vlgmr.msra.gmra.mxu3 %v13984_v51  ;;  %v7676_v14 = vadd.f32 %v7675_v54, %v7674_v39  ;;  %v7703_v51 = vrot.slane %v7702_v45, 2  ;;  %v12105_v2 = vor.u32 %v13159_v55, %v12102_v27  ;;  %v11814_v39 = vld [vmem:[#allocation2 + $0x458] sm:$0xf0]  ;;  %v12217_v40 = vor.u32 %v13187_v9, %v12214_v53  ;;  %v13115_v62 = vld [vmem:[#allocation2 + $0x52c] sm:$0xf] }
 0x4b5   :  { %7633 = vmatpush.bf16.msrb.mxu3 %v12281_v32  ;;  %v11849_v32 = vor.u32 %v13095_v48, %v11846_v17  ;;  %v14229_v31 = vsel %vm7733_vm5, %v14198_v26, %v7732_v42  ;;  %v13151_v48 = vld [vmem:[#allocation2 + $0x64c] sm:$0xf]  ;;  %v12070_v54 = vld [vmem:[#allocation2 + $0x658] sm:$0xf0]  ;;  %v11817_v12 = vor.u32 %v13087_v5, %v11814_v39  ;;  %v11945_v55 = vor.u32 %v13119_v60, %v11942_v28 }
 0x4b6   :  { %7592 = vmatpush.bf16.msrb.mxu0 %v11881_v11  ;;  %v7677_v22 = vrot.slane %v7676_v14, 1  ;;  %v7704_v50 = vadd.f32 %v7703_v51, %v7702_v45  ;;  %v13123_v11 = vld [vmem:[#allocation2 + $0x56c] sm:$0xf]  ;;  %v7322_v17 = vpop.f32.mrf.mxu0  ;;  %v12073_v23 = vor.u32 %v13151_v48, %v12070_v54  ;;  %v11926_v36 = vld [vmem:[#allocation2 + $0x538] sm:$0xf0] }
 0x4b7   :  { %7606 = vmatpush.bf16.msrb.mxu1 %v12009_v18  ;;  %v13155_v18 = vld [vmem:[#allocation2 + $0x66c] sm:$0xf]  ;;  %v11961_v4 = vor.u32 %v13123_v11, %v11958_v15  ;;  %v7362_v30 = vpop.f32.mrf.mxu3  ;;  %v7323_v63 = vadd.f32 %v7322_v17, %v5693_v7  ;;  %v7336_v27 = vpop.f32.mrf.mxu1  ;;  %v11782_v3 = vld [vmem:[#allocation2 + $0x418] sm:$0xf0] }
 0x4b8   :  { %7620 = vmatpush.bf16.msrb.mxu2 %v12137_v29  ;;  %v12086_v29 = vld [vmem:[#allocation2 + $0x678] sm:$0xf0]  ;;  %v7678_v25 = vadd.f32 %v7677_v22, %v7676_v14  ;;  %v7705_v6 = vrot.slane %v7704_v50, 1  ;;  %v13183_v42 = vld [vmem:[#allocation2 + $0x74c] sm:$0xf] }
 0x4b9   :  { %7634 = vmatpush.bf16.msrb.mxu3 %v12265_v21  ;;  %v11833_v21 = vor.u32 %v13091_v61, %v11830_v16  ;;  %v12089_v26 = vor.u32 %v13155_v18, %v12086_v29  ;;  %v13147_v61 = vld [vmem:[#allocation2 + $0x62c] sm:$0xf]  ;;  %v12054_v16 = vld [vmem:[#allocation2 + $0x638] sm:$0xf0] }
 0x4ba   :  { %7593 = vmatpush.bf16.msrb.mxu0 %v11865_v20  ;;  %v7706_v33 = vadd.f32 %v7705_v6, %v7704_v50  ;;  %v14232_v19 = vmul.f32 %v14229_v31, %v7678_v25  ;;  %v7348_v20 = vpop.f32.mrf.mxu2  ;;  %v13179_v22 = vld [vmem:[#allocation2 + $0x72c] sm:$0xf]  ;;  %v12182_v50 = vld [vmem:[#allocation2 + $0x738] sm:$0xf0]  ;;  %v12057_v11 = vor.u32 %v13147_v61, %v12054_v16 }
 0x4bb   :  { %7607 = vmatpush.bf16.msrb.mxu1 %v11993_v10  ;;  %v13079_v15 = vld [vmem:[#allocation2 + $0x40c] sm:$0xf]  ;;  %v11910_v29 = vld [vmem:[#allocation2 + $0x518] sm:$0xf0] }
 0x4bc   :  { %7621 = vmatpush.bf16.msrb.mxu2 %v12121_v52  ;;  %v14236_v45 = vmul.f32 %v14229_v31, %v7706_v33  ;;  %v14240_v10 = vmul.f32 %v14232_v19, %v14232_v19  ;;  %v7349_v52 = vadd.f32 %v7348_v20, %v7335_v35  ;;  %v12185_v35 = vor.u32 %v13179_v22, %v12182_v50  ;;  %v13143_v25 = vld [vmem:[#allocation2 + $0x60c] sm:$0xf]  ;;  %v12038_v6 = vld [vmem:[#allocation2 + $0x618] sm:$0xf0] }
 0x4bd   :  { %7635 = vmatpush.bf16.msrb.mxu3 %v12249_v46  ;;  %v12198_v46 = vld [vmem:[#allocation2 + $0x758] sm:$0xf0]  ;;  %v11785_v5 = vor.u32 %v13079_v15, %v11782_v3  ;;  %v12041_v39 = vor.u32 %v13143_v25, %v12038_v6 }
 0x4be   :  { %7594 = vmatpush.bf16.msrb.mxu0 %v11849_v32  ;;  %v7747_v14 = vsub.f32 %v14236_v45, %v14240_v10  ;;  %v7363_v51 = vadd.f32 %v7362_v30, %v7349_v52  ;;  %v12201_v24 = vor.u32 %v13183_v42, %v12198_v46  ;;  %v7337_v32 = vadd.f32 %v7336_v27, %v7323_v63 }
 0x4bf   :  { %7608 = vmatpush.bf16.msrb.mxu1 %v11977_v47  ;;  %v11801_v47 = vor.u32 %v13083_v37, %v11798_v58  ;;  %v7364_v53 = vpop.f32.mrf.mxu3 }
 0x4c0   :  { %7622 = vmatpush.bf16.msrb.mxu2 %v12105_v2  ;;  %v11929_v2 = vor.u32 %v13115_v62, %v11926_v36  ;;  %v7751_v36 = vmax.f32 %v7747_v14, 0.0 }
 0x4c1   :  { %7636 = vmatpush.bf16.msrb.mxu3 %v12233_v34  ;;  %v13111_v34 = vld [vmem:[#allocation2 + $0x50c] sm:$0xf] }
 0x4c2   :  { %7595 = vmatpush.bf16.msrb.mxu0 %v11833_v21  ;;  %v7350_v18 = vpop.f32.mrf.mxu2  ;;  %v13175_v21 = vld [vmem:[#allocation2 + $0x70c] sm:$0xf] }
 0x4c3   :  { %7609 = vmatpush.bf16.msrb.mxu1 %v11961_v4  ;;  %v7351_v9 = vadd.f32 %v7350_v18, %v7337_v32  ;;  %v12166_v4 = vld [vmem:[#allocation2 + $0x718] sm:$0xf0] }
 0x4c4   :  { %7623 = vmatpush.bf16.msrb.mxu2 %v12089_v26  ;;  %v11913_v26 = vor.u32 %v13111_v34, %v11910_v29  ;;  %v12169_v60 = vor.u32 %v13175_v21, %v12166_v4 }
 0x4c5   :  { %7637 = vmatpush.bf16.msrb.mxu3 %v12217_v40  ;;  %v7365_v33 = vadd.f32 %v7364_v53, %v7351_v9 }
 0x4c6   :  { %7596 = vmatpush.bf16.msrb.mxu0 %v11817_v12 }
 0x4c7   :  { %7610 = vmatpush.bf16.msrb.mxu1 %v11945_v55 }
 0x4c8   :  { %7624 = vmatpush.bf16.msrb.mxu2 %v12073_v23 }
 0x4c9   :  { %7638 = vmatpush.bf16.msrb.mxu3 %v12201_v24 }
 0x4ca   :  { %7597 = vmatpush.bf16.msrb.mxu0 %v11801_v47  ;;  %v7755_v47 = vadd.f32 1e-05, %v7751_v36 }
 0x4cb   :  { %7611 = vmatpush.bf16.msrb.mxu1 %v11929_v2 }
 0x4cc   :  { %7625 = vmatpush.bf16.msrb.mxu2 %v12057_v11  ;;  %13543 = vrsqrt.f32 %v7755_v47  ;;  %vm7765_vm10 = vweird.f32 %v7755_v47 }
 0x4cd   :  { %7639 = vmatpush.bf16.msrb.mxu3 %v12185_v35 }
 0x4ce   :  { %7598 = vmatpush.bf16.msrb.mxu0 %v11785_v5  ;;  %v7376_v28 = vpop.f32.mrf.mxu0 }
 0x4cf   :  { %7612 = vmatpush.bf16.msrb.mxu1 %v11913_v26  ;;  %v7377_v7 = vadd.f32 %v7376_v28, %v7363_v51  ;;  %v7390_v40 = vpop.f32.mrf.mxu1 }
 0x4d0   :  { %7626 = vmatpush.bf16.msrb.mxu2 %v12041_v39 }
 0x4d1   :  { %7640 = vmatpush.bf16.msrb.mxu3 %v12169_v60  ;;  %7599 = vmatmul.bf16.vlgmr.msrb.gmra.mxu0 %v14013_v44  ;;  %v7391_v20 = vadd.f32 %v7390_v40, %v7377_v7  ;;  %v7649_v44 = vperm.slane %v13814_v0, 1 }
 0x4d2   :  { %7613 = vmatmul.bf16.vlgmr.msrb.gmra.mxu1 %v14030_v49  ;;  %v13544_v14 = vpop.eup %13543 }
 0x4d3   :  { %7627 = vmatmul.bf16.vlgmr.msrb.gmra.mxu2 %v14032_v59  ;;  %v7760_v53 = vmul.f32 %v13544_v14, %v7755_v47  ;;  %vm7766_vm7 = vweird.f32 %v13544_v14  ;;  %v7650_v47 = vperm.slane %v13814_v0, 2 }
 0x4d4   :  { %7641 = vmatmul.bf16.vlgmr.msrb.gmra.mxu3 %v14040_v57  ;;  %vm7767_vm12 = vmor %vm7765_vm10, %vm7766_vm7 }
 0x4d5   :  { %v7761_v21 = vmul.f32 %v13544_v14, %v7760_v53 }
 0x4d6   :  { %v7404_v48 = vpop.f32.mrf.mxu2  ;;  %v7378_v52 = vpop.f32.mrf.mxu0 }
 0x4d7   :  { %v7405_v54 = vadd.f32 %v7404_v48, %v7391_v20  ;;  %v7418_v17 = vpop.f32.mrf.mxu3  ;;  %v7379_v30 = vadd.f32 %v7378_v52, %v7365_v33  ;;  %v7392_v42 = vpop.f32.mrf.mxu1  ;;  %v7762_v60 = vmul.f32 0.5, %v7761_v21 }
 0x4d9   :  { %v7419_v46 = vadd.f32 %v7418_v17, %v7405_v54  ;;  %v7393_v63 = vadd.f32 %v7392_v42, %v7379_v30  ;;  %v7763_v48 = vsub.f32 1.5, %v7762_v60 }
 0x4db   :  { %v14249_v59 = vadd.f32 %v7649_v44, %v7419_v46 }
 0x4dd   :  { %v7665_v51 = vmul.f32 %v14249_v59, %v14249_v59 }
 0x4de   :  { %v7406_v12 = vpop.f32.mrf.mxu2 }
 0x4df   :  { %v7407_v49 = vadd.f32 %v7406_v12, %v7393_v63  ;;  %v7420_v55 = vpop.f32.mrf.mxu3  ;;  %v7764_v12 = vmul.f32 %v13544_v14, %v7763_v48 }
 0x4e1   :  { %v7421_v57 = vadd.f32 %v7420_v55, %v7407_v49 }
 0x4e3   :  { %v14251_v27 = vadd.f32 %v7649_v44, %v7421_v57 }
 0x4e5   :  { %v7669_v23 = vmul.f32 %v14251_v27, %v14251_v27  ;;  %v7679_v37 = vadd.f32 %v14251_v27, %v14249_v59 }
 0x4e7   :  { %v7680_v58 = vrot.slane %v7679_v37, 4  ;;  %v7707_v62 = vadd.f32 %v7669_v23, %v7665_v51 }
 0x4e9   :  { %v7681_v24 = vadd.f32 %v7680_v58, %v7679_v37  ;;  %v7708_v32 = vrot.slane %v7707_v62, 4  ;;  %v7768_v37 = vsel %vm7767_vm12, %v13544_v14, %v7764_v12 }
 0x4eb   :  { %v7682_v61 = vrot.slane %v7681_v24, 2  ;;  %v7709_v16 = vadd.f32 %v7708_v32, %v7707_v62 }
 0x4ed   :  { %v7683_v22 = vadd.f32 %v7682_v61, %v7681_v24  ;;  %v7710_v50 = vrot.slane %v7709_v16, 2 }
 0x4ee   :  { %v7432_v25 = vpop.f32.mrf.mxu0 }
 0x4ef   :  { %v7684_v2 = vrot.slane %v7683_v22, 1  ;;  %v7711_v11 = vadd.f32 %v7710_v50, %v7709_v16  ;;  %v7446_v6 = vpop.f32.mrf.mxu1  ;;  %v7433_v26 = vadd.f32 %v7432_v25, %v14152_v38 }
 0x4f1   :  { %v7685_v15 = vadd.f32 %v7684_v2, %v7683_v22  ;;  %v7712_v3 = vrot.slane %v7711_v11, 1  ;;  %v7447_v20 = vadd.f32 %v7446_v6, %v7433_v26 }
 0x4f3   :  { %v7713_v34 = vadd.f32 %v7712_v3, %v7711_v11  ;;  %v14263_v35 = vmul.f32 %v14229_v31, %v7685_v15 }
 0x4f5   :  { %v7740_v18 = vmul.f32 %v14229_v31, %v7713_v34  ;;  %v7744_v45 = vmul.f32 %v14263_v35, %v14263_v35 }
 0x4f6   :  { %v7460_v4 = vpop.f32.mrf.mxu2  ;;  %v7434_v39 = vpop.f32.mrf.mxu0 }
 0x4f7   :  { %v7748_v10 = vsub.f32 %v7740_v18, %v7744_v45  ;;  %v7474_v5 = vpop.f32.mrf.mxu3  ;;  %v7448_v7 = vpop.f32.mrf.mxu1  ;;  %v7461_v52 = vadd.f32 %v7460_v4, %v7447_v20  ;;  %v7435_v17 = vadd.f32 %v7434_v39, %v14154_v13 }
 0x4f9   :  { %v7752_v29 = vmax.f32 %v7748_v10, 0.0  ;;  %v7475_v49 = vadd.f32 %v7474_v5, %v7461_v52  ;;  %v7449_v55 = vadd.f32 %v7448_v7, %v7435_v17 }
 0x4fb   :  { %v7756_v9 = vadd.f32 1e-05, %v7752_v29 }
 0x4fd   :  { %13545 = vrsqrt.f32 %v7756_v9  ;;  %vm7775_vm8 = vweird.f32 %v7756_v9 }
 0x4fe   :  { %v7462_v42 = vpop.f32.mrf.mxu2 }
 0x4ff   :  { %v7476_v46 = vpop.f32.mrf.mxu3  ;;  %v7463_v51 = vadd.f32 %v7462_v42, %v7449_v55 }
 0x501   :  { %v7477_v24 = vadd.f32 %v7476_v46, %v7463_v51 }
 0x503   :  { %v13546_v33 = vpop.eup %13545 }
 0x504   :  { %v7770_v28 = vmul.f32 %v13546_v33, %v7756_v9  ;;  %vm7776_vm6 = vweird.f32 %v13546_v33 }
 0x505   :  { %vm7777_vm9 = vmor %vm7775_vm8, %vm7776_vm6 }
 0x506   :  { %v7771_v40 = vmul.f32 %v13546_v33, %v7770_v28 }
 0x508   :  { %v7772_v54 = vmul.f32 0.5, %v7771_v40 }
 0x50a   :  { %v7773_v30 = vsub.f32 1.5, %v7772_v54 }
 0x50c   :  { %v7774_v44 = vmul.f32 %v13546_v33, %v7773_v30 }
 0x50e   :  { %v7488_v63 = vpop.f32.mrf.mxu0  ;;  %v7778_v57 = vsel %vm7777_vm9, %v13546_v33, %v7774_v44 }
 0x50f   :  { %v7502_v38 = vpop.f32.mrf.mxu1  ;;  %v7489_v23 = vadd.f32 %v7488_v63, %v7475_v49  ;;  %v7803_v13 = vrot.slane %v7778_v57, 7 }
 0x511   :  { %v14271_v58 = vsel %vm7806_vm11, %v7768_v37, %v7803_v13  ;;  %v7503_v32 = vadd.f32 %v7502_v38, %v7489_v23 }
 0x516   :  { %v7516_v62 = vpop.f32.mrf.mxu2  ;;  %v7490_v36 = vpop.f32.mrf.mxu0 }
 0x517   :  { %v7530_v61 = vpop.f32.mrf.mxu3  ;;  %v7517_v16 = vadd.f32 %v7516_v62, %v7503_v32  ;;  %v7491_v22 = vadd.f32 %v7490_v36, %v7477_v24  ;;  %v7504_v50 = vpop.f32.mrf.mxu1 }
 0x519   :  { %v7531_v2 = vadd.f32 %v7530_v61, %v7517_v16  ;;  %v7505_v11 = vadd.f32 %v7504_v50, %v7491_v22 }
 0x51b   :  { %v14274_v18 = vadd.f32 %v7650_v47, %v7531_v2 }
 0x51d   :  { %v7666_v14 = vmul.f32 %v14274_v18, %v14274_v18 }
 0x51e   :  { %v7518_v15 = vpop.f32.mrf.mxu2 }
 0x51f   :  { %v7519_v3 = vadd.f32 %v7518_v15, %v7505_v11  ;;  %v7532_v34 = vpop.f32.mrf.mxu3  ;;  %v7651_v15 = vperm.slane %v13814_v0, 3 }
 0x521   :  { %v7533_v45 = vadd.f32 %v7532_v34, %v7519_v3 }
 0x523   :  { %v14276_v10 = vadd.f32 %v7650_v47, %v7533_v45 }
 0x525   :  { %v7670_v29 = vmul.f32 %v14276_v10, %v14276_v10  ;;  %v7686_v25 = vadd.f32 %v14276_v10, %v14274_v18 }
 0x527   :  { %v7687_v6 = vrot.slane %v7686_v25, 4  ;;  %v7714_v9 = vadd.f32 %v7670_v29, %v7666_v14 }
 0x529   :  { %v7688_v53 = vadd.f32 %v7687_v6, %v7686_v25  ;;  %v7715_v21 = vrot.slane %v7714_v9, 4 }
 0x52b   :  { %v7689_v4 = vrot.slane %v7688_v53, 2  ;;  %v7716_v5 = vadd.f32 %v7715_v21, %v7714_v9 }
 0x52d   :  { %v7690_v33 = vadd.f32 %v7689_v4, %v7688_v53  ;;  %v7717_v26 = vrot.slane %v7716_v5, 2 }
 0x52e   :  { %v7544_v17 = vpop.f32.mrf.mxu0 }
 0x52f   :  { %v7691_v39 = vrot.slane %v7690_v33, 1  ;;  %v7718_v60 = vadd.f32 %v7717_v26, %v7716_v5  ;;  %v7558_v30 = vpop.f32.mrf.mxu1  ;;  %v7545_v63 = vadd.f32 %v7544_v17, %v14170_v43 }
 0x531   :  { %v7692_v28 = vadd.f32 %v7691_v39, %v7690_v33  ;;  %v7719_v7 = vrot.slane %v7718_v60, 1  ;;  %v7559_v12 = vadd.f32 %v7558_v30, %v7545_v63 }
 0x533   :  { %v7720_v40 = vadd.f32 %v7719_v7, %v7718_v60  ;;  %v14285_v20 = vmul.f32 %v14229_v31, %v7692_v28 }
 0x535   :  { %v7741_v48 = vmul.f32 %v14229_v31, %v7720_v40  ;;  %v7745_v54 = vmul.f32 %v14285_v20, %v14285_v20 }
 0x536   :  { %v7572_v42 = vpop.f32.mrf.mxu2  ;;  %v7546_v44 = vpop.f32.mrf.mxu0 }
 0x537   :  { %v7749_v52 = vsub.f32 %v7741_v48, %v7745_v54  ;;  %v7586_v46 = vpop.f32.mrf.mxu3  ;;  %v7560_v38 = vpop.f32.mrf.mxu1  ;;  %v7573_v49 = vadd.f32 %v7572_v42, %v7559_v12  ;;  %v7547_v55 = vadd.f32 %v7546_v44, %v14174_v41 }
 0x539   :  { %v7587_v13 = vadd.f32 %v7586_v46, %v7573_v49  ;;  %v7561_v37 = vadd.f32 %v7560_v38, %v7547_v55  ;;  %v7753_v21 = vmax.f32 %v7749_v52, 0.0 }
 0x53b   :  { %v7757_v26 = vadd.f32 1e-05, %v7753_v21 }
 0x53d   :  { %13547 = vrsqrt.f32 %v7757_v26  ;;  %vm7785_vm14 = vweird.f32 %v7757_v26 }
 0x53e   :  { %v7574_v57 = vpop.f32.mrf.mxu2 }
 0x53f   :  { %v7588_v51 = vpop.f32.mrf.mxu3  ;;  %v7575_v24 = vadd.f32 %v7574_v57, %v7561_v37 }
 0x541   :  { %v7589_v61 = vadd.f32 %v7588_v51, %v7575_v24 }
 0x543   :  { %v13548_v46 = vpop.eup %13547 }
 0x544   :  { %v7780_v38 = vmul.f32 %v13548_v46, %v7757_v26  ;;  %vm7786_vm13 = vweird.f32 %v13548_v46 }
 0x545   :  { %vm7787_vm0 = vmor %vm7785_vm14, %vm7786_vm13 }
 0x546   :  { %v7781_v55 = vmul.f32 %v13548_v46, %v7780_v38 }
 0x548   :  { %v7782_v57 = vmul.f32 0.5, %v7781_v55 }
 0x54e   :  { %v7600_v23 = vpop.f32.mrf.mxu0 }
 0x54f   :  { %v7614_v62 = vpop.f32.mrf.mxu1  ;;  %v7601_v32 = vadd.f32 %v7600_v23, %v7587_v13  ;;  %v7783_v23 = vsub.f32 1.5, %v7782_v57 }
 0x551   :  { %v7615_v16 = vadd.f32 %v7614_v62, %v7601_v32  ;;  %v7784_v62 = vmul.f32 %v13548_v46, %v7783_v23 }
 0x556   :  { %v7628_v36 = vpop.f32.mrf.mxu2  ;;  %v7602_v50 = vpop.f32.mrf.mxu0 }
 0x557   :  { %v7642_v22 = vpop.f32.mrf.mxu3  ;;  %v7629_v43 = vadd.f32 %v7628_v36, %v7615_v16  ;;  %v7603_v2 = vadd.f32 %v7602_v50, %v7589_v61  ;;  %v7616_v47 = vpop.f32.mrf.mxu1  ;;  %v7788_v36 = vsel %vm7787_vm0, %v13548_v46, %v7784_v62 }
 0x559   :  { %v7643_v11 = vadd.f32 %v7642_v22, %v7629_v43  ;;  %v7617_v41 = vadd.f32 %v7616_v47, %v7603_v2  ;;  %v7804_v22 = vrot.slane %v7788_v36, 6 }
 0x55b   :  { %v14293_v14 = vadd.f32 %v7651_v15, %v7643_v11 }
 0x55d   :  { %v7667_v6 = vmul.f32 %v14293_v14, %v14293_v14 }
 0x55e   :  { %v7630_v3 = vpop.f32.mrf.mxu2 }
 0x55f   :  { %v7631_v34 = vadd.f32 %v7630_v3, %v7617_v41  ;;  %v7644_v45 = vpop.f32.mrf.mxu3 }
 0x561   :  { %v7645_v29 = vadd.f32 %v7644_v45, %v7631_v34 }
 0x563   :  { %v14295_v25 = vadd.f32 %v7651_v15, %v7645_v29 }
 0x565   :  { %v7671_v9 = vmul.f32 %v14295_v25, %v14295_v25  ;;  %v7693_v53 = vadd.f32 %v14295_v25, %v14293_v14 }
 0x567   :  { %v7694_v0 = vrot.slane %v7693_v53, 4  ;;  %v7721_v4 = vadd.f32 %v7671_v9, %v7667_v6 }
 0x569   :  { %v7695_v5 = vadd.f32 %v7694_v0, %v7693_v53  ;;  %v7722_v33 = vrot.slane %v7721_v4, 4 }
 0x56b   :  { %v7696_v39 = vrot.slane %v7695_v5, 2  ;;  %v7723_v60 = vadd.f32 %v7722_v33, %v7721_v4 }
 0x56d   :  { %v7697_v28 = vadd.f32 %v7696_v39, %v7695_v5  ;;  %v7724_v7 = vrot.slane %v7723_v60, 2 }
 0x56f   :  { %v7698_v40 = vrot.slane %v7697_v28, 1  ;;  %v7725_v48 = vadd.f32 %v7724_v7, %v7723_v60 }
 0x571   :  { %v7699_v54 = vadd.f32 %v7698_v40, %v7697_v28  ;;  %v7726_v17 = vrot.slane %v7725_v48, 1 }
 0x573   :  { %v7727_v30 = vadd.f32 %v7726_v17, %v7725_v48  ;;  %v7738_v42 = vmul.f32 %v14229_v31, %v7699_v54 }
 0x575   :  { %v7742_v52 = vmul.f32 %v14229_v31, %v7727_v30  ;;  %v7746_v63 = vmul.f32 %v7738_v42, %v7738_v42 }
 0x577   :  { %v7750_v44 = vsub.f32 %v7742_v52, %v7746_v63 }
 0x579   :  { %v7754_v12 = vmax.f32 %v7750_v44, 0.0 }
 0x57b   :  { %v7758_v49 = vadd.f32 1e-05, %v7754_v12 }
 0x57d   :  { %13549 = vrsqrt.f32 %v7758_v49  ;;  %vm7795_vm1 = vweird.f32 %v7758_v49 }
 0x583   :  { %v13550_v51 = vpop.eup %13549 }
 0x584   :  { %v7790_v13 = vmul.f32 %v13550_v51, %v7758_v49  ;;  %vm7796_vm15 = vweird.f32 %v13550_v51 }
 0x585   :  { %vm7797_vm2 = vmor %vm7795_vm1, %vm7796_vm15 }
 0x586   :  { %v7791_v37 = vmul.f32 %v13550_v51, %v7790_v13 }
 0x588   :  { %v7792_v24 = vmul.f32 0.5, %v7791_v37 }
 0x58a   :  { %v7793_v32 = vsub.f32 1.5, %v7792_v24 }
 0x58c   :  { %v7794_v61 = vmul.f32 %v13550_v51, %v7793_v32 }
 0x58e   :  { %v7798_v16 = vsel %vm7797_vm2, %v13550_v51, %v7794_v61 }
 0x58f   :  { %v7805_v50 = vrot.slane %v7798_v16, 5 }
 0x591   :  { %v7809_v43 = vsel %vm7808_vm3, %v7804_v22, %v7805_v50 }
 0x592   :  { %v7811_v2 = vsel %vm7810_vm4, %v14271_v58, %v7809_v43 }
 0x593   :  { %v7813_v47 = vmul.f32 %v7811_v2, %v13816_v1 }
 0x595   :  { %v7815_v11 = vperm.slane %v7813_v47, 0  ;;  %v7816_v15 = vperm.slane %v7813_v47, 1  ;;  %v7817_v41 = vperm.slane %v7813_v47, 2  ;;  %v7818_v3 = vperm.slane %v7813_v47, 3 }
 0x597   :  { %v7823_v34 = vmul.f32 %v7815_v11, %v14232_v19  ;;  %v7824_v45 = vmul.f32 %v7816_v15, %v14263_v35  ;;  %v7825_v29 = vmul.f32 %v7817_v41, %v14285_v20  ;;  %v7826_v6 = vmul.f32 %v7818_v3, %v7738_v42 }
 0x598   :  { %v7839_v9 = vmul.f32 %v7815_v11, %v14203_v8  ;;  %v7840_v53 = vmul.f32 %v7816_v15, %v14249_v59  ;;  %v7841_v21 = vmul.f32 %v7817_v41, %v14274_v18  ;;  %v7842_v58 = vmul.f32 %v7818_v3, %v14293_v14  ;;  %v14406_v18 = vld [vmem:[#allocation27_spill] sm:$0xff] }
 0x599   :  { %v7831_v1 = vrot.slane %v7824_v45, 7  ;;  %v7832_v0 = vrot.slane %v7825_v29, 6  ;;  %v7833_v4 = vrot.slane %v7826_v6, 5  ;;  %v7843_v5 = vmul.f32 %v7815_v11, %v14205_v56 }
 0x59a   :  { %v7844_v19 = vmul.f32 %v7816_v15, %v14251_v27  ;;  %v7845_v35 = vmul.f32 %v7817_v41, %v14276_v10  ;;  %v7846_v20 = vmul.f32 %v7818_v3, %v14295_v25 }
 0x59b   :  { %v7834_v33 = vsel %vm7806_vm11, %v7823_v34, %v7831_v1  ;;  %v7835_v8 = vsel %vm7808_vm3, %v7832_v0, %v7833_v4 }
 0x59c   :  { %v7836_v59 = vsel %vm7810_vm4, %v7834_v33, %v7835_v8 }
 0x59d   :  { %v7838_v26 = vsub.f32 %v14406_v18, %v7836_v59 }
 0x59f   :  { %v7848_v14 = vperm.slane %v7838_v26, 0  ;;  %v7849_v39 = vperm.slane %v7838_v26, 1  ;;  %v7850_v60 = vperm.slane %v7838_v26, 2  ;;  %v7851_v28 = vperm.slane %v7838_v26, 3 }
 0x5a1   :  { %v7856_v7 = vadd.f32 %v7848_v14, %v7839_v9  ;;  %v7857_v56 = vadd.f32 %v7849_v39, %v7840_v53  ;;  %v7858_v40 = vadd.f32 %v7850_v60, %v7841_v21  ;;  %v7859_v27 = vadd.f32 %v7851_v28, %v7842_v58 }
 0x5a2   :  { %v7860_v48 = vadd.f32 %v7848_v14, %v7843_v5  ;;  %v7861_v10 = vadd.f32 %v7849_v39, %v7844_v19  ;;  %v7862_v54 = vadd.f32 %v7850_v60, %v7845_v35  ;;  %v7863_v25 = vadd.f32 %v7851_v28, %v7846_v20 }
 0x5a3   :  { %vm7864_vm5 = vcmp.gt.f32.partialorder %v7856_v7, 0.0  ;;  %vm7865_vm6 = vcmp.gt.f32.partialorder %v7857_v56, 0.0  ;;  %vm7866_vm7 = vcmp.gt.f32.partialorder %v7858_v40, 0.0  ;;  %vm7867_vm8 = vcmp.gt.f32.partialorder %v7859_v27, 0.0 }
 0x5a4   :  { %vm7868_vm9 = vcmp.gt.f32.partialorder %v7860_v48, 0.0  ;;  %vm7869_vm10 = vcmp.gt.f32.partialorder %v7861_v10, 0.0  ;;  %vm7870_vm12 = vcmp.gt.f32.partialorder %v7862_v54, 0.0  ;;  %vm7871_vm13 = vcmp.gt.f32.partialorder %v7863_v25, 0.0 }
 0x5a5   :  { %v7872_v17 = vmul.f32 0.2, %v7856_v7  ;;  %v7873_v30 = vmul.f32 0.2, %v7857_v56  ;;  %v7874_v42 = vmul.f32 0.2, %v7858_v40 }
 0x5a6   :  { %v7875_v46 = vmul.f32 0.2, %v7859_v27  ;;  %v7876_v52 = vmul.f32 0.2, %v7860_v48  ;;  %v7877_v63 = vmul.f32 0.2, %v7861_v10 }
 0x5a7   :  { %v7878_v44 = vmul.f32 0.2, %v7862_v54  ;;  %v7879_v38 = vmul.f32 0.2, %v7863_v25  ;;  %v7880_v12 = vsel %vm7864_vm5, %v7856_v7, %v7872_v17  ;;  %v7881_v49 = vsel %vm7865_vm6, %v7857_v56, %v7873_v30 }
 0x5a8   :  { %v7882_v55 = vsel %vm7866_vm7, %v7858_v40, %v7874_v42  ;;  %v7883_v57 = vsel %vm7867_vm8, %v7859_v27, %v7875_v46  ;;  %v7884_v51 = vsel %vm7868_vm9, %v7860_v48, %v7876_v52  ;;  %v7885_v23 = vsel %vm7869_vm10, %v7861_v10, %v7877_v63 }
 0x5a9   :  { %v7886_v13 = vsel %vm7870_vm12, %v7862_v54, %v7878_v44  ;;  %v7887_v37 = vsel %vm7871_vm13, %v7863_v25, %v7879_v38  ;;  %v14332_v62 = vpack.c.bf16 %v7884_v51, %v7880_v12  ;;  %v14334_v24 = vpack.c.bf16 %v7885_v23, %v7881_v49 }
 0x5aa   :  { %v14336_v32 = vpack.c.bf16 %v7886_v13, %v7882_v55  ;;  %v14338_v36 = vpack.c.bf16 %v7887_v37, %v7883_v57 }
 0x5ab   :  { %13741 = dma.done.wait [#allocation5 + $0x2], 8192 }
 0x5ac   :  { %13742 = vsyncadd [#allocation5 + $0x2], 4294959104  ;;  %v12340_v61 = vld [vmem:[#allocation4 + $0x70] sm:$0xf]  ;;  %v13477_v16 = vld [vmem:[#allocation4 + $0x74] sm:$0xf0] }
 0x5ad   :  { %v12404_v22 = vld [vmem:[#allocation4 + $0xf0] sm:$0xf]  ;;  %v12341_v50 = vor.u32 %v13477_v16, %v12340_v61  ;;  %v13493_v43 = vld [vmem:[#allocation4 + $0xf4] sm:$0xf0]  ;;  %v12332_v34 = vld [vmem:[#allocation4 + $0x60] sm:$0xf] }
 0x5ae   :  { %v12468_v2 = vld [vmem:[#allocation4 + $0x170] sm:$0xf]  ;;  %v13509_v47 = vld [vmem:[#allocation4 + $0x174] sm:$0xf0]  ;;  %v12405_v11 = vor.u32 %v13493_v43, %v12404_v22  ;;  %v13475_v29 = vld [vmem:[#allocation4 + $0x64] sm:$0xf0] }
 0x5af   :  { %v12469_v15 = vor.u32 %v13509_v47, %v12468_v2  ;;  %v12532_v41 = vld [vmem:[#allocation4 + $0x1f0] sm:$0xf]  ;;  %v13525_v3 = vld [vmem:[#allocation4 + $0x1f4] sm:$0xf0]  ;;  %8285 = vmatpush.bf16.msra.mxu0 %v12341_v50  ;;  %v12396_v6 = vld [vmem:[#allocation4 + $0xe0] sm:$0xf]  ;;  %v12333_v53 = vor.u32 %v13475_v29, %v12332_v34 }
 0x5b0   :  { %v12533_v45 = vor.u32 %v13525_v3, %v12532_v41  ;;  %v13491_v9 = vld [vmem:[#allocation4 + $0xe4] sm:$0xf0]  ;;  %8299 = vmatpush.bf16.msra.mxu1 %v12405_v11  ;;  %v12460_v58 = vld [vmem:[#allocation4 + $0x160] sm:$0xf]  ;;  %v12324_v19 = vld [vmem:[#allocation4 + $0x50] sm:$0xf] }
 0x5b1   :  { %8313 = vmatpush.bf16.msra.mxu2 %v12469_v15  ;;  %v12397_v21 = vor.u32 %v13491_v9, %v12396_v6  ;;  %v13507_v1 = vld [vmem:[#allocation4 + $0x164] sm:$0xf0]  ;;  %v12524_v0 = vld [vmem:[#allocation4 + $0x1e0] sm:$0xf]  ;;  %v13473_v35 = vld [vmem:[#allocation4 + $0x54] sm:$0xf0] }
 0x5b2   :  { %8327 = vmatpush.bf16.msra.mxu3 %v12533_v45  ;;  %v12461_v4 = vor.u32 %v13507_v1, %v12460_v58  ;;  %v13523_v5 = vld [vmem:[#allocation4 + $0x1e4] sm:$0xf0]  ;;  %v12388_v33 = vld [vmem:[#allocation4 + $0xd0] sm:$0xf]  ;;  %v13489_v8 = vld [vmem:[#allocation4 + $0xd4] sm:$0xf0]  ;;  %v12325_v18 = vor.u32 %v13473_v35, %v12324_v19 }
 0x5b3   :  { %v12525_v20 = vor.u32 %v13523_v5, %v12524_v0  ;;  %v12452_v59 = vld [vmem:[#allocation4 + $0x150] sm:$0xf]  ;;  %8286 = vmatpush.bf16.msra.mxu0 %v12333_v53  ;;  %v13505_v26 = vld [vmem:[#allocation4 + $0x154] sm:$0xf0]  ;;  %v12389_v60 = vor.u32 %v13489_v8, %v12388_v33  ;;  %v12316_v7 = vld [vmem:[#allocation4 + $0x40] sm:$0xf] }
 0x5b4   :  { %v12516_v14 = vld [vmem:[#allocation4 + $0x1d0] sm:$0xf]  ;;  %v13521_v39 = vld [vmem:[#allocation4 + $0x1d4] sm:$0xf0]  ;;  %8300 = vmatpush.bf16.msra.mxu1 %v12397_v21  ;;  %v12453_v28 = vor.u32 %v13505_v26, %v12452_v59  ;;  %v13471_v56 = vld [vmem:[#allocation4 + $0x44] sm:$0xf0] }
 0x5b5   :  { %8314 = vmatpush.bf16.msra.mxu2 %v12461_v4  ;;  %v12380_v40 = vld [vmem:[#allocation4 + $0xc0] sm:$0xf]  ;;  %v12517_v27 = vor.u32 %v13521_v39, %v12516_v14  ;;  %v13487_v48 = vld [vmem:[#allocation4 + $0xc4] sm:$0xf0]  ;;  %v12317_v30 = vor.u32 %v13471_v56, %v12316_v7  ;;  %v12308_v52 = vld [vmem:[#allocation4 + $0x30] sm:$0xf] }
 0x5b6   :  { %8328 = vmatpush.bf16.msra.mxu3 %v12525_v20  ;;  %v12444_v10 = vld [vmem:[#allocation4 + $0x140] sm:$0xf]  ;;  %v13503_v54 = vld [vmem:[#allocation4 + $0x144] sm:$0xf0]  ;;  %v12381_v42 = vor.u32 %v13487_v48, %v12380_v40  ;;  %v13469_v63 = vld [vmem:[#allocation4 + $0x34] sm:$0xf0] }
 0x5b7   :  { %v12508_v25 = vld [vmem:[#allocation4 + $0x1c0] sm:$0xf]  ;;  %v13519_v17 = vld [vmem:[#allocation4 + $0x1c4] sm:$0xf0]  ;;  %8287 = vmatpush.bf16.msra.mxu0 %v12325_v18  ;;  %v12445_v46 = vor.u32 %v13503_v54, %v12444_v10  ;;  %v12372_v44 = vld [vmem:[#allocation4 + $0xb0] sm:$0xf]  ;;  %v12309_v23 = vor.u32 %v13469_v63, %v12308_v52 }
 0x5b8   :  { %8301 = vmatpush.bf16.msra.mxu1 %v12389_v60  ;;  %v12509_v38 = vor.u32 %v13519_v17, %v12508_v25  ;;  %v13485_v12 = vld [vmem:[#allocation4 + $0xb4] sm:$0xf0]  ;;  %v12436_v49 = vld [vmem:[#allocation4 + $0x130] sm:$0xf]  ;;  %v12300_v61 = vld [vmem:[#allocation4 + $0x20] sm:$0xf] }
 0x5b9   :  { %8315 = vmatpush.bf16.msra.mxu2 %v12453_v28  ;;  %v13501_v55 = vld [vmem:[#allocation4 + $0x134] sm:$0xf0]  ;;  %v12500_v57 = vld [vmem:[#allocation4 + $0x1b0] sm:$0xf]  ;;  %v12373_v13 = vor.u32 %v13485_v12, %v12372_v44  ;;  %v13467_v16 = vld [vmem:[#allocation4 + $0x24] sm:$0xf0] }
 0x5ba   :  { %8329 = vmatpush.bf16.msra.mxu3 %v12517_v27  ;;  %v13517_v51 = vld [vmem:[#allocation4 + $0x1b4] sm:$0xf0]  ;;  %v12437_v37 = vor.u32 %v13501_v55, %v12436_v49  ;;  %v12364_v22 = vld [vmem:[#allocation4 + $0xa0] sm:$0xf]  ;;  %v13483_v43 = vld [vmem:[#allocation4 + $0xa4] sm:$0xf0]  ;;  %v12301_v41 = vor.u32 %v13467_v16, %v12300_v61 }
 0x5bb   :  { %8288 = vmatpush.bf16.msra.mxu0 %v12317_v30  ;;  %v12501_v50 = vor.u32 %v13517_v51, %v12500_v57  ;;  %v12428_v2 = vld [vmem:[#allocation4 + $0x120] sm:$0xf]  ;;  %v13499_v47 = vld [vmem:[#allocation4 + $0x124] sm:$0xf0]  ;;  %v12365_v3 = vor.u32 %v13483_v43, %v12364_v22  ;;  %v12292_v45 = vld [vmem:[#allocation4 + $0x10] sm:$0xf] }
 0x5bc   :  { %8302 = vmatpush.bf16.msra.mxu1 %v12381_v42  ;;  %v12492_v11 = vld [vmem:[#allocation4 + $0x1a0] sm:$0xf]  ;;  %v13515_v15 = vld [vmem:[#allocation4 + $0x1a4] sm:$0xf0]  ;;  %v12429_v34 = vor.u32 %v13499_v47, %v12428_v2  ;;  %v13465_v29 = vld [vmem:[#allocation4 + $0x14] sm:$0xf0] }
 0x5bd   :  { %8316 = vmatpush.bf16.msra.mxu2 %v12445_v46  ;;  %v12356_v6 = vld [vmem:[#allocation4 + $0x90] sm:$0xf]  ;;  %v12493_v9 = vor.u32 %v13515_v15, %v12492_v11  ;;  %v13481_v53 = vld [vmem:[#allocation4 + $0x94] sm:$0xf0]  ;;  %v12293_v4 = vor.u32 %v13465_v29, %v12292_v45  ;;  %v12284_v5 = vld [vmem:[#allocation4] sm:$0xf] }
 0x5be   :  { %8330 = vmatpush.bf16.msra.mxu3 %v12509_v38  ;;  %v12420_v21 = vld [vmem:[#allocation4 + $0x110] sm:$0xf]  ;;  %v13497_v58 = vld [vmem:[#allocation4 + $0x114] sm:$0xf0]  ;;  %v13463_v19 = vld [vmem:[#allocation4 + $0x4] sm:$0xf0]  ;;  %v12357_v35 = vor.u32 %v13481_v53, %v12356_v6 }
 0x5bf   :  { %8289 = vmatpush.bf16.msra.mxu0 %v12309_v23  ;;  %v12484_v1 = vld [vmem:[#allocation4 + $0x190] sm:$0xf]  ;;  %v13513_v0 = vld [vmem:[#allocation4 + $0x194] sm:$0xf0]  ;;  %v12421_v20 = vor.u32 %v13497_v58, %v12420_v21  ;;  %v12348_v33 = vld [vmem:[#allocation4 + $0x80] sm:$0xf]  ;;  %v12285_v56 = vor.u32 %v13463_v19, %v12284_v5 }
 0x5c0   :  { %8303 = vmatpush.bf16.msra.mxu1 %v12373_v13  ;;  %v13479_v8 = vld [vmem:[#allocation4 + $0x84] sm:$0xf0]  ;;  %v12412_v59 = vld [vmem:[#allocation4 + $0x100] sm:$0xf]  ;;  %v12485_v18 = vor.u32 %v13513_v0, %v12484_v1  ;;  %v13476_v60 = vld [vmem:[#allocation4 + $0x74] sm:$0xf] }
 0x5c1   :  { %8317 = vmatpush.bf16.msra.mxu2 %v12437_v37  ;;  %v13495_v26 = vld [vmem:[#allocation4 + $0x104] sm:$0xf0]  ;;  %v12476_v14 = vld [vmem:[#allocation4 + $0x180] sm:$0xf]  ;;  %v12342_v28 = vld [vmem:[#allocation4 + $0x78] sm:$0xf0]  ;;  %v12349_v10 = vor.u32 %v13479_v8, %v12348_v33 }
 0x5c2   :  { %8331 = vmatpush.bf16.msra.mxu3 %v12501_v50  ;;  %v13511_v39 = vld [vmem:[#allocation4 + $0x184] sm:$0xf0]  ;;  %v13492_v7 = vld [vmem:[#allocation4 + $0xf4] sm:$0xf]  ;;  %v12406_v40 = vld [vmem:[#allocation4 + $0xf8] sm:$0xf0]  ;;  %v12413_v54 = vor.u32 %v13495_v26, %v12412_v59  ;;  %v12345_v42 = vor.u32 %v13476_v60, %v12342_v28 }
 0x5c3   :  { %8290 = vmatpush.bf16.msra.mxu0 %v12301_v41  ;;  %v13508_v27 = vld [vmem:[#allocation4 + $0x174] sm:$0xf]  ;;  %v12470_v48 = vld [vmem:[#allocation4 + $0x178] sm:$0xf0]  ;;  %v12477_v30 = vor.u32 %v13511_v39, %v12476_v14  ;;  %v12409_v46 = vor.u32 %v13492_v7, %v12406_v40  ;;  %v13474_v63 = vld [vmem:[#allocation4 + $0x64] sm:$0xf] }
 0x5c4   :  { %8304 = vmatpush.bf16.msra.mxu1 %v12365_v3  ;;  %v13524_v25 = vld [vmem:[#allocation4 + $0x1f4] sm:$0xf]  ;;  %v12534_v17 = vld [vmem:[#allocation4 + $0x1f8] sm:$0xf0]  ;;  %v12473_v52 = vor.u32 %v13508_v27, %v12470_v48  ;;  %v12334_v44 = vld [vmem:[#allocation4 + $0x68] sm:$0xf0] }
 0x5c5   :  { %8318 = vmatpush.bf16.msra.mxu2 %v12429_v34  ;;  %v13490_v38 = vld [vmem:[#allocation4 + $0xe4] sm:$0xf]  ;;  %v12537_v12 = vor.u32 %v13524_v25, %v12534_v17  ;;  %v12398_v49 = vld [vmem:[#allocation4 + $0xe8] sm:$0xf0]  ;;  %v12337_v13 = vor.u32 %v13474_v63, %v12334_v44  ;;  %v13472_v16 = vld [vmem:[#allocation4 + $0x54] sm:$0xf] }
 0x5c6   :  { %8332 = vmatpush.bf16.msra.mxu3 %v12493_v9  ;;  %v13506_v55 = vld [vmem:[#allocation4 + $0x164] sm:$0xf]  ;;  %v12462_v57 = vld [vmem:[#allocation4 + $0x168] sm:$0xf0]  ;;  %v12401_v37 = vor.u32 %v13490_v38, %v12398_v49  ;;  %v12326_v22 = vld [vmem:[#allocation4 + $0x58] sm:$0xf0] }
 0x5c7   :  { %8291 = vmatpush.bf16.msra.mxu0 %v12293_v4  ;;  %v13522_v51 = vld [vmem:[#allocation4 + $0x1e4] sm:$0xf]  ;;  %v12526_v23 = vld [vmem:[#allocation4 + $0x1e8] sm:$0xf0]  ;;  %v12465_v61 = vor.u32 %v13506_v55, %v12462_v57  ;;  %v13488_v50 = vld [vmem:[#allocation4 + $0xd4] sm:$0xf]  ;;  %v12329_v3 = vor.u32 %v13472_v16, %v12326_v22 }
 0x5c8   :  { %8305 = vmatpush.bf16.msra.mxu1 %v12357_v35  ;;  %v12529_v43 = vor.u32 %v13522_v51, %v12526_v23  ;;  %v12390_v2 = vld [vmem:[#allocation4 + $0xd8] sm:$0xf0]  ;;  %v13504_v47 = vld [vmem:[#allocation4 + $0x154] sm:$0xf]  ;;  %v13470_v29 = vld [vmem:[#allocation4 + $0x44] sm:$0xf] }
 0x5c9   :  { %8319 = vmatpush.bf16.msra.mxu2 %v12421_v20  ;;  %v12454_v11 = vld [vmem:[#allocation4 + $0x158] sm:$0xf0]  ;;  %v13520_v15 = vld [vmem:[#allocation4 + $0x1d4] sm:$0xf]  ;;  %v12393_v34 = vor.u32 %v13488_v50, %v12390_v2  ;;  %v12318_v6 = vld [vmem:[#allocation4 + $0x48] sm:$0xf0] }
 0x5ca   :  { %8333 = vmatpush.bf16.msra.mxu3 %v12485_v18  ;;  %v12518_v41 = vld [vmem:[#allocation4 + $0x1d8] sm:$0xf0]  ;;  %v12457_v45 = vor.u32 %v13504_v47, %v12454_v11  ;;  %v13486_v9 = vld [vmem:[#allocation4 + $0xc4] sm:$0xf]  ;;  %v12382_v21 = vld [vmem:[#allocation4 + $0xc8] sm:$0xf0]  ;;  %v12321_v5 = vor.u32 %v13470_v29, %v12318_v6 }
 0x5cb   :  { %8292 = vmatpush.bf16.msra.mxu0 %v12285_v56  ;;  %v12521_v53 = vor.u32 %v13520_v15, %v12518_v41  ;;  %v13502_v58 = vld [vmem:[#allocation4 + $0x144] sm:$0xf]  ;;  %v12446_v1 = vld [vmem:[#allocation4 + $0x148] sm:$0xf0]  ;;  %v12385_v19 = vor.u32 %v13486_v9, %v12382_v21  ;;  %v13468_v20 = vld [vmem:[#allocation4 + $0x34] sm:$0xf] }
 0x5cc   :  { %8306 = vmatpush.bf16.msra.mxu1 %v12349_v10  ;;  %v13518_v0 = vld [vmem:[#allocation4 + $0x1c4] sm:$0xf]  ;;  %v12510_v4 = vld [vmem:[#allocation4 + $0x1c8] sm:$0xf0]  ;;  %v12449_v35 = vor.u32 %v13502_v58, %v12446_v1  ;;  %v12310_v33 = vld [vmem:[#allocation4 + $0x38] sm:$0xf0] }
 0x5cd   :  { %8320 = vmatpush.bf16.msra.mxu2 %v12413_v54  ;;  %v13484_v8 = vld [vmem:[#allocation4 + $0xb4] sm:$0xf]  ;;  %v12513_v59 = vor.u32 %v13518_v0, %v12510_v4  ;;  %v12374_v18 = vld [vmem:[#allocation4 + $0xb8] sm:$0xf0]  ;;  %v12313_v28 = vor.u32 %v13468_v20, %v12310_v33  ;;  %v13466_v40 = vld [vmem:[#allocation4 + $0x24] sm:$0xf] }
 0x5ce   :  { %8334 = vmatpush.bf16.msra.mxu3 %v12477_v30  ;;  %8293 = vmatmul.bf16.vlgmr.msra.gmra.mxu0 %v14332_v62  ;;  %v13500_v26 = vld [vmem:[#allocation4 + $0x134] sm:$0xf]  ;;  %v12438_v14 = vld [vmem:[#allocation4 + $0x138] sm:$0xf0]  ;;  %v12377_v7 = vor.u32 %v13484_v8, %v12374_v18  ;;  %v12302_v27 = vld [vmem:[#allocation4 + $0x28] sm:$0xf0] }
 0x5cf   :  { %8341 = vmatpush.bf16.msrb.mxu0 %v12345_v42  ;;  %8307 = vmatmul.bf16.vlgmr.msra.gmra.mxu1 %v14334_v24  ;;  %v13516_v39 = vld [vmem:[#allocation4 + $0x1b4] sm:$0xf]  ;;  %v12502_v60 = vld [vmem:[#allocation4 + $0x1b8] sm:$0xf0]  ;;  %v12441_v56 = vor.u32 %v13500_v26, %v12438_v14  ;;  %v13482_v48 = vld [vmem:[#allocation4 + $0xa4] sm:$0xf] }
 0x5d0   :  { %8355 = vmatpush.bf16.msrb.mxu1 %v12409_v46  ;;  %8321 = vmatmul.bf16.vlgmr.msra.gmra.mxu2 %v14336_v32  ;;  %v12505_v10 = vor.u32 %v13516_v39, %v12502_v60  ;;  %v12366_v54 = vld [vmem:[#allocation4 + $0xa8] sm:$0xf0]  ;;  %v13498_v25 = vld [vmem:[#allocation4 + $0x124] sm:$0xf]  ;;  %v12305_v46 = vor.u32 %v13466_v40, %v12302_v27  ;;  %v13464_v44 = vld [vmem:[#allocation4 + $0x14] sm:$0xf] }
 0x5d1   :  { %8369 = vmatpush.bf16.msrb.mxu2 %v12473_v52  ;;  %8335 = vmatmul.bf16.vlgmr.msra.gmra.mxu3 %v14338_v36  ;;  %v12430_v17 = vld [vmem:[#allocation4 + $0x128] sm:$0xf0]  ;;  %v13514_v30 = vld [vmem:[#allocation4 + $0x1a4] sm:$0xf]  ;;  %v12369_v52 = vor.u32 %v13482_v48, %v12366_v54  ;;  %v12294_v38 = vld [vmem:[#allocation4 + $0x18] sm:$0xf0] }
 0x5d2   :  { %8383 = vmatpush.bf16.msrb.mxu3 %v12537_v12  ;;  %v12494_v42 = vld [vmem:[#allocation4 + $0x1a8] sm:$0xf0]  ;;  %v12433_v63 = vor.u32 %v13498_v25, %v12430_v17  ;;  %v13480_v12 = vld [vmem:[#allocation4 + $0x94] sm:$0xf]  ;;  %v12358_v55 = vld [vmem:[#allocation4 + $0x98] sm:$0xf0] }
 0x5d3   :  { %8342 = vmatpush.bf16.msrb.mxu0 %v12337_v13  ;;  %v12497_v49 = vor.u32 %v13514_v30, %v12494_v42  ;;  %v13496_v57 = vld [vmem:[#allocation4 + $0x114] sm:$0xf]  ;;  %v12422_v51 = vld [vmem:[#allocation4 + $0x118] sm:$0xf0]  ;;  %v13462_v22 = vld [vmem:[#allocation4 + $0x4] sm:$0xf] }
 0x5d4   :  { %8356 = vmatpush.bf16.msrb.mxu1 %v12401_v37  ;;  %v13512_v23 = vld [vmem:[#allocation4 + $0x194] sm:$0xf]  ;;  %v12486_v13 = vld [vmem:[#allocation4 + $0x198] sm:$0xf0]  ;;  %v12297_v37 = vor.u32 %v13464_v44, %v12294_v38  ;;  %v12425_v16 = vor.u32 %v13496_v57, %v12422_v51  ;;  %v12286_v50 = vld [vmem:[#allocation4 + $0x8] sm:$0xf0] }
 0x5d5   :  { %8370 = vmatpush.bf16.msrb.mxu2 %v12465_v61  ;;  %v12361_v61 = vor.u32 %v13480_v12, %v12358_v55  ;;  %v12489_v2 = vor.u32 %v13512_v23, %v12486_v13  ;;  %v12350_v47 = vld [vmem:[#allocation4 + $0x88] sm:$0xf0]  ;;  %v13494_v11 = vld [vmem:[#allocation4 + $0x104] sm:$0xf]  ;;  %vm8560_vm9 = vcmask 7168  }
 0x5d6   :  { %8384 = vmatpush.bf16.msrb.mxu3 %v12529_v43  ;;  %v13478_v43 = vld [vmem:[#allocation4 + $0x84] sm:$0xf]  ;;  %v12414_v15 = vld [vmem:[#allocation4 + $0x108] sm:$0xf0] }
 0x5d7   :  { %8343 = vmatpush.bf16.msrb.mxu0 %v12329_v3  ;;  %v13510_v41 = vld [vmem:[#allocation4 + $0x184] sm:$0xf]  ;;  %v12478_v3 = vld [vmem:[#allocation4 + $0x188] sm:$0xf0]  ;;  %v12417_v29 = vor.u32 %v13494_v11, %v12414_v15 }
 0x5d8   :  { %8357 = vmatpush.bf16.msrb.mxu1 %v12393_v34  ;;  %v12289_v34 = vor.u32 %v13462_v22, %v12286_v50  ;;  %v12481_v6 = vor.u32 %v13510_v41, %v12478_v3  ;;  %v14407_v9 = vld [vmem:[#allocation28_spill] sm:$0xff] }
 0x5d9   :  { %8371 = vmatpush.bf16.msrb.mxu2 %v12457_v45  ;;  %v12353_v45 = vor.u32 %v13478_v43, %v12350_v47  ;;  %v7962_v27 = vperm.slane %v14407_v9, 1 }
 0x5da   :  { %8385 = vmatpush.bf16.msrb.mxu3 %v12521_v53  ;;  %v7961_v53 = vperm.slane %v14407_v9, 0 }
 0x5db   :  { %8344 = vmatpush.bf16.msrb.mxu0 %v12321_v5 }
 0x5dc   :  { %8358 = vmatpush.bf16.msrb.mxu1 %v12385_v19 }
 0x5dd   :  { %8372 = vmatpush.bf16.msrb.mxu2 %v12449_v35 }
 0x5de   :  { %8386 = vmatpush.bf16.msrb.mxu3 %v12513_v59 }
 0x5df   :  { %8345 = vmatpush.bf16.msrb.mxu0 %v12313_v28 }
 0x5e0   :  { %8359 = vmatpush.bf16.msrb.mxu1 %v12377_v7 }
 0x5e1   :  { %8373 = vmatpush.bf16.msrb.mxu2 %v12441_v56 }
 0x5e2   :  { %8387 = vmatpush.bf16.msrb.mxu3 %v12505_v10 }
 0x5e3   :  { %8346 = vmatpush.bf16.msrb.mxu0 %v12305_v46 }
 0x5e4   :  { %8360 = vmatpush.bf16.msrb.mxu1 %v12369_v52 }
 0x5e5   :  { %8374 = vmatpush.bf16.msrb.mxu2 %v12433_v63 }
 0x5e6   :  { %8388 = vmatpush.bf16.msrb.mxu3 %v12497_v49 }
 0x5e7   :  { %8347 = vmatpush.bf16.msrb.mxu0 %v12297_v37 }
 0x5e8   :  { %8361 = vmatpush.bf16.msrb.mxu1 %v12361_v61 }
 0x5e9   :  { %8375 = vmatpush.bf16.msrb.mxu2 %v12425_v16 }
 0x5ea   :  { %8389 = vmatpush.bf16.msrb.mxu3 %v12489_v2 }
 0x5eb   :  { %8348 = vmatpush.bf16.msrb.mxu0 %v12289_v34 }
 0x5ec   :  { %8362 = vmatpush.bf16.msrb.mxu1 %v12353_v45 }
 0x5ed   :  { %8376 = vmatpush.bf16.msrb.mxu2 %v12417_v29 }
 0x5ee   :  { %8390 = vmatpush.bf16.msrb.mxu3 %v12481_v6  ;;  %8349 = vmatmul.bf16.vlgmr.msrb.gmra.mxu0 %v14332_v62 }
 0x5ef   :  { %8363 = vmatmul.bf16.vlgmr.msrb.gmra.mxu1 %v14334_v24 }
 0x5f0   :  { %8377 = vmatmul.bf16.vlgmr.msrb.gmra.mxu2 %v14336_v32 }
 0x5f1   :  { %8391 = vmatmul.bf16.vlgmr.msrb.gmra.mxu3 %v14338_v36 }
 0x64b   :  { %v8294_v21 = vpop.f32.mrf.mxu0 }
 0x64c   :  { %v8295_v58 = vadd.f32 %v8294_v21, %v7961_v53  ;;  %v8308_v1 = vpop.f32.mrf.mxu1 }
 0x64e   :  { %v8309_v0 = vadd.f32 %v8308_v1, %v8295_v58 }
 0x653   :  { %v8322_v4 = vpop.f32.mrf.mxu2  ;;  %v8296_v35 = vpop.f32.mrf.mxu0 }
 0x654   :  { %v8336_v5 = vpop.f32.mrf.mxu3  ;;  %v8323_v19 = vadd.f32 %v8322_v4, %v8309_v0  ;;  %v8297_v20 = vadd.f32 %v8296_v35, %v7961_v53  ;;  %v8310_v33 = vpop.f32.mrf.mxu1 }
 0x656   :  { %v8311_v8 = vadd.f32 %v8310_v33, %v8297_v20  ;;  %v14349_v62 = vadd.f32 %v8336_v5, %v8323_v19 }
 0x658   :  { %v8397_v36 = vmul.f32 %v14349_v62, %v14349_v62 }
 0x65b   :  { %v8324_v24 = vpop.f32.mrf.mxu2 }
 0x65c   :  { %v8325_v59 = vadd.f32 %v8324_v24, %v8311_v8  ;;  %v8338_v32 = vpop.f32.mrf.mxu3 }
 0x65e   :  { %v14353_v18 = vadd.f32 %v8338_v32, %v8325_v59 }
 0x660   :  { %v8399_v26 = vmul.f32 %v14353_v18, %v14353_v18  ;;  %v8401_v14 = vadd.f32 %v14353_v18, %v14349_v62 }
 0x662   :  { %v8402_v39 = vrot.slane %v8401_v14, 4  ;;  %v8415_v60 = vadd.f32 %v8399_v26, %v8397_v36 }
 0x664   :  { %v8403_v28 = vadd.f32 %v8402_v39, %v8401_v14  ;;  %v8416_v7 = vrot.slane %v8415_v60, 4 }
 0x666   :  { %v8404_v56 = vrot.slane %v8403_v28, 2  ;;  %v8417_v40 = vadd.f32 %v8416_v7, %v8415_v60 }
 0x668   :  { %v8405_v10 = vadd.f32 %v8404_v56, %v8403_v28  ;;  %v8418_v54 = vrot.slane %v8417_v40, 2 }
 0x66a   :  { %v8406_v30 = vrot.slane %v8405_v10, 1  ;;  %v8419_v42 = vadd.f32 %v8418_v54, %v8417_v40 }
 0x66b   :  { %v8350_v48 = vpop.f32.mrf.mxu0 }
 0x66c   :  { %v8364_v25 = vpop.f32.mrf.mxu1  ;;  %v8351_v17 = vadd.f32 %v8350_v48, %v7962_v27  ;;  %v8407_v38 = vadd.f32 %v8406_v30, %v8405_v10  ;;  %v8420_v12 = vrot.slane %v8419_v42, 1  ;;  %v14408_v30 = vld [vmem:[#allocation29_spill] sm:$0xff] }
 0x66e   :  { %v8365_v52 = vadd.f32 %v8364_v25, %v8351_v17  ;;  %v8421_v51 = vadd.f32 %v8420_v12, %v8419_v42  ;;  %v8429_v23 = vmul.f32 %v8407_v38, %v14229_v31 }
 0x670   :  { %v8431_v50 = vmul.f32 %v8421_v51, %v14229_v31  ;;  %v8433_v43 = vmul.f32 %v8429_v23, %v8429_v23 }
 0x672   :  { %v8435_v41 = vsub.f32 %v8431_v50, %v8433_v43 }
 0x673   :  { %v8378_v46 = vpop.f32.mrf.mxu2  ;;  %v8352_v44 = vpop.f32.mrf.mxu0 }
 0x674   :  { %v8392_v63 = vpop.f32.mrf.mxu3  ;;  %v8353_v49 = vadd.f32 %v8352_v44, %v7962_v27  ;;  %v8379_v55 = vadd.f32 %v8378_v46, %v8365_v52  ;;  %v8366_v57 = vpop.f32.mrf.mxu1  ;;  %v8437_v6 = vmax.f32 %v8435_v41, 0.0 }
 0x676   :  { %v8367_v13 = vadd.f32 %v8366_v57, %v8353_v49  ;;  %v14361_v61 = vadd.f32 %v8392_v63, %v8379_v55  ;;  %v8439_v1 = vadd.f32 1e-05, %v8437_v6  ;;  %v14409_v49 = vld [vmem:[#allocation30_spill] sm:$0xff] }
 0x678   :  { %v8398_v47 = vmul.f32 %v14361_v61, %v14361_v61  ;;  %13551 = vrsqrt.f32 %v8439_v1  ;;  %vm8447_vm2 = vweird.f32 %v8439_v1 }
 0x67b   :  { %v8380_v37 = vpop.f32.mrf.mxu2 }
 0x67c   :  { %v8381_v16 = vadd.f32 %v8380_v37, %v8367_v13  ;;  %v8394_v22 = vpop.f32.mrf.mxu3 }
 0x67e   :  { %v8395_v2 = vadd.f32 %v8394_v22, %v8381_v16  ;;  %v13552_v59 = vpop.eup %13551 }
 0x67f   :  { %v8442_v26 = vmul.f32 %v13552_v59, %v8439_v1  ;;  %vm8448_vm15 = vweird.f32 %v13552_v59 }
 0x680   :  { %v8400_v11 = vmul.f32 %v8395_v2, %v8395_v2  ;;  %v8408_v15 = vadd.f32 %v8395_v2, %v14361_v61  ;;  %vm8449_vm3 = vmor %vm8447_vm2, %vm8448_vm15 }
 0x681   :  { %v8443_v14 = vmul.f32 %v13552_v59, %v8442_v26 }
 0x682   :  { %v8409_v3 = vrot.slane %v8408_v15, 4  ;;  %v8422_v34 = vadd.f32 %v8400_v11, %v8398_v47 }
 0x683   :  { %v8444_v60 = vmul.f32 0.5, %v8443_v14 }
 0x684   :  { %v8410_v45 = vadd.f32 %v8409_v3, %v8408_v15  ;;  %v8423_v29 = vrot.slane %v8422_v34, 4  ;;  %v14410_v15 = vld [vmem:[#allocation31_spill] sm:$0xff] }
 0x685   :  { %v8445_v56 = vsub.f32 1.5, %v8444_v60  ;;  %v8507_v41 = vperm.slane %v14410_v15, 1 }
 0x686   :  { %v8411_v9 = vrot.slane %v8410_v45, 2  ;;  %v8424_v53 = vadd.f32 %v8423_v29, %v8422_v34 }
 0x687   :  { %v8446_v48 = vmul.f32 %v13552_v59, %v8445_v56 }
 0x688   :  { %v8412_v21 = vadd.f32 %v8411_v9, %v8410_v45  ;;  %v8425_v58 = vrot.slane %v8424_v53, 2 }
 0x689   :  { %v8450_v25 = vsel %vm8449_vm3, %v13552_v59, %v8446_v48 }
 0x68a   :  { %v8413_v0 = vrot.slane %v8412_v21, 1  ;;  %v8426_v4 = vadd.f32 %v8425_v58, %v8424_v53 }
 0x68c   :  { %v8414_v5 = vadd.f32 %v8413_v0, %v8412_v21  ;;  %v8427_v19 = vrot.slane %v8426_v4, 1 }
 0x68e   :  { %v8428_v35 = vadd.f32 %v8427_v19, %v8426_v4  ;;  %v8430_v20 = vmul.f32 %v8414_v5, %v14229_v31  ;;  %v14411_v4 = vld [vmem:[#allocation32_spill] sm:$0xff] }
 0x690   :  { %v8432_v33 = vmul.f32 %v8428_v35, %v14229_v31  ;;  %v8434_v8 = vmul.f32 %v8430_v20, %v8430_v20 }
 0x692   :  { %v8436_v24 = vsub.f32 %v8432_v33, %v8434_v8 }
 0x694   :  { %v8438_v32 = vmax.f32 %v8436_v24, 0.0 }
 0x696   :  { %v8440_v36 = vadd.f32 1e-05, %v8438_v32 }
 0x698   :  { %13553 = vrsqrt.f32 %v8440_v36  ;;  %vm8457_vm0 = vweird.f32 %v8440_v36 }
 0x69e   :  { %v13554_v39 = vpop.eup %13553 }
 0x69f   :  { %v8452_v28 = vmul.f32 %v13554_v39, %v8440_v36  ;;  %vm8458_vm14 = vweird.f32 %v13554_v39 }
 0x6a0   :  { %vm8459_vm1 = vmor %vm8457_vm0, %vm8458_vm14 }
 0x6a1   :  { %v8453_v7 = vmul.f32 %v13554_v39, %v8452_v28 }
 0x6a3   :  { %v8454_v40 = vmul.f32 0.5, %v8453_v7 }
 0x6a5   :  { %v8455_v27 = vsub.f32 1.5, %v8454_v40 }
 0x6a7   :  { %v8456_v10 = vmul.f32 %v13554_v39, %v8455_v27 }
 0x6a9   :  { %v8460_v31 = vsel %vm8459_vm1, %v13554_v39, %v8456_v10 }
 0x6aa   :  { %v8463_v54 = vrot.slane %v8460_v31, 7 }
 0x6ac   :  { %v8464_v17 = vsel %vm7806_vm11, %v8450_v25, %v8463_v54 }
 0x6ad   :  { %v8466_v42 = vmul.f32 %v8464_v17, %v14408_v30 }
 0x6af   :  { %v8468_v46 = vperm.slane %v8466_v42, 0  ;;  %v8469_v52 = vperm.slane %v8466_v42, 1 }
 0x6b1   :  { %v8473_v63 = vmul.f32 %v8469_v52, %v8430_v20  ;;  %v8472_v44 = vmul.f32 %v8468_v46, %v8429_v23  ;;  %v8483_v57 = vmul.f32 %v8469_v52, %v8395_v2  ;;  %v8480_v51 = vmul.f32 %v8468_v46, %v14349_v62 }
 0x6b2   :  { %v8481_v37 = vmul.f32 %v8469_v52, %v14361_v61  ;;  %v8482_v22 = vmul.f32 %v8468_v46, %v14353_v18  ;;  %v8506_v23 = vperm.slane %v14410_v15, 0 }
 0x6b3   :  { %v8476_v38 = vrot.slane %v8473_v63, 7 }
 0x6b5   :  { %v8477_v12 = vsel %vm7806_vm11, %v8472_v44, %v8476_v38 }
 0x6b6   :  { %v8479_v55 = vsub.f32 %v14409_v49, %v8477_v12 }
 0x6b8   :  { %v8486_v13 = vperm.slane %v8479_v55, 1  ;;  %v8485_v16 = vperm.slane %v8479_v55, 0 }
 0x6ba   :  { %v8492_v50 = vadd.f32 %v8486_v13, %v8483_v57  ;;  %v8489_v43 = vadd.f32 %v8485_v16, %v8480_v51  ;;  %v8490_v47 = vadd.f32 %v8486_v13, %v8481_v37  ;;  %v8491_v11 = vadd.f32 %v8485_v16, %v8482_v22 }
 0x6bc   :  { %vm8493_vm11 = vcmp.gt.f32.partialorder %v8489_v43, 0.0  ;;  %vm8494_vm4 = vcmp.gt.f32.partialorder %v8490_v47, 0.0  ;;  %v8497_v3 = vmul.f32 0.2, %v8489_v43  ;;  %v8498_v2 = vmul.f32 0.2, %v8490_v47 }
 0x6bd   :  { %v8499_v45 = vmul.f32 0.2, %v8491_v11  ;;  %v8500_v29 = vmul.f32 0.2, %v8492_v50  ;;  %vm8495_vm5 = vcmp.gt.f32.partialorder %v8491_v11, 0.0  ;;  %vm8496_vm6 = vcmp.gt.f32.partialorder %v8492_v50, 0.0 }
 0x6be   :  { %v8501_v34 = vsel %vm8493_vm11, %v8489_v43, %v8497_v3  ;;  %v8502_v62 = vsel %vm8494_vm4, %v8490_v47, %v8498_v2 }
 0x6bf   :  { %v8510_v61 = vmul.f32 %v8506_v23, %v8501_v34  ;;  %v8511_v6 = vmul.f32 %v8507_v41, %v8502_v62  ;;  %v8503_v9 = vsel %vm8495_vm5, %v8491_v11, %v8499_v45  ;;  %v8504_v53 = vsel %vm8496_vm6, %v8492_v50, %v8500_v29 }
 0x6c0   :  { %v8512_v21 = vmul.f32 %v8506_v23, %v8503_v9  ;;  %v8513_v58 = vmul.f32 %v8507_v41, %v8504_v53 }
 0x6c1   :  { %v8514_v18 = vadd.f32 %v8511_v6, %v8510_v61 }
 0x6c2   :  { %v8517_v1 = vadd.f32 %v8513_v58, %v8512_v21 }
 0x6c3   :  { %8515 = vadd.xlane.f32.xlu0 %v8514_v18 }
 0x6cb   :  { %8518 = vadd.xlane.f32.xlu0 %v8517_v1 }
 0x736   :  { %v8516_v0 = vpop.xlane.xlu0 %8515 }
 0x737   :  { %v8520_v5 = vadd.f32 %v8516_v0, %v14411_v4 }
 0x739   :  { %v12538_v19 = vmul.f32 -1.442695, %v8520_v5 }
 0x73b   :  { %13555 = vpow2.f32 %v12538_v19 }
 0x73e   :  { %v8519_v35 = vpop.xlane.xlu0 %8518 }
 0x73f   :  { %v8521_v20 = vadd.f32 %v8519_v35, %v14411_v4 }
 0x741   :  { %v13556_v33 = vpop.eup %13555  ;;  %v12539_v8 = vmul.f32 -1.442695, %v8521_v20 }
 0x742   :  { %v8528_v24 = vadd.f32 1.0, %v13556_v33 }
 0x743   :  { %13557 = vpow2.f32 %v12539_v8 }
 0x744   :  { %13559 = vrcp.f32 %v8528_v24  ;;  %v8541_v39 = vand.u32 2147483648, %v8528_v24  ;;  %v8539_v28 = vand.u32 2147483647, %v8528_v24  ;;  %vm8535_vm8 = vweird.f32 %v8528_v24 }
 0x746   :  { %v8542_v40 = vor.u32 1.1754944e-38, %v8541_v39  ;;  %vm8540_vm12 = vcmp.eq.f32.partialorder %v8539_v28, 8.507059e+37 }
 0x749   :  { %v13558_v59 = vpop.eup %13557 }
 0x74a   :  { %v13560_v32 = vpop.eup %13559  ;;  %v8529_v36 = vadd.f32 1.0, %v13558_v59 }
 0x74b   :  { %v8531_v26 = vmul.f32 %v13560_v32, %v8528_v24  ;;  %vm8536_vm7 = vweird.f32 %v13560_v32 }
 0x74c   :  { %13561 = vrcp.f32 %v8529_v36  ;;  %vm8537_vm10 = vmor %vm8535_vm8, %vm8536_vm7  ;;  %v8556_v54 = vand.u32 2147483648, %v8529_v36  ;;  %v8554_v17 = vand.u32 2147483647, %v8529_v36  ;;  %vm8550_vm14 = vweird.f32 %v8529_v36 }
 0x74d   :  { %v8532_v14 = vsub.f32 1.0, %v8531_v26 }
 0x74e   :  { %v8557_v42 = vor.u32 1.1754944e-38, %v8556_v54  ;;  %vm8555_vm0 = vcmp.eq.f32.partialorder %v8554_v17, 8.507059e+37 }
 0x74f   :  { %v8533_v60 = vmul.f32 %v13560_v32, %v8532_v14 }
 0x751   :  { %v8534_v7 = vadd.f32 %v13560_v32, %v8533_v60 }
 0x752   :  { %v13562_v56 = vpop.eup %13561 }
 0x753   :  { %v8538_v27 = vsel %vm8537_vm10, %v13560_v32, %v8534_v7  ;;  %v8546_v48 = vmul.f32 %v13562_v56, %v8529_v36  ;;  %vm8551_vm13 = vweird.f32 %v13562_v56 }
 0x754   :  { %v8543_v10 = vsel %vm8540_vm12, %v8542_v40, %v8538_v27  ;;  %vm8552_vm15 = vmor %vm8550_vm14, %vm8551_vm13 }
 0x755   :  { %8561 = vst.msk [vmem:[%s14396_s8] sm:$0xff] %vm8560_vm9, %v8543_v10  ;;  %v8547_v31 = vsub.f32 1.0, %v8546_v48 }
 0x757   :  { %v8548_v25 = vmul.f32 %v13562_v56, %v8547_v31 }
 0x759   :  { %v8549_v30 = vadd.f32 %v13562_v56, %v8548_v25 }
 0x75b   :  { %v8553_v46 = vsel %vm8552_vm15, %v13562_v56, %v8549_v30 }
 0x75c   :  { %v8558_v52 = vsel %vm8555_vm0, %v8557_v42, %v8553_v46 }
 0x75d   :  { %8562 = vst.msk [vmem:[%s14396_s8 + $0x8] sm:$0xff] %vm8560_vm9, %v8558_v52 }
 0x75e   :  { %8567 = vsyncpa [#allocation7], 1 }
 0x75f   :  { %8568 = vsyncpa [#allocation9], 1 }
 0x760   :  { %8569 = vsyncpa [#allocation12], 1 }
 0x761   :  { %8570 = vsyncmov [#allocation5] }
 0x764   :  { %s8571_s21 = vpop.sfrf %8570 }
 0x765   :  { %p12540_p0 = scmp.ne.s32.totalorder %s8571_s21, 0 }
 0x767   :  { %8575 = shalt.err (%p12540_p0)  }
 0x768   :  { %8577 = vsyncmov [#allocation5 + $0x1] }
 0x76b   :  { %s8578_s22 = vpop.sfrf %8577 }
 0x76c   :  { %p12541_p1 = scmp.ne.s32.totalorder %s8578_s22, 0 }
 0x76e   :  { %8582 = shalt.err (%p12541_p1)  }
 0x76f   :  { %8584 = vsyncmov [#allocation5 + $0x2] }
 0x772   :  { %s8585_s23 = vpop.sfrf %8584 }
 0x773   :  { %p12542_p2 = scmp.ne.s32.totalorder %s8585_s23, 0 }
 0x775   :  { %8589 = shalt.err (%p12542_p2)  }

</bundles_post_ra>
